<compile_context>
chip_gen: v7x
topology: tpu7x:2x2x1
jax: 0.10.0
libtpu: 0.0.40
codegen_flags: <defaults>
</compile_context>

<pallas_src>
import functools

import numpy as np
import jax
import jax.numpy as jnp
from jax.experimental import pallas as pl
from jax.experimental.pallas import tpu as pltpu

LN_EPS = 1e-5
BN_EPS = 1e-5
_SQRT_HALF = 0.7071067811865476


# --------------------------------------------------------------------------------------
# Generation-aware knobs
# --------------------------------------------------------------------------------------
@functools.lru_cache(maxsize=None)
def _vmem_limit_bytes():
    """Scoped-VMEM limit per TPU generation (None -> keep compiler default)."""
    try:
        kind = jax.devices()[0].device_kind.lower()
    except Exception:
        return None
    if "v7" in kind:
        return 40 * 1024 * 1024           # v7x: only 64 MiB physical -> leave headroom
    if any(t in kind for t in ("v5 lite", "v5e", "v6")):
        return 64 * 1024 * 1024           # v5e/v6e: 128 MiB physical, small default scope
    return None


def _cparams(*semantics):
    return pltpu.CompilerParams(dimension_semantics=tuple(semantics),
                                vmem_limit_bytes=_vmem_limit_bytes())


def _row_tile(M, target=1024):
    """Largest multiple-of-8 divisor of M that is <= target (falls back to M).
    # TODO(synk): for awkward M use a cdiv grid + masked remainder tile instead of a
    # single whole-array block."""
    best = M
    for t in range(8, min(M, target) + 1, 8):
        if M % t == 0:
            best = t
    return best


def _pick_group_batch(B, nW, N, target_rows=256, min_rows=128):
    """Images per attention grid step: gb | B, gb*nW*N >= target_rows (fills the
    256-wide MXU on v6e/v7x) while preferring >= 2 grid steps (v7x dual-TC /
    pipelining) when that still leaves >= min_rows per step."""
    divs = [g for g in range(1, B + 1) if B % g == 0]
    gb = next((g for g in divs if g * nW * N >= target_rows), B)
    if B // gb < 2:
        smaller = [g for g in divs if g < gb and g * nW * N >= min_rows]
        if smaller:
            gb = smaller[-1]
    return gb


# --------------------------------------------------------------------------------------
# Elementwise helpers (f32 math)
# --------------------------------------------------------------------------------------
def _gelu(x):
    # Exact (erf-based) GELU = PyTorch nn.GELU default.
    return 0.5 * x * (1.0 + jax.lax.erf(x * _SQRT_HALF))


def _ln(x, g, b):
    mu = jnp.mean(x, axis=-1, keepdims=True)
    var = jnp.mean((x - mu) ** 2, axis=-1, keepdims=True)
    return (x - mu) * jax.lax.rsqrt(var + LN_EPS) * g + b


# --------------------------------------------------------------------------------------
# Pallas kernels
# --------------------------------------------------------------------------------------
def linear_kernel(x_ref, w_ref, b_ref, o_ref):
    """o = x @ w + b ; x:(tm,K) (bf16 MXU operand), w:(K,N) bf16, b:(1,N) f32."""
    x = x_ref[...].astype(jnp.bfloat16)
    y = jnp.dot(x, w_ref[...], preferred_element_type=jnp.float32) + b_ref[0]
    o_ref[...] = y.astype(o_ref.dtype)


def linear_ln_kernel(x_ref, w_ref, b_ref, g_ref, be_ref, o_ref):
    """o = LayerNorm(x @ w + b)  -- patch embed with the norm fused into the epilogue."""
    x = x_ref[...].astype(jnp.bfloat16)
    y = jnp.dot(x, w_ref[...], preferred_element_type=jnp.float32) + b_ref[0]
    o_ref[...] = _ln(y, g_ref[0], be_ref[0]).astype(o_ref.dtype)


def conv3x3_kernel(x_ref, w_ref, b_ref, o_ref, *, H, W, relu):
    """Fused 3x3 stride-1 pad-1 conv (+ folded BN, optional ReLU).

    x_ref block: (1, (H+2)*W, 3*Cin) bf16 -- the 3 width-shifted (kw) copies are
    concatenated on channels, so the conv is 3 matmuls with K=3*Cin (one per kh),
    each reading an aligned (multiple-of-W) row-offset slice.  Accumulates in f32
    VMEM / vregs -- no HBM im2col.
    """
    HW = H * W
    Cout = o_ref.shape[-1]
    slab = x_ref[0]                                   # ((H+2)*W, 3*Cin)
    acc = jnp.zeros((HW, Cout), jnp.float32)
    for kh in range(3):
        acc = acc + jnp.dot(slab[kh * W:kh * W + HW, :], w_ref[kh],
                            preferred_element_type=jnp.float32)
    out = acc + b_ref[0]
    if relu:
        out = jnp.maximum(out, 0.0)
    o_ref[0] = out.astype(o_ref.dtype)


def attn_kernel(x_ref, g1_ref, b1_ref, wqkv_ref, bqkv_ref, bias_ref,
                wp_ref, bp_ref, o_ref, *, num_heads, head_dim, gb, n_win, n_tok, scale):
    """G = gb*n_win windows per grid step: LN -> one QKV matmul over G*N rows ->
    window-batched per-head softmax attention -> heads concatenated in-register ->
    one lane-dense (GN,C)@(C,C) output projection (no f32 scratch round trip)."""
    C = x_ref.shape[-1]
    G = gb * n_win
    N = n_tok
    x = x_ref[...]                                            # (GN, C) f32
    xn = _ln(x, g1_ref[0], b1_ref[0]).astype(jnp.bfloat16)
    qkv = jnp.dot(xn, wqkv_ref[...], preferred_element_type=jnp.float32) + bqkv_ref[0]
    heads = []
    for h in range(num_heads):                                # static unroll over heads
        qh = (qkv[:, h * head_dim:(h + 1) * head_dim] * scale)
        kh = qkv[:, C + h * head_dim:C + (h + 1) * head_dim]
        vh = qkv[:, 2 * C + h * head_dim:2 * C + (h + 1) * head_dim]
        qh = qh.reshape(G, N, head_dim).astype(jnp.bfloat16)
        kh = kh.reshape(G, N, head_dim).astype(jnp.bfloat16)
        vh = vh.reshape(G, N, head_dim).astype(jnp.bfloat16)
        s = jnp.einsum('gqd,gkd->gqk', qh, kh,
                       preferred_element_type=jnp.float32)    # (G, N, N)
        # rel-pos bias + shift mask, resident as (nW, N, N) per head; broadcast over gb.
        s = s.reshape(gb, n_win, N, N) + bias_ref[h][None]
        s = s.reshape(G, N, N)
        m = jnp.max(s, axis=-1, keepdims=True)
        e = jnp.exp(s - m)
        p = e / jnp.sum(e, axis=-1, keepdims=True)
        yh = jnp.einsum('gqk,gkd->gqd', p.astype(jnp.bfloat16), vh,
                        preferred_element_type=jnp.float32)   # (G, N, hd)
        heads.append(yh.reshape(G * N, head_dim))
    y = jnp.concatenate(heads, axis=-1).astype(jnp.bfloat16)  # (GN, C), head-major
    o_ref[...] = jnp.dot(y, wp_ref[...], preferred_element_type=jnp.float32) + bp_ref[0]


def mlp_kernel(x_ref, g_ref, b_ref, w1_ref, b1_ref, w2_ref, b2_ref, o_ref):
    """out = x + fc2(gelu(fc1(layernorm(x))))  (fused norm2 + MLP + residual)."""
    x = x_ref[...]
    xn = _ln(x, g_ref[0], b_ref[0]).astype(jnp.bfloat16)
    h = jnp.dot(xn, w1_ref[...], preferred_element_type=jnp.float32) + b1_ref[0]
    h = _gelu(h).astype(jnp.bfloat16)
    y = jnp.dot(h, w2_ref[...], preferred_element_type=jnp.float32) + b2_ref[0]
    o_ref[...] = x + y


# --------------------------------------------------------------------------------------
# Pallas wrappers
# --------------------------------------------------------------------------------------
def linear_pallas(x, w, b, out_dtype=jnp.float32):
    M, K = x.shape
    N = w.shape[1]
    tm = _row_tile(M)
    return pl.pallas_call(
        linear_kernel,
        out_shape=jax.ShapeDtypeStruct((M, N), out_dtype),
        grid=(M // tm,),
        in_specs=[
            pl.BlockSpec((tm, K), lambda i: (i, 0)),
            pl.BlockSpec((K, N), lambda i: (0, 0)),     # resident weights
            pl.BlockSpec((1, N), lambda i: (0, 0)),
        ],
        out_specs=pl.BlockSpec((tm, N), lambda i: (i, 0)),
        compiler_params=_cparams("parallel"),
    )(x, w.astype(jnp.bfloat16), b.reshape(1, N).astype(jnp.float32))


def linear_ln_pallas(x, w, b, g, be, out_dtype=jnp.float32):
    M, K = x.shape
    N = w.shape[1]
    tm = _row_tile(M)
    return pl.pallas_call(
        linear_ln_kernel,
        out_shape=jax.ShapeDtypeStruct((M, N), out_dtype),
        grid=(M // tm,),
        in_specs=[
            pl.BlockSpec((tm, K), lambda i: (i, 0)),
            pl.BlockSpec((K, N), lambda i: (0, 0)),
            pl.BlockSpec((1, N), lambda i: (0, 0)),
            pl.BlockSpec((1, N), lambda i: (0, 0)),
            pl.BlockSpec((1, N), lambda i: (0, 0)),
        ],
        out_specs=pl.BlockSpec((tm, N), lambda i: (i, 0)),
        compiler_params=_cparams("parallel"),
    )(x, w.astype(jnp.bfloat16), b.reshape(1, N).astype(jnp.float32),
      g.reshape(1, N).astype(jnp.float32), be.reshape(1, N).astype(jnp.float32))


def _fold_bn(w, b, bn):
    if bn is None:
        return w, b
    g, beta, mean, var = bn
    scale = g * jax.lax.rsqrt(var + BN_EPS)
    return w * scale[:, None, None, None], (b - mean) * scale + beta


def conv3x3_bn_pallas(x_nhwc, w_oihw, bias, bn=None, relu=False, out_dtype=jnp.float32):
    """3x3 conv with eval-mode BatchNorm folded into the weights.

    Pallas path when the output is lane-friendly (Cout >= 8) and the row slices stay
    sublane-aligned (W % 8 == 0); otherwise plain XLA (fuses with neighbouring ops,
    avoids 4/128-lane masked stores).
    # TODO(synk): row-tile H with a 2-row halo for large resolutions (v7x 64 MiB VMEM).
    """
    B, H, W, Cin = x_nhwc.shape
    Cout = w_oihw.shape[0]
    w, b = _fold_bn(w_oihw, bias, bn)
    if (W % 8) != 0 or Cout < 8:
        out = jax.lax.conv_general_dilated(
            x_nhwc.astype(jnp.float32),
            jnp.transpose(w, (2, 3, 1, 0)).astype(jnp.float32),
            window_strides=(1, 1), padding='SAME',
            dimension_numbers=('NHWC', 'HWIO', 'NHWC')) + b
        if relu:
            out = jax.nn.relu(out)
        return out.astype(out_dtype)

    # (Cout,Cin,3,3) -> (kh, kw, Cin, Cout) -> (3, 3*Cin, Cout): kw folded into K.
    wm = jnp.transpose(w, (2, 3, 1, 0)).reshape(3, 3 * Cin, Cout).astype(jnp.bfloat16)
    xp = jnp.pad(x_nhwc, ((0, 0), (1, 1), (1, 1), (0, 0)))
    xs = jnp.concatenate([xp[:, :, kw:kw + W, :] for kw in range(3)], axis=-1)
    xs = xs.reshape(B, (H + 2) * W, 3 * Cin).astype(jnp.bfloat16)
    kern = functools.partial(conv3x3_kernel, H=H, W=W, relu=relu)
    out = pl.pallas_call(
        kern,
        out_shape=jax.ShapeDtypeStruct((B, H * W, Cout), out_dtype),
        grid=(B,),
        in_specs=[
            pl.BlockSpec((1, (H + 2) * W, 3 * Cin), lambda i: (i, 0, 0)),
            pl.BlockSpec((3, 3 * Cin, Cout), lambda i: (0, 0, 0)),
            pl.BlockSpec((1, Cout), lambda i: (0, 0)),
        ],
        out_specs=pl.BlockSpec((1, H * W, Cout), lambda i: (i, 0, 0)),
        compiler_params=_cparams("parallel"),
    )(xs, wm, b.reshape(1, Cout).astype(jnp.float32))
    return out.reshape(B, H, W, Cout)


def window_attention_pallas(xw, g1, b1, wqkv, bqkv, attn_bias, wproj, bproj,
                            num_heads, batch):
    """xw: (B*nW, N, C) windowed tokens; attn_bias: (num_heads, nW, N, N), static."""
    B_, N, C = xw.shape
    nW = attn_bias.shape[1]
    hd = C // num_heads
    gb = _pick_group_batch(batch, nW, N)            # images per grid step (gb | B)
    G = gb * nW                                     # windows per grid step
    GN = G * N
    x2 = xw.reshape(B_ * N, C)
    kern = functools.partial(attn_kernel, num_heads=num_heads, head_dim=hd,
                             gb=gb, n_win=nW, n_tok=N, scale=hd ** (-0.5))
    out = pl.pallas_call(
        kern,
        out_shape=jax.ShapeDtypeStruct((B_ * N, C), jnp.float32),
        grid=(B_ // G,),
        in_specs=[
            pl.BlockSpec((GN, C), lambda i: (i, 0)),
            pl.BlockSpec((1, C), lambda i: (0, 0)),
            pl.BlockSpec((1, C), lambda i: (0, 0)),
            pl.BlockSpec((C, 3 * C), lambda i: (0, 0)),
            pl.BlockSpec((1, 3 * C), lambda i: (0, 0)),
            pl.BlockSpec((num_heads, nW, N, N), lambda i: (0, 0, 0, 0)),   # resident
            pl.BlockSpec((C, C), lambda i: (0, 0)),
            pl.BlockSpec((1, C), lambda i: (0, 0)),
        ],
        out_specs=pl.BlockSpec((GN, C), lambda i: (i, 0)),
        compiler_params=_cparams("parallel"),
    )(x2, g1.reshape(1, C), b1.reshape(1, C),
      wqkv.astype(jnp.bfloat16), bqkv.reshape(1, 3 * C).astype(jnp.float32),
      attn_bias.astype(jnp.float32),
      wproj.astype(jnp.bfloat16), bproj.reshape(1, C).astype(jnp.float32))
    return out.reshape(B_, N, C)


def mlp_pallas(x, g, b, w1, b1, w2, b2):
    M, C = x.shape
    Hd = w1.shape[1]
    tm = _row_tile(M)
    return pl.pallas_call(
        mlp_kernel,
        out_shape=jax.ShapeDtypeStruct((M, C), jnp.float32),
        grid=(M // tm,),
        in_specs=[
            pl.BlockSpec((tm, C), lambda i: (i, 0)),
            pl.BlockSpec((1, C), lambda i: (0, 0)),
            pl.BlockSpec((1, C), lambda i: (0, 0)),
            pl.BlockSpec((C, Hd), lambda i: (0, 0)),
            pl.BlockSpec((1, Hd), lambda i: (0, 0)),
            pl.BlockSpec((Hd, C), lambda i: (0, 0)),
            pl.BlockSpec((1, C), lambda i: (0, 0)),
        ],
        out_specs=pl.BlockSpec((tm, C), lambda i: (i, 0)),
        compiler_params=_cparams("parallel"),
    )(x, g.reshape(1, C), b.reshape(1, C),
      w1.astype(jnp.bfloat16), b1.reshape(1, Hd).astype(jnp.float32),
      w2.astype(jnp.bfloat16), b2.reshape(1, C).astype(jnp.float32))


# --------------------------------------------------------------------------------------
# Plain-JAX / numpy glue
# --------------------------------------------------------------------------------------
def window_partition(x, ws):
    B, H, W, C = x.shape
    x = x.reshape(B, H // ws, ws, W // ws, ws, C)
    return x.transpose(0, 1, 3, 2, 4, 5).reshape(-1, ws, ws, C)


def window_reverse(windows, ws, H, W):
    B = windows.shape[0] // (H * W // ws // ws)
    x = windows.reshape(B, H // ws, W // ws, ws, ws, -1)
    return x.transpose(0, 1, 3, 2, 4, 5).reshape(B, H, W, -1)


def make_rel_pos_index(ws):
    coords = np.stack(np.meshgrid(np.arange(ws), np.arange(ws), indexing="ij"))
    cf = coords.reshape(2, -1)
    rc = (cf[:, :, None] - cf[:, None, :]).transpose(1, 2, 0).astype(np.int64)
    rc[:, :, 0] += ws - 1
    rc[:, :, 1] += ws - 1
    rc[:, :, 0] *= 2 * ws - 1
    return rc.sum(-1)                                    # (N, N)


def make_attn_mask(H, W, ws, shift):
    N = ws * ws
    nW = (H // ws) * (W // ws)
    if shift == 0:
        return np.zeros((nW, N, N), np.float32)
    img_mask = np.zeros((1, H, W, 1), np.float32)
    slices = (slice(0, -ws), slice(-ws, -shift), slice(-shift, None))
    cnt = 0
    for h in slices:
        for w in slices:
            img_mask[:, h, w, :] = cnt
            cnt += 1
    mw = window_partition(img_mask, ws).reshape(-1, N)
    am = mw[:, None, :] - mw[:, :, None]
    return np.where(am != 0, -100.0, 0.0).astype(np.float32)


# --------------------------------------------------------------------------------------
# Parameters (deterministic synthetic init; torch default inits for norms/BN)
# --------------------------------------------------------------------------------------
def init_params(key, *, img_size, patch_size, in_chans, out_chans, embed_dim, depth,
                num_heads, window_size, mlp_ratio):
    assert img_size % patch_size == 0
    pres = img_size // patch_size
    assert pres % window_size == 0
    assert embed_dim % num_heads == 0 and in_chans % num_heads == 0

    keys = iter(jax.random.split(key, 8 * depth + 32))

    def nrm(shape, std=0.02):
        return (jax.random.normal(next(keys), shape) * std).astype(jnp.float32)

    def bn(c):
        return (jnp.ones((c,), jnp.float32), jnp.zeros((c,), jnp.float32),
                jnp.zeros((c,), jnp.float32), jnp.ones((c,), jnp.float32))

    N = window_size * window_size
    rel_index = make_rel_pos_index(window_size)
    hidden = int(embed_dim * mlp_ratio)

    blocks = []
    for i in range(depth):
        # NOTE: shift is a *static* property of the block index; it is NOT stored in
        # the traced params (that caused the previous TracerBoolConversionError).
        shift = 0 if (i % 2 == 0 or pres <= window_size) else window_size // 2
        table = nrm(((2 * window_size - 1) ** 2, num_heads), std=0.02)
        rel_bias = table[rel_index.reshape(-1)].reshape(N, N, num_heads).transpose(2, 0, 1)
        mask = make_attn_mask(pres, pres, window_size, shift)           # (nW, N, N)
        # Fold rel-pos bias + shift mask once: (num_heads, nW, N, N), kernel-resident.
        attn_bias = rel_bias[:, None, :, :] + jnp.asarray(mask, jnp.float32)[None]
        blocks.append(dict(
            attn_bias=attn_bias.astype(jnp.float32),
            ln1_g=jnp.ones((embed_dim,), jnp.float32), ln1_b=jnp.zeros((embed_dim,), jnp.float32),
            ln2_g=jnp.ones((embed_dim,), jnp.float32), ln2_b=jnp.zeros((embed_dim,), jnp.float32),
            qkv_w=nrm((embed_dim, 3 * embed_dim)), qkv_b=nrm((3 * embed_dim,)),
            proj_w=nrm((embed_dim, embed_dim)), proj_b=nrm((embed_dim,)),
            fc1_w=nrm((embed_dim, hidden)), fc1_b=nrm((hidden,)),
            fc2_w=nrm((hidden, embed_dim)), fc2_b=nrm((embed_dim,)),
        ))

    params = dict(
        skip_w=nrm((out_chans, in_chans, 1, 1), std=0.1), skip_b=nrm((out_chans,)),
        # TODO(synk): layers.DCNLayer source not provided; standing in with a standard
        # 3x3 conv (no learned offsets / bilinear deformable sampling).
        in_w=nrm((embed_dim, in_chans, 3, 3), std=0.1), in_b=nrm((embed_dim,)),
        in_bn=bn(embed_dim),
        pe_w=nrm((embed_dim, embed_dim, patch_size, patch_size), std=0.1),
        pe_b=nrm((embed_dim,)),
        pe_ln_g=jnp.ones((embed_dim,), jnp.float32), pe_ln_b=jnp.zeros((embed_dim,), jnp.float32),
        blocks=blocks,
        pu_w=nrm((embed_dim, embed_dim, patch_size, patch_size), std=0.1),
        pu_b=nrm((embed_dim,)),
        out_w=nrm((out_chans, embed_dim, 3, 3), std=0.1), out_b=nrm((out_chans,)),
        out_bn=bn(out_chans),
    )
    return params


# --------------------------------------------------------------------------------------
# Forward pass
# --------------------------------------------------------------------------------------
def swin_block(x, p, H, W, ws, num_heads, shift):
    B, L, C = x.shape
    shortcut = x
    xi = x.reshape(B, H, W, C)
    if shift > 0:                                   # static Python int -> trace-safe
        xi = jnp.roll(xi, (-shift, -shift), axis=(1, 2))
    xw = window_partition(xi, ws).reshape(-1, ws * ws, C)
    aw = window_attention_pallas(xw, p["ln1_g"], p["ln1_b"], p["qkv_w"], p["qkv_b"],
                                 p["attn_bias"], p["proj_w"], p["proj_b"],
                                 num_heads, B)
    xi = window_reverse(aw.reshape(-1, ws, ws, C), ws, H, W)
    if shift > 0:
        xi = jnp.roll(xi, (shift, shift), axis=(1, 2))
    x = shortcut + xi.reshape(B, L, C)              # drop_path = identity (eval)
    y = mlp_pallas(x.reshape(B * L, C), p["ln2_g"], p["ln2_b"],
                   p["fc1_w"], p["fc1_b"], p["fc2_w"], p["fc2_b"])
    return y.reshape(B, L, C)


def deformable_basic_layer_forward(x_nchw, params, cfg):
    B, Cin, Himg, Wimg = x_nchw.shape
    ps = cfg["patch_size"]
    E = cfg["embed_dim"]
    ws = cfg["window_size"]
    nh = cfg["num_heads"]
    Hp, Wp = Himg // ps, Wimg // ps

    x = jnp.transpose(x_nchw, (0, 2, 3, 1)).astype(jnp.float32)     # NCHW -> NHWC

    # skip: 1x1 conv kept in plain XLA so it fuses with the final add + ReLU epilogue.
    skip = jnp.einsum('bhwc,oc->bhwo', x, params["skip_w"][:, :, 0, 0]) + params["skip_b"]

    # in_conv: (DCN stand-in) fused 3x3 conv + folded BN(eval) + ReLU; bf16 output
    # (consumer immediately casts to bf16 anyway) halves writeback.
    y = conv3x3_bn_pallas(x, params["in_w"], params["in_b"], bn=params["in_bn"],
                          relu=True, out_dtype=jnp.bfloat16)

    # patch embed: kernel=stride=patch conv == patchify + matmul, LayerNorm fused
    # into the kernel epilogue.
    patches = y.reshape(B, Hp, ps, Wp, ps, E).transpose(0, 1, 3, 2, 4, 5)
    patches = patches.reshape(B * Hp * Wp, ps * ps * E)
    w_pe = jnp.transpose(params["pe_w"], (2, 3, 1, 0)).reshape(ps * ps * E, E)
    t = linear_ln_pallas(patches, w_pe, params["pe_b"],
                         params["pe_ln_g"], params["pe_ln_b"])
    t = t.reshape(B, Hp * Wp, E)

    # Swin basic layer (shift is static per block index, matching the PyTorch module)
    for i, blk in enumerate(params["blocks"]):
        shift = 0 if (i % 2 == 0 or Hp <= ws) else ws // 2
        t = swin_block(t, blk, Hp, Wp, ws, nh, shift)

    # patch unembed: ConvTranspose with kernel=stride=patch == matmul + unpatchify
    w_pu = jnp.transpose(params["pu_w"], (0, 2, 3, 1)).reshape(E, ps * ps * E)
    b_pu = jnp.tile(params["pu_b"], ps * ps)
    u = linear_pallas(t.reshape(B * Hp * Wp, E), w_pu, b_pu)
    u = u.reshape(B, Hp, Wp, ps, ps, E).transpose(0, 1, 3, 2, 4, 5).reshape(B, Himg, Wimg, E)

    # out_conv: (DCN stand-in) 3x3 conv + folded BN(eval).  Tiny Cout falls back to
    # plain XLA (lane-dense, fuses with the add+ReLU epilogue).
    o = conv3x3_bn_pallas(u, params["out_w"], params["out_b"],
                          bn=params["out_bn"], relu=False)

    out = jax.nn.relu(o + skip)
    return jnp.transpose(out, (0, 3, 1, 2))                         # NHWC -> NCHW


# --------------------------------------------------------------------------------------
if __name__ == "__main__":
    cfg = dict(img_size=16, patch_size=2, in_chans=4, out_chans=4, embed_dim=32,
               depth=2, num_heads=4, window_size=4, mlp_ratio=4.0)
    key = jax.random.PRNGKey(0)
    pkey, xkey = jax.random.split(key)
    params = init_params(pkey, **cfg)
    x = jax.random.normal(xkey, (2, cfg["in_chans"], cfg["img_size"], cfg["img_size"]),
                          dtype=jnp.float32)

    fwd = jax.jit(lambda xx, pp: deformable_basic_layer_forward(xx, pp, cfg))
    out = jax.block_until_ready(fwd(x, params))

    assert out.shape == (2, cfg["out_chans"], cfg["img_size"], cfg["img_size"]), out.shape
    assert bool(jnp.all(jnp.isfinite(out)))
    assert bool(jnp.all(out >= 0.0))  # final ReLU
    print("KERNEL_OK")
</pallas_src>

<mosaic_0001>
module attributes {stable_mosaic.version = 11 : i64} {
  func.func @conv3x3_kernel(%arg0: i32, %arg1: memref<1x288x12xbf16, #tpu.memory_space<vmem>>, %arg2: memref<3x12x32xbf16, #tpu.memory_space<vmem>>, %arg3: memref<1x32xf32, #tpu.memory_space<vmem>>, %arg4: memref<1x256x32xbf16, #tpu.memory_space<vmem>>) attributes {dimension_semantics = [#tpu.dimension_semantics<parallel>], iteration_bounds = array<i64: 2>, scalar_prefetch = 0 : i64, scratch_operands = 0 : i64, tpu.core_type = #tpu.core_type<tc>, window_params = [{transform_indices = @transform_0, window_bounds = array<i64: 1, 288, 12>}, {pipeline_mode = #tpu.pipeline_mode<synchronous>, transform_indices = @transform_1, window_bounds = array<i64: 3, 12, 32>}, {pipeline_mode = #tpu.pipeline_mode<synchronous>, transform_indices = @transform_2, window_bounds = array<i64: 1, 32>}, {transform_indices = @transform_3, window_bounds = array<i64: 1, 256, 32>}]} {
    %c0 = arith.constant 0 : index
    %c0_0 = arith.constant 0 : index
    %c0_1 = arith.constant 0 : index
    %0 = vector.load %arg1[%c0, %c0_0, %c0_1] : memref<1x288x12xbf16, #tpu.memory_space<vmem>>, vector<1x288x12xbf16>
    %1 = vector.shape_cast %0 : vector<1x288x12xbf16> to vector<288x12xbf16>
    %cst = arith.constant 0.000000e+00 : f32
    %2 = vector.broadcast %cst : f32 to vector<256x32xf32>
    %3 = vector.extract_strided_slice %1 {offsets = [0, 0], sizes = [256, 12], strides = [1, 1]} : vector<288x12xbf16> to vector<256x12xbf16>
    %c0_2 = arith.constant 0 : index
    %c0_3 = arith.constant 0 : index
    %c0_4 = arith.constant 0 : index
    %4 = vector.load %arg2[%c0_2, %c0_3, %c0_4] : memref<3x12x32xbf16, #tpu.memory_space<vmem>>, vector<1x12x32xbf16>
    %5 = vector.shape_cast %4 : vector<1x12x32xbf16> to vector<12x32xbf16>
    %cst_5 = arith.constant dense<0.000000e+00> : vector<256x32xf32>
    %6 = tpu.matmul %3, %5, %cst_5 {dimension_numbers = #tpu.dot_dimension_numbers<[1], [0], [0], [1], [0, 0, 1, 1], [], []>} : vector<256x12xbf16>, vector<12x32xbf16>, vector<256x32xf32> -> vector<256x32xf32>
    %7 = arith.addf %2, %6 : vector<256x32xf32>
    %8 = vector.extract_strided_slice %1 {offsets = [16, 0], sizes = [256, 12], strides = [1, 1]} : vector<288x12xbf16> to vector<256x12xbf16>
    %c1 = arith.constant 1 : index
    %c0_6 = arith.constant 0 : index
    %c0_7 = arith.constant 0 : index
    %9 = vector.load %arg2[%c1, %c0_6, %c0_7] : memref<3x12x32xbf16, #tpu.memory_space<vmem>>, vector<1x12x32xbf16>
    %10 = vector.shape_cast %9 : vector<1x12x32xbf16> to vector<12x32xbf16>
    %cst_8 = arith.constant dense<0.000000e+00> : vector<256x32xf32>
    %11 = tpu.matmul %8, %10, %cst_8 {dimension_numbers = #tpu.dot_dimension_numbers<[1], [0], [0], [1], [0, 0, 1, 1], [], []>} : vector<256x12xbf16>, vector<12x32xbf16>, vector<256x32xf32> -> vector<256x32xf32>
    %12 = arith.addf %7, %11 : vector<256x32xf32>
    %13 = vector.extract_strided_slice %1 {offsets = [32, 0], sizes = [256, 12], strides = [1, 1]} : vector<288x12xbf16> to vector<256x12xbf16>
    %c2 = arith.constant 2 : index
    %c0_9 = arith.constant 0 : index
    %c0_10 = arith.constant 0 : index
    %14 = vector.load %arg2[%c2, %c0_9, %c0_10] : memref<3x12x32xbf16, #tpu.memory_space<vmem>>, vector<1x12x32xbf16>
    %15 = vector.shape_cast %14 : vector<1x12x32xbf16> to vector<12x32xbf16>
    %cst_11 = arith.constant dense<0.000000e+00> : vector<256x32xf32>
    %16 = tpu.matmul %13, %15, %cst_11 {dimension_numbers = #tpu.dot_dimension_numbers<[1], [0], [0], [1], [0, 0, 1, 1], [], []>} : vector<256x12xbf16>, vector<12x32xbf16>, vector<256x32xf32> -> vector<256x32xf32>
    %17 = arith.addf %12, %16 : vector<256x32xf32>
    %c0_12 = arith.constant 0 : index
    %c0_13 = arith.constant 0 : index
    %18 = vector.load %arg3[%c0_12, %c0_13] : memref<1x32xf32, #tpu.memory_space<vmem>>, vector<1x32xf32>
    %19 = vector.shape_cast %18 : vector<1x32xf32> to vector<32xf32>
    %20 = vector.shape_cast %19 : vector<32xf32> to vector<1x32xf32>
    %21 = vector.broadcast %20 : vector<1x32xf32> to vector<256x32xf32>
    %22 = arith.addf %17, %21 : vector<256x32xf32>
    %cst_14 = arith.constant 0.000000e+00 : f32
    %23 = vector.broadcast %cst_14 : f32 to vector<256x32xf32>
    %24 = arith.maximumf %22, %23 : vector<256x32xf32>
    %25 = arith.truncf %24 : vector<256x32xf32> to vector<256x32xbf16>
    %c0_15 = arith.constant 0 : index
    %c0_16 = arith.constant 0 : index
    %c0_17 = arith.constant 0 : index
    %26 = vector.load %arg4[%c0_15, %c0_16, %c0_17] : memref<1x256x32xbf16, #tpu.memory_space<vmem>>, vector<1x256x32xbf16>
    %27 = vector.shape_cast %26 : vector<1x256x32xbf16> to vector<256x32xbf16>
    %28 = vector.shape_cast %25 : vector<256x32xbf16> to vector<1x256x32xbf16>
    tpu.vector_store %arg4[%c0_15, %c0_16, %c0_17], %28 {strides = array<i32>} : memref<1x256x32xbf16, #tpu.memory_space<vmem>>, vector<1x256x32xbf16>,
    return
  }
  func.func @transform_0(%arg0: i32) -> (i32, i32, i32) {
    %c0_i32 = arith.constant 0 : i32
    %c0_i32_0 = arith.constant 0 : i32
    %c0_i32_1 = arith.constant 0 : i32
    return %arg0, %c0_i32, %c0_i32_0 : i32, i32, i32
  }
  func.func @transform_1(%arg0: i32) -> (i32, i32, i32) {
    %c0_i32 = arith.constant 0 : i32
    %c0_i32_0 = arith.constant 0 : i32
    %c0_i32_1 = arith.constant 0 : i32
    %c0_i32_2 = arith.constant 0 : i32
    return %c0_i32, %c0_i32_0, %c0_i32_1 : i32, i32, i32
  }
  func.func @transform_2(%arg0: i32) -> (i32, i32) {
    %c0_i32 = arith.constant 0 : i32
    %c0_i32_0 = arith.constant 0 : i32
    %c0_i32_1 = arith.constant 0 : i32
    return %c0_i32, %c0_i32_0 : i32, i32
  }
  func.func @transform_3(%arg0: i32) -> (i32, i32, i32) {
    %c0_i32 = arith.constant 0 : i32
    %c0_i32_0 = arith.constant 0 : i32
    %c0_i32_1 = arith.constant 0 : i32
    return %arg0, %c0_i32, %c0_i32_0 : i32, i32, i32
  }
}

module attributes {stable_mosaic.version = 11 : i64} {
  func.func @linear_ln_kernel(%arg0: i32, %arg1: memref<128x128xbf16, #tpu.memory_space<vmem>>, %arg2: memref<128x32xbf16, #tpu.memory_space<vmem>>, %arg3: memref<1x32xf32, #tpu.memory_space<vmem>>, %arg4: memref<1x32xf32, #tpu.memory_space<vmem>>, %arg5: memref<1x32xf32, #tpu.memory_space<vmem>>, %arg6: memref<128x32xf32, #tpu.memory_space<vmem>>) attributes {dimension_semantics = [#tpu.dimension_semantics<parallel>], iteration_bounds = array<i64: 1>, scalar_prefetch = 0 : i64, scratch_operands = 0 : i64, tpu.core_type = #tpu.core_type<tc>, window_params = [{transform_indices = @transform_0, window_bounds = array<i64: 128, 128>}, {pipeline_mode = #tpu.pipeline_mode<synchronous>, transform_indices = @transform_1, window_bounds = array<i64: 128, 32>}, {pipeline_mode = #tpu.pipeline_mode<synchronous>, transform_indices = @transform_2, window_bounds = array<i64: 1, 32>}, {pipeline_mode = #tpu.pipeline_mode<synchronous>, transform_indices = @transform_3, window_bounds = array<i64: 1, 32>}, {pipeline_mode = #tpu.pipeline_mode<synchronous>, transform_indices = @transform_4, window_bounds = array<i64: 1, 32>}, {transform_indices = @transform_5, window_bounds = array<i64: 128, 32>}]} {
    %c0 = arith.constant 0 : index
    %c0_0 = arith.constant 0 : index
    %0 = vector.load %arg1[%c0, %c0_0] : memref<128x128xbf16, #tpu.memory_space<vmem>>, vector<128x128xbf16>
    %c0_1 = arith.constant 0 : index
    %c0_2 = arith.constant 0 : index
    %1 = vector.load %arg2[%c0_1, %c0_2] : memref<128x32xbf16, #tpu.memory_space<vmem>>, vector<128x32xbf16>
    %cst = arith.constant dense<0.000000e+00> : vector<128x32xf32>
    %2 = tpu.matmul %0, %1, %cst {dimension_numbers = #tpu.dot_dimension_numbers<[1], [0], [0], [1], [0, 0, 1, 1], [], []>} : vector<128x128xbf16>, vector<128x32xbf16>, vector<128x32xf32> -> vector<128x32xf32>
    %c0_3 = arith.constant 0 : index
    %c0_4 = arith.constant 0 : index
    %3 = vector.load %arg3[%c0_3, %c0_4] : memref<1x32xf32, #tpu.memory_space<vmem>>, vector<1x32xf32>
    %4 = vector.shape_cast %3 : vector<1x32xf32> to vector<32xf32>
    %5 = vector.shape_cast %4 : vector<32xf32> to vector<1x32xf32>
    %6 = vector.broadcast %5 : vector<1x32xf32> to vector<128x32xf32>
    %7 = arith.addf %2, %6 : vector<128x32xf32>
    %c0_5 = arith.constant 0 : index
    %c0_6 = arith.constant 0 : index
    %8 = vector.load %arg4[%c0_5, %c0_6] : memref<1x32xf32, #tpu.memory_space<vmem>>, vector<1x32xf32>
    %9 = vector.shape_cast %8 : vector<1x32xf32> to vector<32xf32>
    %c0_7 = arith.constant 0 : index
    %c0_8 = arith.constant 0 : index
    %10 = vector.load %arg5[%c0_7, %c0_8] : memref<1x32xf32, #tpu.memory_space<vmem>>, vector<1x32xf32>
    %11 = vector.shape_cast %10 : vector<1x32xf32> to vector<32xf32>
    %cst_9 = arith.constant dense<0.000000e+00> : vector<128xf32>
    %12 = vector.multi_reduction <add>, %7, %cst_9 [1] : vector<128x32xf32> to vector<128xf32>
    %13 = vector.shape_cast %12 : vector<128xf32> to vector<128x1xf32>
    %cst_10 = arith.constant 3.200000e+01 : f32
    %14 = vector.broadcast %cst_10 : f32 to vector<128x1xf32>
    %15 = arith.divf %13, %14 : vector<128x1xf32>
    %16 = vector.broadcast %15 : vector<128x1xf32> to vector<128x32xf32>
    %17 = arith.subf %7, %16 : vector<128x32xf32>
    %18 = arith.mulf %17, %17 : vector<128x32xf32>
    %cst_11 = arith.constant dense<0.000000e+00> : vector<128xf32>
    %19 = vector.multi_reduction <add>, %18, %cst_11 [1] : vector<128x32xf32> to vector<128xf32>
    %20 = vector.shape_cast %19 : vector<128xf32> to vector<128x1xf32>
    %cst_12 = arith.constant 3.200000e+01 : f32
    %21 = vector.broadcast %cst_12 : f32 to vector<128x1xf32>
    %22 = arith.divf %20, %21 : vector<128x1xf32>
    %23 = vector.broadcast %15 : vector<128x1xf32> to vector<128x32xf32>
    %24 = arith.subf %7, %23 : vector<128x32xf32>
    %cst_13 = arith.constant 9.99999974E-6 : f32
    %25 = vector.broadcast %cst_13 : f32 to vector<128x1xf32>
    %26 = arith.addf %22, %25 : vector<128x1xf32>
    %27 = math.rsqrt %26 : vector<128x1xf32>
    %28 = vector.broadcast %27 : vector<128x1xf32> to vector<128x32xf32>
    %29 = arith.mulf %24, %28 : vector<128x32xf32>
    %30 = vector.shape_cast %9 : vector<32xf32> to vector<1x32xf32>
    %31 = vector.broadcast %30 : vector<1x32xf32> to vector<128x32xf32>
    %32 = arith.mulf %29, %31 : vector<128x32xf32>
    %33 = vector.shape_cast %11 : vector<32xf32> to vector<1x32xf32>
    %34 = vector.broadcast %33 : vector<1x32xf32> to vector<128x32xf32>
    %35 = arith.addf %32, %34 : vector<128x32xf32>
    %c0_14 = arith.constant 0 : index
    %c0_15 = arith.constant 0 : index
    %36 = vector.load %arg6[%c0_14, %c0_15] : memref<128x32xf32, #tpu.memory_space<vmem>>, vector<128x32xf32>
    tpu.vector_store %arg6[%c0_14, %c0_15], %35 {strides = array<i32>} : memref<128x32xf32, #tpu.memory_space<vmem>>, vector<128x32xf32>,
    return
  }
  func.func @transform_0(%arg0: i32) -> (i32, i32) {
    %c0_i32 = arith.constant 0 : i32
    %c0_i32_0 = arith.constant 0 : i32
    return %arg0, %c0_i32 : i32, i32
  }
  func.func @transform_1(%arg0: i32) -> (i32, i32) {
    %c0_i32 = arith.constant 0 : i32
    %c0_i32_0 = arith.constant 0 : i32
    %c0_i32_1 = arith.constant 0 : i32
    return %c0_i32, %c0_i32_0 : i32, i32
  }
  func.func @transform_2(%arg0: i32) -> (i32, i32) {
    %c0_i32 = arith.constant 0 : i32
    %c0_i32_0 = arith.constant 0 : i32
    %c0_i32_1 = arith.constant 0 : i32
    return %c0_i32, %c0_i32_0 : i32, i32
  }
  func.func @transform_3(%arg0: i32) -> (i32, i32) {
    %c0_i32 = arith.constant 0 : i32
    %c0_i32_0 = arith.constant 0 : i32
    %c0_i32_1 = arith.constant 0 : i32
    return %c0_i32, %c0_i32_0 : i32, i32
  }
  func.func @transform_4(%arg0: i32) -> (i32, i32) {
    %c0_i32 = arith.constant 0 : i32
    %c0_i32_0 = arith.constant 0 : i32
    %c0_i32_1 = arith.constant 0 : i32
    return %c0_i32, %c0_i32_0 : i32, i32
  }
  func.func @transform_5(%arg0: i32) -> (i32, i32) {
    %c0_i32 = arith.constant 0 : i32
    %c0_i32_0 = arith.constant 0 : i32
    return %arg0, %c0_i32 : i32, i32
  }
}

module attributes {stable_mosaic.version = 11 : i64} {
  func.func @attn_kernel(%arg0: i32, %arg1: memref<128x32xf32, #tpu.memory_space<vmem>>, %arg2: memref<1x32xf32, #tpu.memory_space<vmem>>, %arg3: memref<1x32xf32, #tpu.memory_space<vmem>>, %arg4: memref<32x96xbf16, #tpu.memory_space<vmem>>, %arg5: memref<1x96xf32, #tpu.memory_space<vmem>>, %arg6: memref<4x4x16x16xf32, #tpu.memory_space<vmem>>, %arg7: memref<32x32xbf16, #tpu.memory_space<vmem>>, %arg8: memref<1x32xf32, #tpu.memory_space<vmem>>, %arg9: memref<128x32xf32, #tpu.memory_space<vmem>>) attributes {dimension_semantics = [#tpu.dimension_semantics<parallel>], iteration_bounds = array<i64: 1>, scalar_prefetch = 0 : i64, scratch_operands = 0 : i64, tpu.core_type = #tpu.core_type<tc>, window_params = [{transform_indices = @transform_0, window_bounds = array<i64: 128, 32>}, {pipeline_mode = #tpu.pipeline_mode<synchronous>, transform_indices = @transform_1, window_bounds = array<i64: 1, 32>}, {pipeline_mode = #tpu.pipeline_mode<synchronous>, transform_indices = @transform_2, window_bounds = array<i64: 1, 32>}, {pipeline_mode = #tpu.pipeline_mode<synchronous>, transform_indices = @transform_3, window_bounds = array<i64: 32, 96>}, {pipeline_mode = #tpu.pipeline_mode<synchronous>, transform_indices = @transform_4, window_bounds = array<i64: 1, 96>}, {pipeline_mode = #tpu.pipeline_mode<synchronous>, transform_indices = @transform_5, window_bounds = array<i64: 4, 4, 16, 16>}, {pipeline_mode = #tpu.pipeline_mode<synchronous>, transform_indices = @transform_6, window_bounds = array<i64: 32, 32>}, {pipeline_mode = #tpu.pipeline_mode<synchronous>, transform_indices = @transform_7, window_bounds = array<i64: 1, 32>}, {transform_indices = @transform_8, window_bounds = array<i64: 128, 32>}]} {
    %c0 = arith.constant 0 : index
    %c0_0 = arith.constant 0 : index
    %0 = vector.load %arg1[%c0, %c0_0] : memref<128x32xf32, #tpu.memory_space<vmem>>, vector<128x32xf32>
    %c0_1 = arith.constant 0 : index
    %c0_2 = arith.constant 0 : index
    %1 = vector.load %arg2[%c0_1, %c0_2] : memref<1x32xf32, #tpu.memory_space<vmem>>, vector<1x32xf32>
    %2 = vector.shape_cast %1 : vector<1x32xf32> to vector<32xf32>
    %c0_3 = arith.constant 0 : index
    %c0_4 = arith.constant 0 : index
    %3 = vector.load %arg3[%c0_3, %c0_4] : memref<1x32xf32, #tpu.memory_space<vmem>>, vector<1x32xf32>
    %4 = vector.shape_cast %3 : vector<1x32xf32> to vector<32xf32>
    %cst = arith.constant dense<0.000000e+00> : vector<128xf32>
    %5 = vector.multi_reduction <add>, %0, %cst [1] : vector<128x32xf32> to vector<128xf32>
    %6 = vector.shape_cast %5 : vector<128xf32> to vector<128x1xf32>
    %cst_5 = arith.constant 3.200000e+01 : f32
    %7 = vector.broadcast %cst_5 : f32 to vector<128x1xf32>
    %8 = arith.divf %6, %7 : vector<128x1xf32>
    %9 = vector.broadcast %8 : vector<128x1xf32> to vector<128x32xf32>
    %10 = arith.subf %0, %9 : vector<128x32xf32>
    %11 = arith.mulf %10, %10 : vector<128x32xf32>
    %cst_6 = arith.constant dense<0.000000e+00> : vector<128xf32>
    %12 = vector.multi_reduction <add>, %11, %cst_6 [1] : vector<128x32xf32> to vector<128xf32>
    %13 = vector.shape_cast %12 : vector<128xf32> to vector<128x1xf32>
    %cst_7 = arith.constant 3.200000e+01 : f32
    %14 = vector.broadcast %cst_7 : f32 to vector<128x1xf32>
    %15 = arith.divf %13, %14 : vector<128x1xf32>
    %16 = vector.broadcast %8 : vector<128x1xf32> to vector<128x32xf32>
    %17 = arith.subf %0, %16 : vector<128x32xf32>
    %cst_8 = arith.constant 9.99999974E-6 : f32
    %18 = vector.broadcast %cst_8 : f32 to vector<128x1xf32>
    %19 = arith.addf %15, %18 : vector<128x1xf32>
    %20 = math.rsqrt %19 : vector<128x1xf32>
    %21 = vector.broadcast %20 : vector<128x1xf32> to vector<128x32xf32>
    %22 = arith.mulf %17, %21 : vector<128x32xf32>
    %23 = vector.shape_cast %2 : vector<32xf32> to vector<1x32xf32>
    %24 = vector.broadcast %23 : vector<1x32xf32> to vector<128x32xf32>
    %25 = arith.mulf %22, %24 : vector<128x32xf32>
    %26 = vector.shape_cast %4 : vector<32xf32> to vector<1x32xf32>
    %27 = vector.broadcast %26 : vector<1x32xf32> to vector<128x32xf32>
    %28 = arith.addf %25, %27 : vector<128x32xf32>
    %29 = arith.truncf %28 : vector<128x32xf32> to vector<128x32xbf16>
    %c0_9 = arith.constant 0 : index
    %c0_10 = arith.constant 0 : index
    %30 = vector.load %arg4[%c0_9, %c0_10] : memref<32x96xbf16, #tpu.memory_space<vmem>>, vector<32x96xbf16>
    %cst_11 = arith.constant dense<0.000000e+00> : vector<128x96xf32>
    %31 = tpu.matmul %29, %30, %cst_11 {dimension_numbers = #tpu.dot_dimension_numbers<[1], [0], [0], [1], [0, 0, 1, 1], [], []>} : vector<128x32xbf16>, vector<32x96xbf16>, vector<128x96xf32> -> vector<128x96xf32>
    %c0_12 = arith.constant 0 : index
    %c0_13 = arith.constant 0 : index
    %32 = vector.load %arg5[%c0_12, %c0_13] : memref<1x96xf32, #tpu.memory_space<vmem>>, vector<1x96xf32>
    %33 = vector.shape_cast %32 : vector<1x96xf32> to vector<96xf32>
    %34 = vector.shape_cast %33 : vector<96xf32> to vector<1x96xf32>
    %35 = vector.broadcast %34 : vector<1x96xf32> to vector<128x96xf32>
    %36 = arith.addf %31, %35 : vector<128x96xf32>
    %37 = vector.extract_strided_slice %36 {offsets = [0, 0], sizes = [128, 8], strides = [1, 1]} : vector<128x96xf32> to vector<128x8xf32>
    %cst_14 = arith.constant 0.353553385 : f32
    %38 = vector.broadcast %cst_14 : f32 to vector<128x8xf32>
    %39 = arith.mulf %37, %38 : vector<128x8xf32>
    %40 = vector.extract_strided_slice %36 {offsets = [0, 32], sizes = [128, 8], strides = [1, 1]} : vector<128x96xf32> to vector<128x8xf32>
    %41 = vector.extract_strided_slice %36 {offsets = [0, 64], sizes = [128, 8], strides = [1, 1]} : vector<128x96xf32> to vector<128x8xf32>
    %42 = vector.shape_cast %39 : vector<128x8xf32> to vector<8x16x8xf32>
    %43 = arith.truncf %42 : vector<8x16x8xf32> to vector<8x16x8xbf16>
    %44 = vector.shape_cast %40 : vector<128x8xf32> to vector<8x16x8xf32>
    %45 = arith.truncf %44 : vector<8x16x8xf32> to vector<8x16x8xbf16>
    %46 = vector.shape_cast %41 : vector<128x8xf32> to vector<8x16x8xf32>
    %47 = arith.truncf %46 : vector<8x16x8xf32> to vector<8x16x8xbf16>
    "tpu.trace_start"() <{level = 10 : i32, message = "gqd,gkd->gqk"}> : () -> ()
    %cst_15 = arith.constant dense<0.000000e+00> : vector<8x16x16xf32>
    %48 = tpu.matmul %43, %45, %cst_15 {dimension_numbers = #tpu.dot_dimension_numbers<[2], [2], [1], [1], [0, 0, 0, 1, 1, 1], [0], [0]>} : vector<8x16x8xbf16>, vector<8x16x8xbf16>, vector<8x16x16xf32> -> vector<8x16x16xf32>
    "tpu.trace_stop"() : () -> ()
    %49 = vector.shape_cast %48 : vector<8x16x16xf32> to vector<2x4x16x16xf32>
    %c0_16 = arith.constant 0 : index
    %c0_17 = arith.constant 0 : index
    %c0_18 = arith.constant 0 : index
    %c0_19 = arith.constant 0 : index
    %50 = vector.load %arg6[%c0_16, %c0_17, %c0_18, %c0_19] : memref<4x4x16x16xf32, #tpu.memory_space<vmem>>, vector<1x4x16x16xf32>
    %51 = vector.shape_cast %50 : vector<1x4x16x16xf32> to vector<4x16x16xf32>
    %52 = vector.shape_cast %51 : vector<4x16x16xf32> to vector<1x4x16x16xf32>
    %53 = vector.broadcast %52 : vector<1x4x16x16xf32> to vector<2x4x16x16xf32>
    %54 = arith.addf %49, %53 : vector<2x4x16x16xf32>
    %55 = vector.shape_cast %54 : vector<2x4x16x16xf32> to vector<8x16x16xf32>
    %cst_20 = arith.constant dense<0xFF800000> : vector<8x16xf32>
    %56 = vector.multi_reduction <maximumf>, %55, %cst_20 [2] : vector<8x16x16xf32> to vector<8x16xf32>
    %57 = vector.shape_cast %56 : vector<8x16xf32> to vector<8x16x1xf32>
    %58 = vector.broadcast %57 : vector<8x16x1xf32> to vector<8x16x16xf32>
    %59 = arith.subf %55, %58 : vector<8x16x16xf32>
    %60 = math.exp %59 : vector<8x16x16xf32>
    %cst_21 = arith.constant dense<0.000000e+00> : vector<8x16xf32>
    %61 = vector.multi_reduction <add>, %60, %cst_21 [2] : vector<8x16x16xf32> to vector<8x16xf32>
    %62 = vector.shape_cast %61 : vector<8x16xf32> to vector<8x16x1xf32>
    %63 = vector.broadcast %62 : vector<8x16x1xf32> to vector<8x16x16xf32>
    %64 = arith.divf %60, %63 : vector<8x16x16xf32>
    %65 = arith.truncf %64 : vector<8x16x16xf32> to vector<8x16x16xbf16>
    "tpu.trace_start"() <{level = 10 : i32, message = "gqk,gkd->gqd"}> : () -> ()
    %cst_22 = arith.constant dense<0.000000e+00> : vector<8x16x8xf32>
    %66 = tpu.matmul %65, %47, %cst_22 {dimension_numbers = #tpu.dot_dimension_numbers<[2], [1], [1], [2], [0, 0, 0, 1, 1, 2], [0], [0]>} : vector<8x16x16xbf16>, vector<8x16x8xbf16>, vector<8x16x8xf32> -> vector<8x16x8xf32>
    "tpu.trace_stop"() : () -> ()
    %67 = vector.shape_cast %66 : vector<8x16x8xf32> to vector<128x8xf32>
    %68 = vector.extract_strided_slice %36 {offsets = [0, 8], sizes = [128, 8], strides = [1, 1]} : vector<128x96xf32> to vector<128x8xf32>
    %cst_23 = arith.constant 0.353553385 : f32
    %69 = vector.broadcast %cst_23 : f32 to vector<128x8xf32>
    %70 = arith.mulf %68, %69 : vector<128x8xf32>
    %71 = vector.extract_strided_slice %36 {offsets = [0, 40], sizes = [128, 8], strides = [1, 1]} : vector<128x96xf32> to vector<128x8xf32>
    %72 = vector.extract_strided_slice %36 {offsets = [0, 72], sizes = [128, 8], strides = [1, 1]} : vector<128x96xf32> to vector<128x8xf32>
    %73 = vector.shape_cast %70 : vector<128x8xf32> to vector<8x16x8xf32>
    %74 = arith.truncf %73 : vector<8x16x8xf32> to vector<8x16x8xbf16>
    %75 = vector.shape_cast %71 : vector<128x8xf32> to vector<8x16x8xf32>
    %76 = arith.truncf %75 : vector<8x16x8xf32> to vector<8x16x8xbf16>
    %77 = vector.shape_cast %72 : vector<128x8xf32> to vector<8x16x8xf32>
    %78 = arith.truncf %77 : vector<8x16x8xf32> to vector<8x16x8xbf16>
    "tpu.trace_start"() <{level = 10 : i32, message = "gqd,gkd->gqk"}> : () -> ()
    %cst_24 = arith.constant dense<0.000000e+00> : vector<8x16x16xf32>
    %79 = tpu.matmul %74, %76, %cst_24 {dimension_numbers = #tpu.dot_dimension_numbers<[2], [2], [1], [1], [0, 0, 0, 1, 1, 1], [0], [0]>} : vector<8x16x8xbf16>, vector<8x16x8xbf16>, vector<8x16x16xf32> -> vector<8x16x16xf32>
    "tpu.trace_stop"() : () -> ()
    %80 = vector.shape_cast %79 : vector<8x16x16xf32> to vector<2x4x16x16xf32>
    %c1 = arith.constant 1 : index
    %c0_25 = arith.constant 0 : index
    %c0_26 = arith.constant 0 : index
    %c0_27 = arith.constant 0 : index
    %81 = vector.load %arg6[%c1, %c0_25, %c0_26, %c0_27] : memref<4x4x16x16xf32, #tpu.memory_space<vmem>>, vector<1x4x16x16xf32>
    %82 = vector.shape_cast %81 : vector<1x4x16x16xf32> to vector<4x16x16xf32>
    %83 = vector.shape_cast %82 : vector<4x16x16xf32> to vector<1x4x16x16xf32>
    %84 = vector.broadcast %83 : vector<1x4x16x16xf32> to vector<2x4x16x16xf32>
    %85 = arith.addf %80, %84 : vector<2x4x16x16xf32>
    %86 = vector.shape_cast %85 : vector<2x4x16x16xf32> to vector<8x16x16xf32>
    %cst_28 = arith.constant dense<0xFF800000> : vector<8x16xf32>
    %87 = vector.multi_reduction <maximumf>, %86, %cst_28 [2] : vector<8x16x16xf32> to vector<8x16xf32>
    %88 = vector.shape_cast %87 : vector<8x16xf32> to vector<8x16x1xf32>
    %89 = vector.broadcast %88 : vector<8x16x1xf32> to vector<8x16x16xf32>
    %90 = arith.subf %86, %89 : vector<8x16x16xf32>
    %91 = math.exp %90 : vector<8x16x16xf32>
    %cst_29 = arith.constant dense<0.000000e+00> : vector<8x16xf32>
    %92 = vector.multi_reduction <add>, %91, %cst_29 [2] : vector<8x16x16xf32> to vector<8x16xf32>
    %93 = vector.shape_cast %92 : vector<8x16xf32> to vector<8x16x1xf32>
    %94 = vector.broadcast %93 : vector<8x16x1xf32> to vector<8x16x16xf32>
    %95 = arith.divf %91, %94 : vector<8x16x16xf32>
    %96 = arith.truncf %95 : vector<8x16x16xf32> to vector<8x16x16xbf16>
    "tpu.trace_start"() <{level = 10 : i32, message = "gqk,gkd->gqd"}> : () -> ()
    %cst_30 = arith.constant dense<0.000000e+00> : vector<8x16x8xf32>
    %97 = tpu.matmul %96, %78, %cst_30 {dimension_numbers = #tpu.dot_dimension_numbers<[2], [1], [1], [2], [0, 0, 0, 1, 1, 2], [0], [0]>} : vector<8x16x16xbf16>, vector<8x16x8xbf16>, vector<8x16x8xf32> -> vector<8x16x8xf32>
    "tpu.trace_stop"() : () -> ()
    %98 = vector.shape_cast %97 : vector<8x16x8xf32> to vector<128x8xf32>
    %99 = vector.extract_strided_slice %36 {offsets = [0, 16], sizes = [128, 8], strides = [1, 1]} : vector<128x96xf32> to vector<128x8xf32>
    %cst_31 = arith.constant 0.353553385 : f32
    %100 = vector.broadcast %cst_31 : f32 to vector<128x8xf32>
    %101 = arith.mulf %99, %100 : vector<128x8xf32>
    %102 = vector.extract_strided_slice %36 {offsets = [0, 48], sizes = [128, 8], strides = [1, 1]} : vector<128x96xf32> to vector<128x8xf32>
    %103 = vector.extract_strided_slice %36 {offsets = [0, 80], sizes = [128, 8], strides = [1, 1]} : vector<128x96xf32> to vector<128x8xf32>
    %104 = vector.shape_cast %101 : vector<128x8xf32> to vector<8x16x8xf32>
    %105 = arith.truncf %104 : vector<8x16x8xf32> to vector<8x16x8xbf16>
    %106 = vector.shape_cast %102 : vector<128x8xf32> to vector<8x16x8xf32>
    %107 = arith.truncf %106 : vector<8x16x8xf32> to vector<8x16x8xbf16>
    %108 = vector.shape_cast %103 : vector<128x8xf32> to vector<8x16x8xf32>
    %109 = arith.truncf %108 : vector<8x16x8xf32> to vector<8x16x8xbf16>
    "tpu.trace_start"() <{level = 10 : i32, message = "gqd,gkd->gqk"}> : () -> ()
    %cst_32 = arith.constant dense<0.000000e+00> : vector<8x16x16xf32>
    %110 = tpu.matmul %105, %107, %cst_32 {dimension_numbers = #tpu.dot_dimension_numbers<[2], [2], [1], [1], [0, 0, 0, 1, 1, 1], [0], [0]>} : vector<8x16x8xbf16>, vector<8x16x8xbf16>, vector<8x16x16xf32> -> vector<8x16x16xf32>
    "tpu.trace_stop"() : () -> ()
    %111 = vector.shape_cast %110 : vector<8x16x16xf32> to vector<2x4x16x16xf32>
    %c2 = arith.constant 2 : index
    %c0_33 = arith.constant 0 : index
    %c0_34 = arith.constant 0 : index
    %c0_35 = arith.constant 0 : index
    %112 = vector.load %arg6[%c2, %c0_33, %c0_34, %c0_35] : memref<4x4x16x16xf32, #tpu.memory_space<vmem>>, vector<1x4x16x16xf32>
    %113 = vector.shape_cast %112 : vector<1x4x16x16xf32> to vector<4x16x16xf32>
    %114 = vector.shape_cast %113 : vector<4x16x16xf32> to vector<1x4x16x16xf32>
    %115 = vector.broadcast %114 : vector<1x4x16x16xf32> to vector<2x4x16x16xf32>
    %116 = arith.addf %111, %115 : vector<2x4x16x16xf32>
    %117 = vector.shape_cast %116 : vector<2x4x16x16xf32> to vector<8x16x16xf32>
    %cst_36 = arith.constant dense<0xFF800000> : vector<8x16xf32>
    %118 = vector.multi_reduction <maximumf>, %117, %cst_36 [2] : vector<8x16x16xf32> to vector<8x16xf32>
    %119 = vector.shape_cast %118 : vector<8x16xf32> to vector<8x16x1xf32>
    %120 = vector.broadcast %119 : vector<8x16x1xf32> to vector<8x16x16xf32>
    %121 = arith.subf %117, %120 : vector<8x16x16xf32>
    %122 = math.exp %121 : vector<8x16x16xf32>
    %cst_37 = arith.constant dense<0.000000e+00> : vector<8x16xf32>
    %123 = vector.multi_reduction <add>, %122, %cst_37 [2] : vector<8x16x16xf32> to vector<8x16xf32>
    %124 = vector.shape_cast %123 : vector<8x16xf32> to vector<8x16x1xf32>
    %125 = vector.broadcast %124 : vector<8x16x1xf32> to vector<8x16x16xf32>
    %126 = arith.divf %122, %125 : vector<8x16x16xf32>
    %127 = arith.truncf %126 : vector<8x16x16xf32> to vector<8x16x16xbf16>
    "tpu.trace_start"() <{level = 10 : i32, message = "gqk,gkd->gqd"}> : () -> ()
    %cst_38 = arith.constant dense<0.000000e+00> : vector<8x16x8xf32>
    %128 = tpu.matmul %127, %109, %cst_38 {dimension_numbers = #tpu.dot_dimension_numbers<[2], [1], [1], [2], [0, 0, 0, 1, 1, 2], [0], [0]>} : vector<8x16x16xbf16>, vector<8x16x8xbf16>, vector<8x16x8xf32> -> vector<8x16x8xf32>
    "tpu.trace_stop"() : () -> ()
    %129 = vector.shape_cast %128 : vector<8x16x8xf32> to vector<128x8xf32>
    %130 = vector.extract_strided_slice %36 {offsets = [0, 24], sizes = [128, 8], strides = [1, 1]} : vector<128x96xf32> to vector<128x8xf32>
    %cst_39 = arith.constant 0.353553385 : f32
    %131 = vector.broadcast %cst_39 : f32 to vector<128x8xf32>
    %132 = arith.mulf %130, %131 : vector<128x8xf32>
    %133 = vector.extract_strided_slice %36 {offsets = [0, 56], sizes = [128, 8], strides = [1, 1]} : vector<128x96xf32> to vector<128x8xf32>
    %134 = vector.extract_strided_slice %36 {offsets = [0, 88], sizes = [128, 8], strides = [1, 1]} : vector<128x96xf32> to vector<128x8xf32>
    %135 = vector.shape_cast %132 : vector<128x8xf32> to vector<8x16x8xf32>
    %136 = arith.truncf %135 : vector<8x16x8xf32> to vector<8x16x8xbf16>
    %137 = vector.shape_cast %133 : vector<128x8xf32> to vector<8x16x8xf32>
    %138 = arith.truncf %137 : vector<8x16x8xf32> to vector<8x16x8xbf16>
    %139 = vector.shape_cast %134 : vector<128x8xf32> to vector<8x16x8xf32>
    %140 = arith.truncf %139 : vector<8x16x8xf32> to vector<8x16x8xbf16>
    "tpu.trace_start"() <{level = 10 : i32, message = "gqd,gkd->gqk"}> : () -> ()
    %cst_40 = arith.constant dense<0.000000e+00> : vector<8x16x16xf32>
    %141 = tpu.matmul %136, %138, %cst_40 {dimension_numbers = #tpu.dot_dimension_numbers<[2], [2], [1], [1], [0, 0, 0, 1, 1, 1], [0], [0]>} : vector<8x16x8xbf16>, vector<8x16x8xbf16>, vector<8x16x16xf32> -> vector<8x16x16xf32>
    "tpu.trace_stop"() : () -> ()
    %142 = vector.shape_cast %141 : vector<8x16x16xf32> to vector<2x4x16x16xf32>
    %c3 = arith.constant 3 : index
    %c0_41 = arith.constant 0 : index
    %c0_42 = arith.constant 0 : index
    %c0_43 = arith.constant 0 : index
    %143 = vector.load %arg6[%c3, %c0_41, %c0_42, %c0_43] : memref<4x4x16x16xf32, #tpu.memory_space<vmem>>, vector<1x4x16x16xf32>
    %144 = vector.shape_cast %143 : vector<1x4x16x16xf32> to vector<4x16x16xf32>
    %145 = vector.shape_cast %144 : vector<4x16x16xf32> to vector<1x4x16x16xf32>
    %146 = vector.broadcast %145 : vector<1x4x16x16xf32> to vector<2x4x16x16xf32>
    %147 = arith.addf %142, %146 : vector<2x4x16x16xf32>
    %148 = vector.shape_cast %147 : vector<2x4x16x16xf32> to vector<8x16x16xf32>
    %cst_44 = arith.constant dense<0xFF800000> : vector<8x16xf32>
    %149 = vector.multi_reduction <maximumf>, %148, %cst_44 [2] : vector<8x16x16xf32> to vector<8x16xf32>
    %150 = vector.shape_cast %149 : vector<8x16xf32> to vector<8x16x1xf32>
    %151 = vector.broadcast %150 : vector<8x16x1xf32> to vector<8x16x16xf32>
    %152 = arith.subf %148, %151 : vector<8x16x16xf32>
    %153 = math.exp %152 : vector<8x16x16xf32>
    %cst_45 = arith.constant dense<0.000000e+00> : vector<8x16xf32>
    %154 = vector.multi_reduction <add>, %153, %cst_45 [2] : vector<8x16x16xf32> to vector<8x16xf32>
    %155 = vector.shape_cast %154 : vector<8x16xf32> to vector<8x16x1xf32>
    %156 = vector.broadcast %155 : vector<8x16x1xf32> to vector<8x16x16xf32>
    %157 = arith.divf %153, %156 : vector<8x16x16xf32>
    %158 = arith.truncf %157 : vector<8x16x16xf32> to vector<8x16x16xbf16>
    "tpu.trace_start"() <{level = 10 : i32, message = "gqk,gkd->gqd"}> : () -> ()
    %cst_46 = arith.constant dense<0.000000e+00> : vector<8x16x8xf32>
    %159 = tpu.matmul %158, %140, %cst_46 {dimension_numbers = #tpu.dot_dimension_numbers<[2], [1], [1], [2], [0, 0, 0, 1, 1, 2], [0], [0]>} : vector<8x16x16xbf16>, vector<8x16x8xbf16>, vector<8x16x8xf32> -> vector<8x16x8xf32>
    "tpu.trace_stop"() : () -> ()
    %160 = vector.shape_cast %159 : vector<8x16x8xf32> to vector<128x8xf32>
    %161 = tpu.concatenate %67, %98, %129, %160 in 1 : vector<128x8xf32>, vector<128x8xf32>, vector<128x8xf32>, vector<128x8xf32> -> vector<128x32xf32>
    %162 = arith.truncf %161 : vector<128x32xf32> to vector<128x32xbf16>
    %c0_47 = arith.constant 0 : index
    %c0_48 = arith.constant 0 : index
    %163 = vector.load %arg7[%c0_47, %c0_48] : memref<32x32xbf16, #tpu.memory_space<vmem>>, vector<32x32xbf16>
    %cst_49 = arith.constant dense<0.000000e+00> : vector<128x32xf32>
    %164 = tpu.matmul %162, %163, %cst_49 {dimension_numbers = #tpu.dot_dimension_numbers<[1], [0], [0], [1], [0, 0, 1, 1], [], []>} : vector<128x32xbf16>, vector<32x32xbf16>, vector<128x32xf32> -> vector<128x32xf32>
    %c0_50 = arith.constant 0 : index
    %c0_51 = arith.constant 0 : index
    %165 = vector.load %arg8[%c0_50, %c0_51] : memref<1x32xf32, #tpu.memory_space<vmem>>, vector<1x32xf32>
    %166 = vector.shape_cast %165 : vector<1x32xf32> to vector<32xf32>
    %167 = vector.shape_cast %166 : vector<32xf32> to vector<1x32xf32>
    %168 = vector.broadcast %167 : vector<1x32xf32> to vector<128x32xf32>
    %169 = arith.addf %164, %168 : vector<128x32xf32>
    %c0_52 = arith.constant 0 : index
    %c0_53 = arith.constant 0 : index
    %170 = vector.load %arg9[%c0_52, %c0_53] : memref<128x32xf32, #tpu.memory_space<vmem>>, vector<128x32xf32>
    tpu.vector_store %arg9[%c0_52, %c0_53], %169 {strides = array<i32>} : memref<128x32xf32, #tpu.memory_space<vmem>>, vector<128x32xf32>,
    return
  }
  func.func @transform_0(%arg0: i32) -> (i32, i32) {
    %c0_i32 = arith.constant 0 : i32
    %c0_i32_0 = arith.constant 0 : i32
    return %arg0, %c0_i32 : i32, i32
  }
  func.func @transform_1(%arg0: i32) -> (i32, i32) {
    %c0_i32 = arith.constant 0 : i32
    %c0_i32_0 = arith.constant 0 : i32
    %c0_i32_1 = arith.constant 0 : i32
    return %c0_i32, %c0_i32_0 : i32, i32
  }
  func.func @transform_2(%arg0: i32) -> (i32, i32) {
    %c0_i32 = arith.constant 0 : i32
    %c0_i32_0 = arith.constant 0 : i32
    %c0_i32_1 = arith.constant 0 : i32
    return %c0_i32, %c0_i32_0 : i32, i32
  }
  func.func @transform_3(%arg0: i32) -> (i32, i32) {
    %c0_i32 = arith.constant 0 : i32
    %c0_i32_0 = arith.constant 0 : i32
    %c0_i32_1 = arith.constant 0 : i32
    return %c0_i32, %c0_i32_0 : i32, i32
  }
  func.func @transform_4(%arg0: i32) -> (i32, i32) {
    %c0_i32 = arith.constant 0 : i32
    %c0_i32_0 = arith.constant 0 : i32
    %c0_i32_1 = arith.constant 0 : i32
    return %c0_i32, %c0_i32_0 : i32, i32
  }
  func.func @transform_5(%arg0: i32) -> (i32, i32, i32, i32) {
    %c0_i32 = arith.constant 0 : i32
    %c0_i32_0 = arith.constant 0 : i32
    %c0_i32_1 = arith.constant 0 : i32
    %c0_i32_2 = arith.constant 0 : i32
    %c0_i32_3 = arith.constant 0 : i32
    return %c0_i32, %c0_i32_0, %c0_i32_1, %c0_i32_2 : i32, i32, i32, i32
  }
  func.func @transform_6(%arg0: i32) -> (i32, i32) {
    %c0_i32 = arith.constant 0 : i32
    %c0_i32_0 = arith.constant 0 : i32
    %c0_i32_1 = arith.constant 0 : i32
    return %c0_i32, %c0_i32_0 : i32, i32
  }
  func.func @transform_7(%arg0: i32) -> (i32, i32) {
    %c0_i32 = arith.constant 0 : i32
    %c0_i32_0 = arith.constant 0 : i32
    %c0_i32_1 = arith.constant 0 : i32
    return %c0_i32, %c0_i32_0 : i32, i32
  }
  func.func @transform_8(%arg0: i32) -> (i32, i32) {
    %c0_i32 = arith.constant 0 : i32
    %c0_i32_0 = arith.constant 0 : i32
    return %arg0, %c0_i32 : i32, i32
  }
}

module attributes {stable_mosaic.version = 11 : i64} {
  func.func @mlp_kernel(%arg0: i32, %arg1: memref<128x32xf32, #tpu.memory_space<vmem>>, %arg2: memref<1x32xf32, #tpu.memory_space<vmem>>, %arg3: memref<1x32xf32, #tpu.memory_space<vmem>>, %arg4: memref<32x128xbf16, #tpu.memory_space<vmem>>, %arg5: memref<1x128xf32, #tpu.memory_space<vmem>>, %arg6: memref<128x32xbf16, #tpu.memory_space<vmem>>, %arg7: memref<1x32xf32, #tpu.memory_space<vmem>>, %arg8: memref<128x32xf32, #tpu.memory_space<vmem>>) attributes {dimension_semantics = [#tpu.dimension_semantics<parallel>], iteration_bounds = array<i64: 1>, scalar_prefetch = 0 : i64, scratch_operands = 0 : i64, tpu.core_type = #tpu.core_type<tc>, window_params = [{transform_indices = @transform_0, window_bounds = array<i64: 128, 32>}, {pipeline_mode = #tpu.pipeline_mode<synchronous>, transform_indices = @transform_1, window_bounds = array<i64: 1, 32>}, {pipeline_mode = #tpu.pipeline_mode<synchronous>, transform_indices = @transform_2, window_bounds = array<i64: 1, 32>}, {pipeline_mode = #tpu.pipeline_mode<synchronous>, transform_indices = @transform_3, window_bounds = array<i64: 32, 128>}, {pipeline_mode = #tpu.pipeline_mode<synchronous>, transform_indices = @transform_4, window_bounds = array<i64: 1, 128>}, {pipeline_mode = #tpu.pipeline_mode<synchronous>, transform_indices = @transform_5, window_bounds = array<i64: 128, 32>}, {pipeline_mode = #tpu.pipeline_mode<synchronous>, transform_indices = @transform_6, window_bounds = array<i64: 1, 32>}, {transform_indices = @transform_7, window_bounds = array<i64: 128, 32>}]} {
    %c0 = arith.constant 0 : index
    %c0_0 = arith.constant 0 : index
    %0 = vector.load %arg1[%c0, %c0_0] : memref<128x32xf32, #tpu.memory_space<vmem>>, vector<128x32xf32>
    %c0_1 = arith.constant 0 : index
    %c0_2 = arith.constant 0 : index
    %1 = vector.load %arg2[%c0_1, %c0_2] : memref<1x32xf32, #tpu.memory_space<vmem>>, vector<1x32xf32>
    %2 = vector.shape_cast %1 : vector<1x32xf32> to vector<32xf32>
    %c0_3 = arith.constant 0 : index
    %c0_4 = arith.constant 0 : index
    %3 = vector.load %arg3[%c0_3, %c0_4] : memref<1x32xf32, #tpu.memory_space<vmem>>, vector<1x32xf32>
    %4 = vector.shape_cast %3 : vector<1x32xf32> to vector<32xf32>
    %cst = arith.constant dense<0.000000e+00> : vector<128xf32>
    %5 = vector.multi_reduction <add>, %0, %cst [1] : vector<128x32xf32> to vector<128xf32>
    %6 = vector.shape_cast %5 : vector<128xf32> to vector<128x1xf32>
    %cst_5 = arith.constant 3.200000e+01 : f32
    %7 = vector.broadcast %cst_5 : f32 to vector<128x1xf32>
    %8 = arith.divf %6, %7 : vector<128x1xf32>
    %9 = vector.broadcast %8 : vector<128x1xf32> to vector<128x32xf32>
    %10 = arith.subf %0, %9 : vector<128x32xf32>
    %11 = arith.mulf %10, %10 : vector<128x32xf32>
    %cst_6 = arith.constant dense<0.000000e+00> : vector<128xf32>
    %12 = vector.multi_reduction <add>, %11, %cst_6 [1] : vector<128x32xf32> to vector<128xf32>
    %13 = vector.shape_cast %12 : vector<128xf32> to vector<128x1xf32>
    %cst_7 = arith.constant 3.200000e+01 : f32
    %14 = vector.broadcast %cst_7 : f32 to vector<128x1xf32>
    %15 = arith.divf %13, %14 : vector<128x1xf32>
    %16 = vector.broadcast %8 : vector<128x1xf32> to vector<128x32xf32>
    %17 = arith.subf %0, %16 : vector<128x32xf32>
    %cst_8 = arith.constant 9.99999974E-6 : f32
    %18 = vector.broadcast %cst_8 : f32 to vector<128x1xf32>
    %19 = arith.addf %15, %18 : vector<128x1xf32>
    %20 = math.rsqrt %19 : vector<128x1xf32>
    %21 = vector.broadcast %20 : vector<128x1xf32> to vector<128x32xf32>
    %22 = arith.mulf %17, %21 : vector<128x32xf32>
    %23 = vector.shape_cast %2 : vector<32xf32> to vector<1x32xf32>
    %24 = vector.broadcast %23 : vector<1x32xf32> to vector<128x32xf32>
    %25 = arith.mulf %22, %24 : vector<128x32xf32>
    %26 = vector.shape_cast %4 : vector<32xf32> to vector<1x32xf32>
    %27 = vector.broadcast %26 : vector<1x32xf32> to vector<128x32xf32>
    %28 = arith.addf %25, %27 : vector<128x32xf32>
    %29 = arith.truncf %28 : vector<128x32xf32> to vector<128x32xbf16>
    %c0_9 = arith.constant 0 : index
    %c0_10 = arith.constant 0 : index
    %30 = vector.load %arg4[%c0_9, %c0_10] : memref<32x128xbf16, #tpu.memory_space<vmem>>, vector<32x128xbf16>
    %cst_11 = arith.constant dense<0.000000e+00> : vector<128x128xf32>
    %31 = tpu.matmul %29, %30, %cst_11 {dimension_numbers = #tpu.dot_dimension_numbers<[1], [0], [0], [1], [0, 0, 1, 1], [], []>} : vector<128x32xbf16>, vector<32x128xbf16>, vector<128x128xf32> -> vector<128x128xf32>
    %c0_12 = arith.constant 0 : index
    %c0_13 = arith.constant 0 : index
    %32 = vector.load %arg5[%c0_12, %c0_13] : memref<1x128xf32, #tpu.memory_space<vmem>>, vector<1x128xf32>
    %33 = vector.shape_cast %32 : vector<1x128xf32> to vector<128xf32>
    %34 = vector.shape_cast %33 : vector<128xf32> to vector<1x128xf32>
    %35 = vector.broadcast %34 : vector<1x128xf32> to vector<128x128xf32>
    %36 = arith.addf %31, %35 : vector<128x128xf32>
    %cst_14 = arith.constant 5.000000e-01 : f32
    %37 = vector.broadcast %cst_14 : f32 to vector<128x128xf32>
    %38 = arith.mulf %37, %36 : vector<128x128xf32>
    %cst_15 = arith.constant 0.707106769 : f32
    %39 = vector.broadcast %cst_15 : f32 to vector<128x128xf32>
    %40 = arith.mulf %36, %39 : vector<128x128xf32>
    %41 = math.erf %40 : vector<128x128xf32>
    %cst_16 = arith.constant 1.000000e+00 : f32
    %42 = vector.broadcast %cst_16 : f32 to vector<128x128xf32>
    %43 = arith.addf %42, %41 : vector<128x128xf32>
    %44 = arith.mulf %38, %43 : vector<128x128xf32>
    %45 = arith.truncf %44 : vector<128x128xf32> to vector<128x128xbf16>
    %c0_17 = arith.constant 0 : index
    %c0_18 = arith.constant 0 : index
    %46 = vector.load %arg6[%c0_17, %c0_18] : memref<128x32xbf16, #tpu.memory_space<vmem>>, vector<128x32xbf16>
    %cst_19 = arith.constant dense<0.000000e+00> : vector<128x32xf32>
    %47 = tpu.matmul %45, %46, %cst_19 {dimension_numbers = #tpu.dot_dimension_numbers<[1], [0], [0], [1], [0, 0, 1, 1], [], []>} : vector<128x128xbf16>, vector<128x32xbf16>, vector<128x32xf32> -> vector<128x32xf32>
    %c0_20 = arith.constant 0 : index
    %c0_21 = arith.constant 0 : index
    %48 = vector.load %arg7[%c0_20, %c0_21] : memref<1x32xf32, #tpu.memory_space<vmem>>, vector<1x32xf32>
    %49 = vector.shape_cast %48 : vector<1x32xf32> to vector<32xf32>
    %50 = vector.shape_cast %49 : vector<32xf32> to vector<1x32xf32>
    %51 = vector.broadcast %50 : vector<1x32xf32> to vector<128x32xf32>
    %52 = arith.addf %47, %51 : vector<128x32xf32>
    %53 = arith.addf %0, %52 : vector<128x32xf32>
    %c0_22 = arith.constant 0 : index
    %c0_23 = arith.constant 0 : index
    %54 = vector.load %arg8[%c0_22, %c0_23] : memref<128x32xf32, #tpu.memory_space<vmem>>, vector<128x32xf32>
    tpu.vector_store %arg8[%c0_22, %c0_23], %53 {strides = array<i32>} : memref<128x32xf32, #tpu.memory_space<vmem>>, vector<128x32xf32>,
    return
  }
  func.func @transform_0(%arg0: i32) -> (i32, i32) {
    %c0_i32 = arith.constant 0 : i32
    %c0_i32_0 = arith.constant 0 : i32
    return %arg0, %c0_i32 : i32, i32
  }
  func.func @transform_1(%arg0: i32) -> (i32, i32) {
    %c0_i32 = arith.constant 0 : i32
    %c0_i32_0 = arith.constant 0 : i32
    %c0_i32_1 = arith.constant 0 : i32
    return %c0_i32, %c0_i32_0 : i32, i32
  }
  func.func @transform_2(%arg0: i32) -> (i32, i32) {
    %c0_i32 = arith.constant 0 : i32
    %c0_i32_0 = arith.constant 0 : i32
    %c0_i32_1 = arith.constant 0 : i32
    return %c0_i32, %c0_i32_0 : i32, i32
  }
  func.func @transform_3(%arg0: i32) -> (i32, i32) {
    %c0_i32 = arith.constant 0 : i32
    %c0_i32_0 = arith.constant 0 : i32
    %c0_i32_1 = arith.constant 0 : i32
    return %c0_i32, %c0_i32_0 : i32, i32
  }
  func.func @transform_4(%arg0: i32) -> (i32, i32) {
    %c0_i32 = arith.constant 0 : i32
    %c0_i32_0 = arith.constant 0 : i32
    %c0_i32_1 = arith.constant 0 : i32
    return %c0_i32, %c0_i32_0 : i32, i32
  }
  func.func @transform_5(%arg0: i32) -> (i32, i32) {
    %c0_i32 = arith.constant 0 : i32
    %c0_i32_0 = arith.constant 0 : i32
    %c0_i32_1 = arith.constant 0 : i32
    return %c0_i32, %c0_i32_0 : i32, i32
  }
  func.func @transform_6(%arg0: i32) -> (i32, i32) {
    %c0_i32 = arith.constant 0 : i32
    %c0_i32_0 = arith.constant 0 : i32
    %c0_i32_1 = arith.constant 0 : i32
    return %c0_i32, %c0_i32_0 : i32, i32
  }
  func.func @transform_7(%arg0: i32) -> (i32, i32) {
    %c0_i32 = arith.constant 0 : i32
    %c0_i32_0 = arith.constant 0 : i32
    return %arg0, %c0_i32 : i32, i32
  }
}

module attributes {stable_mosaic.version = 11 : i64} {
  func.func @linear_kernel(%arg0: i32, %arg1: memref<128x32xf32, #tpu.memory_space<vmem>>, %arg2: memref<32x128xbf16, #tpu.memory_space<vmem>>, %arg3: memref<1x128xf32, #tpu.memory_space<vmem>>, %arg4: memref<128x128xf32, #tpu.memory_space<vmem>>) attributes {dimension_semantics = [#tpu.dimension_semantics<parallel>], iteration_bounds = array<i64: 1>, scalar_prefetch = 0 : i64, scratch_operands = 0 : i64, tpu.core_type = #tpu.core_type<tc>, window_params = [{transform_indices = @transform_0, window_bounds = array<i64: 128, 32>}, {pipeline_mode = #tpu.pipeline_mode<synchronous>, transform_indices = @transform_1, window_bounds = array<i64: 32, 128>}, {pipeline_mode = #tpu.pipeline_mode<synchronous>, transform_indices = @transform_2, window_bounds = array<i64: 1, 128>}, {transform_indices = @transform_3, window_bounds = array<i64: 128, 128>}]} {
    %c0 = arith.constant 0 : index
    %c0_0 = arith.constant 0 : index
    %0 = vector.load %arg1[%c0, %c0_0] : memref<128x32xf32, #tpu.memory_space<vmem>>, vector<128x32xf32>
    %1 = arith.truncf %0 : vector<128x32xf32> to vector<128x32xbf16>
    %c0_1 = arith.constant 0 : index
    %c0_2 = arith.constant 0 : index
    %2 = vector.load %arg2[%c0_1, %c0_2] : memref<32x128xbf16, #tpu.memory_space<vmem>>, vector<32x128xbf16>
    %cst = arith.constant dense<0.000000e+00> : vector<128x128xf32>
    %3 = tpu.matmul %1, %2, %cst {dimension_numbers = #tpu.dot_dimension_numbers<[1], [0], [0], [1], [0, 0, 1, 1], [], []>} : vector<128x32xbf16>, vector<32x128xbf16>, vector<128x128xf32> -> vector<128x128xf32>
    %c0_3 = arith.constant 0 : index
    %c0_4 = arith.constant 0 : index
    %4 = vector.load %arg3[%c0_3, %c0_4] : memref<1x128xf32, #tpu.memory_space<vmem>>, vector<1x128xf32>
    %5 = vector.shape_cast %4 : vector<1x128xf32> to vector<128xf32>
    %6 = vector.shape_cast %5 : vector<128xf32> to vector<1x128xf32>
    %7 = vector.broadcast %6 : vector<1x128xf32> to vector<128x128xf32>
    %8 = arith.addf %3, %7 : vector<128x128xf32>
    %c0_5 = arith.constant 0 : index
    %c0_6 = arith.constant 0 : index
    %9 = vector.load %arg4[%c0_5, %c0_6] : memref<128x128xf32, #tpu.memory_space<vmem>>, vector<128x128xf32>
    tpu.vector_store %arg4[%c0_5, %c0_6], %8 {strides = array<i32>} : memref<128x128xf32, #tpu.memory_space<vmem>>, vector<128x128xf32>,
    return
  }
  func.func @transform_0(%arg0: i32) -> (i32, i32) {
    %c0_i32 = arith.constant 0 : i32
    %c0_i32_0 = arith.constant 0 : i32
    return %arg0, %c0_i32 : i32, i32
  }
  func.func @transform_1(%arg0: i32) -> (i32, i32) {
    %c0_i32 = arith.constant 0 : i32
    %c0_i32_0 = arith.constant 0 : i32
    %c0_i32_1 = arith.constant 0 : i32
    return %c0_i32, %c0_i32_0 : i32, i32
  }
  func.func @transform_2(%arg0: i32) -> (i32, i32) {
    %c0_i32 = arith.constant 0 : i32
    %c0_i32_0 = arith.constant 0 : i32
    %c0_i32_1 = arith.constant 0 : i32
    return %c0_i32, %c0_i32_0 : i32, i32
  }
  func.func @transform_3(%arg0: i32) -> (i32, i32) {
    %c0_i32 = arith.constant 0 : i32
    %c0_i32_0 = arith.constant 0 : i32
    return %arg0, %c0_i32 : i32, i32
  }
}

</mosaic_0001>

<bundles_post_ra>
// kernel: _lambda_.8
= control target key start
LH: loop header
LB: loop body
LE: loop exit
PB: predicated region body
PF: predicated region fallthrough
CT: control target
= control target key end

     0   :  { %vm255_vm0 = vcmask 261120   ;;  %s1023_s1 = inlined_call_operand.vmem [shape: bf16[128,32], index: 1, kind: input, shape index: {}]   ;;  %s1024_s0 = inlined_call_operand.vmem [shape: bf16[128,128], index: 0, kind: input, shape index: {}]   ;;  %s1025_s2 = inlined_call_operand.vmem [shape: f32[1,32], index: 2, kind: input, shape index: {}]   ;;  %s1026_s3 = inlined_call_operand.vmem [shape: f32[1,32], index: 3, kind: input, shape index: {}]   ;;  %s1027_s4 = inlined_call_operand.vmem [shape: f32[1,32], index: 4, kind: input, shape index: {}]   ;;  %s1028_s5 = inlined_call_operand.vmem [shape: f32[128,32], index: 5, kind: output, shape index: {}]  }
   0x1   :  { %v612_v0 = vld [vmem:[%s1023_s1] sm:$0xff]   ;;  %v613_v1 = vld [vmem:[%s1023_s1 + $0x8] sm:$0xff]   ;;  %v614_v2 = vld [vmem:[%s1023_s1 + $0x10] sm:$0xff]  }
   0x2   :  { %564 = vmatprep.subr.bf16.mxu0 %v612_v0  ;;  %596 = vmatprep.subr.bf16.mxu1 %v612_v0  ;;  %v615_v3 = vld [vmem:[%s1023_s1 + $0x18] sm:$0xff]   ;;  %v620_v4 = vld [vmem:[%s1024_s0] sm:$0xff]   ;;  %v617_v7 = vld [vmem:[%s1023_s1 + $0x28] sm:$0xff]  }
   0x3   :  { %565 = vmatpush3.bf16.msra.mxu0 %v612_v0  ;;  %604 = vmatpush3.bf16.msra.mxu1 %v612_v0  ;;  %v621_v5 = vld [vmem:[%s1024_s0 + $0x20] sm:$0xff]   ;;  %v618_v8 = vld [vmem:[%s1023_s1 + $0x30] sm:$0xff]   ;;  %v619_v9 = vld [vmem:[%s1023_s1 + $0x38] sm:$0xff]  }
   0x4   :  { %566 = vmatprep.subr.bf16.mxu0 %v613_v1  ;;  %597 = vmatprep.subr.bf16.mxu1 %v613_v1  ;;  %v616_v6 = vld [vmem:[%s1023_s1 + $0x20] sm:$0xff]   ;;  %v622_v10 = vld [vmem:[%s1024_s0 + $0x8] sm:$0xff]   ;;  %v624_v12 = vld [vmem:[%s1024_s0 + $0x10] sm:$0xff]  }
   0x5   :  { %580 = vmatprep.mubr.bf16.mxu0 %v620_v4  ;;  %588 = vmatprep.mubr.bf16.mxu1 %v621_v5  ;;  %v623_v11 = vld [vmem:[%s1024_s0 + $0x28] sm:$0xff]   ;;  %v626_v13 = vld [vmem:[%s1024_s0 + $0x30] sm:$0xff]   ;;  %v625_v14 = vld [vmem:[%s1024_s0 + $0x18] sm:$0xff]  }
   0x6   :  { %v627_v15 = vld [vmem:[%s1024_s0 + $0x38] sm:$0xff]   ;;  %v529_v16 = vld [vmem:[%s1025_s2] ss:$0 sm:$0xff] }
   0x7   :  { %567 = vmatpush3.bf16.msra.mxu0 %v613_v1  ;;  %605 = vmatpush3.bf16.msra.mxu1 %v613_v1 }
   0x8   :  { %568 = vmatprep.subr.bf16.mxu0 %v614_v2  ;;  %598 = vmatprep.subr.bf16.mxu1 %v614_v2 }
   0xb   :  { %569 = vmatpush3.bf16.msra.mxu0 %v614_v2  ;;  %606 = vmatpush3.bf16.msra.mxu1 %v614_v2 }
   0xc   :  { %570 = vmatprep.subr.bf16.mxu0 %v615_v3  ;;  %599 = vmatprep.subr.bf16.mxu1 %v615_v3 }
   0xf   :  { %571 = vmatpush3.bf16.msra.mxu0 %v615_v3  ;;  %607 = vmatpush3.bf16.msra.mxu1 %v615_v3 }
  0x10   :  { %572 = vmatprep.subr.bf16.mxu0 %v616_v6  ;;  %600 = vmatprep.subr.bf16.mxu1 %v616_v6 }
  0x13   :  { %573 = vmatpush3.bf16.msra.mxu0 %v616_v6  ;;  %608 = vmatpush3.bf16.msra.mxu1 %v616_v6 }
  0x14   :  { %574 = vmatprep.subr.bf16.mxu0 %v617_v7  ;;  %601 = vmatprep.subr.bf16.mxu1 %v617_v7 }
  0x17   :  { %575 = vmatpush3.bf16.msra.mxu0 %v617_v7  ;;  %609 = vmatpush3.bf16.msra.mxu1 %v617_v7 }
  0x18   :  { %576 = vmatprep.subr.bf16.mxu0 %v618_v8  ;;  %602 = vmatprep.subr.bf16.mxu1 %v618_v8 }
  0x1b   :  { %577 = vmatpush3.bf16.msra.mxu0 %v618_v8  ;;  %610 = vmatpush3.bf16.msra.mxu1 %v618_v8 }
  0x1c   :  { %578 = vmatprep.subr.bf16.mxu0 %v619_v9  ;;  %603 = vmatprep.subr.bf16.mxu1 %v619_v9 }
  0x1f   :  { %579 = vmatpush3.bf16.msra.mxu0 %v619_v9  ;;  %611 = vmatpush3.bf16.msra.mxu1 %v619_v9 }
  0x22   :  { %581 = vmatmul.mubr.bf16.vlgmr.msra.gmra.mrb[0].mxu0 %v622_v10  ;;  %589 = vmatmul.mubr.bf16.vlgmr.msra.gmra.mrb[0].mxu1 %v623_v11 }
  0x23   :  { %584 = vmatprep.mubr.bf16.mxu0 %v624_v12  ;;  %592 = vmatprep.mubr.bf16.mxu1 %v626_v13 }
  0x2a   :  { %585 = vmatmul.mubr.bf16.gmra.mrb[4].mxu0 %v625_v14  ;;  %593 = vmatmul.mubr.bf16.gmra.mrb[4].mxu1 %v627_v15 }
  0xf5   :  { %v582_v17 = vpop.f32.mrb[0].mxu0  ;;  %v590_v18 = vpop.f32.mrb[0].mxu1 }
  0xf6   :  { %v741_v19 = vadd.f32 %v582_v17, %v529_v16  ;;  %v743_v20 = vadd.f32 %v590_v18, %v529_v16  ;;  %v190_v21 = vpop.f32.mrb[1].mxu0  ;;  %v222_v22 = vpop.f32.mrb[1].mxu1 }
  0xf7   :  { %v583_v23 = vpop.f32.mrb[2].mxu0  ;;  %v591_v24 = vpop.f32.mrb[2].mxu1  ;;  %v745_v25 = vadd.f32 %v529_v16, %v190_v21  ;;  %v753_v31 = vadd.f32 %v529_v16, %v222_v22 }
  0xf8   :  { %v747_v26 = vadd.f32 %v583_v23, %v529_v16  ;;  %v193_v27 = vpop.f32.mrb[3].mxu0  ;;  %v225_v28 = vpop.f32.mrb[3].mxu1  ;;  %v286_v29 = vsel %vm255_vm0, %v743_v20, 0.0  ;;  %v262_v30 = vsel %vm255_vm0, %v741_v19, 0.0  ;;  %v755_v32 = vadd.f32 %v591_v24, %v529_v16 }
  0xf9   :  { %287 = vadd.xlane.f32.xlu0 %v286_v29  ;;  %263 = vadd.xlane.f32.xlu1 %v262_v30  ;;  %v256_v34 = vsel %vm255_vm0, %v745_v25, 0.0  ;;  %v761_v41 = vadd.f32 %v529_v16, %v193_v27  ;;  %v763_v42 = vadd.f32 %v529_v16, %v225_v28  ;;  %v280_v44 = vsel %vm255_vm0, %v753_v31, 0.0 }
  0xfa   :  { %v265_v33 = vsel %vm255_vm0, %v747_v26, 0.0  ;;  %v289_v43 = vsel %vm255_vm0, %v755_v32, 0.0 }
  0xfb   :  { %v283_v49 = vsel %vm255_vm0, %v763_v42, 0.0  ;;  %v259_v50 = vsel %vm255_vm0, %v761_v41, 0.0 }
  0xfd   :  { %266 = vadd.xlane.f32.xlu1 %v265_v33  ;;  %257 = vadd.xlane.f32.xlu0 %v256_v34  ;;  %v586_v35 = vpop.f32.mrb[4].mxu0  ;;  %v594_v36 = vpop.f32.mrb[4].mxu1 }
  0xfe   :  { %v206_v37 = vpop.f32.mrb[5].mxu0  ;;  %v238_v38 = vpop.f32.mrb[5].mxu1  ;;  %v769_v47 = vadd.f32 %v586_v35, %v529_v16  ;;  %v797_v61 = vadd.f32 %v594_v36, %v529_v16 }
  0xff   :  { %v587_v39 = vpop.f32.mrb[6].mxu0  ;;  %v595_v40 = vpop.f32.mrb[6].mxu1  ;;  %v781_v53 = vadd.f32 %v529_v16, %v206_v37  ;;  %v785_v55 = vadd.f32 %v529_v16, %v238_v38 }
 0x100   :  { %v209_v45 = vpop.f32.mrb[7].mxu0  ;;  %v241_v46 = vpop.f32.mrb[7].mxu1  ;;  %v771_v48 = vadd.f32 %v587_v39, %v529_v16  ;;  %v274_v52 = vsel %vm255_vm0, %v769_v47, 0.0  ;;  %v799_v62 = vadd.f32 %v595_v40, %v529_v16  ;;  %v298_v0 = vsel %vm255_vm0, %v797_v61, 0.0 }
 0x101   :  { %290 = vadd.xlane.f32.xlu1 %v289_v43  ;;  %281 = vadd.xlane.f32.xlu0 %v280_v44  ;;  %v783_v54 = vadd.f32 %v529_v16, %v209_v45  ;;  %v787_v56 = vadd.f32 %v529_v16, %v241_v46  ;;  %v268_v58 = vsel %vm255_vm0, %v781_v53, 0.0  ;;  %v292_v60 = vsel %vm255_vm0, %v785_v55, 0.0 }
 0x102   :  { %v277_v51 = vsel %vm255_vm0, %v771_v48, 0.0  ;;  %v301_v63 = vsel %vm255_vm0, %v799_v62, 0.0 }
 0x103   :  { %v271_v57 = vsel %vm255_vm0, %v783_v54, 0.0  ;;  %v295_v59 = vsel %vm255_vm0, %v787_v56, 0.0 }
 0x105   :  { %284 = vadd.xlane.f32.xlu1 %v283_v49  ;;  %260 = vadd.xlane.f32.xlu0 %v259_v50 }
 0x109   :  { %278 = vadd.xlane.f32.xlu1 %v277_v51  ;;  %275 = vadd.xlane.f32.xlu0 %v274_v52 }
 0x10d   :  { %272 = vadd.xlane.f32.xlu1 %v271_v57  ;;  %269 = vadd.xlane.f32.xlu0 %v268_v58 }
 0x111   :  { %296 = vadd.xlane.f32.xlu1 %v295_v59  ;;  %293 = vadd.xlane.f32.xlu0 %v292_v60 }
 0x115   :  { %302 = vadd.xlane.f32.xlu1 %v301_v63  ;;  %299 = vadd.xlane.f32.xlu0 %v298_v0 }
 0x186   :  { %v288_v1 = vpop.xlane.xlu0 %287  ;;  %v264_v2 = vpop.xlane.xlu1 %263 }
 0x187   :  { %v315_v3 = vmul.f32 0.03125, %v288_v1  ;;  %v307_v4 = vmul.f32 0.03125, %v264_v2 }
 0x189   :  { %v806_v5 = vsub.f32 %v743_v20, %v315_v3  ;;  %v809_v6 = vsub.f32 %v741_v19, %v307_v4 }
 0x18a   :  { %v267_v7 = vpop.xlane.xlu1 %266  ;;  %v258_v8 = vpop.xlane.xlu0 %257 }
 0x18b   :  { %v308_v9 = vmul.f32 0.03125, %v267_v7  ;;  %v305_v10 = vmul.f32 0.03125, %v258_v8  ;;  %v339_v11 = vmul.f32 %v809_v6, %v809_v6  ;;  %v347_v15 = vmul.f32 %v806_v5, %v806_v5 }
 0x18d   :  { %v814_v12 = vsub.f32 %v747_v26, %v308_v9  ;;  %v817_v13 = vsub.f32 %v745_v25, %v305_v10  ;;  %v359_v14 = vsel %vm255_vm0, %v339_v11, 0.0  ;;  %v383_v25 = vsel %vm255_vm0, %v347_v15, 0.0 }
 0x18e   :  { %v291_v16 = vpop.xlane.xlu1 %290  ;;  %360 = vadd.xlane.f32.xlu0 %v359_v14  ;;  %v282_v17 = vpop.xlane.xlu0 %281 }
 0x18f   :  { %v316_v18 = vmul.f32 0.03125, %v291_v16  ;;  %v313_v19 = vmul.f32 0.03125, %v282_v17  ;;  %v340_v20 = vmul.f32 %v814_v12, %v814_v12  ;;  %v337_v21 = vmul.f32 %v817_v13, %v817_v13 }
 0x191   :  { %v827_v22 = vsub.f32 %v755_v32, %v316_v18  ;;  %v830_v23 = vsub.f32 %v753_v31, %v313_v19  ;;  %v362_v24 = vsel %vm255_vm0, %v340_v20, 0.0  ;;  %v353_v33 = vsel %vm255_vm0, %v337_v21, 0.0 }
 0x192   :  { %v285_v26 = vpop.xlane.xlu1 %284  ;;  %363 = vadd.xlane.f32.xlu1 %v362_v24  ;;  %384 = vadd.xlane.f32.xlu0 %v383_v25  ;;  %v261_v27 = vpop.xlane.xlu0 %260 }
 0x193   :  { %v314_v28 = vmul.f32 0.03125, %v285_v26  ;;  %v306_v29 = vmul.f32 0.03125, %v261_v27  ;;  %v348_v30 = vmul.f32 %v827_v22, %v827_v22  ;;  %v345_v35 = vmul.f32 %v830_v23, %v830_v23 }
 0x195   :  { %v838_v32 = vsub.f32 %v763_v42, %v314_v28  ;;  %v841_v31 = vsub.f32 %v761_v41, %v306_v29  ;;  %v386_v34 = vsel %vm255_vm0, %v348_v30, 0.0  ;;  %v377_v44 = vsel %vm255_vm0, %v345_v35, 0.0 }
 0x196   :  { %v279_v36 = vpop.xlane.xlu1 %278  ;;  %387 = vadd.xlane.f32.xlu1 %v386_v34  ;;  %354 = vadd.xlane.f32.xlu0 %v353_v33  ;;  %v276_v37 = vpop.xlane.xlu0 %275 }
 0x197   :  { %v312_v38 = vmul.f32 0.03125, %v279_v36  ;;  %v311_v39 = vmul.f32 0.03125, %v276_v37  ;;  %v338_v40 = vmul.f32 %v841_v31, %v841_v31  ;;  %v346_v42 = vmul.f32 %v838_v32, %v838_v32 }
 0x199   :  { %v851_v41 = vsub.f32 %v771_v48, %v312_v38  ;;  %v854_v43 = vsub.f32 %v769_v47, %v311_v39  ;;  %v356_v45 = vsel %vm255_vm0, %v338_v40, 0.0  ;;  %v380_v57 = vsel %vm255_vm0, %v346_v42, 0.0 }
 0x19a   :  { %v273_v46 = vpop.xlane.xlu1 %272  ;;  %378 = vadd.xlane.f32.xlu0 %v377_v44  ;;  %357 = vadd.xlane.f32.xlu1 %v356_v45  ;;  %v270_v49 = vpop.xlane.xlu0 %269 }
 0x19b   :  { %v310_v50 = vmul.f32 0.03125, %v273_v46  ;;  %v309_v51 = vmul.f32 0.03125, %v270_v49  ;;  %v343_v52 = vmul.f32 %v854_v43, %v854_v43  ;;  %v344_v59 = vmul.f32 %v851_v41, %v851_v41  ;;  %v904_v49 = vld [vmem:[%s1026_s3] ss:$0 sm:$0xff] }
 0x19d   :  { %v862_v48 = vsub.f32 %v783_v54, %v310_v50  ;;  %v865_v47 = vsub.f32 %v781_v53, %v309_v51  ;;  %v371_v58 = vsel %vm255_vm0, %v343_v52, 0.0  ;;  %v374_v4 = vsel %vm255_vm0, %v344_v59, 0.0  ;;  %v910_v59 = vld [vmem:[%s1027_s4] ss:$0 sm:$0xff] }
 0x19e   :  { %v297_v60 = vpop.xlane.xlu1 %296  ;;  %381 = vadd.xlane.f32.xlu1 %v380_v57  ;;  %372 = vadd.xlane.f32.xlu0 %v371_v58  ;;  %v294_v63 = vpop.xlane.xlu0 %293 }
 0x19f   :  { %v318_v0 = vmul.f32 0.03125, %v297_v60  ;;  %v317_v1 = vmul.f32 0.03125, %v294_v63  ;;  %v341_v2 = vmul.f32 %v865_v47, %v865_v47  ;;  %v342_v54 = vmul.f32 %v862_v48, %v862_v48 }
 0x1a1   :  { %v875_v53 = vsub.f32 %v787_v56, %v318_v0  ;;  %v878_v3 = vsub.f32 %v785_v55, %v317_v1  ;;  %v365_v7 = vsel %vm255_vm0, %v341_v2, 0.0  ;;  %v368_v15 = vsel %vm255_vm0, %v342_v54, 0.0 }
 0x1a2   :  { %v303_v8 = vpop.xlane.xlu1 %302  ;;  %375 = vadd.xlane.f32.xlu1 %v374_v4  ;;  %366 = vadd.xlane.f32.xlu0 %v365_v7  ;;  %v300_v9 = vpop.xlane.xlu0 %299 }
 0x1a3   :  { %v320_v10 = vmul.f32 0.03125, %v303_v8  ;;  %v319_v11 = vmul.f32 0.03125, %v300_v9  ;;  %v349_v14 = vmul.f32 %v878_v3, %v878_v3  ;;  %v350_v17 = vmul.f32 %v875_v53, %v875_v53 }
 0x1a5   :  { %v886_v56 = vsub.f32 %v799_v62, %v320_v10  ;;  %v889_v55 = vsub.f32 %v797_v61, %v319_v11  ;;  %v389_v16 = vsel %vm255_vm0, %v349_v14, 0.0  ;;  %v392_v19 = vsel %vm255_vm0, %v350_v17, 0.0 }
 0x1a6   :  { %369 = vadd.xlane.f32.xlu1 %v368_v15  ;;  %390 = vadd.xlane.f32.xlu0 %v389_v16 }
 0x1a7   :  { %v351_v18 = vmul.f32 %v889_v55, %v889_v55  ;;  %v352_v62 = vmul.f32 %v886_v56, %v886_v56 }
 0x1a9   :  { %v395_v20 = vsel %vm255_vm0, %v351_v18, 0.0  ;;  %v398_v61 = vsel %vm255_vm0, %v352_v62, 0.0 }
 0x1aa   :  { %393 = vadd.xlane.f32.xlu1 %v392_v19  ;;  %396 = vadd.xlane.f32.xlu0 %v395_v20 }
 0x1ae   :  { %399 = vadd.xlane.f32.xlu1 %v398_v61 }
 0x21b   :  { %v361_v21 = vpop.xlane.xlu0 %360 }
 0x21c   :  { %v403_v24 = vmul.f32 0.03125, %v361_v21 }
 0x21e   :  { %v419_v25 = vadd.f32 1e-05, %v403_v24 }
 0x21f   :  { %v364_v26 = vpop.xlane.xlu1 %363  ;;  %v385_v27 = vpop.xlane.xlu0 %384 }
 0x220   :  { %628 = vrsqrt.f32 %v419_v25  ;;  %v404_v28 = vmul.f32 0.03125, %v364_v26  ;;  %v411_v29 = vmul.f32 0.03125, %v385_v27 }
 0x222   :  { %v420_v30 = vadd.f32 1e-05, %v404_v28  ;;  %v427_v33 = vadd.f32 1e-05, %v411_v29 }
 0x223   :  { %v388_v34 = vpop.xlane.xlu1 %387  ;;  %v355_v35 = vpop.xlane.xlu0 %354 }
 0x224   :  { %630 = vrsqrt.f32 %v420_v30  ;;  %v412_v36 = vmul.f32 0.03125, %v388_v34  ;;  %v401_v37 = vmul.f32 0.03125, %v355_v35 }
 0x225   :  { %632 = vrsqrt.f32 %v427_v33 }
 0x226   :  { %v428_v38 = vadd.f32 1e-05, %v412_v36  ;;  %v417_v39 = vadd.f32 1e-05, %v401_v37 }
 0x227   :  { %v358_v40 = vpop.xlane.xlu1 %357  ;;  %v379_v42 = vpop.xlane.xlu0 %378 }
 0x228   :  { %634 = vrsqrt.f32 %v428_v38  ;;  %v402_v44 = vmul.f32 0.03125, %v358_v40  ;;  %v409_v45 = vmul.f32 0.03125, %v379_v42 }
 0x229   :  { %636 = vrsqrt.f32 %v417_v39 }
 0x22a   :  { %v629_v46 = vpop.eup %628  ;;  %v418_v50 = vadd.f32 1e-05, %v402_v44  ;;  %v425_v51 = vadd.f32 1e-05, %v409_v45 }
 0x22b   :  { %v451_v52 = vmul.f32 %v629_v46, %v809_v6  ;;  %v382_v57 = vpop.xlane.xlu1 %381  ;;  %v373_v58 = vpop.xlane.xlu0 %372 }
 0x22c   :  { %638 = vrsqrt.f32 %v418_v50  ;;  %v410_v60 = vmul.f32 0.03125, %v382_v57  ;;  %v407_v63 = vmul.f32 0.03125, %v373_v58 }
 0x22d   :  { %v473_v0 = vmul.f32 %v904_v49, %v451_v52  ;;  %640 = vrsqrt.f32 %v425_v51 }
 0x22e   :  { %v631_v1 = vpop.eup %630  ;;  %v426_v2 = vadd.f32 1e-05, %v410_v60  ;;  %v423_v54 = vadd.f32 1e-05, %v407_v63 }
 0x22f   :  { %v633_v4 = vpop.eup %632  ;;  %v495_v7 = vadd.f32 %v910_v59, %v473_v0  ;;  %v452_v6 = vmul.f32 %v631_v1, %v814_v12  ;;  %v376_v8 = vpop.xlane.xlu1 %375 }
 0x230   :  { %v367_v9 = vpop.xlane.xlu0 %366  ;;  %v459_v10 = vmul.f32 %v633_v4, %v806_v5  ;;  %642 = vrsqrt.f32 %v426_v2  ;;  %v408_v11 = vmul.f32 0.03125, %v376_v8 }
 0x231   :  { %v405_v14 = vmul.f32 0.03125, %v367_v9  ;;  %511 = vst.msk [vmem:[%s1028_s5 + $0x10] sm:$0xff] %vm255_vm0, %v495_v7  ;;  %v474_v15 = vmul.f32 %v904_v49, %v452_v6  ;;  %644 = vrsqrt.f32 %v423_v54 }
 0x232   :  { %v635_v16 = vpop.eup %634  ;;  %v481_v17 = vmul.f32 %v904_v49, %v459_v10  ;;  %v424_v18 = vadd.f32 1e-05, %v408_v11 }
 0x233   :  { %v421_v12 = vadd.f32 1e-05, %v405_v14  ;;  %v637_v19 = vpop.eup %636  ;;  %v496_v20 = vadd.f32 %v910_v59, %v474_v15  ;;  %v460_v5 = vmul.f32 %v635_v16, %v827_v22  ;;  %v370_v62 = vpop.xlane.xlu1 %369 }
 0x234   :  { %v391_v61 = vpop.xlane.xlu0 %390  ;;  %v503_v21 = vadd.f32 %v910_v59, %v481_v17  ;;  %v449_v24 = vmul.f32 %v637_v19, %v817_v13  ;;  %646 = vrsqrt.f32 %v424_v18  ;;  %v406_v25 = vmul.f32 0.03125, %v370_v62 }
 0x235   :  { %512 = vst.msk [vmem:[%s1028_s5 + $0x18] sm:$0xff] %vm255_vm0, %v496_v20  ;;  %v482_v26 = vmul.f32 %v904_v49, %v460_v5  ;;  %648 = vrsqrt.f32 %v421_v12  ;;  %v413_v27 = vmul.f32 0.03125, %v391_v61 }
 0x236   :  { %v639_v28 = vpop.eup %638  ;;  %519 = vst.msk [vmem:[%s1028_s5 + $0x50] sm:$0xff] %vm255_vm0, %v503_v21  ;;  %v471_v22 = vmul.f32 %v904_v49, %v449_v24  ;;  %v422_v13 = vadd.f32 1e-05, %v406_v25 }
 0x237   :  { %v641_v29 = vpop.eup %640  ;;  %v504_v30 = vadd.f32 %v910_v59, %v482_v26  ;;  %v450_v33 = vmul.f32 %v639_v28, %v841_v31  ;;  %v429_v34 = vadd.f32 1e-05, %v413_v27  ;;  %v394_v35 = vpop.xlane.xlu1 %393 }
 0x238   :  { %v397_v36 = vpop.xlane.xlu0 %396  ;;  %v493_v37 = vadd.f32 %v910_v59, %v471_v22  ;;  %v457_v38 = vmul.f32 %v641_v29, %v830_v23  ;;  %650 = vrsqrt.f32 %v422_v13  ;;  %v414_v39 = vmul.f32 0.03125, %v394_v35 }
 0x239   :  { %520 = vst.msk [vmem:[%s1028_s5 + $0x58] sm:$0xff] %vm255_vm0, %v504_v30  ;;  %v472_v40 = vmul.f32 %v904_v49, %v450_v33  ;;  %652 = vrsqrt.f32 %v429_v34  ;;  %v415_v42 = vmul.f32 0.03125, %v397_v36 }
 0x23a   :  { %v643_v44 = vpop.eup %642  ;;  %509 = vst.msk [vmem:[%s1028_s5] sm:$0xff] %vm255_vm0, %v493_v37  ;;  %v479_v31 = vmul.f32 %v904_v49, %v457_v38  ;;  %v430_v23 = vadd.f32 1e-05, %v414_v39 }
 0x23b   :  { %v645_v45 = vpop.eup %644  ;;  %v494_v46 = vadd.f32 %v910_v59, %v472_v40  ;;  %v458_v50 = vmul.f32 %v643_v44, %v838_v32  ;;  %v431_v51 = vadd.f32 1e-05, %v415_v42  ;;  %v400_v52 = vpop.xlane.xlu1 %399 }
 0x23c   :  { %v501_v57 = vadd.f32 %v910_v59, %v479_v31  ;;  %v455_v58 = vmul.f32 %v645_v45, %v854_v43  ;;  %654 = vrsqrt.f32 %v430_v23  ;;  %v416_v60 = vmul.f32 0.03125, %v400_v52 }
 0x23d   :  { %510 = vst.msk [vmem:[%s1028_s5 + $0x8] sm:$0xff] %vm255_vm0, %v494_v46  ;;  %v480_v63 = vmul.f32 %v904_v49, %v458_v50  ;;  %656 = vrsqrt.f32 %v431_v51 }
 0x23e   :  { %v647_v0 = vpop.eup %646  ;;  %517 = vst.msk [vmem:[%s1028_s5 + $0x40] sm:$0xff] %vm255_vm0, %v501_v57  ;;  %v477_v32 = vmul.f32 %v904_v49, %v455_v58  ;;  %v432_v1 = vadd.f32 1e-05, %v416_v60 }
 0x23f   :  { %v649_v43 = vpop.eup %648  ;;  %v502_v2 = vadd.f32 %v910_v59, %v480_v63  ;;  %v456_v54 = vmul.f32 %v647_v0, %v851_v41 }
 0x240   :  { %v499_v4 = vadd.f32 %v910_v59, %v477_v32  ;;  %v453_v7 = vmul.f32 %v649_v43, %v865_v47  ;;  %658 = vrsqrt.f32 %v432_v1 }
 0x241   :  { %518 = vst.msk [vmem:[%s1028_s5 + $0x48] sm:$0xff] %vm255_vm0, %v502_v2  ;;  %v478_v6 = vmul.f32 %v904_v49, %v456_v54 }
 0x242   :  { %v651_v8 = vpop.eup %650  ;;  %515 = vst.msk [vmem:[%s1028_s5 + $0x30] sm:$0xff] %vm255_vm0, %v499_v4  ;;  %v475_v41 = vmul.f32 %v904_v49, %v453_v7 }
 0x243   :  { %v653_v9 = vpop.eup %652  ;;  %v500_v10 = vadd.f32 %v910_v59, %v478_v6  ;;  %v454_v47 = vmul.f32 %v651_v8, %v862_v48 }
 0x244   :  { %v497_v11 = vadd.f32 %v910_v59, %v475_v41  ;;  %v461_v14 = vmul.f32 %v653_v9, %v878_v3 }
 0x245   :  { %516 = vst.msk [vmem:[%s1028_s5 + $0x38] sm:$0xff] %vm255_vm0, %v500_v10  ;;  %v476_v15 = vmul.f32 %v904_v49, %v454_v47 }
 0x246   :  { %v655_v16 = vpop.eup %654  ;;  %513 = vst.msk [vmem:[%s1028_s5 + $0x20] sm:$0xff] %vm255_vm0, %v497_v11  ;;  %v483_v17 = vmul.f32 %v904_v49, %v461_v14 }
 0x247   :  { %v657_v48 = vpop.eup %656  ;;  %v498_v18 = vadd.f32 %v910_v59, %v476_v15  ;;  %v462_v3 = vmul.f32 %v655_v16, %v875_v53 }
 0x248   :  { %v505_v12 = vadd.f32 %v910_v59, %v483_v17  ;;  %v463_v19 = vmul.f32 %v657_v48, %v889_v55 }
 0x249   :  { %514 = vst.msk [vmem:[%s1028_s5 + $0x28] sm:$0xff] %vm255_vm0, %v498_v18  ;;  %v484_v20 = vmul.f32 %v904_v49, %v462_v3 }
 0x24a   :  { %v659_v5 = vpop.eup %658  ;;  %521 = vst.msk [vmem:[%s1028_s5 + $0x60] sm:$0xff] %vm255_vm0, %v505_v12  ;;  %v485_v62 = vmul.f32 %v904_v49, %v463_v19 }
 0x24b   :  { %v506_v53 = vadd.f32 %v910_v59, %v484_v20  ;;  %v464_v61 = vmul.f32 %v659_v5, %v886_v56 }
 0x24c   :  { %v507_v55 = vadd.f32 %v910_v59, %v485_v62 }
 0x24d   :  { %522 = vst.msk [vmem:[%s1028_s5 + $0x68] sm:$0xff] %vm255_vm0, %v506_v53  ;;  %v486_v21 = vmul.f32 %v904_v49, %v464_v61 }
 0x24e   :  { %523 = vst.msk [vmem:[%s1028_s5 + $0x70] sm:$0xff] %vm255_vm0, %v507_v55 }
 0x24f   :  { %v508_v24 = vadd.f32 %v910_v59, %v486_v21 }
 0x251   :  { %524 = vst.msk [vmem:[%s1028_s5 + $0x78] sm:$0xff] %vm255_vm0, %v508_v24 }

// kernel: _lambda_.7
= control target key start
LH: loop header
LB: loop body
LE: loop exit
PB: predicated region body
PF: predicated region fallthrough
CT: control target
= control target key end

     0   :  { %s1618_s12 = smov 0   ;;  %s1844_s0 = inlined_call_operand.vmem [shape: bf16[2,288,12], index: 0, kind: input, shape index: {}]   ;;  %s1845_s1 = inlined_call_operand.vmem [shape: bf16[3,12,32], index: 1, kind: input, shape index: {}]   ;;  %s1846_s2 = inlined_call_operand.vmem [shape: f32[1,32], index: 2, kind: input, shape index: {}]   ;;  %s1847_s3 = inlined_call_operand.vmem [shape: bf16[2,256,32], index: 3, kind: output, shape index: {}]  }
   0x1 LB: > { %s1188_s13 = sadd.s32 4294967295, %s1596_s12   ;;  %p1192_p0 = scmp.ge.s32.totalorder %s1596_s12, 1  ;;  %s1596_s12 = sphi %s1618_s12, %s13_s12  }
   0x2   : > { %p137_p1 = scmp.lt.s32.totalorder %s1596_s12, 3 }
   0x4   : > { %p138_p2 = pnand %p1192_p0, %p137_p1 }
   0x5   : > { %v1569_v0 = vld [vmem:[%s1845_s1 + $0x8] sm:$0x3f] (!%p138_p2)   ;;  %vm347_vm0 = vcmask (!%p138_p2), 1045504   ;;  %p161_p3 = scmp.lt.s32.totalorder (!%p138_p2), %s1188_s13, 1  ;;  %v1570_v1 = vld [vmem:[%s1845_s1] sm:$0x3f] (!%p138_p2)  }
   0x6   : > { %141 = sbr.rel (%p138_p2) target bundleno = 331 (0x14b), region = 32  ;;  %1556 = vmatprep.subr.msk.bf16.mxu1 (!%p138_p2), %vm347_vm0, %v1569_v0  ;;  %v349_v2 = vsel (!%p138_p2), %vm347_vm0, %v1569_v0, 0  ;;  %v1573_v3 = vld [vmem:[%s1845_s1 + $0x10] sm:$0x3f] (!%p138_p2)   ;;  %1557 = vmatprep.subr.msk.bf16.mxu0 (!%p138_p2), %vm347_vm0, %v1570_v1  ;;  %v526_v4 = vsel (!%p138_p2), %vm347_vm0, %v1570_v1, 0  ;;  %vm298_vm1 = vcmask (!%p138_p2), 97280  }
   0x7   : > { %1389 = vmatpush3.bf16.msra.mxu1 (!%p138_p2), %v349_v2  ;;  %1423 = vmatpush3.bf16.msra.mxu0 (!%p138_p2), %v526_v4  ;;  %v706_v8 = vsel (!%p138_p2), %vm347_vm0, %v1573_v3, 0  ;;  %v1731_v41 = vld [vmem:[%s1846_s2] ss:$0 sm:$0xff] (!%p138_p2)  ;;  %vm1100_vm2 = vcmask (!%p138_p2), 257024  }
   0x8   : > { %1558 = vmatprep.subr.msk.bf16.mxu1 (!%p138_p2), %vm347_vm0, %v1570_v1  ;;  %1559 = vmatprep.subr.msk.bf16.mxu0 (!%p138_p2), %vm347_vm0, %v1573_v3 }
   0xd   : > { %s1849_s13 = smov (!%p161_p3, %s1188_s13), 1 }
   0xe   : > { %s1560_s20 = smul.u32 144, %s1849_s13  ;;  %s1304_s26 = sshll.u32 %s1849_s13, 7 }
   0xf   : > { %s1740_s29 = scalar_lea.vmem %s1847_s3, %s1304_s26 }
  0x10   : > { %s1647_s23 = scalar_lea.vmem %s1844_s0, %s1560_s20 }
  0x11   : > { %v1571_v5 = vld [vmem:[%s1647_s23 + $0x8] sm:$0xff]   ;;  %v1572_v6 = vld [vmem:[%s1647_s23] sm:$0xff]   ;;  %v1574_v7 = vld [vmem:[%s1647_s23 + $0x10] sm:$0xff]  }
  0x12   : > { %1390 = vmatprep.mubr.msk.bf16.mxu1 %vm298_vm1, %v1571_v5  ;;  %1424 = vmatprep.mubr.msk.bf16.mxu0 %vm298_vm1, %v1572_v6  ;;  %v1575_v9 = vld [vmem:[%s1647_s23 + $0x18] sm:$0xff]   ;;  %v1576_v10 = vld [vmem:[%s1647_s23 + $0x20] sm:$0xff]   ;;  %v1577_v11 = vld [vmem:[%s1647_s23 + $0x28] sm:$0xff]  }
  0x13   : > { %1391 = vmatmul.mubr.msk.bf16.vlgmr.msra.gmra.mrb[0].mxu1 %vm298_vm1, %v1574_v7  ;;  %1425 = vmatmul.mubr.msk.bf16.vlgmr.msra.gmra.mrb[0].mxu0 %vm298_vm1, %v1571_v5  ;;  %v1578_v12 = vld [vmem:[%s1647_s23 + $0x30] sm:$0xff]   ;;  %v1579_v13 = vld [vmem:[%s1647_s23 + $0x38] sm:$0xff]   ;;  %v1580_v14 = vld [vmem:[%s1647_s23 + $0x40] sm:$0xff]  }
  0x14   : > { %1491 = vmatpush3.bf16.msra.mxu1 %v526_v4  ;;  %1457 = vmatpush3.bf16.msra.mxu0 %v706_v8  ;;  %v1581_v15 = vld [vmem:[%s1647_s23 + $0x48] sm:$0xff]   ;;  %v1582_v16 = vld [vmem:[%s1647_s23 + $0x50] sm:$0xff]   ;;  %v1583_v17 = vld [vmem:[%s1647_s23 + $0x58] sm:$0xff]  }
  0x15   : > { %1394 = vmatprep.mubr.msk.bf16.mxu1 %vm298_vm1, %v1575_v9  ;;  %1428 = vmatprep.mubr.msk.bf16.mxu0 %vm298_vm1, %v1574_v7  ;;  %v1584_v18 = vld [vmem:[%s1647_s23 + $0x60] sm:$0xff]   ;;  %v1585_v19 = vld [vmem:[%s1647_s23 + $0x68] sm:$0xff]   ;;  %v1586_v20 = vld [vmem:[%s1647_s23 + $0x70] sm:$0xff]  }
  0x16   : > { %v1587_v21 = vld [vmem:[%s1647_s23 + $0x78] sm:$0xff]   ;;  %v1588_v22 = vld [vmem:[%s1647_s23 + $0x80] sm:$0xff]   ;;  %v1589_v23 = vld [vmem:[%s1647_s23 + $0x88] sm:$0xff]  }
  0x1b   : > { %1395 = vmatmul.mubr.msk.bf16.gmra.mrb[4].mxu1 %vm298_vm1, %v1576_v10  ;;  %1429 = vmatmul.mubr.msk.bf16.gmra.mrb[4].mxu0 %vm298_vm1, %v1575_v9 }
  0x1c   : > { %1398 = vmatprep.mubr.msk.bf16.mxu1 %vm298_vm1, %v1577_v11  ;;  %1432 = vmatprep.mubr.msk.bf16.mxu0 %vm298_vm1, %v1576_v10 }
  0x23   : > { %1399 = vmatmul.mubr.msk.bf16.gmra.mrb[8].mxu1 %vm298_vm1, %v1578_v12  ;;  %1433 = vmatmul.mubr.msk.bf16.gmra.mrb[8].mxu0 %vm298_vm1, %v1577_v11 }
  0x24   : > { %1402 = vmatprep.mubr.msk.bf16.mxu1 %vm298_vm1, %v1579_v13  ;;  %1436 = vmatprep.mubr.msk.bf16.mxu0 %vm298_vm1, %v1578_v12 }
  0x2b   : > { %1403 = vmatmul.mubr.msk.bf16.gmra.mrb[12].mxu1 %vm298_vm1, %v1580_v14  ;;  %1437 = vmatmul.mubr.msk.bf16.gmra.mrb[12].mxu0 %vm298_vm1, %v1579_v13 }
  0x2c   : > { %1406 = vmatprep.mubr.msk.bf16.mxu1 %vm298_vm1, %v1581_v15  ;;  %1458 = vmatprep.mubr.msk.bf16.mxu0 %vm298_vm1, %v1574_v7 }
  0x33   : > { %1407 = vmatmul.mubr.msk.bf16.gmra.mrb[16].mxu1 %vm298_vm1, %v1582_v16  ;;  %1459 = vmatmul.mubr.msk.bf16.vlgmr.msra.gmra.mrb[0].mxu0 %vm298_vm1, %v1575_v9 }
  0x34   : > { %1410 = vmatprep.mubr.msk.bf16.mxu1 %vm298_vm1, %v1583_v17  ;;  %1462 = vmatprep.mubr.msk.bf16.mxu0 %vm298_vm1, %v1576_v10 }
  0x3b   : > { %1411 = vmatmul.mubr.msk.bf16.gmra.mrb[20].mxu1 %vm298_vm1, %v1584_v18  ;;  %1463 = vmatmul.mubr.msk.bf16.gmra.mrb[4].mxu0 %vm298_vm1, %v1577_v11 }
  0x3c   : > { %1414 = vmatprep.mubr.msk.bf16.mxu1 %vm298_vm1, %v1585_v19  ;;  %1466 = vmatprep.mubr.msk.bf16.mxu0 %vm298_vm1, %v1578_v12 }
  0x43   : > { %1415 = vmatmul.mubr.msk.bf16.gmra.mrb[24].mxu1 %vm298_vm1, %v1586_v20  ;;  %1467 = vmatmul.mubr.msk.bf16.gmra.mrb[8].mxu0 %vm298_vm1, %v1579_v13 }
  0x44   : > { %1418 = vmatprep.mubr.msk.bf16.mxu1 %vm298_vm1, %v1587_v21  ;;  %1470 = vmatprep.mubr.msk.bf16.mxu0 %vm298_vm1, %v1580_v14 }
  0x4b   : > { %1419 = vmatmul.mubr.msk.bf16.gmra.mrb[28].mxu1 %vm298_vm1, %v1588_v22  ;;  %1471 = vmatmul.mubr.msk.bf16.gmra.mrb[12].mxu0 %vm298_vm1, %v1581_v15 }
  0x4c   : > { %1440 = vmatprep.mubr.msk.bf16.mxu1 %vm298_vm1, %v1580_v14  ;;  %1474 = vmatprep.mubr.msk.bf16.mxu0 %vm298_vm1, %v1582_v16 }
  0x53   : > { %1441 = vmatmul.mubr.msk.bf16.vlgmr.msra.gmra.mrb[16].mxu1 %vm298_vm1, %v1581_v15  ;;  %1475 = vmatmul.mubr.msk.bf16.gmra.mrb[16].mxu0 %vm298_vm1, %v1583_v17 }
  0x54   : > { %1444 = vmatprep.mubr.msk.bf16.mxu1 %vm298_vm1, %v1582_v16  ;;  %1478 = vmatprep.mubr.msk.bf16.mxu0 %vm298_vm1, %v1584_v18 }
  0x5b   : > { %1445 = vmatmul.mubr.msk.bf16.gmra.mrb[20].mxu1 %vm298_vm1, %v1583_v17  ;;  %1479 = vmatmul.mubr.msk.bf16.gmra.mrb[20].mxu0 %vm298_vm1, %v1585_v19 }
  0x5c   : > { %1448 = vmatprep.mubr.msk.bf16.mxu1 %vm298_vm1, %v1584_v18  ;;  %1482 = vmatprep.mubr.msk.bf16.mxu0 %vm298_vm1, %v1586_v20 }
  0x63   : > { %1449 = vmatmul.mubr.msk.bf16.gmra.mrb[24].mxu1 %vm298_vm1, %v1585_v19  ;;  %1483 = vmatmul.mubr.msk.bf16.gmra.mrb[24].mxu0 %vm298_vm1, %v1587_v21 }
  0x64   : > { %1452 = vmatprep.mubr.msk.bf16.mxu1 %vm298_vm1, %v1586_v20  ;;  %1486 = vmatprep.mubr.msk.bf16.mxu0 %vm298_vm1, %v1588_v22 }
  0x6b   : > { %1453 = vmatmul.mubr.msk.bf16.gmra.mrb[28].mxu1 %vm298_vm1, %v1587_v21  ;;  %1487 = vmatmul.mubr.msk.bf16.gmra.mrb[28].mxu0 %vm298_vm1, %v1589_v23 }
  0xe6   : > { %v1392_v24 = vpop.f32.mrb[0].mxu1 }
  0xe7   : > { %v385_v25 = vpop.f32.mrb[1].mxu1 }
  0xe8   : > { %v1393_v26 = vpop.f32.mrb[2].mxu1 }
  0xe9   : > { %v388_v27 = vpop.f32.mrb[3].mxu1 }
  0xee   : > { %v1396_v28 = vpop.f32.mrb[4].mxu1 }
  0xef   : > { %v401_v29 = vpop.f32.mrb[5].mxu1 }
  0xf0   : > { %v1397_v30 = vpop.f32.mrb[6].mxu1 }
  0xf1   : > { %v404_v31 = vpop.f32.mrb[7].mxu1 }
  0xf6   : > { %v1400_v32 = vpop.f32.mrb[8].mxu1 }
  0xf7   : > { %v417_v33 = vpop.f32.mrb[9].mxu1 }
  0xf8   : > { %v1716_v34 = vpop.f32.mrb[10].mxu1 }
  0xf9   : > { %v1718_v35 = vpop.f32.mrb[11].mxu1 }
  0xfe   : > { %v1720_v36 = vpop.f32.mrb[12].mxu1 }
  0xff   : > { %v1722_v37 = vpop.f32.mrb[13].mxu1 }
 0x100   : > { %v1724_v38 = vpop.f32.mrb[14].mxu1 }
 0x101   : > { %v1726_v39 = vpop.f32.mrb[15].mxu1 }
 0x106   : > { %v1460_v40 = vpop.f32.mrb[0].mxu0 }
 0x107   : > { %v1492_v42 = vadd.f32 %v1460_v40, %v1392_v24  ;;  %v742_v43 = vpop.f32.mrb[1].mxu0 }
 0x108   : > { %v1493_v44 = vadd.f32 %v742_v43, %v385_v25  ;;  %v1461_v45 = vpop.f32.mrb[2].mxu0 }
 0x109   : > { %v910_v46 = vadd.f32 %v1492_v42, %v1731_v41  ;;  %v1494_v47 = vadd.f32 %v1461_v45, %v1393_v26  ;;  %v745_v48 = vpop.f32.mrb[3].mxu0 }
 0x10a   : > { %v908_v49 = vadd.f32 %v1493_v44, %v1731_v41  ;;  %v1495_v50 = vadd.f32 %v745_v48, %v388_v27 }
 0x10b   : > { %v942_v51 = vmax.f32 %v910_v46, 0.0  ;;  %v911_v52 = vadd.f32 %v1494_v47, %v1731_v41 }
 0x10c   : > { %v940_v53 = vmax.f32 %v908_v49, 0.0  ;;  %v909_v54 = vadd.f32 %v1495_v50, %v1731_v41 }
 0x10d   : > { %v1307_v55 = vpack.c.bf16 %v942_v51, %v942_v51  ;;  %v943_v56 = vmax.f32 %v911_v52, 0.0 }
 0x10e   : > { %v1305_v57 = vpack.c.bf16 %v940_v53, %v940_v53  ;;  %v941_v58 = vmax.f32 %v909_v54, 0.0  ;;  %v1464_v59 = vpop.f32.mrb[4].mxu0 }
 0x10f   : > { %1103 = vst.msk [vmem:[%s1740_s29 + $0x8] sm:$0xf] %vm1100_vm2, %v1307_v55  ;;  %v1308_v60 = vpack.c.bf16 %v943_v56, %v943_v56  ;;  %v1496_v61 = vadd.f32 %v1464_v59, %v1396_v28  ;;  %v758_v62 = vpop.f32.mrb[5].mxu0 }
 0x110   : > { %1101 = vst.msk [vmem:[%s1740_s29] sm:$0xf] %vm1100_vm2, %v1305_v57  ;;  %v1306_v63 = vpack.c.bf16 %v941_v58, %v941_v58  ;;  %v1497_v0 = vadd.f32 %v758_v62, %v401_v29  ;;  %v1465_v1 = vpop.f32.mrb[6].mxu0 }
 0x111   : > { %1104 = vst.msk [vmem:[%s1740_s29 + $0xc] sm:$0xf] %vm1100_vm2, %v1308_v60  ;;  %v914_v2 = vadd.f32 %v1496_v61, %v1731_v41  ;;  %v1498_v3 = vadd.f32 %v1465_v1, %v1397_v30  ;;  %v761_v4 = vpop.f32.mrb[7].mxu0 }
 0x112   : > { %1102 = vst.msk [vmem:[%s1740_s29 + $0x4] sm:$0xf] %vm1100_vm2, %v1306_v63  ;;  %v912_v5 = vadd.f32 %v1497_v0, %v1731_v41  ;;  %v1499_v6 = vadd.f32 %v761_v4, %v404_v31 }
 0x113   : > { %v946_v7 = vmax.f32 %v914_v2, 0.0  ;;  %v915_v8 = vadd.f32 %v1498_v3, %v1731_v41 }
 0x114   : > { %v944_v9 = vmax.f32 %v912_v5, 0.0  ;;  %v913_v10 = vadd.f32 %v1499_v6, %v1731_v41 }
 0x115   : > { %v1311_v11 = vpack.c.bf16 %v946_v7, %v946_v7  ;;  %v947_v12 = vmax.f32 %v915_v8, 0.0 }
 0x116   : > { %v1309_v13 = vpack.c.bf16 %v944_v9, %v944_v9  ;;  %v945_v14 = vmax.f32 %v913_v10, 0.0  ;;  %v1468_v15 = vpop.f32.mrb[8].mxu0 }
 0x117   : > { %1107 = vst.msk [vmem:[%s1740_s29 + $0x18] sm:$0xf] %vm1100_vm2, %v1311_v11  ;;  %v1312_v16 = vpack.c.bf16 %v947_v12, %v947_v12  ;;  %v1500_v17 = vadd.f32 %v1468_v15, %v1400_v32  ;;  %v774_v18 = vpop.f32.mrb[9].mxu0 }
 0x118   : > { %1105 = vst.msk [vmem:[%s1740_s29 + $0x10] sm:$0xf] %vm1100_vm2, %v1309_v13  ;;  %v1310_v19 = vpack.c.bf16 %v945_v14, %v945_v14  ;;  %v1501_v20 = vadd.f32 %v774_v18, %v417_v33  ;;  %v1469_v21 = vpop.f32.mrb[10].mxu0 }
 0x119   : > { %1108 = vst.msk [vmem:[%s1740_s29 + $0x1c] sm:$0xf] %vm1100_vm2, %v1312_v16  ;;  %v918_v22 = vadd.f32 %v1500_v17, %v1731_v41  ;;  %v1502_v23 = vadd.f32 %v1469_v21, %v1716_v34  ;;  %v777_v24 = vpop.f32.mrb[11].mxu0 }
 0x11a   : > { %1106 = vst.msk [vmem:[%s1740_s29 + $0x14] sm:$0xf] %vm1100_vm2, %v1310_v19  ;;  %v916_v25 = vadd.f32 %v1501_v20, %v1731_v41  ;;  %v1503_v26 = vadd.f32 %v777_v24, %v1718_v35 }
 0x11b   : > { %v950_v27 = vmax.f32 %v918_v22, 0.0  ;;  %v919_v28 = vadd.f32 %v1502_v23, %v1731_v41 }
 0x11c   : > { %v948_v29 = vmax.f32 %v916_v25, 0.0  ;;  %v917_v30 = vadd.f32 %v1503_v26, %v1731_v41 }
 0x11d   : > { %v1315_v31 = vpack.c.bf16 %v950_v27, %v950_v27  ;;  %v951_v32 = vmax.f32 %v919_v28, 0.0 }
 0x11e   : > { %v1313_v33 = vpack.c.bf16 %v948_v29, %v948_v29  ;;  %v949_v34 = vmax.f32 %v917_v30, 0.0  ;;  %v1472_v40 = vpop.f32.mrb[12].mxu0 }
 0x11f   : > { %1111 = vst.msk [vmem:[%s1740_s29 + $0x28] sm:$0xf] %vm1100_vm2, %v1315_v31  ;;  %v1316_v42 = vpack.c.bf16 %v951_v32, %v951_v32  ;;  %v1504_v43 = vadd.f32 %v1472_v40, %v1720_v36  ;;  %v790_v44 = vpop.f32.mrb[13].mxu0 }
 0x120   : > { %1109 = vst.msk [vmem:[%s1740_s29 + $0x20] sm:$0xf] %vm1100_vm2, %v1313_v33  ;;  %v1314_v35 = vpack.c.bf16 %v949_v34, %v949_v34  ;;  %v1505_v45 = vadd.f32 %v790_v44, %v1722_v37  ;;  %v1473_v46 = vpop.f32.mrb[14].mxu0 }
 0x121   : > { %1112 = vst.msk [vmem:[%s1740_s29 + $0x2c] sm:$0xf] %vm1100_vm2, %v1316_v42  ;;  %v922_v47 = vadd.f32 %v1504_v43, %v1731_v41  ;;  %v1506_v48 = vadd.f32 %v1473_v46, %v1724_v38  ;;  %v793_v49 = vpop.f32.mrb[15].mxu0 }
 0x122   : > { %1110 = vst.msk [vmem:[%s1740_s29 + $0x24] sm:$0xf] %vm1100_vm2, %v1314_v35  ;;  %v920_v50 = vadd.f32 %v1505_v45, %v1731_v41  ;;  %v1507_v36 = vadd.f32 %v793_v49, %v1726_v39 }
 0x123   : > { %v954_v51 = vmax.f32 %v922_v47, 0.0  ;;  %v923_v52 = vadd.f32 %v1506_v48, %v1731_v41 }
 0x124   : > { %v952_v37 = vmax.f32 %v920_v50, 0.0  ;;  %v921_v53 = vadd.f32 %v1507_v36, %v1731_v41 }
 0x125   : > { %v1319_v54 = vpack.c.bf16 %v954_v51, %v954_v51  ;;  %v955_v55 = vmax.f32 %v923_v52, 0.0 }
 0x126   : > { %v1317_v56 = vpack.c.bf16 %v952_v37, %v952_v37  ;;  %v953_v57 = vmax.f32 %v921_v53, 0.0  ;;  %v1442_v38 = vpop.f32.mrb[16].mxu1  ;;  %v1476_v58 = vpop.f32.mrb[16].mxu0 }
 0x127   : > { %1115 = vst.msk [vmem:[%s1740_s29 + $0x38] sm:$0xf] %vm1100_vm2, %v1319_v54  ;;  %v1320_v59 = vpack.c.bf16 %v955_v55, %v955_v55  ;;  %v1508_v60 = vadd.f32 %v1476_v58, %v1442_v38  ;;  %v626_v39 = vpop.f32.mrb[17].mxu1  ;;  %v806_v61 = vpop.f32.mrb[17].mxu0 }
 0x128   : > { %1113 = vst.msk [vmem:[%s1740_s29 + $0x30] sm:$0xf] %vm1100_vm2, %v1317_v56  ;;  %v1318_v62 = vpack.c.bf16 %v953_v57, %v953_v57  ;;  %v1509_v63 = vadd.f32 %v806_v61, %v626_v39  ;;  %v1443_v0 = vpop.f32.mrb[18].mxu1  ;;  %v1477_v1 = vpop.f32.mrb[18].mxu0 }
 0x129   : > { %1116 = vst.msk [vmem:[%s1740_s29 + $0x3c] sm:$0xf] %vm1100_vm2, %v1320_v59  ;;  %v926_v2 = vadd.f32 %v1508_v60, %v1731_v41  ;;  %v1510_v3 = vadd.f32 %v1477_v1, %v1443_v0  ;;  %v629_v4 = vpop.f32.mrb[19].mxu1  ;;  %v809_v5 = vpop.f32.mrb[19].mxu0 }
 0x12a   : > { %1114 = vst.msk [vmem:[%s1740_s29 + $0x34] sm:$0xf] %vm1100_vm2, %v1318_v62  ;;  %v924_v6 = vadd.f32 %v1509_v63, %v1731_v41  ;;  %v1511_v7 = vadd.f32 %v809_v5, %v629_v4 }
 0x12b   : > { %v958_v8 = vmax.f32 %v926_v2, 0.0  ;;  %v927_v9 = vadd.f32 %v1510_v3, %v1731_v41 }
 0x12c   : > { %v956_v10 = vmax.f32 %v924_v6, 0.0  ;;  %v925_v11 = vadd.f32 %v1511_v7, %v1731_v41 }
 0x12d   : > { %v1323_v12 = vpack.c.bf16 %v958_v8, %v958_v8  ;;  %v959_v13 = vmax.f32 %v927_v9, 0.0 }
 0x12e   : > { %v1321_v14 = vpack.c.bf16 %v956_v10, %v956_v10  ;;  %v957_v15 = vmax.f32 %v925_v11, 0.0  ;;  %v1446_v16 = vpop.f32.mrb[20].mxu1  ;;  %v1480_v17 = vpop.f32.mrb[20].mxu0 }
 0x12f   : > { %1119 = vst.msk [vmem:[%s1740_s29 + $0x48] sm:$0xf] %vm1100_vm2, %v1323_v12  ;;  %v1324_v18 = vpack.c.bf16 %v959_v13, %v959_v13  ;;  %v1512_v19 = vadd.f32 %v1480_v17, %v1446_v16  ;;  %v642_v20 = vpop.f32.mrb[21].mxu1  ;;  %v822_v21 = vpop.f32.mrb[21].mxu0 }
 0x130   : > { %1117 = vst.msk [vmem:[%s1740_s29 + $0x40] sm:$0xf] %vm1100_vm2, %v1321_v14  ;;  %v1322_v22 = vpack.c.bf16 %v957_v15, %v957_v15  ;;  %v1513_v23 = vadd.f32 %v822_v21, %v642_v20  ;;  %v1447_v24 = vpop.f32.mrb[22].mxu1  ;;  %v1481_v25 = vpop.f32.mrb[22].mxu0 }
 0x131   : > { %1120 = vst.msk [vmem:[%s1740_s29 + $0x4c] sm:$0xf] %vm1100_vm2, %v1324_v18  ;;  %v930_v26 = vadd.f32 %v1512_v19, %v1731_v41  ;;  %v1514_v27 = vadd.f32 %v1481_v25, %v1447_v24  ;;  %v645_v28 = vpop.f32.mrb[23].mxu1  ;;  %v825_v29 = vpop.f32.mrb[23].mxu0 }
 0x132   : > { %1118 = vst.msk [vmem:[%s1740_s29 + $0x44] sm:$0xf] %vm1100_vm2, %v1322_v22  ;;  %v928_v30 = vadd.f32 %v1513_v23, %v1731_v41  ;;  %v1515_v31 = vadd.f32 %v825_v29, %v645_v28 }
 0x133   : > { %v962_v32 = vmax.f32 %v930_v26, 0.0  ;;  %v931_v33 = vadd.f32 %v1514_v27, %v1731_v41 }
 0x134   : > { %v960_v34 = vmax.f32 %v928_v30, 0.0  ;;  %v929_v40 = vadd.f32 %v1515_v31, %v1731_v41 }
 0x135   : > { %v1327_v42 = vpack.c.bf16 %v962_v32, %v962_v32  ;;  %v963_v43 = vmax.f32 %v931_v33, 0.0 }
 0x136   : > { %v1325_v44 = vpack.c.bf16 %v960_v34, %v960_v34  ;;  %v961_v35 = vmax.f32 %v929_v40, 0.0  ;;  %v1450_v45 = vpop.f32.mrb[24].mxu1  ;;  %v1484_v46 = vpop.f32.mrb[24].mxu0 }
 0x137   : > { %1123 = vst.msk [vmem:[%s1740_s29 + $0x58] sm:$0xf] %vm1100_vm2, %v1327_v42  ;;  %v1328_v47 = vpack.c.bf16 %v963_v43, %v963_v43  ;;  %v1516_v48 = vadd.f32 %v1484_v46, %v1450_v45  ;;  %v658_v49 = vpop.f32.mrb[25].mxu1  ;;  %v838_v50 = vpop.f32.mrb[25].mxu0 }
 0x138   : > { %1121 = vst.msk [vmem:[%s1740_s29 + $0x50] sm:$0xf] %vm1100_vm2, %v1325_v44  ;;  %v1326_v36 = vpack.c.bf16 %v961_v35, %v961_v35  ;;  %v1517_v51 = vadd.f32 %v838_v50, %v658_v49  ;;  %v1451_v52 = vpop.f32.mrb[26].mxu1  ;;  %v1485_v37 = vpop.f32.mrb[26].mxu0 }
 0x139   : > { %1124 = vst.msk [vmem:[%s1740_s29 + $0x5c] sm:$0xf] %vm1100_vm2, %v1328_v47  ;;  %v934_v53 = vadd.f32 %v1516_v48, %v1731_v41  ;;  %v1518_v54 = vadd.f32 %v1485_v37, %v1451_v52  ;;  %v661_v55 = vpop.f32.mrb[27].mxu1  ;;  %v841_v56 = vpop.f32.mrb[27].mxu0 }
 0x13a   : > { %1122 = vst.msk [vmem:[%s1740_s29 + $0x54] sm:$0xf] %vm1100_vm2, %v1326_v36  ;;  %v932_v57 = vadd.f32 %v1517_v51, %v1731_v41  ;;  %v1519_v38 = vadd.f32 %v841_v56, %v661_v55 }
 0x13b   : > { %v966_v58 = vmax.f32 %v934_v53, 0.0  ;;  %v935_v59 = vadd.f32 %v1518_v54, %v1731_v41 }
 0x13c   : > { %v964_v60 = vmax.f32 %v932_v57, 0.0  ;;  %v933_v39 = vadd.f32 %v1519_v38, %v1731_v41 }
 0x13d   : > { %v1331_v61 = vpack.c.bf16 %v966_v58, %v966_v58  ;;  %v967_v62 = vmax.f32 %v935_v59, 0.0 }
 0x13e   : > { %v1329_v63 = vpack.c.bf16 %v964_v60, %v964_v60  ;;  %v965_v0 = vmax.f32 %v933_v39, 0.0  ;;  %v1454_v1 = vpop.f32.mrb[28].mxu1  ;;  %v1488_v2 = vpop.f32.mrb[28].mxu0 }
 0x13f   : > { %1127 = vst.msk [vmem:[%s1740_s29 + $0x68] sm:$0xf] %vm1100_vm2, %v1331_v61  ;;  %v1332_v3 = vpack.c.bf16 %v967_v62, %v967_v62  ;;  %v1520_v4 = vadd.f32 %v1488_v2, %v1454_v1  ;;  %v674_v5 = vpop.f32.mrb[29].mxu1  ;;  %v854_v6 = vpop.f32.mrb[29].mxu0 }
 0x140   : > { %1125 = vst.msk [vmem:[%s1740_s29 + $0x60] sm:$0xf] %vm1100_vm2, %v1329_v63  ;;  %v1330_v7 = vpack.c.bf16 %v965_v0, %v965_v0  ;;  %v1521_v8 = vadd.f32 %v854_v6, %v674_v5  ;;  %v1455_v9 = vpop.f32.mrb[30].mxu1  ;;  %v1489_v10 = vpop.f32.mrb[30].mxu0 }
 0x141   : > { %1128 = vst.msk [vmem:[%s1740_s29 + $0x6c] sm:$0xf] %vm1100_vm2, %v1332_v3  ;;  %v938_v11 = vadd.f32 %v1520_v4, %v1731_v41  ;;  %v1522_v12 = vadd.f32 %v1489_v10, %v1455_v9  ;;  %v677_v13 = vpop.f32.mrb[31].mxu1  ;;  %v857_v14 = vpop.f32.mrb[31].mxu0 }
 0x142   : > { %1126 = vst.msk [vmem:[%s1740_s29 + $0x64] sm:$0xf] %vm1100_vm2, %v1330_v7  ;;  %v936_v15 = vadd.f32 %v1521_v8, %v1731_v41  ;;  %v1523_v16 = vadd.f32 %v857_v14, %v677_v13 }
 0x143   : > { %v970_v17 = vmax.f32 %v938_v11, 0.0  ;;  %v939_v18 = vadd.f32 %v1522_v12, %v1731_v41 }
 0x144   : > { %v968_v19 = vmax.f32 %v936_v15, 0.0  ;;  %v937_v20 = vadd.f32 %v1523_v16, %v1731_v41 }
 0x145   : > { %v1335_v21 = vpack.c.bf16 %v970_v17, %v970_v17  ;;  %v971_v22 = vmax.f32 %v939_v18, 0.0 }
 0x146   : > { %v1333_v23 = vpack.c.bf16 %v968_v19, %v968_v19  ;;  %v969_v24 = vmax.f32 %v937_v20, 0.0 }
 0x147   : > { %1131 = vst.msk [vmem:[%s1740_s29 + $0x78] sm:$0xf] %vm1100_vm2, %v1335_v21  ;;  %v1336_v25 = vpack.c.bf16 %v971_v22, %v971_v22 }
 0x148   : > { %1129 = vst.msk [vmem:[%s1740_s29 + $0x70] sm:$0xf] %vm1100_vm2, %v1333_v23  ;;  %v1334_v26 = vpack.c.bf16 %v969_v24, %v969_v24 }
 0x149   : > { %1132 = vst.msk [vmem:[%s1740_s29 + $0x7c] sm:$0xf] %vm1100_vm2, %v1336_v25 }
 0x14a   : > { %1130 = vst.msk [vmem:[%s1740_s29 + $0x74] sm:$0xf] %vm1100_vm2, %v1334_v26 }
 0x14b PF: > { %s13_s12 = sadd.s32 1, %s1596_s12  }
 0x14c   : > { %p10_p4 = scmp.ge.s32.totalorder %s13_s12, 4  }
 0x14e   :  { %12 = sbr.rel (!%p10_p4) target bundleno = 1 (0x1), region = 64 }

// kernel: tile.8
= control target key start
LH: loop header
LB: loop body
LE: loop exit
PB: predicated region body
PF: predicated region fallthrough
CT: control target
= control target key end

     0   :  { %s22_s0 = inlined_call_operand.vmem [shape: f32[32], index: 0, kind: input, shape index: {}]   ;;  %s23_s1 = inlined_call_operand.vmem [shape: f32[4,32], index: 1, kind: output, shape index: {}]  }
   0x1   :  { %v4_v0 = vld [vmem:[%s22_s0] ss:$0 sm:$0xff] }
   0x2   :  { %5 = vst [vmem:[%s23_s1] sm:$0xf] %v4_v0 }

// kernel: tile.9
= control target key start
LH: loop header
LB: loop body
LE: loop exit
PB: predicated region body
PF: predicated region fallthrough
CT: control target
= control target key end

     0   :  { %vm7_vm0 = vcmask 261120   ;;  %s37_s8 = smov 32   ;;  %s38_s9 = smov 64   ;;  %vm13_vm1 = vcmask 1048320   ;;  %vm19_vm2 = vcmask 785920   ;;  %vm25_vm3 = vcmask 523520   ;;  %s55_s0 = inlined_call_operand.vmem [shape: f32[4,32], index: 0, kind: input, shape index: {}]   ;;  %s56_s1 = inlined_call_operand.vmem [shape: f32[1,128], index: 1, kind: output, shape index: {}]  }
   0x1   :  { %v4_v0 = vld [vmem:[%s55_s0] sm:$0xf]  ;;  %s36_s0 = smov 96  }
   0x2   :  { %5 = vst [vmem:[#allocation1] sm:$0xf] %v4_v0 }
   0x9   :  { %v10_v1 = vld [vmem:[#allocation1 + $0x3] sm:$0x1]   ;;  %v22_v2 = vld [vmem:[#allocation1 + $0x1] sm:$0x1]   ;;  %v6_v3 = vld [vmem:[#allocation1] sm:$0x1]  }
   0xa   :  { %11 = vrot.lane.b32.xlu0 %v10_v1, %s36_s0  ;;  %23 = vrot.lane.b32.xlu1 %v22_v2, %s37_s8  ;;  %v16_v4 = vld [vmem:[#allocation1 + $0x2] sm:$0x1]   ;;  %8 = vst.msk [vmem:[#allocation0] sm:$0x1] %vm7_vm0, %v6_v3  }
   0xe   :  { %17 = vrot.lane.b32.xlu0 %v16_v4, %s38_s9 }
  0x7c   :  { %v12_v5 = vpop.permute.xlu0 %11   ;;  %v24_v6 = vpop.permute.xlu1 %23  }
  0x7d   :  { %14 = vst.msk [vmem:[#allocation0] sm:$0x1] %vm13_vm1, %v12_v5  }
  0x80   :  { %v18_v7 = vpop.permute.xlu0 %17  }
  0x81   :  { %20 = vst.msk [vmem:[#allocation0] sm:$0x1] %vm19_vm2, %v18_v7  }
  0x82   :  { %26 = vst.msk [vmem:[#allocation0] sm:$0x1] %vm25_vm3, %v24_v6  }
  0x89   :  { %v30_v8 = vld [vmem:[#allocation0] sm:$0x1] }
  0x8a   :  { %32 = vst [vmem:[%s56_s1] sm:$0x1] %v30_v8 }

// kernel: _lambda_.10
= control target key start
LH: loop header
LB: loop body
LE: loop exit
PB: predicated region body
PF: predicated region fallthrough
CT: control target
= control target key end

     0   :  { %vm45_vm0 = vcmask 261120   ;;  %s1447_s0 = inlined_call_operand.vmem [shape: f32[128,32], index: 0, kind: input, shape index: {}]   ;;  %s1448_s3 = inlined_call_operand.vmem [shape: bf16[32,128], index: 3, kind: input, shape index: {}]   ;;  %s1449_s5 = inlined_call_operand.vmem [shape: bf16[128,32], index: 5, kind: input, shape index: {}]   ;;  %s1450_s1 = inlined_call_operand.vmem [shape: f32[1,32], index: 1, kind: input, shape index: {}]   ;;  %s1451_s2 = inlined_call_operand.vmem [shape: f32[1,32], index: 2, kind: input, shape index: {}]   ;;  %s1452_s4 = inlined_call_operand.vmem [shape: f32[1,128], index: 4, kind: input, shape index: {}]   ;;  %s1453_s6 = inlined_call_operand.vmem [shape: f32[1,32], index: 6, kind: input, shape index: {}]   ;;  %s1454_s7 = inlined_call_operand.vmem [shape: f32[128,32], index: 7, kind: output, shape index: {}]  }
   0x1   :  { %v27_v0 = vld [vmem:[%s1447_s0] sm:$0xff]  ;;  %v29_v1 = vld [vmem:[%s1447_s0 + $0x10] sm:$0xff]  ;;  %v28_v2 = vld [vmem:[%s1447_s0 + $0x8] sm:$0xff] }
   0x2   :  { %v46_v3 = vsel %vm45_vm0, %v27_v0, 0.0  ;;  %v52_v4 = vsel %vm45_vm0, %v29_v1, 0.0  ;;  %v30_v5 = vld [vmem:[%s1447_s0 + $0x18] sm:$0xff]  ;;  %v49_v6 = vsel %vm45_vm0, %v28_v2, 0.0  ;;  %v31_v8 = vld [vmem:[%s1447_s0 + $0x20] sm:$0xff]  ;;  %v32_v9 = vld [vmem:[%s1447_s0 + $0x28] sm:$0xff] }
   0x3   :  { %47 = vadd.xlane.f32.xlu0 %v46_v3  ;;  %53 = vadd.xlane.f32.xlu1 %v52_v4  ;;  %v55_v7 = vsel %vm45_vm0, %v30_v5, 0.0  ;;  %v58_v10 = vsel %vm45_vm0, %v31_v8, 0.0  ;;  %v61_v11 = vsel %vm45_vm0, %v32_v9, 0.0  ;;  %v1016_v12 = vld [vmem:[%s1447_s0 + $0x30] sm:$0xff]  ;;  %v1021_v13 = vld [vmem:[%s1447_s0 + $0x38] sm:$0xff]  ;;  %v1030_v16 = vld [vmem:[%s1447_s0 + $0x40] sm:$0xff] }
   0x4   :  { %v64_v14 = vsel %vm45_vm0, %v1016_v12, 0.0  ;;  %v67_v15 = vsel %vm45_vm0, %v1021_v13, 0.0  ;;  %v1035_v17 = vld [vmem:[%s1447_s0 + $0x48] sm:$0xff]  ;;  %v70_v18 = vsel %vm45_vm0, %v1030_v16, 0.0  ;;  %v1044_v20 = vld [vmem:[%s1447_s0 + $0x50] sm:$0xff]  ;;  %v1049_v21 = vld [vmem:[%s1447_s0 + $0x58] sm:$0xff] }
   0x5   :  { %v73_v19 = vsel %vm45_vm0, %v1035_v17, 0.0  ;;  %v76_v22 = vsel %vm45_vm0, %v1044_v20, 0.0  ;;  %v79_v23 = vsel %vm45_vm0, %v1049_v21, 0.0  ;;  %v1058_v24 = vld [vmem:[%s1447_s0 + $0x60] sm:$0xff]  ;;  %v1063_v25 = vld [vmem:[%s1447_s0 + $0x68] sm:$0xff]  ;;  %v1072_v28 = vld [vmem:[%s1447_s0 + $0x70] sm:$0xff] }
   0x6   :  { %v82_v26 = vsel %vm45_vm0, %v1058_v24, 0.0  ;;  %v85_v27 = vsel %vm45_vm0, %v1063_v25, 0.0  ;;  %v1077_v29 = vld [vmem:[%s1447_s0 + $0x78] sm:$0xff]  ;;  %v88_v30 = vsel %vm45_vm0, %v1072_v28, 0.0 }
   0x7   :  { %50 = vadd.xlane.f32.xlu0 %v49_v6  ;;  %56 = vadd.xlane.f32.xlu1 %v55_v7  ;;  %v91_v31 = vsel %vm45_vm0, %v1077_v29, 0.0 }
   0xb   :  { %59 = vadd.xlane.f32.xlu0 %v58_v10  ;;  %62 = vadd.xlane.f32.xlu1 %v61_v11 }
   0xf   :  { %65 = vadd.xlane.f32.xlu0 %v64_v14  ;;  %68 = vadd.xlane.f32.xlu1 %v67_v15 }
  0x13   :  { %71 = vadd.xlane.f32.xlu0 %v70_v18  ;;  %74 = vadd.xlane.f32.xlu1 %v73_v19 }
  0x17   :  { %77 = vadd.xlane.f32.xlu0 %v76_v22  ;;  %80 = vadd.xlane.f32.xlu1 %v79_v23 }
  0x1b   :  { %83 = vadd.xlane.f32.xlu0 %v82_v26  ;;  %86 = vadd.xlane.f32.xlu1 %v85_v27 }
  0x1f   :  { %89 = vadd.xlane.f32.xlu0 %v88_v30  ;;  %92 = vadd.xlane.f32.xlu1 %v91_v31 }
  0x90   :  { %v48_v32 = vpop.xlane.xlu0 %47  ;;  %v54_v33 = vpop.xlane.xlu1 %53 }
  0x91   :  { %v95_v34 = vmul.f32 0.03125, %v48_v32  ;;  %v97_v35 = vmul.f32 0.03125, %v54_v33 }
  0x93   :  { %v1083_v36 = vsub.f32 %v27_v0, %v95_v34  ;;  %v1085_v37 = vsub.f32 %v29_v1, %v97_v35 }
  0x94   :  { %v51_v38 = vpop.xlane.xlu0 %50  ;;  %v57_v39 = vpop.xlane.xlu1 %56 }
  0x95   :  { %v96_v40 = vmul.f32 0.03125, %v51_v38  ;;  %v98_v41 = vmul.f32 0.03125, %v57_v39  ;;  %v127_v42 = vmul.f32 %v1083_v36, %v1083_v36  ;;  %v129_v43 = vmul.f32 %v1085_v37, %v1085_v37 }
  0x97   :  { %v1091_v44 = vsub.f32 %v28_v2, %v96_v40  ;;  %v1093_v45 = vsub.f32 %v30_v5, %v98_v41  ;;  %v143_v46 = vsel %vm45_vm0, %v127_v42, 0.0  ;;  %v149_v49 = vsel %vm45_vm0, %v129_v43, 0.0 }
  0x98   :  { %144 = vadd.xlane.f32.xlu0 %v143_v46  ;;  %v60_v47 = vpop.xlane.xlu0 %59  ;;  %v63_v48 = vpop.xlane.xlu1 %62 }
  0x99   :  { %v99_v50 = vmul.f32 0.03125, %v60_v47  ;;  %v100_v51 = vmul.f32 0.03125, %v63_v48  ;;  %v128_v52 = vmul.f32 %v1091_v44, %v1091_v44  ;;  %v130_v53 = vmul.f32 %v1093_v45, %v1093_v45 }
  0x9b   :  { %v1101_v54 = vsub.f32 %v31_v8, %v99_v50  ;;  %v1103_v55 = vsub.f32 %v32_v9, %v100_v51  ;;  %v146_v56 = vsel %vm45_vm0, %v128_v52, 0.0  ;;  %v152_v59 = vsel %vm45_vm0, %v130_v53, 0.0  ;;  %v860_v53 = vld [vmem:[%s1448_s3 + $0x8] sm:$0xff]  }
  0x9c   :  { %150 = vadd.xlane.f32.xlu0 %v149_v49  ;;  %147 = vadd.xlane.f32.xlu1 %v146_v56  ;;  %v66_v57 = vpop.xlane.xlu0 %65  ;;  %v69_v58 = vpop.xlane.xlu1 %68  ;;  %v1182_v56 = vld [vmem:[%s1449_s5] sm:$0xff]  }
  0x9d   :  { %v101_v60 = vmul.f32 0.03125, %v66_v57  ;;  %v102_v61 = vmul.f32 0.03125, %v69_v58  ;;  %v131_v62 = vmul.f32 %v1101_v54, %v1101_v54  ;;  %v132_v63 = vmul.f32 %v1103_v55, %v1103_v55  ;;  %v1187_v57 = vld [vmem:[%s1449_s5 + $0x8] sm:$0xff]   ;;  %843 = vmatprep.subr.bf16.mxu1 %v1182_v56 }
  0x9e   :  { %851 = vmatpush3.bf16.msra.mxu1 %v1182_v56 }
  0x9f   :  { %v1112_v0 = vsub.f32 %v1016_v12, %v101_v60  ;;  %v1115_v1 = vsub.f32 %v1021_v13, %v102_v61  ;;  %v155_v2 = vsel %vm45_vm0, %v131_v62, 0.0  ;;  %v158_v5 = vsel %vm45_vm0, %v132_v63, 0.0  ;;  %844 = vmatprep.subr.bf16.mxu1 %v1187_v57 }
  0xa0   :  { %153 = vadd.xlane.f32.xlu1 %v152_v59  ;;  %156 = vadd.xlane.f32.xlu0 %v155_v2  ;;  %v72_v3 = vpop.xlane.xlu0 %71  ;;  %v75_v4 = vpop.xlane.xlu1 %74 }
  0xa1   :  { %v103_v6 = vmul.f32 0.03125, %v72_v3  ;;  %v104_v7 = vmul.f32 0.03125, %v75_v4  ;;  %v133_v8 = vmul.f32 %v1112_v0, %v1112_v0  ;;  %v134_v9 = vmul.f32 %v1115_v1, %v1115_v1 }
  0xa2   :  { %852 = vmatpush3.bf16.msra.mxu1 %v1187_v57 }
  0xa3   :  { %v1124_v10 = vsub.f32 %v1030_v16, %v103_v6  ;;  %v1127_v11 = vsub.f32 %v1035_v17, %v104_v7  ;;  %v161_v12 = vsel %vm45_vm0, %v133_v8, 0.0  ;;  %v164_v15 = vsel %vm45_vm0, %v134_v9, 0.0 }
  0xa4   :  { %159 = vadd.xlane.f32.xlu1 %v158_v5  ;;  %162 = vadd.xlane.f32.xlu0 %v161_v12  ;;  %v78_v13 = vpop.xlane.xlu0 %77  ;;  %v81_v14 = vpop.xlane.xlu1 %80 }
  0xa5   :  { %v105_v18 = vmul.f32 0.03125, %v78_v13  ;;  %v106_v19 = vmul.f32 0.03125, %v81_v14  ;;  %v135_v22 = vmul.f32 %v1124_v10, %v1124_v10  ;;  %v136_v16 = vmul.f32 %v1127_v11, %v1127_v11 }
  0xa7   :  { %v1136_v23 = vsub.f32 %v1044_v20, %v105_v18  ;;  %v1139_v17 = vsub.f32 %v1049_v21, %v106_v19  ;;  %v167_v26 = vsel %vm45_vm0, %v135_v22, 0.0  ;;  %v170_v31 = vsel %vm45_vm0, %v136_v16, 0.0 }
  0xa8   :  { %165 = vadd.xlane.f32.xlu1 %v164_v15  ;;  %168 = vadd.xlane.f32.xlu0 %v167_v26  ;;  %v84_v27 = vpop.xlane.xlu0 %83  ;;  %v87_v30 = vpop.xlane.xlu1 %86 }
  0xa9   :  { %v107_v32 = vmul.f32 0.03125, %v84_v27  ;;  %v108_v33 = vmul.f32 0.03125, %v87_v30  ;;  %v137_v34 = vmul.f32 %v1136_v23, %v1136_v23  ;;  %v138_v20 = vmul.f32 %v1139_v17, %v1139_v17 }
  0xab   :  { %v1148_v35 = vsub.f32 %v1058_v24, %v107_v32  ;;  %v1151_v21 = vsub.f32 %v1063_v25, %v108_v33  ;;  %v173_v38 = vsel %vm45_vm0, %v137_v34, 0.0  ;;  %v176_v41 = vsel %vm45_vm0, %v138_v20, 0.0  ;;  %v1198_v33 = vld [vmem:[%s1450_s1] ss:$0 sm:$0xff] }
  0xac   :  { %171 = vadd.xlane.f32.xlu1 %v170_v31  ;;  %174 = vadd.xlane.f32.xlu0 %v173_v38  ;;  %v90_v39 = vpop.xlane.xlu0 %89  ;;  %v93_v40 = vpop.xlane.xlu1 %92 }
  0xad   :  { %v109_v42 = vmul.f32 0.03125, %v90_v39  ;;  %v110_v43 = vmul.f32 0.03125, %v93_v40  ;;  %v139_v46 = vmul.f32 %v1148_v35, %v1148_v35  ;;  %v140_v24 = vmul.f32 %v1151_v21, %v1151_v21 }
  0xaf   :  { %v1160_v47 = vsub.f32 %v1072_v28, %v109_v42  ;;  %v1163_v25 = vsub.f32 %v1077_v29, %v110_v43  ;;  %v179_v48 = vsel %vm45_vm0, %v139_v46, 0.0  ;;  %v182_v49 = vsel %vm45_vm0, %v140_v24, 0.0  ;;  %v859_v29 = vld [vmem:[%s1448_s3] sm:$0xff]  }
  0xb0   :  { %177 = vadd.xlane.f32.xlu1 %v176_v41  ;;  %180 = vadd.xlane.f32.xlu0 %v179_v48  ;;  %v1206_v48 = vld [vmem:[%s1451_s2] ss:$0 sm:$0xff] }
  0xb1   :  { %v141_v50 = vmul.f32 %v1160_v47, %v1160_v47  ;;  %v142_v51 = vmul.f32 %v1163_v25, %v1163_v25  ;;  %791 = vmatprep.subr.bf16.mxu0 %v859_v29 }
  0xb2   :  { %792 = vmatpush3.bf16.msra.mxu0 %v859_v29 }
  0xb3   :  { %v185_v52 = vsel %vm45_vm0, %v141_v50, 0.0  ;;  %v188_v28 = vsel %vm45_vm0, %v142_v51, 0.0  ;;  %793 = vmatprep.subr.bf16.mxu0 %v860_v53 }
  0xb4   :  { %183 = vadd.xlane.f32.xlu1 %v182_v49  ;;  %186 = vadd.xlane.f32.xlu0 %v185_v52 }
  0xb6   :  { %794 = vmatpush3.bf16.msra.mxu0 %v860_v53 }
  0xb7   :  { %811 = vmatprep.subr.bf16.mxu0 %v1182_v56 }
  0xb8   :  { %189 = vadd.xlane.f32.xlu1 %v188_v28 }
 0x125   :  { %v145_v58 = vpop.xlane.xlu0 %144 }
 0x126   :  { %v191_v59 = vmul.f32 0.03125, %v145_v58 }
 0x128   :  { %v207_v60 = vadd.f32 1e-05, %v191_v59 }
 0x129   :  { %v148_v61 = vpop.xlane.xlu1 %147  ;;  %v151_v62 = vpop.xlane.xlu0 %150 }
 0x12a   :  { %869 = vrsqrt.f32 %v207_v60  ;;  %v192_v63 = vmul.f32 0.03125, %v148_v61  ;;  %v193_v2 = vmul.f32 0.03125, %v151_v62 }
 0x12c   :  { %v208_v3 = vadd.f32 1e-05, %v192_v63  ;;  %v209_v4 = vadd.f32 1e-05, %v193_v2 }
 0x12d   :  { %v154_v5 = vpop.xlane.xlu1 %153  ;;  %v157_v6 = vpop.xlane.xlu0 %156 }
 0x12e   :  { %871 = vrsqrt.f32 %v208_v3  ;;  %v194_v7 = vmul.f32 0.03125, %v154_v5  ;;  %v195_v8 = vmul.f32 0.03125, %v157_v6 }
 0x12f   :  { %873 = vrsqrt.f32 %v209_v4 }
 0x130   :  { %v210_v9 = vadd.f32 1e-05, %v194_v7  ;;  %v211_v12 = vadd.f32 1e-05, %v195_v8 }
 0x131   :  { %v160_v13 = vpop.xlane.xlu1 %159  ;;  %v163_v14 = vpop.xlane.xlu0 %162 }
 0x132   :  { %875 = vrsqrt.f32 %v210_v9  ;;  %v196_v15 = vmul.f32 0.03125, %v160_v13  ;;  %v197_v18 = vmul.f32 0.03125, %v163_v14 }
 0x133   :  { %877 = vrsqrt.f32 %v211_v12 }
 0x134   :  { %v870_v19 = vpop.eup %869  ;;  %v212_v22 = vadd.f32 1e-05, %v196_v15  ;;  %v213_v16 = vadd.f32 1e-05, %v197_v18 }
 0x135   :  { %v166_v26 = vpop.xlane.xlu1 %165  ;;  %v169_v27 = vpop.xlane.xlu0 %168  ;;  %v239_v30 = vmul.f32 %v870_v19, %v1083_v36 }
 0x136   :  { %879 = vrsqrt.f32 %v212_v22  ;;  %v198_v31 = vmul.f32 0.03125, %v166_v26  ;;  %v199_v32 = vmul.f32 0.03125, %v169_v27 }
 0x137   :  { %881 = vrsqrt.f32 %v213_v16  ;;  %v261_v43 = vmul.f32 %v1198_v33, %v239_v30 }
 0x138   :  { %v872_v34 = vpop.eup %871  ;;  %v214_v20 = vadd.f32 1e-05, %v198_v31  ;;  %v215_v38 = vadd.f32 1e-05, %v199_v32 }
 0x139   :  { %v874_v39 = vpop.eup %873  ;;  %v172_v40 = vpop.xlane.xlu1 %171  ;;  %v240_v42 = vmul.f32 %v872_v34, %v1091_v44 }
 0x13a   :  { %v175_v41 = vpop.xlane.xlu0 %174  ;;  %v241_v36 = vmul.f32 %v874_v39, %v1085_v37  ;;  %883 = vrsqrt.f32 %v214_v20  ;;  %v200_v46 = vmul.f32 0.03125, %v172_v40  ;;  %v283_v37 = vadd.f32 %v1206_v48, %v261_v43 }
 0x13b   :  { %v201_v24 = vmul.f32 0.03125, %v175_v41  ;;  %885 = vrsqrt.f32 %v215_v38  ;;  %v262_v49 = vmul.f32 %v1198_v33, %v240_v42 }
 0x13c   :  { %v876_v50 = vpop.eup %875  ;;  %v216_v51 = vadd.f32 1e-05, %v200_v46  ;;  %v263_v59 = vmul.f32 %v1198_v33, %v241_v36 }
 0x13d   :  { %v217_v52 = vadd.f32 1e-05, %v201_v24  ;;  %v878_v28 = vpop.eup %877  ;;  %v242_v44 = vmul.f32 %v876_v50, %v1093_v45  ;;  %v178_v29 = vpop.xlane.xlu1 %177  ;;  %v284_v58 = vadd.f32 %v1206_v48, %v262_v49 }
 0x13e   :  { %v181_v53 = vpop.xlane.xlu0 %180  ;;  %v243_v60 = vmul.f32 %v878_v28, %v1101_v54  ;;  %887 = vrsqrt.f32 %v216_v51  ;;  %v202_v61 = vmul.f32 0.03125, %v178_v29  ;;  %v285_v9 = vadd.f32 %v1206_v48, %v263_v59 }
 0x13f   :  { %v203_v62 = vmul.f32 0.03125, %v181_v53  ;;  %889 = vrsqrt.f32 %v217_v52  ;;  %v299_v63 = vpack.c.bf16 %v284_v58, %v283_v37  ;;  %v264_v2 = vmul.f32 %v1198_v33, %v242_v44 }
 0x140   :  { %v880_v3 = vpop.eup %879  ;;  %v218_v4 = vadd.f32 1e-05, %v202_v61  ;;  %v265_v12 = vmul.f32 %v1198_v33, %v243_v60 }
 0x141   :  { %v219_v45 = vadd.f32 1e-05, %v203_v62  ;;  %v882_v5 = vpop.eup %881  ;;  %v244_v6 = vmul.f32 %v880_v3, %v1103_v55  ;;  %v184_v7 = vpop.xlane.xlu1 %183  ;;  %795 = vmatprep.mubr.msk.bf16.mxu0 %vm45_vm0, %v299_v63  ;;  %v286_v54 = vadd.f32 %v1206_v48, %v264_v2 }
 0x142   :  { %v187_v8 = vpop.xlane.xlu0 %186  ;;  %v245_v13 = vmul.f32 %v882_v5, %v1112_v0  ;;  %891 = vrsqrt.f32 %v218_v4  ;;  %v204_v14 = vmul.f32 0.03125, %v184_v7  ;;  %v287_v31 = vadd.f32 %v1206_v48, %v265_v12  ;;  %v866_v7 = vld [vmem:[%s1449_s5 + $0x28] sm:$0xff]  }
 0x143   :  { %v205_v15 = vmul.f32 0.03125, %v187_v8  ;;  %893 = vrsqrt.f32 %v219_v45  ;;  %v300_v18 = vpack.c.bf16 %v286_v54, %v285_v9  ;;  %v266_v19 = vmul.f32 %v1198_v33, %v244_v6  ;;  %v867_v8 = vld [vmem:[%s1449_s5 + $0x30] sm:$0xff]   ;;  %v868_v9 = vld [vmem:[%s1449_s5 + $0x38] sm:$0xff]   ;;  %v1284_v54 = vld [vmem:[%s1452_s4] ss:$0 sm:$0xff] }
 0x144   :  { %v884_v55 = vpop.eup %883  ;;  %v220_v22 = vadd.f32 1e-05, %v204_v14  ;;  %v267_v32 = vmul.f32 %v1198_v33, %v245_v13 }
 0x145   :  { %v221_v16 = vadd.f32 1e-05, %v205_v15  ;;  %v886_v26 = vpop.eup %885  ;;  %v246_v27 = vmul.f32 %v884_v55, %v1115_v1  ;;  %v190_v30 = vpop.xlane.xlu1 %189  ;;  %796 = vmatmul.mubr.msk.bf16.vlgmr.msra.gmra.mrb[0].mxu0 %vm45_vm0, %v300_v18  ;;  %v288_v0 = vadd.f32 %v1206_v48, %v266_v19 }
 0x146   :  { %v247_v34 = vmul.f32 %v886_v26, %v1124_v10  ;;  %895 = vrsqrt.f32 %v220_v22  ;;  %v206_v20 = vmul.f32 0.03125, %v190_v30  ;;  %812 = vmatpush3.bf16.msra.mxu0 %v1182_v56  ;;  %v289_v43 = vadd.f32 %v1206_v48, %v267_v32 }
 0x147   :  { %897 = vrsqrt.f32 %v221_v16  ;;  %v301_v38 = vpack.c.bf16 %v288_v0, %v287_v31  ;;  %v268_v39 = vmul.f32 %v1198_v33, %v246_v27  ;;  %813 = vmatprep.subr.bf16.mxu0 %v1187_v57 }
 0x148   :  { %v888_v1 = vpop.eup %887  ;;  %v222_v40 = vadd.f32 1e-05, %v206_v20  ;;  %v269_v36 = vmul.f32 %v1198_v33, %v247_v34 }
 0x149   :  { %v890_v41 = vpop.eup %889  ;;  %v248_v42 = vmul.f32 %v888_v1, %v1127_v11  ;;  %799 = vmatprep.mubr.msk.bf16.mxu0 %vm45_vm0, %v301_v38  ;;  %v290_v10 = vadd.f32 %v1206_v48, %v268_v39 }
 0x14a   :  { %v249_v56 = vmul.f32 %v890_v41, %v1136_v23  ;;  %899 = vrsqrt.f32 %v222_v40  ;;  %814 = vmatpush3.bf16.msra.mxu0 %v1187_v57  ;;  %v291_v51 = vadd.f32 %v1206_v48, %v269_v36 }
 0x14b   :  { %v302_v46 = vpack.c.bf16 %v290_v10, %v289_v43  ;;  %v270_v24 = vmul.f32 %v1198_v33, %v248_v42 }
 0x14c   :  { %v892_v49 = vpop.eup %891  ;;  %v271_v28 = vmul.f32 %v1198_v33, %v249_v56 }
 0x14d   :  { %v894_v50 = vpop.eup %893  ;;  %v250_v11 = vmul.f32 %v892_v49, %v1139_v17  ;;  %800 = vmatmul.mubr.msk.bf16.gmra.mrb[4].mxu0 %vm45_vm0, %v302_v46  ;;  %v292_v52 = vadd.f32 %v1206_v48, %v270_v24 }
 0x14e   :  { %v251_v23 = vmul.f32 %v894_v50, %v1148_v35  ;;  %v293_v17 = vadd.f32 %v1206_v48, %v271_v28 }
 0x14f   :  { %v303_v44 = vpack.c.bf16 %v292_v52, %v291_v51  ;;  %v272_v57 = vmul.f32 %v1198_v33, %v250_v11 }
 0x150   :  { %v896_v29 = vpop.eup %895  ;;  %v273_v59 = vmul.f32 %v1198_v33, %v251_v23 }
 0x151   :  { %v898_v53 = vpop.eup %897  ;;  %v252_v37 = vmul.f32 %v896_v29, %v1151_v21  ;;  %803 = vmatprep.mubr.msk.bf16.mxu0 %vm45_vm0, %v303_v44  ;;  %v294_v58 = vadd.f32 %v1206_v48, %v272_v57 }
 0x152   :  { %v253_v60 = vmul.f32 %v898_v53, %v1160_v47  ;;  %v295_v21 = vadd.f32 %v1206_v48, %v273_v59 }
 0x153   :  { %v304_v61 = vpack.c.bf16 %v294_v58, %v293_v17  ;;  %v274_v35 = vmul.f32 %v1198_v33, %v252_v37 }
 0x154   :  { %v900_v62 = vpop.eup %899  ;;  %v275_v3 = vmul.f32 %v1198_v33, %v253_v60 }
 0x155   :  { %v254_v63 = vmul.f32 %v900_v62, %v1163_v25  ;;  %804 = vmatmul.mubr.msk.bf16.gmra.mrb[8].mxu0 %vm45_vm0, %v304_v61  ;;  %v296_v2 = vadd.f32 %v1206_v48, %v274_v35  ;;  %v863_v25 = vld [vmem:[%s1449_s5 + $0x10] sm:$0xff]  }
 0x156   :  { %v297_v47 = vadd.f32 %v1206_v48, %v275_v3  ;;  %815 = vmatprep.subr.bf16.mxu0 %v863_v25  ;;  %845 = vmatprep.subr.bf16.mxu1 %v863_v25 }
 0x157   :  { %v305_v4 = vpack.c.bf16 %v296_v2, %v295_v21  ;;  %v276_v45 = vmul.f32 %v1198_v33, %v254_v63  ;;  %816 = vmatpush3.bf16.msra.mxu0 %v863_v25  ;;  %853 = vmatpush3.bf16.msra.mxu1 %v863_v25  ;;  %v864_v33 = vld [vmem:[%s1449_s5 + $0x18] sm:$0xff]  }
 0x158   :  { %817 = vmatprep.subr.bf16.mxu0 %v864_v33  ;;  %846 = vmatprep.subr.bf16.mxu1 %v864_v33 }
 0x159   :  { %807 = vmatprep.mubr.msk.bf16.mxu0 %vm45_vm0, %v305_v4  ;;  %v298_v5 = vadd.f32 %v1206_v48, %v276_v45  ;;  %v865_v48 = vld [vmem:[%s1449_s5 + $0x20] sm:$0xff]  }
 0x15b   :  { %v306_v6 = vpack.c.bf16 %v298_v5, %v297_v47  ;;  %818 = vmatpush3.bf16.msra.mxu0 %v864_v33  ;;  %854 = vmatpush3.bf16.msra.mxu1 %v864_v33 }
 0x15c   :  { %819 = vmatprep.subr.bf16.mxu0 %v865_v48  ;;  %847 = vmatprep.subr.bf16.mxu1 %v865_v48 }
 0x15d   :  { %808 = vmatmul.mubr.msk.bf16.gmra.mrb[12].mxu0 %vm45_vm0, %v306_v6 }
 0x15f   :  { %820 = vmatpush3.bf16.msra.mxu0 %v865_v48  ;;  %855 = vmatpush3.bf16.msra.mxu1 %v865_v48 }
 0x160   :  { %821 = vmatprep.subr.bf16.mxu0 %v866_v7  ;;  %848 = vmatprep.subr.bf16.mxu1 %v866_v7 }
 0x163   :  { %822 = vmatpush3.bf16.msra.mxu0 %v866_v7  ;;  %856 = vmatpush3.bf16.msra.mxu1 %v866_v7 }
 0x164   :  { %823 = vmatprep.subr.bf16.mxu0 %v867_v8  ;;  %849 = vmatprep.subr.bf16.mxu1 %v867_v8 }
 0x167   :  { %824 = vmatpush3.bf16.msra.mxu0 %v867_v8  ;;  %857 = vmatpush3.bf16.msra.mxu1 %v867_v8 }
 0x168   :  { %825 = vmatprep.subr.bf16.mxu0 %v868_v9  ;;  %850 = vmatprep.subr.bf16.mxu1 %v868_v9 }
 0x16b   :  { %826 = vmatpush3.bf16.msra.mxu0 %v868_v9  ;;  %858 = vmatpush3.bf16.msra.mxu1 %v868_v9 }
 0x218   :  { %v797_v12 = vpop.f32.mrb[0].mxu0 }
 0x219   :  { %v397_v13 = vadd.f32 %v797_v12, %v1284_v54  ;;  %v388_v14 = vpop.f32.mrb[1].mxu0 }
 0x21a   :  { %v389_v15 = vadd.f32 %v1284_v54, %v388_v14  ;;  %v798_v18 = vpop.f32.mrb[2].mxu0 }
 0x21b   :  { %v469_v19 = vmul.f32 0.70710677, %v397_v13  ;;  %v400_v55 = vadd.f32 %v798_v18, %v1284_v54  ;;  %v391_v22 = vpop.f32.mrb[3].mxu0  ;;  %v453_v52 = vmul.f32 0.5, %v397_v13 }
 0x21c   :  { %v467_v16 = vmul.f32 0.70710677, %v389_v15  ;;  %v392_v26 = vadd.f32 %v1284_v54, %v391_v22  ;;  %v451_v29 = vmul.f32 0.5, %v389_v15 }
 0x21d   :  { %901 = verf.f32 %v469_v19  ;;  %v470_v27 = vmul.f32 0.70710677, %v400_v55  ;;  %v454_v28 = vmul.f32 0.5, %v400_v55 }
 0x21e   :  { %903 = verf.f32 %v467_v16  ;;  %v468_v30 = vmul.f32 0.70710677, %v392_v26  ;;  %v452_v53 = vmul.f32 0.5, %v392_v26 }
 0x21f   :  { %905 = verf.f32 %v470_v27 }
 0x220   :  { %907 = verf.f32 %v468_v30  ;;  %v801_v31 = vpop.f32.mrb[4].mxu0 }
 0x221   :  { %v413_v0 = vadd.f32 %v801_v31, %v1284_v54  ;;  %v404_v32 = vpop.f32.mrb[5].mxu0 }
 0x222   :  { %v405_v34 = vadd.f32 %v1284_v54, %v404_v32  ;;  %v802_v20 = vpop.f32.mrb[6].mxu0 }
 0x223   :  { %v473_v38 = vmul.f32 0.70710677, %v413_v0  ;;  %v416_v39 = vadd.f32 %v802_v20, %v1284_v54  ;;  %v407_v1 = vpop.f32.mrb[7].mxu0  ;;  %v457_v33 = vmul.f32 0.5, %v413_v0 }
 0x224   :  { %v471_v40 = vmul.f32 0.70710677, %v405_v34  ;;  %v1294_v41 = vadd.f32 %v1284_v54, %v407_v1  ;;  %v455_v19 = vmul.f32 0.5, %v405_v34 }
 0x225   :  { %909 = verf.f32 %v473_v38  ;;  %v474_v42 = vmul.f32 0.70710677, %v416_v39  ;;  %v458_v12 = vmul.f32 0.5, %v416_v39 }
 0x226   :  { %911 = verf.f32 %v471_v40  ;;  %v472_v43 = vmul.f32 0.70710677, %v1294_v41  ;;  %v456_v30 = vmul.f32 0.5, %v1294_v41 }
 0x227   :  { %v902_v10 = vpop.eup %901  ;;  %913 = verf.f32 %v474_v42 }
 0x228   :  { %v904_v36 = vpop.eup %903  ;;  %v501_v56 = vadd.f32 1.0, %v902_v10  ;;  %915 = verf.f32 %v472_v43  ;;  %v805_v46 = vpop.f32.mrb[8].mxu0 }
 0x229   :  { %v906_v24 = vpop.eup %905  ;;  %v499_v49 = vadd.f32 1.0, %v904_v36  ;;  %v1298_v50 = vadd.f32 %v805_v46, %v1284_v54  ;;  %v420_v11 = vpop.f32.mrb[9].mxu0 }
 0x22a   :  { %v908_v51 = vpop.eup %907  ;;  %v502_v23 = vadd.f32 1.0, %v906_v24  ;;  %v1301_v44 = vadd.f32 %v1284_v54, %v420_v11  ;;  %v806_v57 = vpop.f32.mrb[10].mxu0  ;;  %v517_v59 = vmul.f32 %v501_v56, %v453_v52 }
 0x22b   :  { %v500_v37 = vadd.f32 1.0, %v908_v51  ;;  %v477_v17 = vmul.f32 0.70710677, %v1298_v50  ;;  %v423_v58 = vpop.f32.mrb[11].mxu0  ;;  %v432_v35 = vadd.f32 %v806_v57, %v1284_v54  ;;  %v515_v62 = vmul.f32 %v499_v49, %v451_v29 }
 0x22c   :  { %v518_v60 = vmul.f32 %v502_v23, %v454_v28  ;;  %v475_v61 = vmul.f32 0.70710677, %v1301_v44  ;;  %v424_v21 = vadd.f32 %v1284_v54, %v423_v58  ;;  %v459_v49 = vmul.f32 0.5, %v1301_v44 }
 0x22d   :  { %v516_v63 = vmul.f32 %v500_v37, %v452_v53  ;;  %917 = verf.f32 %v477_v17  ;;  %v478_v3 = vmul.f32 0.70710677, %v432_v35  ;;  %v462_v46 = vmul.f32 0.5, %v432_v35 }
 0x22e   :  { %v532_v2 = vpack.c.bf16 %v518_v60, %v517_v59  ;;  %919 = verf.f32 %v475_v61  ;;  %v476_v45 = vmul.f32 0.70710677, %v424_v21  ;;  %v460_v11 = vmul.f32 0.5, %v424_v21 }
 0x22f   :  { %v910_v4 = vpop.eup %909  ;;  %v531_v47 = vpack.c.bf16 %v516_v63, %v515_v62  ;;  %921 = verf.f32 %v478_v3 }
 0x230   :  { %v912_v5 = vpop.eup %911  ;;  %v809_v6 = vpop.f32.mrb[12].mxu0  ;;  %v505_v48 = vadd.f32 1.0, %v910_v4  ;;  %923 = verf.f32 %v476_v45 }
 0x231   :  { %v914_v25 = vpop.eup %913  ;;  %v445_v7 = vadd.f32 %v809_v6, %v1284_v54  ;;  %v436_v8 = vpop.f32.mrb[13].mxu0  ;;  %827 = vmatprep.mubr.bf16.mxu0 %v531_v47  ;;  %v503_v18 = vadd.f32 1.0, %v912_v5  ;;  %v1317_v6 = vld [vmem:[%s1453_s6] ss:$0 sm:$0xff] }
 0x232   :  { %v916_v9 = vpop.eup %915  ;;  %v506_v13 = vadd.f32 1.0, %v914_v25  ;;  %v437_v14 = vadd.f32 %v1284_v54, %v436_v8  ;;  %v810_v15 = vpop.f32.mrb[14].mxu0  ;;  %828 = vmatmul.mubr.bf16.vlgmr.msra.gmra.mrb[16].mxu0 %v532_v2  ;;  %v521_v32 = vmul.f32 %v505_v48, %v457_v33 }
 0x233   :  { %v481_v55 = vmul.f32 0.70710677, %v445_v7  ;;  %v448_v22 = vadd.f32 %v810_v15, %v1284_v54  ;;  %v439_v16 = vpop.f32.mrb[15].mxu0  ;;  %v504_v26 = vadd.f32 1.0, %v916_v9  ;;  %v519_v39 = vmul.f32 %v503_v18, %v455_v19  ;;  %v933_v9 = vld [vmem:[%s1447_s0 + $0x10] sm:$0xff]  ;;  %v934_v15 = vld [vmem:[%s1447_s0] sm:$0xff] }
 0x234   :  { %v522_v27 = vmul.f32 %v506_v13, %v458_v12  ;;  %v479_v31 = vmul.f32 0.70710677, %v437_v14  ;;  %v440_v0 = vadd.f32 %v1284_v54, %v439_v16  ;;  %v461_v54 = vmul.f32 0.5, %v1298_v50  ;;  %v936_v16 = vld [vmem:[%s1447_s0 + $0x8] sm:$0xff] }
 0x235   :  { %925 = verf.f32 %v481_v55  ;;  %v482_v20 = vmul.f32 0.70710677, %v448_v22  ;;  %v520_v1 = vmul.f32 %v504_v26, %v456_v30  ;;  %v465_v50 = vmul.f32 0.5, %v445_v7  ;;  %v935_v55 = vld [vmem:[%s1447_s0 + $0x18] sm:$0xff] }
 0x236   :  { %927 = verf.f32 %v479_v31  ;;  %v480_v38 = vmul.f32 0.70710677, %v440_v0  ;;  %v534_v34 = vpack.c.bf16 %v522_v27, %v521_v32  ;;  %v466_v35 = vmul.f32 0.5, %v448_v22 }
 0x237   :  { %v918_v40 = vpop.eup %917  ;;  %929 = verf.f32 %v482_v20  ;;  %v533_v43 = vpack.c.bf16 %v520_v1, %v519_v39  ;;  %v463_v63 = vmul.f32 0.5, %v437_v14  ;;  %v464_v44 = vmul.f32 0.5, %v440_v0  ;;  %v937_v20 = vld [vmem:[%s1447_s0 + $0x30] sm:$0xff] }
 0x238   :  { %v920_v42 = vpop.eup %919  ;;  %931 = verf.f32 %v480_v38  ;;  %v509_v10 = vadd.f32 1.0, %v918_v40  ;;  %v938_v40 = vld [vmem:[%s1447_s0 + $0x20] sm:$0xff] }
 0x239   :  { %v922_v36 = vpop.eup %921  ;;  %v507_v56 = vadd.f32 1.0, %v920_v42  ;;  %831 = vmatprep.mubr.bf16.mxu1 %v533_v43  ;;  %v939_v43 = vld [vmem:[%s1447_s0 + $0x38] sm:$0xff] }
 0x23a   :  { %v924_v41 = vpop.eup %923  ;;  %v510_v24 = vadd.f32 1.0, %v922_v36  ;;  %832 = vmatmul.mubr.bf16.vlgmr.msra.gmra.mrb[0].mxu1 %v534_v34  ;;  %v525_v52 = vmul.f32 %v509_v10, %v461_v54  ;;  %v940_v36 = vld [vmem:[%s1447_s0 + $0x28] sm:$0xff] }
 0x23b   :  { %v508_v51 = vadd.f32 1.0, %v924_v41  ;;  %v523_v23 = vmul.f32 %v507_v56, %v459_v49 }
 0x23c   :  { %v526_v28 = vmul.f32 %v510_v24, %v462_v46 }
 0x23d   :  { %v524_v57 = vmul.f32 %v508_v51, %v460_v11  ;;  %v941_v11 = vld [vmem:[%s1447_s0 + $0x50] sm:$0xff] }
 0x23e   :  { %v536_v53 = vpack.c.bf16 %v526_v28, %v525_v52 }
 0x23f   :  { %v926_v29 = vpop.eup %925  ;;  %v535_v58 = vpack.c.bf16 %v524_v57, %v523_v23  ;;  %v942_v23 = vld [vmem:[%s1447_s0 + $0x40] sm:$0xff] }
 0x240   :  { %v928_v37 = vpop.eup %927  ;;  %v513_v17 = vadd.f32 1.0, %v926_v29 }
 0x241   :  { %v930_v59 = vpop.eup %929  ;;  %v511_v60 = vadd.f32 1.0, %v928_v37  ;;  %835 = vmatprep.mubr.bf16.mxu1 %v535_v58 }
 0x242   :  { %v932_v61 = vpop.eup %931  ;;  %v514_v62 = vadd.f32 1.0, %v930_v59  ;;  %836 = vmatmul.mubr.bf16.gmra.mrb[4].mxu1 %v536_v53  ;;  %v529_v2 = vmul.f32 %v513_v17, %v465_v50  ;;  %v943_v53 = vld [vmem:[%s1447_s0 + $0x58] sm:$0xff]  ;;  %v944_v17 = vld [vmem:[%s1447_s0 + $0x48] sm:$0xff] }
 0x243   :  { %v512_v21 = vadd.f32 1.0, %v932_v61  ;;  %v527_v4 = vmul.f32 %v511_v60, %v463_v63 }
 0x244   :  { %v530_v3 = vmul.f32 %v514_v62, %v466_v35  ;;  %v945_v62 = vld [vmem:[%s1447_s0 + $0x70] sm:$0xff] }
 0x245   :  { %v528_v45 = vmul.f32 %v512_v21, %v464_v44 }
 0x246   :  { %v538_v47 = vpack.c.bf16 %v530_v3, %v529_v2  ;;  %v946_v2 = vld [vmem:[%s1447_s0 + $0x60] sm:$0xff] }
 0x247   :  { %v537_v5 = vpack.c.bf16 %v528_v45, %v527_v4  ;;  %v947_v45 = vld [vmem:[%s1447_s0 + $0x78] sm:$0xff] }
 0x249   :  { %839 = vmatprep.mubr.bf16.mxu1 %v537_v5  ;;  %v948_v5 = vld [vmem:[%s1447_s0 + $0x68] sm:$0xff] }
 0x24a   :  { %840 = vmatmul.mubr.bf16.gmra.mrb[8].mxu1 %v538_v47 }
 0x305   :  { %v829_v25 = vpop.f32.mrb[16].mxu0 }
 0x306   :  { %v653_v33 = vadd.f32 %v829_v25, %v1317_v6  ;;  %v644_v48 = vpop.f32.mrb[17].mxu0 }
 0x307   :  { %v645_v7 = vadd.f32 %v1317_v6, %v644_v48  ;;  %v830_v8 = vpop.f32.mrb[18].mxu0 }
 0x308   :  { %v709_v12 = vadd.f32 %v933_v9, %v653_v33  ;;  %v656_v13 = vadd.f32 %v830_v8, %v1317_v6  ;;  %v647_v14 = vpop.f32.mrb[19].mxu0 }
 0x309   :  { %v707_v18 = vadd.f32 %v934_v15, %v645_v7  ;;  %v648_v19 = vadd.f32 %v1317_v6, %v647_v14 }
 0x30a   :  { %725 = vst.msk [vmem:[%s1454_s7 + $0x10] sm:$0xff] %vm45_vm0, %v709_v12  ;;  %v710_v22 = vadd.f32 %v935_v55, %v656_v13 }
 0x30b   :  { %723 = vst.msk [vmem:[%s1454_s7] sm:$0xff] %vm45_vm0, %v707_v18  ;;  %v708_v26 = vadd.f32 %v936_v16, %v648_v19 }
 0x30c   :  { %726 = vst.msk [vmem:[%s1454_s7 + $0x18] sm:$0xff] %vm45_vm0, %v710_v22 }
 0x30d   :  { %724 = vst.msk [vmem:[%s1454_s7 + $0x8] sm:$0xff] %vm45_vm0, %v708_v26  ;;  %v833_v27 = vpop.f32.mrb[0].mxu1 }
 0x30e   :  { %v669_v30 = vadd.f32 %v833_v27, %v1317_v6  ;;  %v660_v31 = vpop.f32.mrb[1].mxu1 }
 0x30f   :  { %v661_v0 = vadd.f32 %v1317_v6, %v660_v31  ;;  %v834_v32 = vpop.f32.mrb[2].mxu1 }
 0x310   :  { %v713_v38 = vadd.f32 %v937_v20, %v669_v30  ;;  %v672_v39 = vadd.f32 %v834_v32, %v1317_v6  ;;  %v663_v1 = vpop.f32.mrb[3].mxu1 }
 0x311   :  { %v711_v34 = vadd.f32 %v938_v40, %v661_v0  ;;  %v664_v42 = vadd.f32 %v1317_v6, %v663_v1 }
 0x312   :  { %729 = vst.msk [vmem:[%s1454_s7 + $0x30] sm:$0xff] %vm45_vm0, %v713_v38  ;;  %v714_v10 = vadd.f32 %v939_v43, %v672_v39 }
 0x313   :  { %727 = vst.msk [vmem:[%s1454_s7 + $0x20] sm:$0xff] %vm45_vm0, %v711_v34  ;;  %v712_v56 = vadd.f32 %v940_v36, %v664_v42 }
 0x314   :  { %730 = vst.msk [vmem:[%s1454_s7 + $0x38] sm:$0xff] %vm45_vm0, %v714_v10 }
 0x315   :  { %728 = vst.msk [vmem:[%s1454_s7 + $0x28] sm:$0xff] %vm45_vm0, %v712_v56  ;;  %v837_v41 = vpop.f32.mrb[4].mxu1 }
 0x316   :  { %v685_v54 = vadd.f32 %v837_v41, %v1317_v6  ;;  %v676_v46 = vpop.f32.mrb[5].mxu1 }
 0x317   :  { %v677_v24 = vadd.f32 %v1317_v6, %v676_v46  ;;  %v838_v49 = vpop.f32.mrb[6].mxu1 }
 0x318   :  { %v717_v51 = vadd.f32 %v941_v11, %v685_v54  ;;  %v688_v52 = vadd.f32 %v838_v49, %v1317_v6  ;;  %v679_v28 = vpop.f32.mrb[7].mxu1 }
 0x319   :  { %v715_v57 = vadd.f32 %v942_v23, %v677_v24  ;;  %v680_v29 = vadd.f32 %v1317_v6, %v679_v28 }
 0x31a   :  { %733 = vst.msk [vmem:[%s1454_s7 + $0x50] sm:$0xff] %vm45_vm0, %v717_v51  ;;  %v718_v37 = vadd.f32 %v943_v53, %v688_v52 }
 0x31b   :  { %731 = vst.msk [vmem:[%s1454_s7 + $0x40] sm:$0xff] %vm45_vm0, %v715_v57  ;;  %v716_v58 = vadd.f32 %v944_v17, %v680_v29 }
 0x31c   :  { %734 = vst.msk [vmem:[%s1454_s7 + $0x58] sm:$0xff] %vm45_vm0, %v718_v37 }
 0x31d   :  { %732 = vst.msk [vmem:[%s1454_s7 + $0x48] sm:$0xff] %vm45_vm0, %v716_v58  ;;  %v841_v59 = vpop.f32.mrb[8].mxu1 }
 0x31e   :  { %v701_v60 = vadd.f32 %v841_v59, %v1317_v6  ;;  %v692_v61 = vpop.f32.mrb[9].mxu1 }
 0x31f   :  { %v693_v50 = vadd.f32 %v1317_v6, %v692_v61  ;;  %v842_v35 = vpop.f32.mrb[10].mxu1 }
 0x320   :  { %v721_v63 = vadd.f32 %v945_v62, %v701_v60  ;;  %v704_v44 = vadd.f32 %v842_v35, %v1317_v6  ;;  %v695_v21 = vpop.f32.mrb[11].mxu1 }
 0x321   :  { %v719_v3 = vadd.f32 %v946_v2, %v693_v50  ;;  %v696_v4 = vadd.f32 %v1317_v6, %v695_v21 }
 0x322   :  { %737 = vst.msk [vmem:[%s1454_s7 + $0x70] sm:$0xff] %vm45_vm0, %v721_v63  ;;  %v722_v47 = vadd.f32 %v947_v45, %v704_v44 }
 0x323   :  { %735 = vst.msk [vmem:[%s1454_s7 + $0x60] sm:$0xff] %vm45_vm0, %v719_v3  ;;  %v720_v6 = vadd.f32 %v948_v5, %v696_v4 }
 0x324   :  { %738 = vst.msk [vmem:[%s1454_s7 + $0x78] sm:$0xff] %vm45_vm0, %v722_v47 }
 0x325   :  { %736 = vst.msk [vmem:[%s1454_s7 + $0x68] sm:$0xff] %vm45_vm0, %v720_v6 }

// kernel: _lambda_.13
= control target key start
LH: loop header
LB: loop body
LE: loop exit
PB: predicated region body
PF: predicated region fallthrough
CT: control target
= control target key end

     0   :  { %vm62_vm0 = vcmask 261120   ;;  %s384_s1 = inlined_call_operand.vmem [shape: bf16[32,128], index: 1, kind: input, shape index: {}]   ;;  %s385_s0 = inlined_call_operand.vmem [shape: f32[128,32], index: 0, kind: input, shape index: {}]   ;;  %s386_s2 = inlined_call_operand.vmem [shape: f32[1,128], index: 2, kind: input, shape index: {}]   ;;  %s387_s3 = inlined_call_operand.vmem [shape: f32[128,128], index: 3, kind: output, shape index: {}]  }
   0x1   :  { %v249_v0 = vld [vmem:[%s384_s1] sm:$0xff]   ;;  %v250_v1 = vld [vmem:[%s384_s1 + $0x8] sm:$0xff]   ;;  %v17_v7 = vld [vmem:[%s385_s0 + $0x10] sm:$0xff] }
   0x2   :  { %225 = vmatprep.subr.bf16.mxu0 %v249_v0  ;;  %245 = vmatprep.subr.bf16.mxu1 %v249_v0  ;;  %v15_v2 = vld [vmem:[%s385_s0] sm:$0xff]  ;;  %v16_v3 = vld [vmem:[%s385_s0 + $0x8] sm:$0xff]  ;;  %v18_v8 = vld [vmem:[%s385_s0 + $0x18] sm:$0xff] }
   0x3   :  { %v23_v4 = vld [vmem:[%s385_s0 + $0x40] sm:$0xff]  ;;  %226 = vmatpush3.bf16.msra.mxu0 %v249_v0  ;;  %247 = vmatpush3.bf16.msra.mxu1 %v249_v0  ;;  %v31_v5 = vpack.c.bf16 %v16_v3, %v15_v2  ;;  %v24_v6 = vld [vmem:[%s385_s0 + $0x48] sm:$0xff]  ;;  %v25_v10 = vld [vmem:[%s385_s0 + $0x50] sm:$0xff]  ;;  %v32_v16 = vpack.c.bf16 %v18_v8, %v17_v7 }
   0x4   :  { %227 = vmatprep.subr.bf16.mxu0 %v250_v1  ;;  %246 = vmatprep.subr.bf16.mxu1 %v250_v1  ;;  %v35_v9 = vpack.c.bf16 %v24_v6, %v23_v4  ;;  %v26_v11 = vld [vmem:[%s385_s0 + $0x58] sm:$0xff]  ;;  %v19_v12 = vld [vmem:[%s385_s0 + $0x20] sm:$0xff]  ;;  %v20_v13 = vld [vmem:[%s385_s0 + $0x28] sm:$0xff] }
   0x5   :  { %229 = vmatprep.mubr.msk.bf16.mxu0 %vm62_vm0, %v31_v5  ;;  %v27_v14 = vld [vmem:[%s385_s0 + $0x60] sm:$0xff]  ;;  %v28_v15 = vld [vmem:[%s385_s0 + $0x68] sm:$0xff]  ;;  %v36_v17 = vpack.c.bf16 %v26_v11, %v25_v10  ;;  %v33_v18 = vpack.c.bf16 %v20_v13, %v19_v12  ;;  %v21_v20 = vld [vmem:[%s385_s0 + $0x30] sm:$0xff] }
   0x6   :  { %237 = vmatprep.mubr.msk.bf16.mxu1 %vm62_vm0, %v35_v9  ;;  %v37_v19 = vpack.c.bf16 %v28_v15, %v27_v14  ;;  %v22_v21 = vld [vmem:[%s385_s0 + $0x38] sm:$0xff]  ;;  %v29_v22 = vld [vmem:[%s385_s0 + $0x70] sm:$0xff]  ;;  %v204_v26 = vld [vmem:[%s386_s2] ss:$0 sm:$0xff] }
   0x7   :  { %228 = vmatpush3.bf16.msra.mxu0 %v250_v1  ;;  %248 = vmatpush3.bf16.msra.mxu1 %v250_v1  ;;  %v30_v23 = vld [vmem:[%s385_s0 + $0x78] sm:$0xff]  ;;  %v34_v24 = vpack.c.bf16 %v22_v21, %v21_v20 }
   0x8   :  { %v38_v25 = vpack.c.bf16 %v30_v23, %v29_v22 }
   0xa   :  { %230 = vmatmul.mubr.msk.bf16.vlgmr.msra.gmra.mrb[0].mxu0 %vm62_vm0, %v32_v16  ;;  %238 = vmatmul.mubr.msk.bf16.vlgmr.msra.gmra.mrb[0].mxu1 %vm62_vm0, %v36_v17 }
   0xb   :  { %233 = vmatprep.mubr.msk.bf16.mxu0 %vm62_vm0, %v33_v18  ;;  %241 = vmatprep.mubr.msk.bf16.mxu1 %vm62_vm0, %v37_v19 }
  0x12   :  { %234 = vmatmul.mubr.msk.bf16.gmra.mrb[4].mxu0 %vm62_vm0, %v34_v24  ;;  %242 = vmatmul.mubr.msk.bf16.gmra.mrb[4].mxu1 %vm62_vm0, %v38_v25 }
  0xdd   :  { %v231_v27 = vpop.f32.mrb[0].mxu0  ;;  %v239_v28 = vpop.f32.mrb[0].mxu1 }
  0xde   :  { %v130_v29 = vadd.f32 %v231_v27, %v204_v26  ;;  %v162_v30 = vadd.f32 %v239_v28, %v204_v26  ;;  %v121_v31 = vpop.f32.mrb[1].mxu0  ;;  %v153_v32 = vpop.f32.mrb[1].mxu1 }
  0xdf   :  { %v122_v33 = vadd.f32 %v204_v26, %v121_v31  ;;  %v154_v34 = vadd.f32 %v204_v26, %v153_v32  ;;  %v232_v35 = vpop.f32.mrb[2].mxu0  ;;  %v240_v36 = vpop.f32.mrb[2].mxu1 }
  0xe0   :  { %186 = vst [vmem:[%s387_s3 + $0x10] sm:$0xff] %v130_v29  ;;  %194 = vst [vmem:[%s387_s3 + $0x50] sm:$0xff] %v162_v30  ;;  %v133_v37 = vadd.f32 %v232_v35, %v204_v26  ;;  %v165_v38 = vadd.f32 %v240_v36, %v204_v26  ;;  %v124_v39 = vpop.f32.mrb[3].mxu0  ;;  %v156_v40 = vpop.f32.mrb[3].mxu1 }
  0xe1   :  { %184 = vst [vmem:[%s387_s3] sm:$0xff] %v122_v33  ;;  %192 = vst [vmem:[%s387_s3 + $0x40] sm:$0xff] %v154_v34  ;;  %v125_v41 = vadd.f32 %v204_v26, %v124_v39  ;;  %v157_v42 = vadd.f32 %v204_v26, %v156_v40 }
  0xe2   :  { %187 = vst [vmem:[%s387_s3 + $0x18] sm:$0xff] %v133_v37  ;;  %195 = vst [vmem:[%s387_s3 + $0x58] sm:$0xff] %v165_v38 }
  0xe3   :  { %185 = vst [vmem:[%s387_s3 + $0x8] sm:$0xff] %v125_v41  ;;  %193 = vst [vmem:[%s387_s3 + $0x48] sm:$0xff] %v157_v42 }
  0xe5   :  { %v235_v43 = vpop.f32.mrb[4].mxu0  ;;  %v243_v44 = vpop.f32.mrb[4].mxu1 }
  0xe6   :  { %v146_v45 = vadd.f32 %v235_v43, %v204_v26  ;;  %v178_v46 = vadd.f32 %v243_v44, %v204_v26  ;;  %v137_v47 = vpop.f32.mrb[5].mxu0  ;;  %v169_v48 = vpop.f32.mrb[5].mxu1 }
  0xe7   :  { %v138_v49 = vadd.f32 %v204_v26, %v137_v47  ;;  %v170_v50 = vadd.f32 %v204_v26, %v169_v48  ;;  %v236_v51 = vpop.f32.mrb[6].mxu0  ;;  %v244_v52 = vpop.f32.mrb[6].mxu1 }
  0xe8   :  { %190 = vst [vmem:[%s387_s3 + $0x30] sm:$0xff] %v146_v45  ;;  %198 = vst [vmem:[%s387_s3 + $0x70] sm:$0xff] %v178_v46  ;;  %v149_v53 = vadd.f32 %v236_v51, %v204_v26  ;;  %v181_v54 = vadd.f32 %v244_v52, %v204_v26  ;;  %v140_v55 = vpop.f32.mrb[7].mxu0  ;;  %v172_v56 = vpop.f32.mrb[7].mxu1 }
  0xe9   :  { %188 = vst [vmem:[%s387_s3 + $0x20] sm:$0xff] %v138_v49  ;;  %196 = vst [vmem:[%s387_s3 + $0x60] sm:$0xff] %v170_v50  ;;  %v141_v57 = vadd.f32 %v204_v26, %v140_v55  ;;  %v173_v58 = vadd.f32 %v204_v26, %v172_v56 }
  0xea   :  { %191 = vst [vmem:[%s387_s3 + $0x38] sm:$0xff] %v149_v53  ;;  %199 = vst [vmem:[%s387_s3 + $0x78] sm:$0xff] %v181_v54 }
  0xeb   :  { %189 = vst [vmem:[%s387_s3 + $0x28] sm:$0xff] %v141_v57  ;;  %197 = vst [vmem:[%s387_s3 + $0x68] sm:$0xff] %v173_v58 }

// kernel: _lambda_.9
= control target key start
LH: loop header
LB: loop body
LE: loop exit
PB: predicated region body
PF: predicated region fallthrough
CT: control target
= control target key end

     0   :  { %vm48_vm0 = vcmask 261120   ;;  %vm5989_vm1 = vmmov 0   ;;  %s5991_s21 = smov 64   ;;  %vm489_vm2 = vcmask 64512   ;;  %vm911_vm3 = vcmask 130048   ;;  %s5992_s15 = smov 88   ;;  %s7960_s0 = inlined_call_operand.vmem [shape: f32[128,32], index: 0, kind: input, shape index: {}]   ;;  %s7961_s3 = inlined_call_operand.vmem [shape: bf16[32,96], index: 3, kind: input, shape index: {}]   ;;  %s7962_s1 = inlined_call_operand.vmem [shape: f32[1,32], index: 1, kind: input, shape index: {}]   ;;  %s7963_s2 = inlined_call_operand.vmem [shape: f32[1,32], index: 2, kind: input, shape index: {}]   ;;  %s7964_s4 = inlined_call_operand.vmem [shape: f32[1,96], index: 4, kind: input, shape index: {}]   ;;  %s7965_s5 = inlined_call_operand.vmem [shape: f32[4,4,16,16], index: 5, kind: input, shape index: {}]   ;;  %s7966_s6 = inlined_call_operand.vmem [shape: bf16[32,32], index: 6, kind: input, shape index: {}]   ;;  %s7967_s7 = inlined_call_operand.vmem [shape: f32[1,32], index: 7, kind: input, shape index: {}]   ;;  %s7968_s8 = inlined_call_operand.vmem [shape: f32[128,32], index: 8, kind: output, shape index: {}]  }
   0x1   :  { %v30_v0 = vld [vmem:[%s7960_s0] sm:$0xff]  ;;  %v32_v1 = vld [vmem:[%s7960_s0 + $0x10] sm:$0xff]  ;;  %v31_v2 = vld [vmem:[%s7960_s0 + $0x8] sm:$0xff]  ;;  %s5993_s16 = smov 120   ;;  %s5994_s20 = smov 56   ;;  %vm4683_vm4 = vcmask 195584  }
   0x2   :  { %v49_v3 = vsel %vm48_vm0, %v30_v0, 0.0  ;;  %v55_v4 = vsel %vm48_vm0, %v32_v1, 0.0  ;;  %v33_v5 = vld [vmem:[%s7960_s0 + $0x18] sm:$0xff]  ;;  %v52_v6 = vsel %vm48_vm0, %v31_v2, 0.0  ;;  %v34_v8 = vld [vmem:[%s7960_s0 + $0x20] sm:$0xff]  ;;  %v35_v9 = vld [vmem:[%s7960_s0 + $0x28] sm:$0xff] }
   0x3   :  { %50 = vadd.xlane.f32.xlu0 %v49_v3  ;;  %56 = vadd.xlane.f32.xlu1 %v55_v4  ;;  %v58_v7 = vsel %vm48_vm0, %v33_v5, 0.0  ;;  %v61_v10 = vsel %vm48_vm0, %v34_v8, 0.0  ;;  %v64_v11 = vsel %vm48_vm0, %v35_v9, 0.0  ;;  %v6076_v12 = vld [vmem:[%s7960_s0 + $0x30] sm:$0xff]  ;;  %v6081_v13 = vld [vmem:[%s7960_s0 + $0x38] sm:$0xff]  ;;  %v6090_v16 = vld [vmem:[%s7960_s0 + $0x40] sm:$0xff] }
   0x4   :  { %v67_v14 = vsel %vm48_vm0, %v6076_v12, 0.0  ;;  %v70_v15 = vsel %vm48_vm0, %v6081_v13, 0.0  ;;  %v6095_v17 = vld [vmem:[%s7960_s0 + $0x48] sm:$0xff]  ;;  %v73_v18 = vsel %vm48_vm0, %v6090_v16, 0.0  ;;  %v6104_v20 = vld [vmem:[%s7960_s0 + $0x50] sm:$0xff]  ;;  %v6109_v21 = vld [vmem:[%s7960_s0 + $0x58] sm:$0xff] }
   0x5   :  { %v76_v19 = vsel %vm48_vm0, %v6095_v17, 0.0  ;;  %v79_v22 = vsel %vm48_vm0, %v6104_v20, 0.0  ;;  %v82_v23 = vsel %vm48_vm0, %v6109_v21, 0.0  ;;  %v6118_v24 = vld [vmem:[%s7960_s0 + $0x60] sm:$0xff]  ;;  %v6123_v25 = vld [vmem:[%s7960_s0 + $0x68] sm:$0xff]  ;;  %v6132_v28 = vld [vmem:[%s7960_s0 + $0x70] sm:$0xff] }
   0x6   :  { %v85_v26 = vsel %vm48_vm0, %v6118_v24, 0.0  ;;  %v88_v27 = vsel %vm48_vm0, %v6123_v25, 0.0  ;;  %v6137_v29 = vld [vmem:[%s7960_s0 + $0x78] sm:$0xff]  ;;  %v91_v30 = vsel %vm48_vm0, %v6132_v28, 0.0  ;;  %s5995_s30 = smov 80   ;;  %s5996_s9 = smov 112  }
   0x7   :  { %53 = vadd.xlane.f32.xlu0 %v52_v6  ;;  %59 = vadd.xlane.f32.xlu1 %v58_v7  ;;  %v94_v31 = vsel %vm48_vm0, %v6137_v29, 0.0  ;;  %s5997_s18 = smov 48   ;;  %s5998_s22 = smov 72  }
   0x8   :  { %s5999_s23 = smov 104   ;;  %s6001_s17 = smov 8  }
   0xb   :  { %62 = vadd.xlane.f32.xlu0 %v61_v10  ;;  %65 = vadd.xlane.f32.xlu1 %v64_v11 }
   0xf   :  { %68 = vadd.xlane.f32.xlu0 %v67_v14  ;;  %71 = vadd.xlane.f32.xlu1 %v70_v15 }
  0x13   :  { %74 = vadd.xlane.f32.xlu0 %v73_v18  ;;  %77 = vadd.xlane.f32.xlu1 %v76_v19 }
  0x17   :  { %80 = vadd.xlane.f32.xlu0 %v79_v22  ;;  %83 = vadd.xlane.f32.xlu1 %v82_v23 }
  0x1b   :  { %86 = vadd.xlane.f32.xlu0 %v85_v26  ;;  %89 = vadd.xlane.f32.xlu1 %v88_v27 }
  0x1f   :  { %92 = vadd.xlane.f32.xlu0 %v91_v30  ;;  %95 = vadd.xlane.f32.xlu1 %v94_v31 }
  0x90   :  { %v51_v32 = vpop.xlane.xlu0 %50  ;;  %v57_v33 = vpop.xlane.xlu1 %56 }
  0x91   :  { %v98_v34 = vmul.f32 0.03125, %v51_v32  ;;  %v100_v35 = vmul.f32 0.03125, %v57_v33 }
  0x93   :  { %v6143_v36 = vsub.f32 %v30_v0, %v98_v34  ;;  %v6145_v37 = vsub.f32 %v32_v1, %v100_v35 }
  0x94   :  { %v54_v38 = vpop.xlane.xlu0 %53  ;;  %v60_v39 = vpop.xlane.xlu1 %59 }
  0x95   :  { %v99_v40 = vmul.f32 0.03125, %v54_v38  ;;  %v101_v41 = vmul.f32 0.03125, %v60_v39  ;;  %v130_v42 = vmul.f32 %v6143_v36, %v6143_v36  ;;  %v132_v43 = vmul.f32 %v6145_v37, %v6145_v37 }
  0x97   :  { %v6151_v44 = vsub.f32 %v31_v2, %v99_v40  ;;  %v6153_v45 = vsub.f32 %v33_v5, %v101_v41  ;;  %v146_v46 = vsel %vm48_vm0, %v130_v42, 0.0  ;;  %v152_v49 = vsel %vm48_vm0, %v132_v43, 0.0 }
  0x98   :  { %147 = vadd.xlane.f32.xlu0 %v146_v46  ;;  %v63_v47 = vpop.xlane.xlu0 %62  ;;  %v66_v48 = vpop.xlane.xlu1 %65 }
  0x99   :  { %v102_v50 = vmul.f32 0.03125, %v63_v47  ;;  %v103_v51 = vmul.f32 0.03125, %v66_v48  ;;  %v131_v52 = vmul.f32 %v6151_v44, %v6151_v44  ;;  %v133_v53 = vmul.f32 %v6153_v45, %v6153_v45 }
  0x9b   :  { %v6161_v54 = vsub.f32 %v34_v8, %v102_v50  ;;  %v6163_v55 = vsub.f32 %v35_v9, %v103_v51  ;;  %v149_v56 = vsel %vm48_vm0, %v131_v52, 0.0  ;;  %v155_v59 = vsel %vm48_vm0, %v133_v53, 0.0  ;;  %v5697_v53 = vld [vmem:[%s7961_s3 + $0x8] sm:$0xff]  }
  0x9c   :  { %153 = vadd.xlane.f32.xlu0 %v152_v49  ;;  %150 = vadd.xlane.f32.xlu1 %v149_v56  ;;  %v69_v57 = vpop.xlane.xlu0 %68  ;;  %v72_v58 = vpop.xlane.xlu1 %71 }
  0x9d   :  { %v104_v60 = vmul.f32 0.03125, %v69_v57  ;;  %v105_v61 = vmul.f32 0.03125, %v72_v58  ;;  %v134_v62 = vmul.f32 %v6161_v54, %v6161_v54  ;;  %v135_v63 = vmul.f32 %v6163_v55, %v6163_v55 }
  0x9f   :  { %v6172_v0 = vsub.f32 %v6076_v12, %v104_v60  ;;  %v6175_v1 = vsub.f32 %v6081_v13, %v105_v61  ;;  %v158_v2 = vsel %vm48_vm0, %v134_v62, 0.0  ;;  %v161_v5 = vsel %vm48_vm0, %v135_v63, 0.0 }
  0xa0   :  { %156 = vadd.xlane.f32.xlu1 %v155_v59  ;;  %159 = vadd.xlane.f32.xlu0 %v158_v2  ;;  %v75_v3 = vpop.xlane.xlu0 %74  ;;  %v78_v4 = vpop.xlane.xlu1 %77 }
  0xa1   :  { %v106_v6 = vmul.f32 0.03125, %v75_v3  ;;  %v107_v7 = vmul.f32 0.03125, %v78_v4  ;;  %v136_v8 = vmul.f32 %v6172_v0, %v6172_v0  ;;  %v137_v9 = vmul.f32 %v6175_v1, %v6175_v1 }
  0xa3   :  { %v6184_v10 = vsub.f32 %v6090_v16, %v106_v6  ;;  %v6187_v11 = vsub.f32 %v6095_v17, %v107_v7  ;;  %v164_v12 = vsel %vm48_vm0, %v136_v8, 0.0  ;;  %v167_v15 = vsel %vm48_vm0, %v137_v9, 0.0 }
  0xa4   :  { %162 = vadd.xlane.f32.xlu1 %v161_v5  ;;  %165 = vadd.xlane.f32.xlu0 %v164_v12  ;;  %v81_v13 = vpop.xlane.xlu0 %80  ;;  %v84_v14 = vpop.xlane.xlu1 %83 }
  0xa5   :  { %v108_v18 = vmul.f32 0.03125, %v81_v13  ;;  %v109_v19 = vmul.f32 0.03125, %v84_v14  ;;  %v138_v22 = vmul.f32 %v6184_v10, %v6184_v10  ;;  %v139_v16 = vmul.f32 %v6187_v11, %v6187_v11 }
  0xa7   :  { %v6196_v23 = vsub.f32 %v6104_v20, %v108_v18  ;;  %v6199_v17 = vsub.f32 %v6109_v21, %v109_v19  ;;  %v170_v26 = vsel %vm48_vm0, %v138_v22, 0.0  ;;  %v173_v31 = vsel %vm48_vm0, %v139_v16, 0.0 }
  0xa8   :  { %168 = vadd.xlane.f32.xlu1 %v167_v15  ;;  %171 = vadd.xlane.f32.xlu0 %v170_v26  ;;  %v87_v27 = vpop.xlane.xlu0 %86  ;;  %v90_v30 = vpop.xlane.xlu1 %89 }
  0xa9   :  { %v110_v32 = vmul.f32 0.03125, %v87_v27  ;;  %v111_v33 = vmul.f32 0.03125, %v90_v30  ;;  %v140_v34 = vmul.f32 %v6196_v23, %v6196_v23  ;;  %v141_v20 = vmul.f32 %v6199_v17, %v6199_v17 }
  0xab   :  { %v6208_v35 = vsub.f32 %v6118_v24, %v110_v32  ;;  %v6211_v21 = vsub.f32 %v6123_v25, %v111_v33  ;;  %v176_v38 = vsel %vm48_vm0, %v140_v34, 0.0  ;;  %v179_v41 = vsel %vm48_vm0, %v141_v20, 0.0 }
  0xac   :  { %174 = vadd.xlane.f32.xlu1 %v173_v31  ;;  %177 = vadd.xlane.f32.xlu0 %v176_v38  ;;  %v93_v39 = vpop.xlane.xlu0 %92  ;;  %v96_v40 = vpop.xlane.xlu1 %95  ;;  %v6243_v31 = vld [vmem:[%s7962_s1] ss:$0 sm:$0xff] }
  0xad   :  { %v112_v42 = vmul.f32 0.03125, %v93_v39  ;;  %v113_v43 = vmul.f32 0.03125, %v96_v40  ;;  %v142_v46 = vmul.f32 %v6208_v35, %v6208_v35  ;;  %v143_v24 = vmul.f32 %v6211_v21, %v6211_v21 }
  0xaf   :  { %v6220_v47 = vsub.f32 %v6132_v28, %v112_v42  ;;  %v6223_v25 = vsub.f32 %v6137_v29, %v113_v43  ;;  %v182_v48 = vsel %vm48_vm0, %v142_v46, 0.0  ;;  %v185_v49 = vsel %vm48_vm0, %v143_v24, 0.0  ;;  %v5696_v29 = vld [vmem:[%s7961_s3] sm:$0xff]   ;;  %s6002_s3 = smov 16  }
  0xb0   :  { %180 = vadd.xlane.f32.xlu1 %v179_v41  ;;  %183 = vadd.xlane.f32.xlu0 %v182_v48  ;;  %v6250_v43 = vld [vmem:[%s7963_s2] ss:$0 sm:$0xff] }
  0xb1   :  { %v144_v50 = vmul.f32 %v6220_v47, %v6220_v47  ;;  %v145_v51 = vmul.f32 %v6223_v25, %v6223_v25  ;;  %5132 = vmatprep.subr.bf16.mxu0 %v5696_v29  ;;  %5556 = vmatprep.subr.bf16.mxu1 %v5696_v29 }
  0xb2   :  { %5133 = vmatpush3.bf16.msra.mxu0 %v5696_v29  ;;  %5558 = vmatpush3.bf16.msra.mxu1 %v5696_v29 }
  0xb3   :  { %v188_v52 = vsel %vm48_vm0, %v144_v50, 0.0  ;;  %v191_v28 = vsel %vm48_vm0, %v145_v51, 0.0  ;;  %5134 = vmatprep.subr.bf16.mxu0 %v5697_v53  ;;  %5557 = vmatprep.subr.bf16.mxu1 %v5697_v53 }
  0xb4   :  { %186 = vadd.xlane.f32.xlu1 %v185_v49  ;;  %189 = vadd.xlane.f32.xlu0 %v188_v52 }
  0xb6   :  { %5135 = vmatpush3.bf16.msra.mxu0 %v5697_v53  ;;  %5559 = vmatpush3.bf16.msra.mxu1 %v5697_v53 }
  0xb8   :  { %192 = vadd.xlane.f32.xlu1 %v191_v28 }
 0x125   :  { %v148_v56 = vpop.xlane.xlu0 %147 }
 0x126   :  { %v194_v57 = vmul.f32 0.03125, %v148_v56 }
 0x128   :  { %v210_v58 = vadd.f32 1e-05, %v194_v57 }
 0x129   :  { %v151_v59 = vpop.xlane.xlu1 %150  ;;  %v154_v60 = vpop.xlane.xlu0 %153 }
 0x12a   :  { %5700 = vrsqrt.f32 %v210_v58  ;;  %v195_v61 = vmul.f32 0.03125, %v151_v59  ;;  %v196_v62 = vmul.f32 0.03125, %v154_v60 }
 0x12c   :  { %v211_v63 = vadd.f32 1e-05, %v195_v61  ;;  %v212_v2 = vadd.f32 1e-05, %v196_v62 }
 0x12d   :  { %v157_v3 = vpop.xlane.xlu1 %156  ;;  %v160_v4 = vpop.xlane.xlu0 %159 }
 0x12e   :  { %5702 = vrsqrt.f32 %v211_v63  ;;  %v197_v5 = vmul.f32 0.03125, %v157_v3  ;;  %v198_v6 = vmul.f32 0.03125, %v160_v4 }
 0x12f   :  { %5704 = vrsqrt.f32 %v212_v2 }
 0x130   :  { %v213_v7 = vadd.f32 1e-05, %v197_v5  ;;  %v214_v8 = vadd.f32 1e-05, %v198_v6 }
 0x131   :  { %v163_v9 = vpop.xlane.xlu1 %162  ;;  %v166_v12 = vpop.xlane.xlu0 %165 }
 0x132   :  { %5706 = vrsqrt.f32 %v213_v7  ;;  %v199_v13 = vmul.f32 0.03125, %v163_v9  ;;  %v200_v14 = vmul.f32 0.03125, %v166_v12 }
 0x133   :  { %5708 = vrsqrt.f32 %v214_v8 }
 0x134   :  { %v5701_v15 = vpop.eup %5700  ;;  %v215_v18 = vadd.f32 1e-05, %v199_v13  ;;  %v216_v19 = vadd.f32 1e-05, %v200_v14 }
 0x135   :  { %v169_v22 = vpop.xlane.xlu1 %168  ;;  %v172_v16 = vpop.xlane.xlu0 %171  ;;  %v242_v26 = vmul.f32 %v5701_v15, %v6143_v36 }
 0x136   :  { %5710 = vrsqrt.f32 %v215_v18  ;;  %v201_v27 = vmul.f32 0.03125, %v169_v22  ;;  %v202_v30 = vmul.f32 0.03125, %v172_v16 }
 0x137   :  { %5712 = vrsqrt.f32 %v216_v19  ;;  %v264_v41 = vmul.f32 %v6243_v31, %v242_v26 }
 0x138   :  { %v5703_v32 = vpop.eup %5702  ;;  %v217_v33 = vadd.f32 1e-05, %v201_v27  ;;  %v218_v34 = vadd.f32 1e-05, %v202_v30 }
 0x139   :  { %v5705_v20 = vpop.eup %5704  ;;  %v175_v38 = vpop.xlane.xlu1 %174  ;;  %v243_v40 = vmul.f32 %v5703_v32, %v6151_v44  ;;  %v286_v28 = vadd.f32 %v6250_v43, %v264_v41 }
 0x13a   :  { %v178_v39 = vpop.xlane.xlu0 %177  ;;  %5714 = vrsqrt.f32 %v217_v33  ;;  %v203_v36 = vmul.f32 0.03125, %v175_v38  ;;  %v244_v46 = vmul.f32 %v5705_v20, %v6145_v37 }
 0x13b   :  { %v204_v42 = vmul.f32 0.03125, %v178_v39  ;;  %5716 = vrsqrt.f32 %v218_v34  ;;  %v265_v24 = vmul.f32 %v6243_v31, %v243_v40 }
 0x13c   :  { %v5707_v48 = vpop.eup %5706  ;;  %v219_v49 = vadd.f32 1e-05, %v203_v36  ;;  %v266_v56 = vmul.f32 %v6243_v31, %v244_v46 }
 0x13d   :  { %v220_v50 = vadd.f32 1e-05, %v204_v42  ;;  %v5709_v51 = vpop.eup %5708  ;;  %v181_v44 = vpop.xlane.xlu1 %180  ;;  %v287_v29 = vadd.f32 %v6250_v43, %v265_v24  ;;  %v245_v53 = vmul.f32 %v5707_v48, %v6153_v45 }
 0x13e   :  { %v184_v52 = vpop.xlane.xlu0 %183  ;;  %5718 = vrsqrt.f32 %v219_v49  ;;  %v205_v57 = vmul.f32 0.03125, %v181_v44  ;;  %v246_v60 = vmul.f32 %v5709_v51, %v6161_v54  ;;  %v288_v45 = vadd.f32 %v6250_v43, %v266_v56 }
 0x13f   :  { %v206_v37 = vmul.f32 0.03125, %v184_v52  ;;  %5720 = vrsqrt.f32 %v220_v50  ;;  %v302_v58 = vpack.c.bf16 %v287_v29, %v286_v28  ;;  %v267_v59 = vmul.f32 %v6243_v31, %v245_v53 }
 0x140   :  { %v5711_v61 = vpop.eup %5710  ;;  %v221_v62 = vadd.f32 1e-05, %v205_v57  ;;  %v268_v7 = vmul.f32 %v6243_v31, %v246_v60 }
 0x141   :  { %v222_v63 = vadd.f32 1e-05, %v206_v37  ;;  %v5713_v2 = vpop.eup %5712  ;;  %v187_v3 = vpop.xlane.xlu1 %186  ;;  %5136 = vmatprep.mubr.msk.bf16.mxu0 %vm48_vm0, %v302_v58  ;;  %v289_v5 = vadd.f32 %v6250_v43, %v267_v59  ;;  %v247_v6 = vmul.f32 %v5711_v61, %v6163_v55 }
 0x142   :  { %v190_v4 = vpop.xlane.xlu0 %189  ;;  %5722 = vrsqrt.f32 %v221_v62  ;;  %v207_v8 = vmul.f32 0.03125, %v187_v3  ;;  %v248_v54 = vmul.f32 %v5713_v2, %v6172_v0  ;;  %v290_v55 = vadd.f32 %v6250_v43, %v268_v7 }
 0x143   :  { %v208_v9 = vmul.f32 0.03125, %v190_v4  ;;  %5724 = vrsqrt.f32 %v222_v63  ;;  %v303_v12 = vpack.c.bf16 %v289_v5, %v288_v45  ;;  %v269_v13 = vmul.f32 %v6243_v31, %v247_v6 }
 0x144   :  { %v5715_v14 = vpop.eup %5714  ;;  %v223_v15 = vadd.f32 1e-05, %v207_v8  ;;  %v270_v27 = vmul.f32 %v6243_v31, %v248_v54  ;;  %v7969_v4 = vmov 0.0  }
 0x145   :  { %v224_v18 = vadd.f32 1e-05, %v208_v9  ;;  %v5717_v19 = vpop.eup %5716  ;;  %v193_v22 = vpop.xlane.xlu1 %192  ;;  %5137 = vmatmul.mubr.msk.bf16.vlgmr.msra.gmra.mrb[0].mxu0 %vm48_vm0, %v303_v12  ;;  %v291_v16 = vadd.f32 %v6250_v43, %v269_v13  ;;  %v249_v26 = vmul.f32 %v5715_v14, %v6175_v1  ;;  %5152 = vmatprep.subr.bf16.mxu1 %v7969_v4 }
 0x146   :  { %5726 = vrsqrt.f32 %v223_v15  ;;  %v209_v0 = vmul.f32 0.03125, %v193_v22  ;;  %v250_v30 = vmul.f32 %v5717_v19, %v6184_v10  ;;  %v292_v39 = vadd.f32 %v6250_v43, %v270_v27  ;;  %5176 = vmatprep.subr.bf16.mxu0 %v7969_v4 }
 0x147   :  { %5728 = vrsqrt.f32 %v224_v18  ;;  %v304_v32 = vpack.c.bf16 %v291_v16, %v290_v55  ;;  %v271_v33 = vmul.f32 %v6243_v31, %v249_v26 }
 0x148   :  { %v5719_v34 = vpop.eup %5718  ;;  %v225_v20 = vadd.f32 1e-05, %v209_v0  ;;  %v272_v41 = vmul.f32 %v6243_v31, %v250_v30 }
 0x149   :  { %v5721_v38 = vpop.eup %5720  ;;  %5140 = vmatprep.mubr.msk.bf16.mxu0 %vm48_vm0, %v304_v32  ;;  %v293_v40 = vadd.f32 %v6250_v43, %v271_v33  ;;  %v251_v1 = vmul.f32 %v5719_v34, %v6187_v11 }
 0x14a   :  { %5730 = vrsqrt.f32 %v225_v20  ;;  %v252_v10 = vmul.f32 %v5721_v38, %v6196_v23  ;;  %v294_v48 = vadd.f32 %v6250_v43, %v272_v41 }
 0x14b   :  { %v305_v36 = vpack.c.bf16 %v293_v40, %v292_v39  ;;  %v273_v42 = vmul.f32 %v6243_v31, %v251_v1 }
 0x14c   :  { %v5723_v46 = vpop.eup %5722  ;;  %v274_v11 = vmul.f32 %v6243_v31, %v252_v10 }
 0x14d   :  { %v5725_v24 = vpop.eup %5724  ;;  %5141 = vmatmul.mubr.msk.bf16.gmra.mrb[4].mxu0 %vm48_vm0, %v305_v36  ;;  %v295_v49 = vadd.f32 %v6250_v43, %v273_v42  ;;  %v253_v50 = vmul.f32 %v5723_v46, %v6199_v17 }
 0x14e   :  { %v254_v51 = vmul.f32 %v5725_v24, %v6208_v35  ;;  %v296_v29 = vadd.f32 %v6250_v43, %v274_v11  ;;  %5178 = vmatprep.mubr.msk.bf16.mxu0 %vm5989_vm1, %v7969_v4 }
 0x14f   :  { %v306_v44 = vpack.c.bf16 %v295_v49, %v294_v48  ;;  %v275_v23 = vmul.f32 %v6243_v31, %v253_v50 }
 0x150   :  { %v5727_v52 = vpop.eup %5726  ;;  %v276_v57 = vmul.f32 %v6243_v31, %v254_v51 }
 0x151   :  { %v5729_v28 = vpop.eup %5728  ;;  %5144 = vmatprep.mubr.msk.bf16.mxu1 %vm48_vm0, %v306_v44  ;;  %v297_v53 = vadd.f32 %v6250_v43, %v275_v23  ;;  %v255_v56 = vmul.f32 %v5727_v52, %v6211_v21 }
 0x152   :  { %v256_v17 = vmul.f32 %v5729_v28, %v6220_v47  ;;  %v298_v59 = vadd.f32 %v6250_v43, %v276_v57 }
 0x153   :  { %v307_v37 = vpack.c.bf16 %v297_v53, %v296_v29  ;;  %v277_v35 = vmul.f32 %v6243_v31, %v255_v56 }
 0x154   :  { %v5731_v58 = vpop.eup %5730  ;;  %v278_v62 = vmul.f32 %v6243_v31, %v256_v17 }
 0x155   :  { %5145 = vmatmul.mubr.msk.bf16.vlgmr.msra.gmra.mrb[0].mxu1 %vm48_vm0, %v307_v37  ;;  %v299_v60 = vadd.f32 %v6250_v43, %v277_v35  ;;  %v257_v61 = vmul.f32 %v5731_v58, %v6223_v25  ;;  %v6310_v25 = vld [vmem:[%s7964_s4] ss:$0 sm:$0xff]  ;;  %s5990_s4 = smov 96  }
 0x156   :  { %v300_v47 = vadd.f32 %v6250_v43, %v278_v62 }
 0x157   :  { %v308_v63 = vpack.c.bf16 %v299_v60, %v298_v59  ;;  %v279_v21 = vmul.f32 %v6243_v31, %v257_v61 }
 0x159   :  { %5148 = vmatprep.mubr.msk.bf16.mxu1 %vm48_vm0, %v308_v63  ;;  %v301_v2 = vadd.f32 %v6250_v43, %v279_v21 }
 0x15b   :  { %v309_v3 = vpack.c.bf16 %v301_v2, %v300_v47 }
 0x15d   :  { %5149 = vmatmul.mubr.msk.bf16.gmra.mrb[4].mxu1 %vm48_vm0, %v309_v3 }
 0x15e   :  { %5154 = vmatprep.mubr.msk.bf16.mxu1 %vm5989_vm1, %v7969_v4 }
 0x218   :  { %v5138_v31 = vpop.f32.mrb[0].mxu0 }
 0x219   :  { %v400_v45 = vadd.f32 %v5138_v31, %v6310_v25  ;;  %v391_v5 = vpop.f32.mrb[1].mxu0 }
 0x21a   :  { %v392_v6 = vadd.f32 %v6310_v25, %v391_v5  ;;  %v5139_v43 = vpop.f32.mrb[2].mxu0 }
 0x21b   :  { %v403_v7 = vadd.f32 %v5139_v43, %v6310_v25  ;;  %v394_v8 = vpop.f32.mrb[3].mxu0  ;;  %v456_v54 = vmul.f32 0.35355338, %v400_v45 }
 0x21c   :  { %v395_v9 = vadd.f32 %v6310_v25, %v394_v8  ;;  %v454_v14 = vmul.f32 0.35355338, %v392_v6 }
 0x21d   :  { %v457_v12 = vmul.f32 0.35355338, %v403_v7  ;;  %v6320_v13 = vpack.c.bf16 %v403_v7, %v400_v45 }
 0x21e   :  { %v455_v15 = vmul.f32 0.35355338, %v395_v9  ;;  %v6322_v18 = vpack.c.bf16 %v395_v9, %v392_v6 }
 0x21f   :  { %v6324_v19 = vpack.c.bf16 %v457_v12, %v456_v54  ;;  %538 = vrot.lane.b32.xlu1 %v6320_v13, %s5990_s4 }
 0x220   :  { %v6328_v22 = vpack.c.bf16 %v455_v15, %v454_v14  ;;  %487 = vrot.lane.b32.xlu0 %v6322_v18, %s5990_s4  ;;  %v5142_v55 = vpop.f32.mrb[4].mxu0 }
 0x221   :  { %v416_v16 = vadd.f32 %v5142_v55, %v6310_v25  ;;  %v407_v26 = vpop.f32.mrb[5].mxu0 }
 0x222   :  { %v408_v27 = vadd.f32 %v6310_v25, %v407_v26  ;;  %v5143_v0 = vpop.f32.mrb[6].mxu0 }
 0x223   :  { %v419_v30 = vadd.f32 %v5143_v0, %v6310_v25  ;;  %v410_v32 = vpop.f32.mrb[7].mxu0  ;;  %v460_v34 = vmul.f32 0.35355338, %v416_v16 }
 0x224   :  { %v411_v33 = vadd.f32 %v6310_v25, %v410_v32  ;;  %v458_v39 = vmul.f32 0.35355338, %v408_v27 }
 0x225   :  { %v461_v20 = vmul.f32 0.35355338, %v419_v30  ;;  %v6336_v38 = vpack.c.bf16 %v419_v30, %v416_v16 }
 0x226   :  { %v459_v40 = vmul.f32 0.35355338, %v411_v33  ;;  %v6338_v1 = vpack.c.bf16 %v411_v33, %v408_v27  ;;  %v887_v33 = vld [vmem:[%s7965_s5] sm:$0xff] }
 0x227   :  { %v6340_v41 = vpack.c.bf16 %v461_v20, %v460_v34  ;;  %v888_v20 = vld [vmem:[%s7965_s5 + $0x8] sm:$0xff] }
 0x228   :  { %v6342_v10 = vpack.c.bf16 %v459_v40, %v458_v39  ;;  %588 = vrot.lane.b32.xlu1 %v6338_v1, %s5990_s4  ;;  %v5146_v36 = vpop.f32.mrb[0].mxu1 }
 0x229   :  { %v432_v42 = vadd.f32 %v5146_v36, %v6310_v25  ;;  %v423_v46 = vpop.f32.mrb[1].mxu1 }
 0x22a   :  { %v424_v24 = vadd.f32 %v6310_v25, %v423_v46  ;;  %v5147_v48 = vpop.f32.mrb[2].mxu1 }
 0x22b   :  { %v435_v49 = vadd.f32 %v5147_v48, %v6310_v25  ;;  %v426_v50 = vpop.f32.mrb[3].mxu1  ;;  %v464_v51 = vmul.f32 0.35355338, %v432_v42 }
 0x22c   :  { %v427_v11 = vadd.f32 %v6310_v25, %v426_v50  ;;  %638 = vrot.lane.b32.xlu1 %v6336_v38, %s5990_s4  ;;  %v462_v52 = vmul.f32 0.35355338, %v424_v24 }
 0x22d   :  { %v465_v44 = vmul.f32 0.35355338, %v435_v49  ;;  %v6352_v23 = vpack.c.bf16 %v435_v49, %v432_v42 }
 0x22e   :  { %v463_v28 = vmul.f32 0.35355338, %v427_v11  ;;  %v6354_v29 = vpack.c.bf16 %v427_v11, %v424_v24 }
 0x22f   :  { %v6356_v53 = vpack.c.bf16 %v465_v44, %v464_v51  ;;  %v889_v44 = vld [vmem:[%s7965_s5 + $0x10] sm:$0xff] }
 0x230   :  { %v6358_v56 = vpack.c.bf16 %v463_v28, %v462_v52  ;;  %738 = vrot.lane.b32.xlu1 %v6352_v23, %s5990_s4  ;;  %688 = vrot.lane.b32.xlu0 %v6354_v29, %s5990_s4  ;;  %v5150_v57 = vpop.f32.mrb[4].mxu1 }
 0x231   :  { %v448_v17 = vadd.f32 %v5150_v57, %v6310_v25  ;;  %v439_v37 = vpop.f32.mrb[5].mxu1 }
 0x232   :  { %v440_v35 = vadd.f32 %v6310_v25, %v439_v37  ;;  %v5151_v58 = vpop.f32.mrb[6].mxu1 }
 0x233   :  { %v451_v59 = vadd.f32 %v5151_v58, %v6310_v25  ;;  %v442_v60 = vpop.f32.mrb[7].mxu1  ;;  %v468_v62 = vmul.f32 0.35355338, %v448_v17 }
 0x234   :  { %v443_v61 = vadd.f32 %v6310_v25, %v442_v60  ;;  %v466_v47 = vmul.f32 0.35355338, %v440_v35 }
 0x235   :  { %v469_v63 = vmul.f32 0.35355338, %v451_v59  ;;  %v6368_v21 = vpack.c.bf16 %v451_v59, %v448_v17 }
 0x236   :  { %v467_v2 = vmul.f32 0.35355338, %v443_v61  ;;  %v6370_v3 = vpack.c.bf16 %v443_v61, %v440_v35 }
 0x237   :  { %v6372_v31 = vpack.c.bf16 %v469_v63, %v468_v62  ;;  %838 = vrot.lane.b32.xlu1 %v6368_v21, %s5990_s4 }
 0x238   :  { %v6376_v45 = vpack.c.bf16 %v467_v2, %v466_v47  ;;  %788 = vrot.lane.b32.xlu0 %v6370_v3, %s5990_s4 }
 0x23b   :  { %1143 = vrot.lane.b32.xlu1 %v6320_v13, %s5991_s21 }
 0x23c   :  { %1096 = vrot.lane.b32.xlu0 %v6322_v18, %s5991_s21 }
 0x23f   :  { %1237 = vrot.lane.b32.xlu1 %v6336_v38, %s5991_s21 }
 0x243   :  { %1190 = vrot.lane.b32.xlu1 %v6338_v1, %s5991_s21 }
 0x291   :  { %v539_v6 = vpop.permute.xlu1 %538 }
 0x292   :  { %v488_v25 = vpop.permute.xlu0 %487  ;;  %v544_v43 = vsel %vm489_vm2, %v539_v6, 0 }
 0x293   :  { %v494_v5 = vsel %vm489_vm2, %v488_v25, 0  ;;  %v890_v25 = vld [vmem:[%s7965_s5 + $0x18] sm:$0xff] }
 0x294   :  { %5153 = vmatpush3.bf16.xpose.msra.mxu1 %v494_v5  ;;  %v891_v5 = vld [vmem:[%s7965_s5 + $0x20] sm:$0xff] }
 0x295   :  { %5158 = vmatprep.subr.bf16.mxu1 %v7969_v4 }
 0x29a   :  { %v589_v7 = vpop.permute.xlu1 %588 }
 0x29b   :  { %5155 = vmatmul.mubr.msk.bf16.vlgmr.msra.gmra.mrb[8].mxu1 %vm489_vm2, %v6328_v22  ;;  %v594_v9 = vsel %vm489_vm2, %v589_v7, 0 }
 0x29c   :  { %5159 = vmatpush3.bf16.xpose.msra.mxu1 %v544_v43  ;;  %5160 = vmatprep.mubr.msk.bf16.mxu1 %vm5989_vm1, %v7969_v4 }
 0x29d   :  { %5164 = vmatprep.subr.bf16.mxu1 %v7969_v4 }
 0x29e   :  { %v639_v12 = vpop.permute.xlu1 %638 }
 0x29f   :  { %v644_v15 = vsel %vm489_vm2, %v639_v12, 0 }
 0x2a2   :  { %v689_v8 = vpop.permute.xlu0 %688  ;;  %v739_v16 = vpop.permute.xlu1 %738 }
 0x2a3   :  { %v694_v54 = vsel %vm489_vm2, %v689_v8, 0  ;;  %5161 = vmatmul.mubr.msk.bf16.vlgmr.msra.gmra.mrb[12].mxu1 %vm489_vm2, %v6324_v19  ;;  %v744_v26 = vsel %vm489_vm2, %v739_v16, 0 }
 0x2a4   :  { %5165 = vmatpush3.bf16.xpose.msra.mxu1 %v594_v9  ;;  %5177 = vmatpush3.bf16.xpose.msra.mxu0 %v694_v54  ;;  %v892_v54 = vld [vmem:[%s7965_s5 + $0x28] sm:$0xff] }
 0x2a5   :  { %5166 = vmatprep.mubr.msk.bf16.mxu1 %vm5989_vm1, %v7969_v4  ;;  %5170 = vmatprep.subr.bf16.mxu1 %v7969_v4 }
 0x2a6   :  { %5188 = vmatprep.subr.bf16.mxu0 %v7969_v4 }
 0x2a9   :  { %v839_v0 = vpop.permute.xlu1 %838 }
 0x2aa   :  { %v789_v14 = vpop.permute.xlu0 %788  ;;  %v844_v30 = vsel %vm489_vm2, %v839_v0, 0 }
 0x2ab   :  { %v794_v55 = vsel %vm489_vm2, %v789_v14, 0  ;;  %5167 = vmatmul.mubr.msk.bf16.vlgmr.msra.gmra.mrb[16].mxu1 %vm489_vm2, %v6342_v10  ;;  %5179 = vmatmul.mubr.msk.bf16.vlgmr.msra.gmra.mrb[8].mxu0 %vm489_vm2, %v6358_v56 }
 0x2ac   :  { %5171 = vmatpush3.bf16.xpose.msra.mxu1 %v644_v15  ;;  %5189 = vmatpush3.bf16.xpose.msra.mxu0 %v794_v55 }
 0x2ad   :  { %5172 = vmatprep.mubr.msk.bf16.mxu1 %vm5989_vm1, %v7969_v4  ;;  %5190 = vmatprep.mubr.msk.bf16.mxu0 %vm5989_vm1, %v7969_v4  ;;  %v1144_v32 = vpop.permute.xlu1 %1143 }
 0x2ae   :  { %5182 = vmatprep.subr.bf16.mxu1 %v7969_v4  ;;  %5200 = vmatprep.subr.bf16.mxu0 %v7969_v4  ;;  %v1097_v27 = vpop.permute.xlu0 %1096 }
 0x2b3   :  { %5173 = vmatmul.mubr.msk.bf16.vlgmr.msra.gmra.mrb[20].mxu1 %vm489_vm2, %v6340_v41  ;;  %5191 = vmatmul.mubr.msk.bf16.vlgmr.msra.gmra.mrb[12].mxu0 %vm489_vm2, %v6376_v45 }
 0x2b4   :  { %5183 = vmatpush3.bf16.xpose.msra.mxu1 %v744_v26  ;;  %5201 = vmatpush3.bf16.msra.mxu0 %v1097_v27 }
 0x2b5   :  { %5184 = vmatprep.mubr.msk.bf16.mxu1 %vm5989_vm1, %v7969_v4  ;;  %5194 = vmatprep.subr.bf16.mxu1 %v7969_v4 }
 0x2b6   :  { %5202 = vmatprep.mubr.msk.bf16.mxu0 %vm5989_vm1, %v7969_v4  ;;  %5212 = vmatprep.subr.bf16.mxu0 %v7969_v4 }
 0x2bb   :  { %5185 = vmatmul.mubr.msk.bf16.vlgmr.msra.gmra.mrb[24].mxu1 %vm489_vm2, %v6356_v53 }
 0x2bc   :  { %5195 = vmatpush3.bf16.xpose.msra.mxu1 %v844_v30  ;;  %5196 = vmatprep.mubr.msk.bf16.mxu1 %vm5989_vm1, %v7969_v4 }
 0x2bd   :  { %5206 = vmatprep.subr.bf16.mxu1 %v7969_v4 }
 0x2c3   :  { %5197 = vmatmul.mubr.msk.bf16.vlgmr.msra.gmra.mrb[28].mxu1 %vm489_vm2, %v6372_v31 }
 0x2c4   :  { %5207 = vmatpush3.bf16.msra.mxu1 %v1144_v32  ;;  %5208 = vmatprep.mubr.msk.bf16.mxu1 %vm5989_vm1, %v7969_v4  ;;  %v894_v32 = vld [vmem:[%s7965_s5 + $0x38] sm:$0xff] }
 0x2c5   :  { %5218 = vmatprep.subr.bf16.mxu1 %v7969_v4 }
 0x36e   :  { %v530_v34 = vpop.f32.mrb[8].mxu1 }
 0x36f   :  { %v6444_v39 = vadd.f32 %v887_v33, %v530_v34  ;;  %v5156_v40 = vpop.f32.mrb[9].mxu1 }
 0x370   :  { %v533_v36 = vpop.f32.mrb[10].mxu1 }
 0x371   :  { %v6446_v42 = vadd.f32 %v888_v20, %v533_v36  ;;  %v5157_v46 = vpop.f32.mrb[11].mxu1  ;;  %v912_v24 = vsel %vm911_vm3, %v6444_v39, -inf }
 0x372   :  { %913 = vmax.xlane.f32.xlu0 %v912_v24 }
 0x373   :  { %v915_v48 = vsel %vm911_vm3, %v6446_v42, -inf }
 0x374   :  { %916 = vmax.xlane.f32.xlu1 %v915_v48 }
 0x376   :  { %v580_v49 = vpop.f32.mrb[12].mxu1 }
 0x377   :  { %v5162_v50 = vpop.f32.mrb[13].mxu1  ;;  %v6457_v59 = vadd.f32 %v889_v44, %v580_v49 }
 0x378   :  { %v583_v11 = vpop.f32.mrb[14].mxu1 }
 0x379   :  { %v5163_v51 = vpop.f32.mrb[15].mxu1  ;;  %v918_v2 = vsel %vm911_vm3, %v6457_v59, -inf  ;;  %v6478_v15 = vadd.f32 %v890_v25, %v583_v11 }
 0x37b   :  { %v921_v34 = vsel %vm911_vm3, %v6478_v15, -inf }
 0x37e   :  { %v630_v52 = vpop.f32.mrb[16].mxu1  ;;  %v730_v28 = vpop.f32.mrb[8].mxu0 }
 0x37f   :  { %v6455_v57 = vadd.f32 %v887_v33, %v730_v28  ;;  %v5168_v17 = vpop.f32.mrb[17].mxu1  ;;  %v5180_v37 = vpop.f32.mrb[9].mxu0  ;;  %v6491_v33 = vadd.f32 %v891_v5, %v630_v52 }
 0x380   :  { %v633_v35 = vpop.f32.mrb[18].mxu1  ;;  %v733_v58 = vpop.f32.mrb[10].mxu0 }
 0x381   :  { %v6459_v60 = vadd.f32 %v888_v20, %v733_v58  ;;  %v5169_v61 = vpop.f32.mrb[19].mxu1  ;;  %v5181_v62 = vpop.f32.mrb[11].mxu0  ;;  %v936_v63 = vsel %vm911_vm3, %v6455_v57, -inf  ;;  %v6484_v0 = vadd.f32 %v892_v54, %v633_v35  ;;  %v893_v20 = vld [vmem:[%s7965_s5 + $0x30] sm:$0xff]  ;;  %v924_v11 = vsel %vm911_vm3, %v6491_v33, -inf }
 0x382   :  { %937 = vmax.xlane.f32.xlu0 %v936_v63 }
 0x383   :  { %v939_v47 = vsel %vm911_vm3, %v6459_v60, -inf  ;;  %v927_v24 = vsel %vm911_vm3, %v6484_v0, -inf }
 0x384   :  { %940 = vmax.xlane.f32.xlu1 %v939_v47 }
 0x386   :  { %v680_v6 = vpop.f32.mrb[20].mxu1  ;;  %919 = vmax.xlane.f32.xlu0 %v918_v2  ;;  %v830_v43 = vpop.f32.mrb[12].mxu0 }
 0x387   :  { %v6473_v7 = vadd.f32 %v891_v5, %v830_v43  ;;  %v5174_v8 = vpop.f32.mrb[21].mxu1  ;;  %v5192_v9 = vpop.f32.mrb[13].mxu0  ;;  %v6502_v49 = vadd.f32 %v893_v20, %v680_v6 }
 0x388   :  { %v683_v12 = vpop.f32.mrb[22].mxu1  ;;  %v833_v14 = vpop.f32.mrb[14].mxu0 }
 0x389   :  { %v6480_v55 = vadd.f32 %v892_v54, %v833_v14  ;;  %v5175_v16 = vpop.f32.mrb[23].mxu1  ;;  %v5193_v26 = vpop.f32.mrb[15].mxu0  ;;  %v948_v27 = vsel %vm911_vm3, %v6473_v7, -inf  ;;  %v6498_v36 = vadd.f32 %v894_v32, %v683_v12  ;;  %v930_v17 = vsel %vm911_vm3, %v6502_v49, -inf }
 0x38a   :  { %949 = vmax.xlane.f32.xlu0 %v948_v27  ;;  %v6530_v5 = vpop.permute.xlu1 %1237 }
 0x38b   :  { %v951_v30 = vsel %vm911_vm3, %v6480_v55, -inf  ;;  %v933_v52 = vsel %vm911_vm3, %v6498_v36, -inf }
 0x38c   :  { %952 = vmax.xlane.f32.xlu1 %v951_v30 }
 0x38e   :  { %v780_v40 = vpop.f32.mrb[24].mxu1  ;;  %922 = vmax.xlane.f32.xlu0 %v921_v34  ;;  %v6532_v6 = vpop.permute.xlu1 %1190 }
 0x38f   :  { %v5186_v46 = vpop.f32.mrb[25].mxu1  ;;  %v6510_v28 = vadd.f32 %v889_v44, %v780_v40 }
 0x390   :  { %v783_v48 = vpop.f32.mrb[26].mxu1  ;;  %928 = vmax.xlane.f32.xlu1 %v927_v24 }
 0x391   :  { %v5187_v50 = vpop.f32.mrb[27].mxu1  ;;  %v6506_v51 = vadd.f32 %v890_v25, %v783_v48  ;;  %v942_v47 = vsel %vm911_vm3, %v6510_v28, -inf }
 0x392   :  { %925 = vmax.xlane.f32.xlu0 %v924_v11 }
 0x393   :  { %v945_v58 = vsel %vm911_vm3, %v6506_v51, -inf }
 0x394   :  { %934 = vmax.xlane.f32.xlu1 %v933_v52 }
 0x396   :  { %v880_v37 = vpop.f32.mrb[28].mxu1  ;;  %931 = vmax.xlane.f32.xlu0 %v930_v17 }
 0x397   :  { %v5198_v35 = vpop.f32.mrb[29].mxu1  ;;  %v6516_v62 = vadd.f32 %v893_v20, %v880_v37 }
 0x398   :  { %v883_v61 = vpop.f32.mrb[30].mxu1  ;;  %946 = vmax.xlane.f32.xlu1 %v945_v58 }
 0x399   :  { %v5199_v63 = vpop.f32.mrb[31].mxu1  ;;  %v954_v44 = vsel %vm911_vm3, %v6516_v62, -inf  ;;  %v6526_v2 = vadd.f32 %v894_v32, %v883_v61 }
 0x39a   :  { %943 = vmax.xlane.f32.xlu0 %v942_v47 }
 0x39b   :  { %v957_v25 = vsel %vm911_vm3, %v6526_v2, -inf }
 0x39e   :  { %955 = vmax.xlane.f32.xlu0 %v954_v44 }
 0x3a9   :  { %1331 = vrot.lane.b32.xlu1 %v6352_v23, %s5991_s21 }
 0x3b4   :  { %1284 = vrot.lane.b32.xlu0 %v6354_v29, %s5991_s21 }
 0x3cd   :  { %958 = vmax.xlane.f32.xlu1 %v957_v25 }
 0x3ff   :  { %v914_v43 = vpop.xlane.xlu0 %913 }
 0x400   :  { %v960_v8 = vsub.f32 %v6444_v39, %v914_v43 }
 0x401   :  { %v917_v9 = vpop.xlane.xlu1 %916 }
 0x402   :  { %v976_v54 = vmul.f32 1.442695, %v960_v8  ;;  %v961_v12 = vsub.f32 %v6446_v42, %v917_v9 }
 0x404   :  { %5732 = vpow2.f32 %v976_v54  ;;  %v978_v14 = vmul.f32 1.442695, %v961_v12 }
 0x406   :  { %5734 = vpow2.f32 %v978_v14 }
 0x40e   :  { %v6536_v16 = vpop.eup %5732 }
 0x40f   :  { %v938_v26 = vpop.xlane.xlu0 %937  ;;  %v1008_v27 = vsel %vm911_vm3, %v6536_v16, 0.0 }
 0x410   :  { %v6540_v30 = vpop.eup %5734  ;;  %v968_v32 = vsub.f32 %v6455_v57, %v938_v26  ;;  %1009 = vadd.xlane.f32.xlu0 %v1008_v27 }
 0x411   :  { %v941_v34 = vpop.xlane.xlu1 %940  ;;  %v1011_v39 = vsel %vm911_vm3, %v6540_v30, 0.0 }
 0x412   :  { %v992_v20 = vmul.f32 1.442695, %v968_v32  ;;  %v969_v42 = vsub.f32 %v6459_v60, %v941_v34  ;;  %1012 = vadd.xlane.f32.xlu1 %v1011_v39 }
 0x413   :  { %v920_v40 = vpop.xlane.xlu0 %919 }
 0x414   :  { %5736 = vpow2.f32 %v992_v20  ;;  %v994_v46 = vmul.f32 1.442695, %v969_v42  ;;  %v962_v24 = vsub.f32 %v6457_v59, %v920_v40 }
 0x416   :  { %5738 = vpow2.f32 %v994_v46  ;;  %v980_v48 = vmul.f32 1.442695, %v962_v24 }
 0x417   :  { %v950_v50 = vpop.xlane.xlu0 %949 }
 0x418   :  { %5740 = vpow2.f32 %v980_v48  ;;  %v972_v57 = vsub.f32 %v6473_v7, %v950_v50 }
 0x419   :  { %v953_v11 = vpop.xlane.xlu1 %952 }
 0x41a   :  { %v1000_v52 = vmul.f32 1.442695, %v972_v57  ;;  %v973_v17 = vsub.f32 %v6480_v55, %v953_v11 }
 0x41b   :  { %v923_v37 = vpop.xlane.xlu0 %922 }
 0x41c   :  { %5742 = vpow2.f32 %v1000_v52  ;;  %v963_v60 = vsub.f32 %v6478_v15, %v923_v37  ;;  %v1002_v61 = vmul.f32 1.442695, %v973_v17 }
 0x41d   :  { %v929_v35 = vpop.xlane.xlu1 %928 }
 0x41e   :  { %v6550_v58 = vpop.eup %5736  ;;  %v982_v63 = vmul.f32 1.442695, %v963_v60  ;;  %v965_v59 = vsub.f32 %v6484_v0, %v929_v35 }
 0x41f   :  { %v926_v47 = vpop.xlane.xlu0 %925  ;;  %v1032_v44 = vsel %vm911_vm3, %v6550_v58, 0.0 }
 0x420   :  { %v6555_v7 = vpop.eup %5738  ;;  %5744 = vpow2.f32 %v982_v63  ;;  %v964_v55 = vsub.f32 %v6491_v33, %v926_v47  ;;  %1033 = vadd.xlane.f32.xlu0 %v1032_v44  ;;  %v986_v8 = vmul.f32 1.442695, %v965_v59 }
 0x421   :  { %v935_v25 = vpop.xlane.xlu1 %934  ;;  %v1035_v15 = vsel %vm911_vm3, %v6555_v7, 0.0  ;;  %5746 = vpow2.f32 %v1002_v61 }
 0x422   :  { %v6560_v43 = vpop.eup %5740  ;;  %v984_v9 = vmul.f32 1.442695, %v964_v55  ;;  %v967_v0 = vsub.f32 %v6498_v36, %v935_v25  ;;  %1036 = vadd.xlane.f32.xlu1 %v1035_v15 }
 0x423   :  { %v932_v54 = vpop.xlane.xlu0 %931  ;;  %v1014_v12 = vsel %vm911_vm3, %v6560_v43, 0.0 }
 0x424   :  { %5748 = vpow2.f32 %v984_v9  ;;  %v966_v33 = vsub.f32 %v6502_v49, %v932_v54  ;;  %1015 = vadd.xlane.f32.xlu0 %v1014_v12  ;;  %v990_v26 = vmul.f32 1.442695, %v967_v0 }
 0x425   :  { %5750 = vpow2.f32 %v986_v8  ;;  %v947_v60 = vpop.xlane.xlu1 %946 }
 0x426   :  { %v6566_v14 = vpop.eup %5742  ;;  %v988_v27 = vmul.f32 1.442695, %v966_v33  ;;  %v971_v61 = vsub.f32 %v6506_v51, %v947_v60 }
 0x427   :  { %v944_v32 = vpop.xlane.xlu0 %943  ;;  %v1044_v34 = vsel %vm911_vm3, %v6566_v14, 0.0 }
 0x428   :  { %5752 = vpow2.f32 %v988_v27  ;;  %v970_v36 = vsub.f32 %v6510_v28, %v944_v32  ;;  %1045 = vadd.xlane.f32.xlu0 %v1044_v34  ;;  %v998_v59 = vmul.f32 1.442695, %v971_v61 }
 0x429   :  { %5754 = vpow2.f32 %v990_v26  ;;  %v6617_v51 = vpop.permute.xlu1 %1331 }
 0x42a   :  { %v6571_v39 = vpop.eup %5744  ;;  %v996_v20 = vmul.f32 1.442695, %v970_v36 }
 0x42b   :  { %v1017_v49 = vsel %vm911_vm3, %v6571_v39, 0.0  ;;  %v6575_v42 = vpop.eup %5746  ;;  %v956_v35 = vpop.xlane.xlu0 %955 }
 0x42c   :  { %5756 = vpow2.f32 %v996_v20  ;;  %1018 = vadd.xlane.f32.xlu1 %v1017_v49  ;;  %v1047_v46 = vsel %vm911_vm3, %v6575_v42, 0.0  ;;  %v974_v63 = vsub.f32 %v6516_v62, %v956_v35 }
 0x42d   :  { %5758 = vpow2.f32 %v998_v59 }
 0x42e   :  { %v6577_v40 = vpop.eup %5748  ;;  %v1004_v47 = vmul.f32 1.442695, %v974_v63 }
 0x42f   :  { %v1020_v28 = vsel %vm911_vm3, %v6577_v40, 0.0  ;;  %v6583_v24 = vpop.eup %5750  ;;  %v6630_v0 = vpop.permute.xlu0 %1284 }
 0x430   :  { %1048 = vadd.xlane.f32.xlu1 %v1047_v46  ;;  %1021 = vadd.xlane.f32.xlu0 %v1020_v28  ;;  %v1023_v50 = vsel %vm911_vm3, %v6583_v24, 0.0  ;;  %5760 = vpow2.f32 %v1004_v47 }
 0x432   :  { %v6585_v48 = vpop.eup %5752 }
 0x433   :  { %v1026_v57 = vsel %vm911_vm3, %v6585_v48, 0.0  ;;  %v6591_v11 = vpop.eup %5754 }
 0x434   :  { %1024 = vadd.xlane.f32.xlu1 %v1023_v50  ;;  %1027 = vadd.xlane.f32.xlu0 %v1026_v57  ;;  %v1029_v17 = vsel %vm911_vm3, %v6591_v11, 0.0 }
 0x436   :  { %v6593_v52 = vpop.eup %5756 }
 0x437   :  { %v1038_v37 = vsel %vm911_vm3, %v6593_v52, 0.0  ;;  %v6605_v44 = vpop.eup %5758 }
 0x438   :  { %1030 = vadd.xlane.f32.xlu1 %v1029_v17  ;;  %1039 = vadd.xlane.f32.xlu0 %v1038_v37  ;;  %v1041_v25 = vsel %vm911_vm3, %v6605_v44, 0.0 }
 0x43a   :  { %v6607_v55 = vpop.eup %5760 }
 0x43b   :  { %v1050_v15 = vsel %vm911_vm3, %v6607_v55, 0.0 }
 0x449   :  { %1425 = vrot.lane.b32.xlu1 %v6368_v21, %s5991_s21 }
 0x44e   :  { %1378 = vrot.lane.b32.xlu0 %v6370_v3, %s5991_s21 }
 0x45a   :  { %v959_v62 = vpop.xlane.xlu1 %958 }
 0x45b   :  { %v975_v8 = vsub.f32 %v6526_v2, %v959_v62 }
 0x45d   :  { %v1006_v9 = vmul.f32 1.442695, %v975_v8 }
 0x45f   :  { %5762 = vpow2.f32 %v1006_v9 }
 0x469   :  { %v6634_v12 = vpop.eup %5762 }
 0x46a   :  { %v1053_v33 = vsel %vm911_vm3, %v6634_v12, 0.0 }
 0x46d   :  { %1042 = vadd.xlane.f32.xlu1 %v1041_v25  ;;  %1051 = vadd.xlane.f32.xlu0 %v1050_v15 }
 0x47e   :  { %1527 = vrot.lane.b32.xlu1 %v6320_v13, %s5992_s15 }
 0x483   :  { %1475 = vrot.lane.b32.xlu0 %v6322_v18, %s5992_s15 }
 0x487   :  { %1473 = vrot.lane.b32.xlu0 %v6328_v22, %s5993_s16 }
 0x48b   :  { %1525 = vrot.lane.b32.xlu0 %v6324_v19, %s5993_s16 }
 0x48f   :  { %1577 = vrot.lane.b32.xlu0 %v6342_v10, %s5993_s16 }
 0x493   :  { %1629 = vrot.lane.b32.xlu0 %v6340_v41, %s5993_s16 }
 0x497   :  { %1681 = vrot.lane.b32.xlu0 %v6358_v56, %s5993_s16 }
 0x49b   :  { %1733 = vrot.lane.b32.xlu0 %v6356_v53, %s5993_s16 }
 0x49d   :  { %v1010_v54 = vpop.xlane.xlu0 %1009 }
 0x49e   :  { %5764 = vrcp.f32 %v1010_v54 }
 0x49f   :  { %v1013_v2 = vpop.xlane.xlu1 %1012  ;;  %1785 = vrot.lane.b32.xlu0 %v6376_v45, %s5993_s16 }
 0x4a0   :  { %5766 = vrcp.f32 %v1013_v2 }
 0x4a2   :  { %1054 = vadd.xlane.f32.xlu1 %v1053_v33 }
 0x4a8   :  { %v5765_v26 = vpop.eup %5764 }
 0x4a9   :  { %v1057_v32 = vmul.f32 %v5765_v26, %v6536_v16 }
 0x4aa   :  { %v5767_v27 = vpop.eup %5766 }
 0x4ab   :  { %v1059_v34 = vmul.f32 %v5767_v27, %v6540_v30 }
 0x4ad   :  { %v1034_v36 = vpop.xlane.xlu0 %1033  ;;  %v1088_v20 = vpack.c.bf16 %v1059_v34, %v1057_v32 }
 0x4af   :  { %5203 = vmatmul.mubr.msk.bf16.vlgmr.msra.gmra.mrb[16].mxu0 %vm911_vm3, %v1088_v20  ;;  %v1037_v46 = vpop.xlane.xlu1 %1036 }
 0x4b0   :  { %5213 = vmatpush3.bf16.msra.mxu0 %v6532_v6  ;;  %5214 = vmatprep.mubr.msk.bf16.mxu0 %vm5989_vm1, %v7969_v4 }
 0x4b1   :  { %5224 = vmatprep.subr.bf16.mxu0 %v7969_v4  ;;  %v1016_v49 = vpop.xlane.xlu0 %1015 }
 0x4b2   :  { %5768 = vrcp.f32 %v1016_v49 }
 0x4b3   :  { %1579 = vrot.lane.b32.xlu1 %v6338_v1, %s5992_s15 }
 0x4b5   :  { %v1046_v16 = vpop.xlane.xlu0 %1045 }
 0x4b7   :  { %1631 = vrot.lane.b32.xlu1 %v6336_v38, %s5992_s15 }
 0x4b9   :  { %v1019_v30 = vpop.xlane.xlu1 %1018 }
 0x4ba   :  { %5770 = vrcp.f32 %v1019_v30 }
 0x4bb   :  { %1683 = vrot.lane.b32.xlu1 %v6354_v29, %s5992_s15 }
 0x4bc   :  { %v5769_v17 = vpop.eup %5768 }
 0x4bd   :  { %v1049_v6 = vpop.xlane.xlu1 %1048  ;;  %v1022_v28 = vpop.xlane.xlu0 %1021  ;;  %v1061_v60 = vmul.f32 %v5769_v17, %v6560_v43 }
 0x4be   :  { %5772 = vrcp.f32 %v1022_v28 }
 0x4bf   :  { %1735 = vrot.lane.b32.xlu1 %v6352_v23, %s5992_s15 }
 0x4c1   :  { %v1025_v50 = vpop.xlane.xlu1 %1024  ;;  %v1028_v57 = vpop.xlane.xlu0 %1027 }
 0x4c2   :  { %5774 = vrcp.f32 %v1025_v50 }
 0x4c3   :  { %1787 = vrot.lane.b32.xlu1 %v6370_v3, %s5992_s15  ;;  %5776 = vrcp.f32 %v1028_v57 }
 0x4c4   :  { %v5771_v37 = vpop.eup %5770  ;;  %5778 = vrcp.f32 %v1037_v46 }
 0x4c5   :  { %v1063_v35 = vmul.f32 %v5771_v37, %v6571_v39  ;;  %v1031_v61 = vpop.xlane.xlu1 %1030 }
 0x4c6   :  { %5780 = vrcp.f32 %v1031_v61 }
 0x4c7   :  { %1839 = vrot.lane.b32.xlu1 %v6368_v21, %s5992_s15  ;;  %v1089_v63 = vpack.c.bf16 %v1063_v35, %v1061_v60  ;;  %5782 = vrcp.f32 %v1034_v36 }
 0x4c8   :  { %v5773_v59 = vpop.eup %5772  ;;  %5784 = vrcp.f32 %v1049_v6 }
 0x4c9   :  { %5209 = vmatmul.mubr.msk.bf16.vlgmr.msra.gmra.mrb[32].mxu1 %vm911_vm3, %v1089_v63  ;;  %v1065_v39 = vmul.f32 %v5773_v59, %v6577_v40  ;;  %5786 = vrcp.f32 %v1046_v16  ;;  %v1426_v27 = vpop.permute.xlu1 %1425 }
 0x4ca   :  { %5219 = vmatpush3.bf16.msra.mxu1 %v6530_v5  ;;  %5220 = vmatprep.mubr.msk.bf16.mxu1 %vm5989_vm1, %v7969_v4 }
 0x4cb   :  { %1837 = vrot.lane.b32.xlu1 %v6372_v31, %s5993_s16  ;;  %5230 = vmatprep.subr.bf16.mxu1 %v7969_v4 }
 0x4cc   :  { %v5775_v43 = vpop.eup %5774 }
 0x4cd   :  { %v1067_v47 = vmul.f32 %v5775_v43, %v6583_v24  ;;  %v5777_v25 = vpop.eup %5776  ;;  %v1040_v24 = vpop.xlane.xlu0 %1039 }
 0x4ce   :  { %v5779_v15 = vpop.eup %5778  ;;  %v1069_v5 = vmul.f32 %v5777_v25, %v6585_v48  ;;  %5788 = vrcp.f32 %v1040_v24 }
 0x4cf   :  { %v1090_v62 = vpack.c.bf16 %v1067_v47, %v1065_v39  ;;  %v1075_v40 = vmul.f32 %v5779_v15, %v6555_v7 }
 0x4d0   :  { %v5781_v8 = vpop.eup %5780 }
 0x4d1   :  { %v1071_v9 = vmul.f32 %v5781_v8, %v6591_v11  ;;  %5215 = vmatmul.mubr.msk.bf16.vlgmr.msra.gmra.mrb[20].mxu0 %vm911_vm3, %v1090_v62  ;;  %v5783_v54 = vpop.eup %5782 }
 0x4d2   :  { %5225 = vmatpush3.bf16.msra.mxu0 %v6630_v0  ;;  %5226 = vmatprep.mubr.msk.bf16.mxu0 %vm5989_vm1, %v7969_v4  ;;  %v1073_v33 = vmul.f32 %v5783_v54, %v6550_v58  ;;  %v5785_v11 = vpop.eup %5784  ;;  %v1379_v0 = vpop.permute.xlu0 %1378 }
 0x4d3   :  { %v1091_v2 = vpack.c.bf16 %v1071_v9, %v1069_v5  ;;  %5236 = vmatprep.subr.bf16.mxu0 %v7969_v4  ;;  %v5787_v7 = vpop.eup %5786  ;;  %v1083_v58 = vmul.f32 %v5785_v11, %v6575_v42 }
 0x4d4   :  { %v1092_v48 = vpack.c.bf16 %v1075_v40, %v1073_v33 }
 0x4d5   :  { %5221 = vmatmul.mubr.msk.bf16.vlgmr.msra.gmra.mrb[36].mxu1 %vm911_vm3, %v1091_v2 }
 0x4d6   :  { %5231 = vmatpush3.bf16.msra.mxu1 %v6617_v51  ;;  %5232 = vmatprep.mubr.msk.bf16.mxu1 %vm5989_vm1, %v7969_v4  ;;  %v1081_v51 = vmul.f32 %v5787_v7, %v6566_v14 }
 0x4d7   :  { %5242 = vmatprep.subr.bf16.mxu1 %v7969_v4 }
 0x4d8   :  { %v1094_v26 = vpack.c.bf16 %v1083_v58, %v1081_v51  ;;  %v5789_v42 = vpop.eup %5788 }
 0x4d9   :  { %5227 = vmatmul.mubr.msk.bf16.vlgmr.msra.gmra.mrb[24].mxu0 %vm911_vm3, %v1092_v48  ;;  %v1077_v14 = vmul.f32 %v5789_v42, %v6593_v52 }
 0x4da   :  { %5237 = vmatpush3.bf16.msra.mxu0 %v1379_v0  ;;  %5238 = vmatprep.mubr.msk.bf16.mxu0 %vm5989_vm1, %v7969_v4 }
 0x4db   :  { %5248 = vmatprep.subr.bf16.mxu0 %v7969_v4 }
 0x4e1   :  { %5239 = vmatmul.mubr.msk.bf16.vlgmr.msra.gmra.mrb[28].mxu0 %vm911_vm3, %v1094_v26 }
 0x4e2   :  { %5250 = vmatprep.mubr.msk.bf16.mxu0 %vm5989_vm1, %v7969_v4 }
 0x4fa   :  { %v1043_v32 = vpop.xlane.xlu1 %1042  ;;  %v1052_v34 = vpop.xlane.xlu0 %1051 }
 0x4fb   :  { %5790 = vrcp.f32 %v1043_v32 }
 0x4fc   :  { %5792 = vrcp.f32 %v1052_v34 }
 0x4fe   :  { %v1476_v36 = vpop.permute.xlu0 %1475  ;;  %v1528_v6 = vpop.permute.xlu1 %1527 }
 0x4ff   :  { %v1481_v20 = vsel %vm489_vm2, %v1476_v36, 0  ;;  %v1533_v47 = vsel %vm489_vm2, %v1528_v6, 0 }
 0x500   :  { %5249 = vmatpush3.bf16.xpose.msra.mxu0 %v1481_v20 }
 0x501   :  { %5260 = vmatprep.subr.bf16.mxu0 %v7969_v4 }
 0x502   :  { %v1474_v16 = vpop.permute.xlu0 %1473 }
 0x505   :  { %v5791_v49 = vpop.eup %5790 }
 0x506   :  { %v1079_v46 = vmul.f32 %v5791_v49, %v6605_v44  ;;  %v1526_v28 = vpop.permute.xlu0 %1525  ;;  %v5793_v37 = vpop.eup %5792 }
 0x507   :  { %5251 = vmatmul.mubr.msk.bf16.vlgmr.msra.gmra.mrb[32].mxu0 %vm489_vm2, %v1474_v16  ;;  %v1085_v61 = vmul.f32 %v5793_v37, %v6607_v55 }
 0x508   :  { %v1093_v30 = vpack.c.bf16 %v1079_v46, %v1077_v14  ;;  %5262 = vmatprep.mubr.msk.bf16.mxu0 %vm5989_vm1, %v7969_v4 }
 0x50a   :  { %5233 = vmatmul.mubr.msk.bf16.vlgmr.msra.gmra.mrb[40].mxu1 %vm911_vm3, %v1093_v30  ;;  %v1578_v44 = vpop.permute.xlu0 %1577 }
 0x50b   :  { %5243 = vmatpush3.bf16.msra.mxu1 %v1426_v27  ;;  %5244 = vmatprep.mubr.msk.bf16.mxu1 %vm5989_vm1, %v7969_v4 }
 0x50c   :  { %5254 = vmatprep.subr.bf16.mxu1 %v7969_v4 }
 0x50e   :  { %v1630_v60 = vpop.permute.xlu0 %1629 }
 0x512   :  { %v1682_v25 = vpop.permute.xlu0 %1681 }
 0x516   :  { %v1734_v62 = vpop.permute.xlu0 %1733 }
 0x51a   :  { %v1786_v5 = vpop.permute.xlu0 %1785 }
 0x52f   :  { %v1055_v52 = vpop.xlane.xlu1 %1054 }
 0x530   :  { %5794 = vrcp.f32 %v1055_v52 }
 0x533   :  { %v1580_v50 = vpop.permute.xlu1 %1579 }
 0x534   :  { %v1585_v57 = vsel %vm489_vm2, %v1580_v50, 0  ;;  %v4909_v50 = vld [vmem:[%s7965_s5 + $0x40] sm:$0xff] }
 0x535   :  { %5261 = vmatpush3.bf16.xpose.msra.mxu0 %v1585_v57 }
 0x536   :  { %5272 = vmatprep.subr.bf16.mxu0 %v7969_v4 }
 0x537   :  { %v1632_v17 = vpop.permute.xlu1 %1631 }
 0x538   :  { %v1637_v8 = vsel %vm489_vm2, %v1632_v17, 0  ;;  %v4910_v17 = vld [vmem:[%s7965_s5 + $0x48] sm:$0xff] }
 0x53a   :  { %v5795_v35 = vpop.eup %5794 }
 0x53b   :  { %v1087_v63 = vmul.f32 %v5795_v35, %v6634_v12  ;;  %v1684_v59 = vpop.permute.xlu1 %1683 }
 0x53c   :  { %v1689_v43 = vsel %vm489_vm2, %v1684_v59, 0  ;;  %5263 = vmatmul.mubr.msk.bf16.vlgmr.msra.gmra.mrb[36].mxu0 %vm489_vm2, %v1578_v44 }
 0x53d   :  { %5273 = vmatpush3.bf16.xpose.msra.mxu0 %v1689_v43  ;;  %v1095_v39 = vpack.c.bf16 %v1087_v63, %v1085_v61  ;;  %5274 = vmatprep.mubr.msk.bf16.mxu0 %vm5989_vm1, %v7969_v4 }
 0x53e   :  { %5284 = vmatprep.subr.bf16.mxu0 %v7969_v4 }
 0x53f   :  { %v1736_v15 = vpop.permute.xlu1 %1735  ;;  %5245 = vmatmul.mubr.msk.bf16.vlgmr.msra.gmra.mrb[44].mxu1 %vm911_vm3, %v1095_v39 }
 0x540   :  { %5255 = vmatpush3.bf16.xpose.msra.mxu1 %v1533_v47  ;;  %5256 = vmatprep.mubr.msk.bf16.mxu1 %vm5989_vm1, %v7969_v4  ;;  %v1741_v9 = vsel %vm489_vm2, %v1736_v15, 0 }
 0x541   :  { %5266 = vmatprep.subr.bf16.mxu1 %v7969_v4 }
 0x543   :  { %v1788_v55 = vpop.permute.xlu1 %1787 }
 0x544   :  { %v1793_v12 = vsel %vm489_vm2, %v1788_v55, 0  ;;  %5275 = vmatmul.mubr.msk.bf16.vlgmr.msra.gmra.mrb[40].mxu0 %vm489_vm2, %v1682_v25 }
 0x545   :  { %5285 = vmatpush3.bf16.xpose.msra.mxu0 %v1793_v12  ;;  %5286 = vmatprep.mubr.msk.bf16.mxu0 %vm5989_vm1, %v7969_v4 }
 0x546   :  { %5296 = vmatprep.subr.bf16.mxu0 %v7969_v4 }
 0x547   :  { %5257 = vmatmul.mubr.msk.bf16.vlgmr.msra.gmra.mrb[48].mxu1 %vm489_vm2, %v1526_v28  ;;  %v1840_v54 = vpop.permute.xlu1 %1839 }
 0x548   :  { %5267 = vmatpush3.bf16.xpose.msra.mxu1 %v1637_v8  ;;  %5268 = vmatprep.mubr.msk.bf16.mxu1 %vm5989_vm1, %v7969_v4  ;;  %v1845_v40 = vsel %vm489_vm2, %v1840_v54, 0 }
 0x549   :  { %5278 = vmatprep.subr.bf16.mxu1 %v7969_v4 }
 0x54b   :  { %v1838_v24 = vpop.permute.xlu1 %1837 }
 0x54c   :  { %5287 = vmatmul.mubr.msk.bf16.vlgmr.msra.gmra.mrb[44].mxu0 %vm489_vm2, %v1786_v5 }
 0x54d   :  { %5298 = vmatprep.mubr.msk.bf16.mxu0 %vm5989_vm1, %v7969_v4 }
 0x54f   :  { %5269 = vmatmul.mubr.msk.bf16.vlgmr.msra.gmra.mrb[52].mxu1 %vm489_vm2, %v1630_v60 }
 0x550   :  { %5279 = vmatpush3.bf16.xpose.msra.mxu1 %v1741_v9  ;;  %5280 = vmatprep.mubr.msk.bf16.mxu1 %vm5989_vm1, %v7969_v4 }
 0x551   :  { %5290 = vmatprep.subr.bf16.mxu1 %v7969_v4 }
 0x557   :  { %5281 = vmatmul.mubr.msk.bf16.vlgmr.msra.gmra.mrb[56].mxu1 %vm489_vm2, %v1734_v62 }
 0x558   :  { %5291 = vmatpush3.bf16.xpose.msra.mxu1 %v1845_v40  ;;  %5292 = vmatprep.mubr.msk.bf16.mxu1 %vm5989_vm1, %v7969_v4  ;;  %v4914_v40 = vld [vmem:[%s7965_s5 + $0x68] sm:$0xff] }
 0x559   :  { %5302 = vmatprep.subr.bf16.mxu1 %v7969_v4 }
 0x55f   :  { %5293 = vmatmul.mubr.msk.bf16.vlgmr.msra.gmra.mrb[60].mxu1 %vm489_vm2, %v1838_v24 }
 0x560   :  { %5304 = vmatprep.mubr.msk.bf16.mxu1 %vm5989_vm1, %v7969_v4 }
 0x582   :  { %v6744_v2 = vpop.f32.mrb[16].mxu0 }
 0x583   :  { %7976 = vst [vmem:[#allocation2_spill] sm:$0xff] %v6744_v2  ;;  %v5204_v33 = vpop.f32.mrb[17].mxu0 }
 0x584   :  { %v6746_v48 = vpop.f32.mrb[18].mxu0 }
 0x585   :  { %7977 = vst [vmem:[#allocation3_spill] sm:$0xff] %v6746_v48  ;;  %v5205_v11 = vpop.f32.mrb[19].mxu0 }
 0x59c   :  { %v6748_v0 = vpop.f32.mrb[32].mxu1 }
 0x59d   :  { %7978 = vst [vmem:[#allocation4_spill] sm:$0xff] %v6748_v0  ;;  %v5210_v7 = vpop.f32.mrb[33].mxu1 }
 0x59e   :  { %v6750_v58 = vpop.f32.mrb[34].mxu1 }
 0x59f   :  { %7979 = vst [vmem:[#allocation5_spill] sm:$0xff] %v6750_v58  ;;  %v5211_v51 = vpop.f32.mrb[35].mxu1 }
 0x5a4   :  { %v6752_v26 = vpop.f32.mrb[20].mxu0 }
 0x5a5   :  { %7980 = vst [vmem:[#allocation6_spill] sm:$0xff] %v6752_v26  ;;  %v5216_v27 = vpop.f32.mrb[21].mxu0 }
 0x5a6   :  { %v6754_v32 = vpop.f32.mrb[22].mxu0  ;;  %v4911_v27 = vld [vmem:[%s7965_s5 + $0x50] sm:$0xff] }
 0x5a7   :  { %7981 = vst [vmem:[#allocation7_spill] sm:$0xff] %v6754_v32  ;;  %v5217_v34 = vpop.f32.mrb[23].mxu0 }
 0x5a8   :  { %v6756_v36 = vpop.f32.mrb[36].mxu1 }
 0x5a9   :  { %7982 = vst [vmem:[#allocation8_spill] sm:$0xff] %v6756_v36  ;;  %v5222_v20 = vpop.f32.mrb[37].mxu1 }
 0x5aa   :  { %v6758_v42 = vpop.f32.mrb[38].mxu1  ;;  %v4913_v20 = vld [vmem:[%s7965_s5 + $0x60] sm:$0xff] }
 0x5ab   :  { %7983 = vst [vmem:[#allocation9_spill] sm:$0xff] %v6758_v42  ;;  %v5223_v49 = vpop.f32.mrb[39].mxu1 }
 0x5ac   :  { %v6760_v14 = vpop.f32.mrb[24].mxu0 }
 0x5ad   :  { %7984 = vst [vmem:[#allocation10_spill] sm:$0xff] %v6760_v14  ;;  %v5228_v46 = vpop.f32.mrb[25].mxu0 }
 0x5ae   :  { %v6762_v16 = vpop.f32.mrb[26].mxu0 }
 0x5af   :  { %7985 = vst [vmem:[#allocation11_spill] sm:$0xff] %v6762_v16  ;;  %v5229_v30 = vpop.f32.mrb[27].mxu0 }
 0x5b4   :  { %v6764_v6 = vpop.f32.mrb[28].mxu0 }
 0x5b5   :  { %7986 = vst [vmem:[#allocation12_spill] sm:$0xff] %v6764_v6  ;;  %v5240_v28 = vpop.f32.mrb[29].mxu0 }
 0x5b6   :  { %v6766_v52 = vpop.f32.mrb[30].mxu0 }
 0x5b7   :  { %7987 = vst [vmem:[#allocation13_spill] sm:$0xff] %v6766_v52  ;;  %v5241_v44 = vpop.f32.mrb[31].mxu0 }
 0x5da   :  { %v1517_v57 = vpop.f32.mrb[32].mxu0 }
 0x5db   :  { %v6774_v37 = vadd.f32 %v4909_v50, %v1517_v57  ;;  %v5252_v60 = vpop.f32.mrb[33].mxu0 }
 0x5dc   :  { %v1520_v35 = vpop.f32.mrb[34].mxu0 }
 0x5dd   :  { %v6776_v61 = vadd.f32 %v4910_v17, %v1520_v35  ;;  %v6778_v63 = vpop.f32.mrb[40].mxu1  ;;  %v5253_v59 = vpop.f32.mrb[35].mxu0  ;;  %v1913_v43 = vsel %vm911_vm3, %v6774_v37, -inf }
 0x5de   :  { %7988 = vst [vmem:[#allocation14_spill] sm:$0xff] %v6778_v63  ;;  %v5234_v39 = vpop.f32.mrb[41].mxu1  ;;  %1914 = vmax.xlane.f32.xlu0 %v1913_v43 }
 0x5df   :  { %v6782_v47 = vpop.f32.mrb[42].mxu1  ;;  %v1916_v25 = vsel %vm911_vm3, %v6776_v61, -inf }
 0x5e0   :  { %7989 = vst [vmem:[#allocation15_spill] sm:$0xff] %v6782_v47  ;;  %v5235_v15 = vpop.f32.mrb[43].mxu1  ;;  %1917 = vmax.xlane.f32.xlu1 %v1916_v25 }
 0x5f1   :  { %2144 = vrot.lane.b32.xlu1 %v6320_v13, %s5994_s20 }
 0x5f5   :  { %2191 = vrot.lane.b32.xlu1 %v6338_v1, %s5994_s20 }
 0x5f9   :  { %2238 = vrot.lane.b32.xlu1 %v6336_v38, %s5994_s20 }
 0x60f   :  { %v1621_v55 = vpop.f32.mrb[36].mxu0 }
 0x610   :  { %v5264_v12 = vpop.f32.mrb[37].mxu0  ;;  %v6815_v60 = vadd.f32 %v4913_v20, %v1621_v55 }
 0x611   :  { %v1624_v62 = vpop.f32.mrb[38].mxu0 }
 0x612   :  { %v6792_v8 = vpop.f32.mrb[44].mxu1  ;;  %v5265_v5 = vpop.f32.mrb[39].mxu0  ;;  %v6799_v11 = vadd.f32 %v4914_v40, %v1624_v62  ;;  %v1925_v55 = vsel %vm911_vm3, %v6815_v60, -inf }
 0x613   :  { %7990 = vst [vmem:[#allocation16_spill] sm:$0xff] %v6792_v8  ;;  %v5246_v9 = vpop.f32.mrb[45].mxu1 }
 0x614   :  { %v6794_v54 = vpop.f32.mrb[46].mxu1  ;;  %v4916_v9 = vld [vmem:[%s7965_s5 + $0x78] sm:$0xff] }
 0x615   :  { %7991 = vst [vmem:[#allocation17_spill] sm:$0xff] %v6794_v54  ;;  %v5247_v24 = vpop.f32.mrb[47].mxu1 }
 0x617   :  { %v1725_v33 = vpop.f32.mrb[40].mxu0 }
 0x618   :  { %v6801_v7 = vadd.f32 %v4909_v50, %v1725_v33  ;;  %v5276_v51 = vpop.f32.mrb[41].mxu0  ;;  %v1928_v50 = vsel %vm911_vm3, %v6799_v11, -inf }
 0x619   :  { %v1728_v34 = vpop.f32.mrb[42].mxu0 }
 0x61a   :  { %v6809_v49 = vadd.f32 %v4910_v17, %v1728_v34  ;;  %v1569_v46 = vpop.f32.mrb[48].mxu1  ;;  %v5277_v30 = vpop.f32.mrb[43].mxu0  ;;  %v4912_v17 = vld [vmem:[%s7965_s5 + $0x58] sm:$0xff] }
 0x61b   :  { %v6811_v28 = vadd.f32 %v4911_v27, %v1569_v46  ;;  %v5258_v44 = vpop.f32.mrb[49].mxu1 }
 0x61c   :  { %v1572_v57 = vpop.f32.mrb[50].mxu1 }
 0x61d   :  { %v5259_v35 = vpop.f32.mrb[51].mxu1  ;;  %1929 = vmax.xlane.f32.xlu1 %v1928_v50  ;;  %v1919_v59 = vsel %vm911_vm3, %v6811_v28, -inf  ;;  %v6824_v15 = vadd.f32 %v4912_v17, %v1572_v57  ;;  %v1940_v50 = vsel %vm911_vm3, %v6809_v49, -inf }
 0x61e   :  { %1920 = vmax.xlane.f32.xlu0 %v1919_v59 }
 0x61f   :  { %v1829_v43 = vpop.f32.mrb[44].mxu0 }
 0x620   :  { %v6822_v39 = vadd.f32 %v4913_v20, %v1829_v43  ;;  %v5288_v25 = vpop.f32.mrb[45].mxu0  ;;  %v1922_v20 = vsel %vm911_vm3, %v6824_v15, -inf }
 0x621   :  { %v1832_v12 = vpop.f32.mrb[46].mxu0 }
 0x622   :  { %1926 = vmax.xlane.f32.xlu0 %v1925_v55  ;;  %v1673_v62 = vpop.f32.mrb[52].mxu1  ;;  %v5289_v5 = vpop.f32.mrb[47].mxu0  ;;  %v6843_v25 = vadd.f32 %v4914_v40, %v1832_v12  ;;  %v4915_v40 = vld [vmem:[%s7965_s5 + $0x70] sm:$0xff] }
 0x623   :  { %v5270_v24 = vpop.f32.mrb[53].mxu1 }
 0x624   :  { %v1676_v33 = vpop.f32.mrb[54].mxu1 }
 0x625   :  { %v6831_v51 = vadd.f32 %v4916_v9, %v1676_v33  ;;  %v5271_v34 = vpop.f32.mrb[55].mxu1 }
 0x626   :  { %1923 = vmax.xlane.f32.xlu0 %v1922_v20 }
 0x627   :  { %v1934_v46 = vsel %vm911_vm3, %v6831_v51, -inf }
 0x628   :  { %1935 = vmax.xlane.f32.xlu1 %v1934_v46 }
 0x62a   :  { %v1777_v30 = vpop.f32.mrb[56].mxu1 }
 0x62b   :  { %v6837_v44 = vadd.f32 %v4911_v27, %v1777_v30  ;;  %v5282_v57 = vpop.f32.mrb[57].mxu1  ;;  %v1952_v27 = vsel %vm911_vm3, %v6843_v25, -inf }
 0x62c   :  { %1941 = vmax.xlane.f32.xlu1 %v1940_v50  ;;  %v1780_v35 = vpop.f32.mrb[58].mxu1  ;;  %v1949_v57 = vsel %vm911_vm3, %v6822_v39, -inf }
 0x62d   :  { %v6841_v59 = vadd.f32 %v4912_v17, %v1780_v35  ;;  %v5283_v43 = vpop.f32.mrb[59].mxu1  ;;  %v6858_v17 = vadd.f32 %v4915_v40, %v1673_v62  ;;  %v1943_v46 = vsel %vm911_vm3, %v6837_v44, -inf }
 0x62f   :  { %v1946_v55 = vsel %vm911_vm3, %v6841_v59, -inf  ;;  %v1931_v12 = vsel %vm911_vm3, %v6858_v17, -inf }
 0x630   :  { %1947 = vmax.xlane.f32.xlu1 %v1946_v55 }
 0x632   :  { %v1881_v5 = vpop.f32.mrb[60].mxu1 }
 0x633   :  { %v5294_v24 = vpop.f32.mrb[61].mxu1  ;;  %v6866_v30 = vadd.f32 %v4915_v40, %v1881_v5 }
 0x634   :  { %v1884_v33 = vpop.f32.mrb[62].mxu1  ;;  %1953 = vmax.xlane.f32.xlu1 %v1952_v27 }
 0x635   :  { %v6849_v34 = vadd.f32 %v4916_v9, %v1884_v33  ;;  %v5295_v20 = vpop.f32.mrb[63].mxu1  ;;  %v1937_v9 = vsel %vm911_vm3, %v6801_v7, -inf  ;;  %v1955_v50 = vsel %vm911_vm3, %v6866_v30, -inf }
 0x637   :  { %v1958_v62 = vsel %vm911_vm3, %v6849_v34, -inf }
 0x63c   :  { %2097 = vrot.lane.b32.xlu0 %v6322_v18, %s5994_s20 }
 0x645   :  { %2332 = vrot.lane.b32.xlu1 %v6352_v23, %s5994_s20 }
 0x65b   :  { %1932 = vmax.xlane.f32.xlu0 %v1931_v12 }
 0x65f   :  { %1938 = vmax.xlane.f32.xlu0 %v1937_v9 }
 0x663   :  { %1944 = vmax.xlane.f32.xlu0 %v1943_v46 }
 0x667   :  { %1950 = vmax.xlane.f32.xlu0 %v1949_v57 }
 0x669   :  { %1959 = vmax.xlane.f32.xlu1 %v1958_v62 }
 0x66b   :  { %1956 = vmax.xlane.f32.xlu0 %v1955_v50  ;;  %v1915_v5 = vpop.xlane.xlu0 %1914 }
 0x66c   :  { %v1961_v27 = vsub.f32 %v6774_v37, %v1915_v5 }
 0x66d   :  { %v1918_v35 = vpop.xlane.xlu1 %1917 }
 0x66e   :  { %v1962_v55 = vsub.f32 %v6776_v61, %v1918_v35  ;;  %v1977_v33 = vmul.f32 1.442695, %v1961_v27 }
 0x670   :  { %v1979_v24 = vmul.f32 1.442695, %v1962_v55 }
 0x671   :  { %v2145_v43 = vpop.permute.xlu1 %2144 }
 0x672   :  { %5303 = vmatpush3.bf16.msra.mxu1 %v2145_v43  ;;  %5796 = vpow2.f32 %v1979_v24 }
 0x673   :  { %5314 = vmatprep.subr.bf16.mxu1 %v7969_v4  ;;  %5798 = vpow2.f32 %v1977_v33 }
 0x675   :  { %v6891_v61 = vpop.permute.xlu1 %2191 }
 0x679   :  { %v6893_v46 = vpop.permute.xlu1 %2238 }
 0x67a   :  { %2426 = vrot.lane.b32.xlu1 %v6368_v21, %s5994_s20 }
 0x67c   :  { %v6883_v20 = vpop.eup %5796 }
 0x67d   :  { %v2012_v40 = vsel %vm911_vm3, %v6883_v20, 0.0  ;;  %v6887_v12 = vpop.eup %5798 }
 0x67e   :  { %v2009_v9 = vsel %vm911_vm3, %v6887_v12, 0.0 }
 0x681   :  { %2285 = vrot.lane.b32.xlu0 %v6354_v29, %s5994_s20 }
 0x685   :  { %2379 = vrot.lane.b32.xlu0 %v6370_v3, %s5994_s20  ;;  %s6003_s20 = smov 24  }
 0x69e   :  { %2013 = vadd.xlane.f32.xlu1 %v2012_v40 }
 0x6a4   :  { %2010 = vadd.xlane.f32.xlu0 %v2009_v9 }
 0x6aa   :  { %v1930_v50 = vpop.xlane.xlu1 %1929 }
 0x6ab   :  { %v1921_v37 = vpop.xlane.xlu0 %1920  ;;  %v1966_v55 = vsub.f32 %v6799_v11, %v1930_v50 }
 0x6ac   :  { %v1963_v57 = vsub.f32 %v6811_v28, %v1921_v37  ;;  %v7992_v37 = vmov 0.0  }
 0x6ad   :  { %v1987_v40 = vmul.f32 1.442695, %v1966_v55 }
 0x6ae   :  { %v1981_v62 = vmul.f32 1.442695, %v1963_v57 }
 0x6af   :  { %v1927_v35 = vpop.xlane.xlu0 %1926 }
 0x6b0   :  { %5800 = vpow2.f32 %v1981_v62  ;;  %v1965_v43 = vsub.f32 %v6815_v60, %v1927_v35 }
 0x6b2   :  { %v1985_v5 = vmul.f32 1.442695, %v1965_v43 }
 0x6b3   :  { %v1924_v24 = vpop.xlane.xlu0 %1923 }
 0x6b4   :  { %5802 = vpow2.f32 %v1985_v5  ;;  %v1964_v27 = vsub.f32 %v6824_v15, %v1924_v24 }
 0x6b5   :  { %v1936_v33 = vpop.xlane.xlu1 %1935 }
 0x6b6   :  { %v1983_v9 = vmul.f32 1.442695, %v1964_v27  ;;  %v1968_v4 = vsub.f32 %v6831_v51, %v1936_v33 }
 0x6b7   :  { %v2098_v6 = vpop.permute.xlu0 %2097 }
 0x6b8   :  { %5804 = vpow2.f32 %v1983_v9  ;;  %5297 = vmatpush3.bf16.msra.mxu0 %v2098_v6  ;;  %v1991_v11 = vmul.f32 1.442695, %v1968_v4 }
 0x6b9   :  { %v1942_v28 = vpop.xlane.xlu1 %1941  ;;  %5308 = vmatprep.subr.bf16.mxu0 %v7992_v37  ;;  %5806 = vpow2.f32 %v1987_v40 }
 0x6ba   :  { %v6901_v57 = vpop.eup %5800  ;;  %v1970_v60 = vsub.f32 %v6809_v49, %v1942_v28  ;;  %5808 = vpow2.f32 %v1991_v11 }
 0x6bb   :  { %v2015_v15 = vsel %vm911_vm3, %v6901_v57, 0.0 }
 0x6bc   :  { %2016 = vadd.xlane.f32.xlu0 %v2015_v15  ;;  %v1995_v51 = vmul.f32 1.442695, %v1970_v60 }
 0x6bd   :  { %v1948_v62 = vpop.xlane.xlu1 %1947 }
 0x6be   :  { %v6906_v50 = vpop.eup %5802  ;;  %v1972_v6 = vsub.f32 %v6841_v59, %v1948_v62  ;;  %5810 = vpow2.f32 %v1995_v51 }
 0x6bf   :  { %v2021_v35 = vsel %vm911_vm3, %v6906_v50, 0.0 }
 0x6c0   :  { %2022 = vadd.xlane.f32.xlu0 %v2021_v35  ;;  %v1999_v4 = vmul.f32 1.442695, %v1972_v6 }
 0x6c1   :  { %v1954_v43 = vpop.xlane.xlu1 %1953 }
 0x6c2   :  { %v6911_v55 = vpop.eup %5804  ;;  %v1974_v49 = vsub.f32 %v6843_v25, %v1954_v43  ;;  %5812 = vpow2.f32 %v1999_v4 }
 0x6c3   :  { %v2018_v5 = vsel %vm911_vm3, %v6911_v55, 0.0  ;;  %v6916_v24 = vpop.eup %5806 }
 0x6c4   :  { %2019 = vadd.xlane.f32.xlu1 %v2018_v5  ;;  %v2003_v27 = vmul.f32 1.442695, %v1974_v49  ;;  %v2024_v59 = vsel %vm911_vm3, %v6916_v24, 0.0  ;;  %v6920_v33 = vpop.eup %5808 }
 0x6c5   :  { %v2030_v40 = vsel %vm911_vm3, %v6920_v33, 0.0 }
 0x6c6   :  { %5814 = vpow2.f32 %v2003_v27  ;;  %v6941_v27 = vpop.permute.xlu1 %2332 }
 0x6c8   :  { %2025 = vadd.xlane.f32.xlu1 %v2024_v59  ;;  %v6924_v9 = vpop.eup %5810 }
 0x6c9   :  { %v2036_v25 = vsel %vm911_vm3, %v6924_v9, 0.0 }
 0x6cc   :  { %2031 = vadd.xlane.f32.xlu1 %v2030_v40  ;;  %v6928_v28 = vpop.eup %5812 }
 0x6cd   :  { %v2042_v11 = vsel %vm911_vm3, %v6928_v28, 0.0 }
 0x6d0   :  { %2037 = vadd.xlane.f32.xlu1 %v2036_v25  ;;  %v6932_v60 = vpop.eup %5814 }
 0x6d1   :  { %v2048_v15 = vsel %vm911_vm3, %v6932_v60, 0.0 }
 0x6d4   :  { %2043 = vadd.xlane.f32.xlu1 %v2042_v11 }
 0x6d8   :  { %2049 = vadd.xlane.f32.xlu1 %v2048_v15 }
 0x6e8   :  { %v1933_v62 = vpop.xlane.xlu0 %1932 }
 0x6e9   :  { %v1967_v51 = vsub.f32 %v6858_v17, %v1933_v62  ;;  %2526 = vrot.lane.b32.xlu1 %v6320_v13, %s5995_s30 }
 0x6eb   :  { %v1989_v6 = vmul.f32 1.442695, %v1967_v51 }
 0x6ec   :  { %v1939_v35 = vpop.xlane.xlu0 %1938 }
 0x6ed   :  { %5816 = vpow2.f32 %v1989_v6  ;;  %v1969_v43 = vsub.f32 %v6801_v7, %v1939_v35 }
 0x6ef   :  { %v1993_v4 = vmul.f32 1.442695, %v1969_v43 }
 0x6f0   :  { %v1945_v49 = vpop.xlane.xlu0 %1944 }
 0x6f1   :  { %5818 = vpow2.f32 %v1993_v4  ;;  %v1971_v5 = vsub.f32 %v6837_v44, %v1945_v49 }
 0x6f3   :  { %v1997_v59 = vmul.f32 1.442695, %v1971_v5 }
 0x6f4   :  { %v1951_v40 = vpop.xlane.xlu0 %1950 }
 0x6f5   :  { %5820 = vpow2.f32 %v1997_v59  ;;  %v1973_v17 = vsub.f32 %v6822_v39, %v1951_v40 }
 0x6f6   :  { %v1960_v25 = vpop.xlane.xlu1 %1959 }
 0x6f7   :  { %v6944_v11 = vpop.eup %5816  ;;  %v2001_v15 = vmul.f32 1.442695, %v1973_v17  ;;  %v1976_v62 = vsub.f32 %v6849_v34, %v1960_v25 }
 0x6f8   :  { %v1957_v51 = vpop.xlane.xlu0 %1956  ;;  %v2027_v7 = vsel %vm911_vm3, %v6944_v11, 0.0 }
 0x6f9   :  { %5822 = vpow2.f32 %v2001_v15  ;;  %v1975_v44 = vsub.f32 %v6866_v30, %v1957_v51  ;;  %2028 = vadd.xlane.f32.xlu0 %v2027_v7  ;;  %v2007_v35 = vmul.f32 1.442695, %v1976_v62 }
 0x6fa   :  { %v6980_v15 = vpop.permute.xlu1 %2426 }
 0x6fb   :  { %v6950_v6 = vpop.eup %5818  ;;  %v2005_v43 = vmul.f32 1.442695, %v1975_v44 }
 0x6fc   :  { %v2033_v39 = vsel %vm911_vm3, %v6950_v6, 0.0  ;;  %v2286_v25 = vpop.permute.xlu0 %2285 }
 0x6fd   :  { %5824 = vpow2.f32 %v2005_v43  ;;  %2034 = vadd.xlane.f32.xlu0 %v2033_v39 }
 0x6fe   :  { %5826 = vpow2.f32 %v2007_v35 }
 0x6ff   :  { %v6954_v4 = vpop.eup %5820 }
 0x700   :  { %v2039_v34 = vsel %vm911_vm3, %v6954_v4, 0.0  ;;  %v6985_v62 = vpop.permute.xlu0 %2379 }
 0x701   :  { %2040 = vadd.xlane.f32.xlu0 %v2039_v34 }
 0x703   :  { %v6958_v49 = vpop.eup %5822 }
 0x704   :  { %v2045_v30 = vsel %vm911_vm3, %v6958_v49, 0.0 }
 0x705   :  { %2046 = vadd.xlane.f32.xlu0 %v2045_v30 }
 0x707   :  { %v6962_v5 = vpop.eup %5824 }
 0x708   :  { %v2051_v59 = vsel %vm911_vm3, %v6962_v5, 0.0  ;;  %v6966_v40 = vpop.eup %5826 }
 0x709   :  { %2052 = vadd.xlane.f32.xlu0 %v2051_v59  ;;  %v2054_v17 = vsel %vm911_vm3, %v6966_v40, 0.0 }
 0x70d   :  { %2055 = vadd.xlane.f32.xlu1 %v2054_v17 }
 0x71e   :  { %2577 = vrot.lane.b32.xlu1 %v6338_v1, %s5995_s30 }
 0x71f   :  { %2475 = vrot.lane.b32.xlu0 %v6322_v18, %s5995_s30 }
 0x722   :  { %2628 = vrot.lane.b32.xlu1 %v6336_v38, %s5995_s30 }
 0x723   :  { %2473 = vrot.lane.b32.xlu0 %v6328_v22, %s5996_s9 }
 0x726   :  { %2679 = vrot.lane.b32.xlu1 %v6354_v29, %s5995_s30 }
 0x727   :  { %2524 = vrot.lane.b32.xlu0 %v6324_v19, %s5996_s9 }
 0x72a   :  { %2730 = vrot.lane.b32.xlu1 %v6352_v23, %s5995_s30 }
 0x72b   :  { %2575 = vrot.lane.b32.xlu0 %v6342_v10, %s5996_s9  ;;  %v2014_v51 = vpop.xlane.xlu1 %2013 }
 0x72c   :  { %5828 = vrcp.f32 %v2014_v51 }
 0x72e   :  { %2781 = vrot.lane.b32.xlu1 %v6370_v3, %s5995_s30 }
 0x72f   :  { %2626 = vrot.lane.b32.xlu0 %v6340_v41, %s5996_s9 }
 0x731   :  { %v2011_v7 = vpop.xlane.xlu0 %2010 }
 0x732   :  { %5830 = vrcp.f32 %v2011_v7  ;;  %2832 = vrot.lane.b32.xlu1 %v6368_v21, %s5995_s30 }
 0x733   :  { %2677 = vrot.lane.b32.xlu0 %v6358_v56, %s5996_s9 }
 0x736   :  { %2830 = vrot.lane.b32.xlu1 %v6372_v31, %s5996_s9  ;;  %v5829_v44 = vpop.eup %5828 }
 0x737   :  { %2728 = vrot.lane.b32.xlu0 %v6356_v53, %s5996_s9  ;;  %v2060_v43 = vmul.f32 %v5829_v44, %v6883_v20 }
 0x73b   :  { %2779 = vrot.lane.b32.xlu0 %v6376_v45, %s5996_s9 }
 0x73c   :  { %v5831_v35 = vpop.eup %5830 }
 0x73d   :  { %v2058_v39 = vmul.f32 %v5831_v35, %v6887_v12 }
 0x73f   :  { %v2089_v34 = vpack.c.bf16 %v2060_v43, %v2058_v39 }
 0x741   :  { %5299 = vmatmul.mubr.msk.bf16.vlgmr.msra.gmra.mrb[48].mxu0 %vm911_vm3, %v2089_v34 }
 0x742   :  { %5309 = vmatpush3.bf16.msra.mxu0 %v6891_v61  ;;  %5310 = vmatprep.mubr.msk.bf16.mxu0 %vm5989_vm1, %v7992_v37 }
 0x743   :  { %5320 = vmatprep.subr.bf16.mxu0 %v7992_v37 }
 0x749   :  { %v2017_v30 = vpop.xlane.xlu0 %2016 }
 0x74a   :  { %5832 = vrcp.f32 %v2017_v30 }
 0x74d   :  { %v2023_v59 = vpop.xlane.xlu0 %2022 }
 0x751   :  { %v2020_v17 = vpop.xlane.xlu1 %2019 }
 0x752   :  { %5834 = vrcp.f32 %v2020_v17 }
 0x753   :  { %5836 = vrcp.f32 %v2023_v59 }
 0x754   :  { %v5833_v20 = vpop.eup %5832 }
 0x755   :  { %v2026_v51 = vpop.xlane.xlu1 %2025  ;;  %v2062_v7 = vmul.f32 %v5833_v20, %v6901_v57 }
 0x756   :  { %5838 = vrcp.f32 %v2026_v51 }
 0x759   :  { %v2032_v57 = vpop.xlane.xlu1 %2031 }
 0x75a   :  { %5840 = vrcp.f32 %v2032_v57 }
 0x75c   :  { %v5835_v12 = vpop.eup %5834 }
 0x75d   :  { %v2064_v44 = vmul.f32 %v5835_v12, %v6911_v55  ;;  %v5837_v61 = vpop.eup %5836 }
 0x75e   :  { %v2066_v39 = vmul.f32 %v5837_v61, %v6906_v50  ;;  %v2038_v50 = vpop.xlane.xlu1 %2037 }
 0x75f   :  { %v2090_v35 = vpack.c.bf16 %v2064_v44, %v2062_v7 }
 0x760   :  { %v5839_v43 = vpop.eup %5838 }
 0x761   :  { %v2068_v34 = vmul.f32 %v5839_v43, %v6916_v24  ;;  %5305 = vmatmul.mubr.msk.bf16.vlgmr.msra.gmra.mrb[64].mxu1 %vm911_vm3, %v2090_v35 }
 0x762   :  { %5315 = vmatpush3.bf16.msra.mxu1 %v6893_v46  ;;  %5316 = vmatprep.mubr.msk.bf16.mxu1 %vm5989_vm1, %v7992_v37  ;;  %v2044_v46 = vpop.xlane.xlu1 %2043 }
 0x763   :  { %v2091_v30 = vpack.c.bf16 %v2068_v34, %v2066_v39  ;;  %5326 = vmatprep.subr.bf16.mxu1 %v7992_v37 }
 0x764   :  { %v5841_v51 = vpop.eup %5840 }
 0x765   :  { %5311 = vmatmul.mubr.msk.bf16.vlgmr.msra.gmra.mrb[52].mxu0 %vm911_vm3, %v2091_v30  ;;  %v2072_v20 = vmul.f32 %v5841_v51, %v6920_v33 }
 0x766   :  { %5321 = vmatpush3.bf16.msra.mxu0 %v2286_v25  ;;  %5322 = vmatprep.mubr.msk.bf16.mxu0 %vm5989_vm1, %v7992_v37  ;;  %v2050_v59 = vpop.xlane.xlu1 %2049 }
 0x767   :  { %5332 = vmatprep.subr.bf16.mxu0 %v7992_v37 }
 0x76a   :  { %v2527_v39 = vpop.permute.xlu1 %2526 }
 0x786   :  { %v2029_v55 = vpop.xlane.xlu0 %2028 }
 0x787   :  { %5842 = vrcp.f32 %v2029_v55 }
 0x788   :  { %5844 = vrcp.f32 %v2038_v50 }
 0x78a   :  { %v2035_v24 = vpop.xlane.xlu0 %2034 }
 0x78b   :  { %5846 = vrcp.f32 %v2035_v24 }
 0x78c   :  { %5848 = vrcp.f32 %v2044_v46 }
 0x78e   :  { %v2041_v17 = vpop.xlane.xlu0 %2040 }
 0x78f   :  { %5850 = vrcp.f32 %v2041_v17 }
 0x790   :  { %5852 = vrcp.f32 %v2050_v59 }
 0x791   :  { %v5843_v25 = vpop.eup %5842 }
 0x792   :  { %v2070_v12 = vmul.f32 %v5843_v25, %v6944_v11  ;;  %v2047_v7 = vpop.xlane.xlu0 %2046  ;;  %v5845_v44 = vpop.eup %5844 }
 0x793   :  { %5854 = vrcp.f32 %v2047_v7  ;;  %v2076_v43 = vmul.f32 %v5845_v44, %v6924_v9  ;;  %v2532_v44 = vsel %vm489_vm2, %v2527_v39, 0 }
 0x794   :  { %v2092_v61 = vpack.c.bf16 %v2072_v20, %v2070_v12 }
 0x795   :  { %v5847_v35 = vpop.eup %5846 }
 0x796   :  { %v2074_v34 = vmul.f32 %v5847_v35, %v6950_v6  ;;  %5317 = vmatmul.mubr.msk.bf16.vlgmr.msra.gmra.mrb[68].mxu1 %vm911_vm3, %v2092_v61  ;;  %v2053_v30 = vpop.xlane.xlu0 %2052  ;;  %v5849_v57 = vpop.eup %5848 }
 0x797   :  { %5327 = vmatpush3.bf16.msra.mxu1 %v6941_v27  ;;  %5328 = vmatprep.mubr.msk.bf16.mxu1 %vm5989_vm1, %v7992_v37  ;;  %5856 = vrcp.f32 %v2053_v30  ;;  %v2080_v50 = vmul.f32 %v5849_v57, %v6928_v28 }
 0x798   :  { %v2093_v33 = vpack.c.bf16 %v2076_v43, %v2074_v34  ;;  %5338 = vmatprep.subr.bf16.mxu1 %v7992_v37 }
 0x799   :  { %v5851_v11 = vpop.eup %5850 }
 0x79a   :  { %v2078_v9 = vmul.f32 %v5851_v11, %v6954_v4  ;;  %v2056_v55 = vpop.xlane.xlu1 %2055  ;;  %5323 = vmatmul.mubr.msk.bf16.vlgmr.msra.gmra.mrb[56].mxu0 %vm911_vm3, %v2093_v33  ;;  %v2476_v6 = vpop.permute.xlu0 %2475 }
 0x79b   :  { %v5853_v46 = vpop.eup %5852  ;;  %5858 = vrcp.f32 %v2056_v55  ;;  %5333 = vmatpush3.bf16.msra.mxu0 %v6985_v62  ;;  %5334 = vmatprep.mubr.msk.bf16.mxu0 %vm5989_vm1, %v7992_v37  ;;  %v2481_v25 = vsel %vm489_vm2, %v2476_v6, 0 }
 0x79c   :  { %v2094_v27 = vpack.c.bf16 %v2080_v50, %v2078_v9  ;;  %5344 = vmatprep.subr.bf16.mxu0 %v7992_v37  ;;  %v2084_v59 = vmul.f32 %v5853_v46, %v6932_v60 }
 0x79d   :  { %v5855_v24 = vpop.eup %5854 }
 0x79e   :  { %v2082_v28 = vmul.f32 %v5855_v24, %v6958_v49  ;;  %5329 = vmatmul.mubr.msk.bf16.vlgmr.msra.gmra.mrb[72].mxu1 %vm911_vm3, %v2094_v27  ;;  %v2474_v4 = vpop.permute.xlu0 %2473  ;;  %v2578_v62 = vpop.permute.xlu1 %2577 }
 0x79f   :  { %5339 = vmatpush3.bf16.msra.mxu1 %v6980_v15  ;;  %5340 = vmatprep.mubr.msk.bf16.mxu1 %vm5989_vm1, %v7992_v37  ;;  %v2583_v35 = vsel %vm489_vm2, %v2578_v62, 0 }
 0x7a0   :  { %v2095_v17 = vpack.c.bf16 %v2084_v59, %v2082_v28  ;;  %5350 = vmatprep.subr.bf16.mxu1 %v7992_v37 }
 0x7a1   :  { %v5857_v51 = vpop.eup %5856 }
 0x7a2   :  { %5335 = vmatmul.mubr.msk.bf16.vlgmr.msra.gmra.mrb[60].mxu0 %vm911_vm3, %v2095_v17  ;;  %v2525_v60 = vpop.permute.xlu0 %2524  ;;  %v2086_v15 = vmul.f32 %v5857_v51, %v6962_v5  ;;  %v2629_v12 = vpop.permute.xlu1 %2628 }
 0x7a3   :  { %5346 = vmatprep.mubr.msk.bf16.mxu0 %vm5989_vm1, %v7992_v37 }
 0x7a4   :  { %5345 = vmatpush3.bf16.xpose.msra.mxu0 %v2481_v25 }
 0x7a5   :  { %v5859_v49 = vpop.eup %5858  ;;  %5356 = vmatprep.subr.bf16.mxu0 %v7992_v37 }
 0x7a6   :  { %v2088_v20 = vmul.f32 %v5859_v49, %v6966_v40  ;;  %v2576_v61 = vpop.permute.xlu0 %2575  ;;  %v2680_v43 = vpop.permute.xlu1 %2679  ;;  %v2634_v40 = vsel %vm489_vm2, %v2629_v12, 0 }
 0x7a7   :  { %v2685_v34 = vsel %vm489_vm2, %v2680_v43, 0 }
 0x7a8   :  { %v2096_v7 = vpack.c.bf16 %v2088_v20, %v2086_v15 }
 0x7aa   :  { %5341 = vmatmul.mubr.msk.bf16.vlgmr.msra.gmra.mrb[76].mxu1 %vm911_vm3, %v2096_v7  ;;  %v2627_v5 = vpop.permute.xlu0 %2626  ;;  %v2731_v39 = vpop.permute.xlu1 %2730 }
 0x7ab   :  { %5347 = vmatmul.mubr.msk.bf16.vlgmr.msra.gmra.mrb[64].mxu0 %vm489_vm2, %v2474_v4  ;;  %5351 = vmatpush3.bf16.xpose.msra.mxu1 %v2532_v44  ;;  %v2736_v33 = vsel %vm489_vm2, %v2731_v39, 0 }
 0x7ac   :  { %5357 = vmatpush3.bf16.xpose.msra.mxu0 %v2583_v35  ;;  %5352 = vmatprep.mubr.msk.bf16.mxu1 %vm5989_vm1, %v7992_v37 }
 0x7ad   :  { %5358 = vmatprep.mubr.msk.bf16.mxu0 %vm5989_vm1, %v7992_v37  ;;  %5362 = vmatprep.subr.bf16.mxu1 %v7992_v37 }
 0x7ae   :  { %5368 = vmatprep.subr.bf16.mxu0 %v7992_v37  ;;  %v2678_v30 = vpop.permute.xlu0 %2677  ;;  %v2782_v57 = vpop.permute.xlu1 %2781 }
 0x7af   :  { %v2787_v11 = vsel %vm489_vm2, %v2782_v57, 0 }
 0x7b2   :  { %5353 = vmatmul.mubr.msk.bf16.vlgmr.msra.gmra.mrb[80].mxu1 %vm489_vm2, %v2525_v60  ;;  %v2729_v50 = vpop.permute.xlu0 %2728  ;;  %v2833_v9 = vpop.permute.xlu1 %2832 }
 0x7b3   :  { %5359 = vmatmul.mubr.msk.bf16.vlgmr.msra.gmra.mrb[68].mxu0 %vm489_vm2, %v2576_v61  ;;  %5363 = vmatpush3.bf16.xpose.msra.mxu1 %v2634_v40  ;;  %v2838_v55 = vsel %vm489_vm2, %v2833_v9, 0 }
 0x7b4   :  { %5369 = vmatpush3.bf16.xpose.msra.mxu0 %v2685_v34  ;;  %5364 = vmatprep.mubr.msk.bf16.mxu1 %vm5989_vm1, %v7992_v37 }
 0x7b5   :  { %5370 = vmatprep.mubr.msk.bf16.mxu0 %vm5989_vm1, %v7992_v37  ;;  %5374 = vmatprep.subr.bf16.mxu1 %v7992_v37 }
 0x7b6   :  { %5380 = vmatprep.subr.bf16.mxu0 %v7992_v37  ;;  %v2780_v6 = vpop.permute.xlu0 %2779  ;;  %v2831_v46 = vpop.permute.xlu1 %2830 }
 0x7ba   :  { %5365 = vmatmul.mubr.msk.bf16.vlgmr.msra.gmra.mrb[84].mxu1 %vm489_vm2, %v2627_v5 }
 0x7bb   :  { %5371 = vmatmul.mubr.msk.bf16.vlgmr.msra.gmra.mrb[72].mxu0 %vm489_vm2, %v2678_v30  ;;  %5375 = vmatpush3.bf16.xpose.msra.mxu1 %v2736_v33 }
 0x7bc   :  { %5381 = vmatpush3.bf16.xpose.msra.mxu0 %v2787_v11  ;;  %5376 = vmatprep.mubr.msk.bf16.mxu1 %vm5989_vm1, %v7992_v37 }
 0x7bd   :  { %5382 = vmatprep.mubr.msk.bf16.mxu0 %vm5989_vm1, %v7992_v37  ;;  %5386 = vmatprep.subr.bf16.mxu1 %v7992_v37 }
 0x7be   :  { %5392 = vmatprep.subr.bf16.mxu0 %v7992_v37 }
 0x7c2   :  { %5377 = vmatmul.mubr.msk.bf16.vlgmr.msra.gmra.mrb[88].mxu1 %vm489_vm2, %v2729_v50 }
 0x7c3   :  { %5383 = vmatmul.mubr.msk.bf16.vlgmr.msra.gmra.mrb[76].mxu0 %vm489_vm2, %v2780_v6  ;;  %5387 = vmatpush3.bf16.xpose.msra.mxu1 %v2838_v55 }
 0x7c4   :  { %5388 = vmatprep.mubr.msk.bf16.mxu1 %vm5989_vm1, %v7992_v37  ;;  %5398 = vmatprep.subr.bf16.mxu1 %v7992_v37 }
 0x7c5   :  { %5394 = vmatprep.mubr.msk.bf16.mxu0 %vm5989_vm1, %v7992_v37 }
 0x7ca   :  { %5389 = vmatmul.mubr.msk.bf16.vlgmr.msra.gmra.mrb[92].mxu1 %vm489_vm2, %v2831_v46 }
 0x7cb   :  { %5400 = vmatprep.mubr.msk.bf16.mxu1 %vm5989_vm1, %v7992_v37 }
 0x814   :  { %v7087_v27 = vpop.f32.mrb[48].mxu0 }
 0x815   :  { %v5300_v24 = vpop.f32.mrb[49].mxu0 }
 0x816   :  { %v7089_v59 = vpop.f32.mrb[50].mxu0 }
 0x817   :  { %v5301_v4 = vpop.f32.mrb[51].mxu0 }
 0x834   :  { %v7093_v62 = vpop.f32.mrb[64].mxu1 }
 0x835   :  { %v5306_v17 = vpop.f32.mrb[65].mxu1 }
 0x836   :  { %v7095_v51 = vpop.f32.mrb[66].mxu1 }
 0x837   :  { %v5307_v60 = vpop.f32.mrb[67].mxu1 }
 0x838   :  { %v7099_v49 = vpop.f32.mrb[52].mxu0  ;;  %v4933_v60 = vld [vmem:[%s7965_s5 + $0x80] sm:$0xff] }
 0x839   :  { %v5312_v15 = vpop.f32.mrb[53].mxu0 }
 0x83a   :  { %v7101_v20 = vpop.f32.mrb[54].mxu0 }
 0x83b   :  { %v5313_v7 = vpop.f32.mrb[55].mxu0 }
 0x869   :  { %v7105_v44 = vpop.f32.mrb[68].mxu1 }
 0x86a   :  { %v5318_v61 = vpop.f32.mrb[69].mxu1 }
 0x86b   :  { %v7107_v35 = vpop.f32.mrb[70].mxu1 }
 0x86c   :  { %v5319_v5 = vpop.f32.mrb[71].mxu1 }
 0x86d   :  { %v7111_v40 = vpop.f32.mrb[56].mxu0  ;;  %v4934_v5 = vld [vmem:[%s7965_s5 + $0x88] sm:$0xff] }
 0x86e   :  { %v5324_v39 = vpop.f32.mrb[57].mxu0 }
 0x86f   :  { %v7113_v34 = vpop.f32.mrb[58].mxu0 }
 0x870   :  { %v5325_v57 = vpop.f32.mrb[59].mxu0 }
 0x871   :  { %v7117_v33 = vpop.f32.mrb[72].mxu1 }
 0x872   :  { %v5330_v11 = vpop.f32.mrb[73].mxu1 }
 0x873   :  { %v7119_v50 = vpop.f32.mrb[74].mxu1 }
 0x874   :  { %v5331_v55 = vpop.f32.mrb[75].mxu1 }
 0x875   :  { %v7123_v6 = vpop.f32.mrb[60].mxu0 }
 0x876   :  { %v5336_v46 = vpop.f32.mrb[61].mxu0 }
 0x877   :  { %v7125_v24 = vpop.f32.mrb[62].mxu0 }
 0x878   :  { %v5337_v17 = vpop.f32.mrb[63].mxu0 }
 0x87d   :  { %v7132_v15 = vpop.f32.mrb[76].mxu1 }
 0x87e   :  { %7993 = vst [vmem:[#allocation18_spill] sm:$0xff] %v7132_v15  ;;  %v2517_v7 = vpop.f32.mrb[64].mxu0  ;;  %v5342_v61 = vpop.f32.mrb[77].mxu1 }
 0x87f   :  { %v7137_v39 = vadd.f32 %v4933_v60, %v2517_v7  ;;  %v5348_v57 = vpop.f32.mrb[65].mxu0  ;;  %v7139_v11 = vpop.f32.mrb[78].mxu1  ;;  %v4935_v7 = vld [vmem:[%s7965_s5 + $0x90] sm:$0xff] }
 0x880   :  { %v2520_v46 = vpop.f32.mrb[66].mxu0  ;;  %v5343_v17 = vpop.f32.mrb[79].mxu1 }
 0x881   :  { %v7143_v4 = vadd.f32 %v4934_v5, %v2520_v46  ;;  %v5349_v9 = vpop.f32.mrb[67].mxu0  ;;  %v2906_v61 = vsel %vm911_vm3, %v7137_v39, -inf  ;;  %v4937_v17 = vld [vmem:[%s7965_s5 + $0xa0] sm:$0xff] }
 0x882   :  { %2907 = vmax.xlane.f32.xlu0 %v2906_v61 }
 0x883   :  { %v2909_v43 = vsel %vm911_vm3, %v7143_v4, -inf }
 0x884   :  { %2910 = vmax.xlane.f32.xlu1 %v2909_v43  ;;  %v4936_v43 = vld [vmem:[%s7965_s5 + $0x98] sm:$0xff] }
 0x885   :  { %v2568_v57 = vpop.f32.mrb[80].mxu1 }
 0x886   :  { %v7155_v46 = vadd.f32 %v4935_v7, %v2568_v57  ;;  %v2619_v9 = vpop.f32.mrb[68].mxu0  ;;  %v5354_v55 = vpop.f32.mrb[81].mxu1 }
 0x887   :  { %v5360_v25 = vpop.f32.mrb[69].mxu0  ;;  %v2571_v30 = vpop.f32.mrb[82].mxu1  ;;  %v7157_v61 = vadd.f32 %v4937_v17, %v2619_v9 }
 0x888   :  { %v2622_v12 = vpop.f32.mrb[70].mxu0  ;;  %v5355_v28 = vpop.f32.mrb[83].mxu1  ;;  %v2912_v52 = vsel %vm911_vm3, %v7155_v46, -inf  ;;  %v7164_v47 = vadd.f32 %v4936_v43, %v2571_v30 }
 0x889   :  { %v5361_v63 = vpop.f32.mrb[71].mxu0  ;;  %2913 = vmax.xlane.f32.xlu0 %v2912_v52  ;;  %v2918_v55 = vsel %vm911_vm3, %v7157_v61, -inf }
 0x88a   :  { %v2915_v36 = vsel %vm911_vm3, %v7164_v47, -inf }
 0x88d   :  { %2919 = vmax.xlane.f32.xlu0 %v2918_v55  ;;  %v2670_v25 = vpop.f32.mrb[84].mxu1 }
 0x88e   :  { %v2721_v57 = vpop.f32.mrb[72].mxu0  ;;  %v5366_v9 = vpop.f32.mrb[85].mxu1 }
 0x88f   :  { %v7168_v8 = vadd.f32 %v4933_v60, %v2721_v57  ;;  %v5372_v28 = vpop.f32.mrb[73].mxu0  ;;  %v2673_v54 = vpop.f32.mrb[86].mxu1 }
 0x890   :  { %v2724_v14 = vpop.f32.mrb[74].mxu0  ;;  %v5367_v16 = vpop.f32.mrb[87].mxu1 }
 0x891   :  { %v7172_v63 = vadd.f32 %v4934_v5, %v2724_v14  ;;  %v5373_v52 = vpop.f32.mrb[75].mxu0  ;;  %2916 = vmax.xlane.f32.xlu0 %v2915_v36 }
 0x895   :  { %3137 = vrot.lane.b32.xlu1 %v6320_v13, %s5997_s18  ;;  %v2772_v30 = vpop.f32.mrb[88].mxu1 }
 0x896   :  { %v7176_v55 = vadd.f32 %v4935_v7, %v2772_v30  ;;  %v2823_v60 = vpop.f32.mrb[76].mxu0  ;;  %v5378_v57 = vpop.f32.mrb[89].mxu1  ;;  %v4940_v7 = vld [vmem:[%s7965_s5 + $0xb8] sm:$0xff] }
 0x897   :  { %v7178_v9 = vadd.f32 %v4937_v17, %v2823_v60  ;;  %v5384_v28 = vpop.f32.mrb[77].mxu0  ;;  %v2775_v16 = vpop.f32.mrb[90].mxu1  ;;  %v4939_v57 = vld [vmem:[%s7965_s5 + $0xb0] sm:$0xff] }
 0x898   :  { %v2826_v42 = vpop.f32.mrb[78].mxu0  ;;  %v5379_v26 = vpop.f32.mrb[91].mxu1  ;;  %v7199_v28 = vadd.f32 %v4940_v7, %v2673_v54  ;;  %v2933_v54 = vsel %vm911_vm3, %v7172_v63, -inf }
 0x899   :  { %3184 = vrot.lane.b32.xlu1 %v6338_v1, %s5997_s18  ;;  %v5385_v14 = vpop.f32.mrb[79].mxu0  ;;  %v4938_v26 = vld [vmem:[%s7965_s5 + $0xa8] sm:$0xff] }
 0x89a   :  { %v7194_v60 = vadd.f32 %v4938_v26, %v2622_v12 }
 0x89c   :  { %v2921_v14 = vsel %vm911_vm3, %v7194_v60, -inf }
 0x89d   :  { %3231 = vrot.lane.b32.xlu1 %v6336_v38, %s5997_s18  ;;  %v2874_v36 = vpop.f32.mrb[92].mxu1 }
 0x89e   :  { %v5390_v5 = vpop.f32.mrb[93].mxu1 }
 0x89f   :  { %v2877_v52 = vpop.f32.mrb[94].mxu1  ;;  %v7203_v5 = vadd.f32 %v4939_v57, %v2670_v25  ;;  %v7215_v25 = vadd.f32 %v4938_v26, %v2826_v42 }
 0x8a0   :  { %v7187_v17 = vadd.f32 %v4940_v7, %v2877_v52  ;;  %v5391_v30 = vpop.f32.mrb[95].mxu1  ;;  %v2927_v52 = vsel %vm911_vm3, %v7199_v28, -inf  ;;  %v2930_v7 = vsel %vm911_vm3, %v7168_v8, -inf }
 0x8a1   :  { %v2924_v12 = vsel %vm911_vm3, %v7203_v5, -inf  ;;  %v7209_v30 = vadd.f32 %v4936_v43, %v2775_v16  ;;  %v2945_v43 = vsel %vm911_vm3, %v7215_v25, -inf  ;;  %v7223_v16 = vadd.f32 %v4939_v57, %v2874_v36 }
 0x8a2   :  { %v2951_v36 = vsel %vm911_vm3, %v7187_v17, -inf }
 0x8a3   :  { %v2948_v42 = vsel %vm911_vm3, %v7223_v16, -inf }
 0x8a7   :  { %3090 = vrot.lane.b32.xlu0 %v6322_v18, %s5997_s18 }
 0x8c1   :  { %2922 = vmax.xlane.f32.xlu1 %v2921_v14  ;;  %v2939_v14 = vsel %vm911_vm3, %v7209_v30, -inf }
 0x8c5   :  { %2928 = vmax.xlane.f32.xlu1 %v2927_v52  ;;  %v2936_v52 = vsel %vm911_vm3, %v7176_v55, -inf }
 0x8c6   :  { %2925 = vmax.xlane.f32.xlu0 %v2924_v12  ;;  %v2942_v12 = vsel %vm911_vm3, %v7178_v9, -inf }
 0x8c9   :  { %2934 = vmax.xlane.f32.xlu1 %v2933_v54 }
 0x8ca   :  { %2931 = vmax.xlane.f32.xlu0 %v2930_v7 }
 0x8cd   :  { %2940 = vmax.xlane.f32.xlu1 %v2939_v14 }
 0x8ce   :  { %2937 = vmax.xlane.f32.xlu0 %v2936_v52 }
 0x8d1   :  { %2946 = vmax.xlane.f32.xlu1 %v2945_v43 }
 0x8d2   :  { %2943 = vmax.xlane.f32.xlu0 %v2942_v12 }
 0x8d6   :  { %2949 = vmax.xlane.f32.xlu0 %v2948_v42 }
 0x8e2   :  { %3325 = vrot.lane.b32.xlu1 %v6352_v23, %s5997_s18 }
 0x8ec   :  { %3278 = vrot.lane.b32.xlu0 %v6354_v29, %s5997_s18 }
 0x8f0   :  { %3372 = vrot.lane.b32.xlu0 %v6370_v3, %s5997_s18 }
 0x906   :  { %2952 = vmax.xlane.f32.xlu1 %v2951_v36 }
 0x90f   :  { %v2908_v26 = vpop.xlane.xlu0 %2907 }
 0x910   :  { %v2954_v57 = vsub.f32 %v7137_v39, %v2908_v26 }
 0x911   :  { %v2911_v54 = vpop.xlane.xlu1 %2910 }
 0x912   :  { %v2970_v7 = vmul.f32 1.442695, %v2954_v57 }
 0x914   :  { %5860 = vpow2.f32 %v2970_v7 }
 0x915   :  { %v3138_v14 = vpop.permute.xlu1 %3137 }
 0x916   :  { %5399 = vmatpush3.bf16.msra.mxu1 %v3138_v14  ;;  %v2914_v52 = vpop.xlane.xlu0 %2913  ;;  %v2955_v14 = vsub.f32 %v7143_v4, %v2911_v54 }
 0x917   :  { %3419 = vrot.lane.b32.xlu1 %v6368_v21, %s5997_s18  ;;  %v2956_v43 = vsub.f32 %v7155_v46, %v2914_v52  ;;  %5410 = vmatprep.subr.bf16.mxu1 %v7992_v37 }
 0x919   :  { %v2974_v12 = vmul.f32 1.442695, %v2956_v43  ;;  %v2972_v43 = vmul.f32 1.442695, %v2955_v14 }
 0x91a   :  { %v2920_v42 = vpop.xlane.xlu0 %2919 }
 0x91b   :  { %5862 = vpow2.f32 %v2974_v12  ;;  %v2958_v36 = vsub.f32 %v7157_v61, %v2920_v42 }
 0x91d   :  { %v2978_v32 = vmul.f32 1.442695, %v2958_v36 }
 0x91e   :  { %v7243_v39 = vpop.eup %5860  ;;  %v2917_v26 = vpop.xlane.xlu0 %2916 }
 0x91f   :  { %5864 = vpow2.f32 %v2978_v32  ;;  %v3002_v57 = vsel %vm911_vm3, %v7243_v39, 0.0  ;;  %v2957_v32 = vsub.f32 %v7164_v47, %v2917_v26  ;;  %v7266_v47 = vpop.permute.xlu1 %3184 }
 0x920   :  { %3003 = vadd.xlane.f32.xlu0 %v3002_v57  ;;  %5866 = vpow2.f32 %v2972_v43 }
 0x921   :  { %v2976_v42 = vmul.f32 1.442695, %v2957_v32 }
 0x922   :  { %v3091_v7 = vpop.permute.xlu0 %3090 }
 0x923   :  { %5393 = vmatpush3.bf16.msra.mxu0 %v3091_v7  ;;  %5868 = vpow2.f32 %v2976_v42  ;;  %v7268_v26 = vpop.permute.xlu1 %3231 }
 0x924   :  { %5404 = vmatprep.subr.bf16.mxu0 %v7992_v37 }
 0x925   :  { %v7248_v46 = vpop.eup %5862 }
 0x926   :  { %v3008_v61 = vsel %vm911_vm3, %v7248_v46, 0.0 }
 0x927   :  { %3009 = vadd.xlane.f32.xlu0 %v3008_v61 }
 0x929   :  { %v7253_v52 = vpop.eup %5864 }
 0x92a   :  { %v3014_v12 = vsel %vm911_vm3, %v7253_v52, 0.0  ;;  %v7258_v36 = vpop.eup %5866 }
 0x92b   :  { %3015 = vadd.xlane.f32.xlu0 %v3014_v12  ;;  %v3005_v4 = vsel %vm911_vm3, %v7258_v36, 0.0 }
 0x92d   :  { %v7262_v54 = vpop.eup %5868 }
 0x92e   :  { %v3011_v57 = vsel %vm911_vm3, %v7262_v54, 0.0 }
 0x93b   :  { %3006 = vadd.xlane.f32.xlu1 %v3005_v4 }
 0x93f   :  { %3012 = vadd.xlane.f32.xlu1 %v3011_v57 }
 0x94e   :  { %v2923_v7 = vpop.xlane.xlu1 %2922 }
 0x94f   :  { %v2959_v14 = vsub.f32 %v7194_v60, %v2923_v7 }
 0x951   :  { %v2980_v61 = vmul.f32 1.442695, %v2959_v14 }
 0x952   :  { %v2929_v43 = vpop.xlane.xlu1 %2928 }
 0x953   :  { %5870 = vpow2.f32 %v2980_v61  ;;  %v2961_v32 = vsub.f32 %v7199_v28, %v2929_v43  ;;  %v2926_v12 = vpop.xlane.xlu0 %2925 }
 0x954   :  { %v2960_v42 = vsub.f32 %v7203_v5, %v2926_v12 }
 0x955   :  { %v2984_v4 = vmul.f32 1.442695, %v2961_v32 }
 0x956   :  { %v2982_v0 = vmul.f32 1.442695, %v2960_v42  ;;  %v2935_v58 = vpop.xlane.xlu1 %2934 }
 0x957   :  { %5872 = vpow2.f32 %v2984_v4  ;;  %v2963_v57 = vsub.f32 %v7172_v63, %v2935_v58  ;;  %v2932_v2 = vpop.xlane.xlu0 %2931 }
 0x958   :  { %5874 = vpow2.f32 %v2982_v0  ;;  %v2962_v48 = vsub.f32 %v7168_v8, %v2932_v2 }
 0x959   :  { %v2988_v15 = vmul.f32 1.442695, %v2963_v57 }
 0x95a   :  { %v2986_v60 = vmul.f32 1.442695, %v2962_v48  ;;  %v2941_v7 = vpop.xlane.xlu1 %2940 }
 0x95b   :  { %5876 = vpow2.f32 %v2988_v15  ;;  %v2965_v14 = vsub.f32 %v7209_v30, %v2941_v7  ;;  %v2938_v28 = vpop.xlane.xlu0 %2937 }
 0x95c   :  { %5878 = vpow2.f32 %v2986_v60  ;;  %v2964_v5 = vsub.f32 %v7176_v55, %v2938_v28 }
 0x95d   :  { %v7277_v61 = vpop.eup %5870  ;;  %v2992_v43 = vmul.f32 1.442695, %v2965_v14 }
 0x95e   :  { %v2990_v32 = vmul.f32 1.442695, %v2964_v5  ;;  %v2947_v12 = vpop.xlane.xlu1 %2946  ;;  %v3017_v0 = vsel %vm911_vm3, %v7277_v61, 0.0 }
 0x95f   :  { %5880 = vpow2.f32 %v2992_v43  ;;  %v2967_v2 = vsub.f32 %v7215_v25, %v2947_v12  ;;  %3018 = vadd.xlane.f32.xlu1 %v3017_v0  ;;  %v2944_v48 = vpop.xlane.xlu0 %2943 }
 0x960   :  { %5882 = vpow2.f32 %v2990_v32  ;;  %v2966_v58 = vsub.f32 %v7178_v9, %v2944_v48 }
 0x961   :  { %v7283_v8 = vpop.eup %5872  ;;  %v2996_v15 = vmul.f32 1.442695, %v2967_v2 }
 0x962   :  { %v7285_v63 = vpop.eup %5874  ;;  %v2994_v55 = vmul.f32 1.442695, %v2966_v58  ;;  %v3023_v30 = vsel %vm911_vm3, %v7283_v8, 0.0 }
 0x963   :  { %5884 = vpow2.f32 %v2996_v15  ;;  %3024 = vadd.xlane.f32.xlu1 %v3023_v30  ;;  %v2950_v42 = vpop.xlane.xlu0 %2949  ;;  %v3020_v25 = vsel %vm911_vm3, %v7285_v63, 0.0  ;;  %v7326_v15 = vpop.permute.xlu1 %3325 }
 0x964   :  { %5886 = vpow2.f32 %v2994_v55  ;;  %v2968_v4 = vsub.f32 %v7223_v16, %v2950_v42  ;;  %3021 = vadd.xlane.f32.xlu0 %v3020_v25 }
 0x965   :  { %v7292_v9 = vpop.eup %5876 }
 0x966   :  { %v7294_v57 = vpop.eup %5878  ;;  %v2998_v60 = vmul.f32 1.442695, %v2968_v4  ;;  %v3029_v7 = vsel %vm911_vm3, %v7292_v9, 0.0 }
 0x967   :  { %3030 = vadd.xlane.f32.xlu1 %v3029_v7  ;;  %v3026_v14 = vsel %vm911_vm3, %v7294_v57, 0.0 }
 0x968   :  { %5888 = vpow2.f32 %v2998_v60  ;;  %3027 = vadd.xlane.f32.xlu0 %v3026_v14 }
 0x969   :  { %v7300_v28 = vpop.eup %5880 }
 0x96a   :  { %v7302_v5 = vpop.eup %5882  ;;  %v3035_v16 = vsel %vm911_vm3, %v7300_v28, 0.0 }
 0x96b   :  { %3036 = vadd.xlane.f32.xlu1 %v3035_v16  ;;  %v3032_v43 = vsel %vm911_vm3, %v7302_v5, 0.0 }
 0x96c   :  { %3033 = vadd.xlane.f32.xlu0 %v3032_v43 }
 0x96d   :  { %v7308_v32 = vpop.eup %5884 }
 0x96e   :  { %v7310_v12 = vpop.eup %5886  ;;  %v3041_v0 = vsel %vm911_vm3, %v7308_v32, 0.0 }
 0x96f   :  { %3042 = vadd.xlane.f32.xlu1 %v3041_v0  ;;  %v3038_v2 = vsel %vm911_vm3, %v7310_v12, 0.0 }
 0x970   :  { %3039 = vadd.xlane.f32.xlu0 %v3038_v2 }
 0x972   :  { %v7316_v48 = vpop.eup %5888 }
 0x973   :  { %v3044_v58 = vsel %vm911_vm3, %v7316_v48, 0.0 }
 0x974   :  { %3045 = vadd.xlane.f32.xlu0 %v3044_v58 }
 0x980   :  { %3519 = vrot.lane.b32.xlu1 %v6320_v13, %s5998_s22 }
 0x98a   :  { %3468 = vrot.lane.b32.xlu0 %v6322_v18, %s5998_s22 }
 0x98e   :  { %3466 = vrot.lane.b32.xlu0 %v6328_v22, %s5999_s23 }
 0x992   :  { %3517 = vrot.lane.b32.xlu0 %v6324_v19, %s5999_s23 }
 0x993   :  { %v2953_v55 = vpop.xlane.xlu1 %2952 }
 0x994   :  { %v2969_v30 = vsub.f32 %v7187_v17, %v2953_v55 }
 0x996   :  { %v3000_v42 = vmul.f32 1.442695, %v2969_v30  ;;  %3568 = vrot.lane.b32.xlu0 %v6342_v10, %s5999_s23 }
 0x998   :  { %5890 = vpow2.f32 %v3000_v42 }
 0x99a   :  { %3619 = vrot.lane.b32.xlu0 %v6340_v41, %s5999_s23  ;;  %v3279_v41 = vpop.permute.xlu0 %3278 }
 0x99e   :  { %3670 = vrot.lane.b32.xlu0 %v6358_v56, %s5999_s23  ;;  %v7351_v10 = vpop.permute.xlu0 %3372 }
 0x9a2   :  { %v7337_v22 = vpop.eup %5890  ;;  %3721 = vrot.lane.b32.xlu0 %v6356_v53, %s5999_s23  ;;  %v7355_v53 = vpop.permute.xlu1 %3419 }
 0x9a3   :  { %v3047_v19 = vsel %vm911_vm3, %v7337_v22, 0.0 }
 0x9a4   :  { %3048 = vadd.xlane.f32.xlu1 %v3047_v19 }
 0x9a6   :  { %3772 = vrot.lane.b32.xlu0 %v6376_v45, %s5999_s23 }
 0x9ad   :  { %v3004_v56 = vpop.xlane.xlu0 %3003 }
 0x9ae   :  { %5892 = vrcp.f32 %v3004_v56 }
 0x9b4   :  { %v3010_v45 = vpop.xlane.xlu0 %3009 }
 0x9b5   :  { %3570 = vrot.lane.b32.xlu1 %v6338_v1, %s5998_s22 }
 0x9b8   :  { %v5893_v4 = vpop.eup %5892 }
 0x9b9   :  { %3621 = vrot.lane.b32.xlu1 %v6336_v38, %s5998_s22  ;;  %v3051_v7 = vmul.f32 %v5893_v4, %v7243_v39  ;;  %v3016_v39 = vpop.xlane.xlu0 %3015 }
 0x9bd   :  { %3672 = vrot.lane.b32.xlu1 %v6354_v29, %s5998_s22 }
 0x9c1   :  { %3723 = vrot.lane.b32.xlu1 %v6352_v23, %s5998_s22 }
 0x9c5   :  { %3774 = vrot.lane.b32.xlu1 %v6370_v3, %s5998_s22 }
 0x9c8   :  { %v3007_v17 = vpop.xlane.xlu1 %3006 }
 0x9c9   :  { %5894 = vrcp.f32 %v3007_v17  ;;  %3825 = vrot.lane.b32.xlu1 %v6368_v21, %s5998_s22 }
 0x9ca   :  { %5896 = vrcp.f32 %v3010_v45 }
 0x9cc   :  { %v3013_v25 = vpop.xlane.xlu1 %3012 }
 0x9cd   :  { %5898 = vrcp.f32 %v3013_v25  ;;  %3823 = vrot.lane.b32.xlu1 %v6372_v31, %s5999_s23 }
 0x9ce   :  { %5900 = vrcp.f32 %v3016_v39 }
 0x9d3   :  { %v5895_v60 = vpop.eup %5894 }
 0x9d4   :  { %v3053_v14 = vmul.f32 %v5895_v60, %v7258_v36  ;;  %v5897_v16 = vpop.eup %5896 }
 0x9d5   :  { %v3055_v2 = vmul.f32 %v5897_v16, %v7248_v46 }
 0x9d6   :  { %v3082_v43 = vpack.c.bf16 %v3053_v14, %v3051_v7 }
 0x9d7   :  { %v5899_v0 = vpop.eup %5898 }
 0x9d8   :  { %v3057_v58 = vmul.f32 %v5899_v0, %v7262_v54  ;;  %5395 = vmatmul.mubr.msk.bf16.vlgmr.msra.gmra.mrb[80].mxu0 %vm911_vm3, %v3082_v43  ;;  %v5901_v55 = vpop.eup %5900 }
 0x9d9   :  { %5405 = vmatpush3.bf16.msra.mxu0 %v7266_v47  ;;  %5406 = vmatprep.mubr.msk.bf16.mxu0 %vm5989_vm1, %v7992_v37 }
 0x9da   :  { %v3083_v31 = vpack.c.bf16 %v3057_v58, %v3055_v2  ;;  %5416 = vmatprep.subr.bf16.mxu0 %v7992_v37 }
 0x9dc   :  { %5401 = vmatmul.mubr.msk.bf16.vlgmr.msra.gmra.mrb[96].mxu1 %vm911_vm3, %v3083_v31 }
 0x9dd   :  { %5411 = vmatpush3.bf16.msra.mxu1 %v7268_v26  ;;  %5412 = vmatprep.mubr.msk.bf16.mxu1 %vm5989_vm1, %v7992_v37  ;;  %v3059_v26 = vmul.f32 %v5901_v55, %v7253_v52 }
 0x9de   :  { %5422 = vmatprep.subr.bf16.mxu1 %v7992_v37 }
 0x9ec   :  { %v3019_v46 = vpop.xlane.xlu1 %3018 }
 0x9ed   :  { %5902 = vrcp.f32 %v3019_v46 }
 0x9f0   :  { %v3025_v36 = vpop.xlane.xlu1 %3024 }
 0x9f1   :  { %5904 = vrcp.f32 %v3025_v36  ;;  %v3022_v54 = vpop.xlane.xlu0 %3021 }
 0x9f2   :  { %5906 = vrcp.f32 %v3022_v54 }
 0x9f4   :  { %v3031_v47 = vpop.xlane.xlu1 %3030 }
 0x9f5   :  { %5908 = vrcp.f32 %v3031_v47  ;;  %v3028_v30 = vpop.xlane.xlu0 %3027 }
 0x9f6   :  { %5910 = vrcp.f32 %v3028_v30 }
 0x9f7   :  { %v5903_v42 = vpop.eup %5902 }
 0x9f8   :  { %v3061_v19 = vmul.f32 %v5903_v42, %v7277_v61  ;;  %v3037_v56 = vpop.xlane.xlu1 %3036 }
 0x9f9   :  { %5912 = vrcp.f32 %v3037_v56  ;;  %v3034_v45 = vpop.xlane.xlu0 %3033 }
 0x9fa   :  { %5914 = vrcp.f32 %v3034_v45  ;;  %v3084_v17 = vpack.c.bf16 %v3061_v19, %v3059_v26 }
 0x9fb   :  { %v5905_v25 = vpop.eup %5904 }
 0x9fc   :  { %v5907_v4 = vpop.eup %5906  ;;  %v3043_v60 = vpop.xlane.xlu1 %3042  ;;  %5407 = vmatmul.mubr.msk.bf16.vlgmr.msra.gmra.mrb[84].mxu0 %vm911_vm3, %v3084_v17  ;;  %v3065_v7 = vmul.f32 %v5905_v25, %v7283_v8 }
 0x9fd   :  { %v3063_v14 = vmul.f32 %v5907_v4, %v7285_v63  ;;  %5916 = vrcp.f32 %v3043_v60  ;;  %5417 = vmatpush3.bf16.msra.mxu0 %v3279_v41  ;;  %v3040_v16 = vpop.xlane.xlu0 %3039  ;;  %5418 = vmatprep.mubr.msk.bf16.mxu0 %vm5989_vm1, %v7992_v37 }
 0x9fe   :  { %5918 = vrcp.f32 %v3040_v16  ;;  %5428 = vmatprep.subr.bf16.mxu0 %v7992_v37 }
 0x9ff   :  { %v5909_v52 = vpop.eup %5908  ;;  %v3085_v61 = vpack.c.bf16 %v3065_v7, %v3063_v14 }
 0xa00   :  { %v5911_v43 = vpop.eup %5910  ;;  %v3069_v0 = vmul.f32 %v5909_v52, %v7292_v9 }
 0xa01   :  { %v3067_v2 = vmul.f32 %v5911_v43, %v7294_v57  ;;  %5413 = vmatmul.mubr.msk.bf16.vlgmr.msra.gmra.mrb[100].mxu1 %vm911_vm3, %v3085_v61  ;;  %v3046_v39 = vpop.xlane.xlu0 %3045 }
 0xa02   :  { %5423 = vmatpush3.bf16.msra.mxu1 %v7326_v15  ;;  %5424 = vmatprep.mubr.msk.bf16.mxu1 %vm5989_vm1, %v7992_v37  ;;  %5920 = vrcp.f32 %v3046_v39 }
 0xa03   :  { %v5913_v8 = vpop.eup %5912  ;;  %v3086_v63 = vpack.c.bf16 %v3069_v0, %v3067_v2  ;;  %5434 = vmatprep.subr.bf16.mxu1 %v7992_v37 }
 0xa04   :  { %v5915_v41 = vpop.eup %5914  ;;  %v3073_v58 = vmul.f32 %v5913_v8, %v7300_v28 }
 0xa05   :  { %v3071_v31 = vmul.f32 %v5915_v41, %v7302_v5  ;;  %5419 = vmatmul.mubr.msk.bf16.vlgmr.msra.gmra.mrb[88].mxu0 %vm911_vm3, %v3086_v63  ;;  %v3469_v28 = vpop.permute.xlu0 %3468 }
 0xa06   :  { %5429 = vmatpush3.bf16.msra.mxu0 %v7351_v10  ;;  %5430 = vmatprep.mubr.msk.bf16.mxu0 %vm5989_vm1, %v7992_v37  ;;  %v3474_v10 = vsel %vm489_vm2, %v3469_v28, 0 }
 0xa07   :  { %v5917_v9 = vpop.eup %5916  ;;  %v3087_v57 = vpack.c.bf16 %v3073_v58, %v3071_v31  ;;  %5440 = vmatprep.subr.bf16.mxu0 %v7992_v37 }
 0xa08   :  { %v5919_v15 = vpop.eup %5918  ;;  %v3077_v46 = vmul.f32 %v5917_v9, %v7308_v32 }
 0xa09   :  { %v3075_v36 = vmul.f32 %v5919_v15, %v7310_v12  ;;  %5425 = vmatmul.mubr.msk.bf16.vlgmr.msra.gmra.mrb[104].mxu1 %vm911_vm3, %v3087_v57  ;;  %v3467_v32 = vpop.permute.xlu0 %3466  ;;  %v3520_v12 = vpop.permute.xlu1 %3519 }
 0xa0a   :  { %5435 = vmatpush3.bf16.msra.mxu1 %v7355_v53  ;;  %5436 = vmatprep.mubr.msk.bf16.mxu1 %vm5989_vm1, %v7992_v37  ;;  %v3525_v7 = vsel %vm489_vm2, %v3520_v12, 0  ;;  %v4964_v12 = vld [vmem:[%s7965_s5 + $0xf8] sm:$0xff] }
 0xa0b   :  { %v3088_v5 = vpack.c.bf16 %v3077_v46, %v3075_v36  ;;  %5446 = vmatprep.subr.bf16.mxu1 %v7992_v37 }
 0xa0c   :  { %v5921_v26 = vpop.eup %5920 }
 0xa0d   :  { %5431 = vmatmul.mubr.msk.bf16.vlgmr.msra.gmra.mrb[92].mxu0 %vm911_vm3, %v3088_v5  ;;  %v3518_v53 = vpop.permute.xlu0 %3517  ;;  %v3079_v45 = vmul.f32 %v5921_v26, %v7316_v48 }
 0xa0e   :  { %5442 = vmatprep.mubr.msk.bf16.mxu0 %vm5989_vm1, %v7992_v37 }
 0xa0f   :  { %5441 = vmatpush3.bf16.xpose.msra.mxu0 %v3474_v10 }
 0xa10   :  { %5452 = vmatprep.subr.bf16.mxu0 %v7992_v37 }
 0xa11   :  { %v3569_v47 = vpop.permute.xlu0 %3568 }
 0xa15   :  { %v3620_v19 = vpop.permute.xlu0 %3619 }
 0xa16   :  { %5443 = vmatmul.mubr.msk.bf16.vlgmr.msra.gmra.mrb[96].mxu0 %vm489_vm2, %v3467_v32 }
 0xa17   :  { %5454 = vmatprep.mubr.msk.bf16.mxu0 %vm5989_vm1, %v7992_v37 }
 0xa19   :  { %v3671_v14 = vpop.permute.xlu0 %3670 }
 0xa1d   :  { %v3722_v52 = vpop.permute.xlu0 %3721 }
 0xa21   :  { %v3773_v43 = vpop.permute.xlu0 %3772 }
 0xa31   :  { %v3049_v54 = vpop.xlane.xlu1 %3048 }
 0xa32   :  { %5922 = vrcp.f32 %v3049_v54 }
 0xa35   :  { %v3571_v55 = vpop.permute.xlu1 %3570 }
 0xa36   :  { %v3576_v30 = vsel %vm489_vm2, %v3571_v55, 0 }
 0xa37   :  { %5453 = vmatpush3.bf16.xpose.msra.mxu0 %v3576_v30 }
 0xa38   :  { %5464 = vmatprep.subr.bf16.mxu0 %v7992_v37 }
 0xa39   :  { %v3622_v42 = vpop.permute.xlu1 %3621 }
 0xa3a   :  { %v3627_v61 = vsel %vm489_vm2, %v3622_v42, 0 }
 0xa3c   :  { %v5923_v56 = vpop.eup %5922 }
 0xa3d   :  { %v3081_v17 = vmul.f32 %v5923_v56, %v7337_v22  ;;  %v3673_v25 = vpop.permute.xlu1 %3672 }
 0xa3e   :  { %v3678_v4 = vsel %vm489_vm2, %v3673_v25, 0  ;;  %5455 = vmatmul.mubr.msk.bf16.vlgmr.msra.gmra.mrb[100].mxu0 %vm489_vm2, %v3569_v47 }
 0xa3f   :  { %5465 = vmatpush3.bf16.xpose.msra.mxu0 %v3678_v4  ;;  %v3089_v60 = vpack.c.bf16 %v3081_v17, %v3079_v45  ;;  %5466 = vmatprep.mubr.msk.bf16.mxu0 %vm5989_vm1, %v7992_v37 }
 0xa40   :  { %5476 = vmatprep.subr.bf16.mxu0 %v7992_v37 }
 0xa41   :  { %v3724_v16 = vpop.permute.xlu1 %3723  ;;  %5437 = vmatmul.mubr.msk.bf16.vlgmr.msra.gmra.mrb[108].mxu1 %vm911_vm3, %v3089_v60 }
 0xa42   :  { %5447 = vmatpush3.bf16.xpose.msra.mxu1 %v3525_v7  ;;  %5448 = vmatprep.mubr.msk.bf16.mxu1 %vm5989_vm1, %v7992_v37  ;;  %v3729_v0 = vsel %vm489_vm2, %v3724_v16, 0 }
 0xa43   :  { %5458 = vmatprep.subr.bf16.mxu1 %v7992_v37 }
 0xa45   :  { %v3775_v48 = vpop.permute.xlu1 %3774 }
 0xa46   :  { %v3780_v22 = vsel %vm489_vm2, %v3775_v48, 0  ;;  %5467 = vmatmul.mubr.msk.bf16.vlgmr.msra.gmra.mrb[104].mxu0 %vm489_vm2, %v3671_v14 }
 0xa47   :  { %5477 = vmatpush3.bf16.xpose.msra.mxu0 %v3780_v22  ;;  %5478 = vmatprep.mubr.msk.bf16.mxu0 %vm5989_vm1, %v7992_v37 }
 0xa48   :  { %5488 = vmatprep.subr.bf16.mxu0 %v7992_v37 }
 0xa49   :  { %5449 = vmatmul.mubr.msk.bf16.vlgmr.msra.gmra.mrb[112].mxu1 %vm489_vm2, %v3518_v53  ;;  %v3826_v2 = vpop.permute.xlu1 %3825 }
 0xa4a   :  { %5459 = vmatpush3.bf16.xpose.msra.mxu1 %v3627_v61  ;;  %5460 = vmatprep.mubr.msk.bf16.mxu1 %vm5989_vm1, %v7992_v37  ;;  %v3831_v8 = vsel %vm489_vm2, %v3826_v2, 0  ;;  %v4958_v2 = vld [vmem:[%s7965_s5 + $0xc8] sm:$0xff] }
 0xa4b   :  { %5470 = vmatprep.subr.bf16.mxu1 %v7992_v37 }
 0xa4d   :  { %v3824_v63 = vpop.permute.xlu1 %3823 }
 0xa4e   :  { %5479 = vmatmul.mubr.msk.bf16.vlgmr.msra.gmra.mrb[108].mxu0 %vm489_vm2, %v3773_v43  ;;  %v4957_v43 = vld [vmem:[%s7965_s5 + $0xc0] sm:$0xff] }
 0xa4f   :  { %5490 = vmatprep.mubr.msk.bf16.mxu0 %vm5989_vm1, %v7992_v37 }
 0xa51   :  { %5461 = vmatmul.mubr.msk.bf16.vlgmr.msra.gmra.mrb[116].mxu1 %vm489_vm2, %v3620_v19 }
 0xa52   :  { %5471 = vmatpush3.bf16.xpose.msra.mxu1 %v3729_v0  ;;  %5472 = vmatprep.mubr.msk.bf16.mxu1 %vm5989_vm1, %v7992_v37 }
 0xa53   :  { %5482 = vmatprep.subr.bf16.mxu1 %v7992_v37 }
 0xa59   :  { %5473 = vmatmul.mubr.msk.bf16.vlgmr.msra.gmra.mrb[120].mxu1 %vm489_vm2, %v3722_v52  ;;  %v4960_v52 = vld [vmem:[%s7965_s5 + $0xd8] sm:$0xff] }
 0xa5a   :  { %5483 = vmatpush3.bf16.xpose.msra.mxu1 %v3831_v8  ;;  %5484 = vmatprep.mubr.msk.bf16.mxu1 %vm5989_vm1, %v7992_v37 }
 0xa5b   :  { %5494 = vmatprep.subr.bf16.mxu1 %v7992_v37 }
 0xa61   :  { %5485 = vmatmul.mubr.msk.bf16.vlgmr.msra.gmra.mrb[124].mxu1 %vm489_vm2, %v3824_v63 }
 0xa62   :  { %5496 = vmatprep.mubr.msk.bf16.mxu1 %vm5989_vm1, %v7992_v37 }
 0xaab   :  { %v7454_v41 = vpop.f32.mrb[80].mxu0 }
 0xaac   :  { %v5396_v58 = vpop.f32.mrb[81].mxu0 }
 0xaad   :  { %v7456_v31 = vpop.f32.mrb[82].mxu0 }
 0xaae   :  { %v5397_v9 = vpop.f32.mrb[83].mxu0 }
 0xaaf   :  { %v7460_v57 = vpop.f32.mrb[96].mxu1 }
 0xab0   :  { %v5402_v15 = vpop.f32.mrb[97].mxu1 }
 0xab1   :  { %v7462_v46 = vpop.f32.mrb[98].mxu1 }
 0xab2   :  { %v5403_v28 = vpop.f32.mrb[99].mxu1 }
 0xacf   :  { %v7466_v5 = vpop.f32.mrb[84].mxu0 }
 0xad0   :  { %v5408_v10 = vpop.f32.mrb[85].mxu0 }
 0xad1   :  { %v7468_v32 = vpop.f32.mrb[86].mxu0 }
 0xad2   :  { %v5409_v53 = vpop.f32.mrb[87].mxu0 }
 0xad4   :  { %v7472_v54 = vpop.f32.mrb[100].mxu1 }
 0xad5   :  { %v5414_v47 = vpop.f32.mrb[101].mxu1 }
 0xad6   :  { %v7474_v55 = vpop.f32.mrb[102].mxu1  ;;  %v4962_v47 = vld [vmem:[%s7965_s5 + $0xe8] sm:$0xff] }
 0xad7   :  { %v5415_v42 = vpop.f32.mrb[103].mxu1 }
 0xad8   :  { %v7478_v26 = vpop.f32.mrb[88].mxu0 }
 0xad9   :  { %v5420_v19 = vpop.f32.mrb[89].mxu0 }
 0xada   :  { %v7480_v56 = vpop.f32.mrb[90].mxu0 }
 0xadb   :  { %v5421_v17 = vpop.f32.mrb[91].mxu0 }
 0xadc   :  { %v7484_v25 = vpop.f32.mrb[104].mxu1 }
 0xadd   :  { %v5426_v4 = vpop.f32.mrb[105].mxu1 }
 0xade   :  { %v7486_v60 = vpop.f32.mrb[106].mxu1 }
 0xadf   :  { %v5427_v14 = vpop.f32.mrb[107].mxu1 }
 0xae0   :  { %v7490_v16 = vpop.f32.mrb[92].mxu0 }
 0xae1   :  { %7994 = vst [vmem:[#allocation19_spill] sm:$0xff] %v7490_v16  ;;  %v5432_v48 = vpop.f32.mrb[93].mxu0 }
 0xae2   :  { %v7492_v22 = vpop.f32.mrb[94].mxu0 }
 0xae3   :  { %7995 = vst [vmem:[#allocation20_spill] sm:$0xff] %v7492_v22  ;;  %v5433_v61 = vpop.f32.mrb[95].mxu0 }
 0xae9   :  { %v3510_v0 = vpop.f32.mrb[96].mxu0 }
 0xaea   :  { %v7502_v8 = vadd.f32 %v4957_v43, %v3510_v0  ;;  %v5444_v63 = vpop.f32.mrb[97].mxu0 }
 0xaeb   :  { %v3513_v58 = vpop.f32.mrb[98].mxu0 }
 0xaec   :  { %v7504_v9 = vadd.f32 %v4958_v2, %v3513_v58  ;;  %v5445_v15 = vpop.f32.mrb[99].mxu0  ;;  %v3899_v28 = vsel %vm911_vm3, %v7502_v8, -inf }
 0xaed   :  { %3900 = vmax.xlane.f32.xlu0 %v3899_v28 }
 0xaee   :  { %v3902_v10 = vsel %vm911_vm3, %v7504_v9, -inf }
 0xaef   :  { %3903 = vmax.xlane.f32.xlu1 %v3902_v10 }
 0xb11   :  { %v3612_v53 = vpop.f32.mrb[100].mxu0 }
 0xb12   :  { %v5456_v42 = vpop.f32.mrb[101].mxu0 }
 0xb13   :  { %v3615_v19 = vpop.f32.mrb[102].mxu0  ;;  %v4959_v42 = vld [vmem:[%s7965_s5 + $0xd0] sm:$0xff] }
 0xb14   :  { %v7513_v17 = vadd.f32 %v4962_v47, %v3615_v19  ;;  %v7515_v4 = vpop.f32.mrb[108].mxu1  ;;  %v5457_v14 = vpop.f32.mrb[103].mxu0 }
 0xb15   :  { %7996 = vst [vmem:[#allocation21_spill] sm:$0xff] %v7515_v4  ;;  %v5438_v48 = vpop.f32.mrb[109].mxu1 }
 0xb16   :  { %v7517_v61 = vpop.f32.mrb[110].mxu1  ;;  %v3914_v0 = vsel %vm911_vm3, %v7513_v17, -inf }
 0xb17   :  { %7997 = vst [vmem:[#allocation22_spill] sm:$0xff] %v7517_v61  ;;  %v5439_v58 = vpop.f32.mrb[111].mxu1  ;;  %3915 = vmax.xlane.f32.xlu1 %v3914_v0 }
 0xb19   :  { %v3714_v15 = vpop.f32.mrb[104].mxu0 }
 0xb1a   :  { %v7523_v28 = vadd.f32 %v4957_v43, %v3714_v15  ;;  %v5468_v10 = vpop.f32.mrb[105].mxu0 }
 0xb1b   :  { %v3717_v19 = vpop.f32.mrb[106].mxu0  ;;  %v4961_v10 = vld [vmem:[%s7965_s5 + $0xe0] sm:$0xff] }
 0xb1c   :  { %v3561_v14 = vpop.f32.mrb[112].mxu1  ;;  %v5469_v48 = vpop.f32.mrb[107].mxu0  ;;  %v7540_v30 = vadd.f32 %v4961_v10, %v3612_v53  ;;  %v7556_v61 = vadd.f32 %v4958_v2, %v3717_v19  ;;  %v3923_v19 = vsel %vm911_vm3, %v7523_v28, -inf }
 0xb1d   :  { %v7531_v7 = vadd.f32 %v4959_v42, %v3561_v14  ;;  %v5450_v63 = vpop.f32.mrb[113].mxu1 }
 0xb1e   :  { %v3564_v58 = vpop.f32.mrb[114].mxu1 }
 0xb1f   :  { %v7533_v0 = vadd.f32 %v4960_v52, %v3564_v58  ;;  %v5451_v43 = vpop.f32.mrb[115].mxu1  ;;  %v3905_v15 = vsel %vm911_vm3, %v7531_v7, -inf  ;;  %v4963_v58 = vld [vmem:[%s7965_s5 + $0xf0] sm:$0xff]  ;;  %s6000_s5 = smov 40  }
 0xb20   :  { %3906 = vmax.xlane.f32.xlu0 %v3905_v15 }
 0xb21   :  { %v3816_v48 = vpop.f32.mrb[108].mxu0  ;;  %v3908_v63 = vsel %vm911_vm3, %v7533_v0, -inf }
 0xb22   :  { %v5480_v45 = vpop.f32.mrb[109].mxu0 }
 0xb23   :  { %v3819_v36 = vpop.f32.mrb[110].mxu0 }
 0xb24   :  { %3909 = vmax.xlane.f32.xlu0 %v3908_v63  ;;  %v3663_v14 = vpop.f32.mrb[116].mxu1  ;;  %v5481_v43 = vpop.f32.mrb[111].mxu0  ;;  %v3911_v63 = vsel %vm911_vm3, %v7540_v30, -inf }
 0xb25   :  { %v5462_v15 = vpop.f32.mrb[117].mxu1  ;;  %v7550_v45 = vadd.f32 %v4963_v58, %v3663_v14 }
 0xb26   :  { %v3666_v39 = vpop.f32.mrb[118].mxu1 }
 0xb27   :  { %v7552_v53 = vadd.f32 %v4964_v12, %v3666_v39  ;;  %v5463_v4 = vpop.f32.mrb[119].mxu1  ;;  %v3917_v16 = vsel %vm911_vm3, %v7550_v45, -inf  ;;  %v3926_v39 = vsel %vm911_vm3, %v7556_v61, -inf }
 0xb28   :  { %3912 = vmax.xlane.f32.xlu0 %v3911_v63 }
 0xb29   :  { %v3920_v43 = vsel %vm911_vm3, %v7552_v53, -inf }
 0xb2a   :  { %3921 = vmax.xlane.f32.xlu1 %v3920_v43  ;;  %v7570_v43 = vadd.f32 %v4962_v47, %v3819_v36 }
 0xb2c   :  { %3918 = vmax.xlane.f32.xlu0 %v3917_v16  ;;  %v3765_v15 = vpop.f32.mrb[120].mxu1 }
 0xb2d   :  { %v5474_v14 = vpop.f32.mrb[121].mxu1  ;;  %v7564_v22 = vadd.f32 %v4959_v42, %v3765_v15  ;;  %v3938_v15 = vsel %vm911_vm3, %v7570_v43, -inf }
 0xb2e   :  { %3927 = vmax.xlane.f32.xlu1 %v3926_v39  ;;  %v3768_v4 = vpop.f32.mrb[122].mxu1  ;;  %v7574_v14 = vadd.f32 %v4961_v10, %v3816_v48 }
 0xb2f   :  { %v7566_v63 = vadd.f32 %v4960_v52, %v3768_v4  ;;  %v5475_v2 = vpop.f32.mrb[123].mxu1  ;;  %v3929_v39 = vsel %vm911_vm3, %v7564_v22, -inf }
 0xb30   :  { %3924 = vmax.xlane.f32.xlu0 %v3923_v19  ;;  %v3935_v10 = vsel %vm911_vm3, %v7574_v14, -inf }
 0xb31   :  { %v3932_v16 = vsel %vm911_vm3, %v7566_v63, -inf }
 0xb32   :  { %3933 = vmax.xlane.f32.xlu1 %v3932_v16 }
 0xb34   :  { %3930 = vmax.xlane.f32.xlu0 %v3929_v39  ;;  %v3867_v42 = vpop.f32.mrb[124].mxu1 }
 0xb35   :  { %v5486_v52 = vpop.f32.mrb[125].mxu1  ;;  %v7580_v2 = vadd.f32 %v4963_v58, %v3867_v42 }
 0xb36   :  { %v3870_v4 = vpop.f32.mrb[126].mxu1  ;;  %3939 = vmax.xlane.f32.xlu1 %v3938_v15 }
 0xb37   :  { %v7582_v36 = vadd.f32 %v4964_v12, %v3870_v4  ;;  %v5487_v47 = vpop.f32.mrb[127].mxu1  ;;  %v3941_v48 = vsel %vm911_vm3, %v7580_v2, -inf }
 0xb38   :  { %3936 = vmax.xlane.f32.xlu0 %v3935_v10 }
 0xb39   :  { %v3944_v12 = vsel %vm911_vm3, %v7582_v36, -inf }
 0xb3c   :  { %3942 = vmax.xlane.f32.xlu0 %v3941_v48 }
 0xb47   :  { %4130 = vrot.lane.b32.xlu1 %v6320_v13, %s6000_s5 }
 0xb4b   :  { %4177 = vrot.lane.b32.xlu1 %v6338_v1, %s6000_s5 }
 0xb4f   :  { %4224 = vrot.lane.b32.xlu1 %v6336_v38, %s6000_s5 }
 0xb52   :  { %4083 = vrot.lane.b32.xlu0 %v6322_v18, %s6000_s5 }
 0xb56   :  { %4271 = vrot.lane.b32.xlu0 %v6354_v29, %s6000_s5 }
 0xb73   :  { %3945 = vmax.xlane.f32.xlu1 %v3944_v12 }
 0xb7a   :  { %v3901_v58 = vpop.xlane.xlu0 %3900 }
 0xb7b   :  { %v3947_v19 = vsub.f32 %v7502_v8, %v3901_v58 }
 0xb7c   :  { %v3904_v38 = vpop.xlane.xlu1 %3903 }
 0xb7d   :  { %v3963_v13 = vmul.f32 1.442695, %v3947_v19  ;;  %v3948_v29 = vsub.f32 %v7504_v9, %v3904_v38 }
 0xb7f   :  { %5924 = vpow2.f32 %v3963_v13  ;;  %v3965_v16 = vmul.f32 1.442695, %v3948_v29 }
 0xb81   :  { %5926 = vpow2.f32 %v3965_v16 }
 0xb84   :  { %4318 = vrot.lane.b32.xlu1 %v6352_v23, %s6000_s5 }
 0xb89   :  { %v7603_v1 = vpop.eup %5924 }
 0xb8a   :  { %v3995_v18 = vsel %vm911_vm3, %v7603_v1, 0.0 }
 0xb8b   :  { %3996 = vadd.xlane.f32.xlu0 %v3995_v18  ;;  %v7608_v39 = vpop.eup %5926 }
 0xb8c   :  { %v3998_v8 = vsel %vm911_vm3, %v7608_v39, 0.0 }
 0xba4   :  { %v3916_v42 = vpop.xlane.xlu1 %3915 }
 0xba5   :  { %v3952_v15 = vsub.f32 %v7513_v17, %v3916_v42 }
 0xba7   :  { %v3973_v9 = vmul.f32 1.442695, %v3952_v15 }
 0xba8   :  { %3999 = vadd.xlane.f32.xlu1 %v3998_v8 }
 0xbad   :  { %v3907_v52 = vpop.xlane.xlu0 %3906 }
 0xbae   :  { %v3949_v23 = vsub.f32 %v7531_v7, %v3907_v52 }
 0xbb0   :  { %v3967_v4 = vmul.f32 1.442695, %v3949_v23 }
 0xbb1   :  { %v3910_v47 = vpop.xlane.xlu0 %3909 }
 0xbb2   :  { %5928 = vpow2.f32 %v3967_v4  ;;  %v3950_v10 = vsub.f32 %v7533_v0, %v3910_v47 }
 0xbb4   :  { %v3969_v48 = vmul.f32 1.442695, %v3950_v10 }
 0xbb5   :  { %v3913_v12 = vpop.xlane.xlu0 %3912 }
 0xbb6   :  { %5930 = vpow2.f32 %v3969_v48  ;;  %v3951_v58 = vsub.f32 %v7540_v30, %v3913_v12 }
 0xbb7   :  { %v3922_v19 = vpop.xlane.xlu1 %3921  ;;  %5932 = vpow2.f32 %v3973_v9 }
 0xbb8   :  { %v3971_v13 = vmul.f32 1.442695, %v3951_v58  ;;  %v3954_v18 = vsub.f32 %v7552_v53, %v3922_v19 }
 0xbb9   :  { %v3919_v38 = vpop.xlane.xlu0 %3918 }
 0xbba   :  { %5934 = vpow2.f32 %v3971_v13  ;;  %v3977_v7 = vmul.f32 1.442695, %v3954_v18  ;;  %v3953_v17 = vsub.f32 %v7550_v45, %v3919_v38 }
 0xbbb   :  { %v3928_v29 = vpop.xlane.xlu1 %3927 }
 0xbbc   :  { %v7618_v16 = vpop.eup %5928  ;;  %5936 = vpow2.f32 %v3977_v7  ;;  %v3975_v0 = vmul.f32 1.442695, %v3953_v17  ;;  %v3956_v8 = vsub.f32 %v7556_v61, %v3928_v29 }
 0xbbd   :  { %v3925_v42 = vpop.xlane.xlu0 %3924  ;;  %v4001_v30 = vsel %vm911_vm3, %v7618_v16, 0.0 }
 0xbbe   :  { %5938 = vpow2.f32 %v3975_v0  ;;  %v3981_v52 = vmul.f32 1.442695, %v3956_v8  ;;  %v3955_v53 = vsub.f32 %v7523_v28, %v3925_v42  ;;  %4002 = vadd.xlane.f32.xlu0 %v4001_v30 }
 0xbbf   :  { %v3934_v23 = vpop.xlane.xlu1 %3933 }
 0xbc0   :  { %v7624_v15 = vpop.eup %5930  ;;  %5940 = vpow2.f32 %v3981_v52  ;;  %v3979_v45 = vmul.f32 1.442695, %v3955_v53  ;;  %v3958_v4 = vsub.f32 %v7566_v63, %v3934_v23 }
 0xbc1   :  { %v3931_v47 = vpop.xlane.xlu0 %3930  ;;  %v4004_v61 = vsel %vm911_vm3, %v7624_v15, 0.0  ;;  %v7629_v10 = vpop.eup %5932 }
 0xbc2   :  { %5942 = vpow2.f32 %v3979_v45  ;;  %v3985_v9 = vmul.f32 1.442695, %v3958_v4  ;;  %v3957_v48 = vsub.f32 %v7564_v22, %v3931_v47  ;;  %4005 = vadd.xlane.f32.xlu1 %v4004_v61  ;;  %v4010_v63 = vsel %vm911_vm3, %v7629_v10, 0.0 }
 0xbc3   :  { %v3940_v28 = vpop.xlane.xlu1 %3939 }
 0xbc4   :  { %v7632_v12 = vpop.eup %5934  ;;  %5944 = vpow2.f32 %v3985_v9  ;;  %v3983_v58 = vmul.f32 1.442695, %v3957_v48  ;;  %v3960_v19 = vsub.f32 %v7570_v43, %v3940_v28 }
 0xbc5   :  { %v3937_v13 = vpop.xlane.xlu0 %3936  ;;  %v4007_v18 = vsel %vm911_vm3, %v7632_v12, 0.0 }
 0xbc6   :  { %v7639_v38 = vpop.eup %5936  ;;  %5946 = vpow2.f32 %v3983_v58  ;;  %v3989_v7 = vmul.f32 1.442695, %v3960_v19  ;;  %v3959_v22 = vsub.f32 %v7574_v14, %v3937_v13  ;;  %4011 = vadd.xlane.f32.xlu1 %v4010_v63  ;;  %4008 = vadd.xlane.f32.xlu0 %v4007_v18  ;;  %v7998_v18 = vpack.i.bf16 %v7089_v59, %v7087_v27 }
 0xbc7   :  { %v4131_v17 = vpop.permute.xlu1 %4130  ;;  %v4016_v8 = vsel %vm911_vm3, %v7639_v38, 0.0 }
 0xbc8   :  { %v7642_v29 = vpop.eup %5938  ;;  %5948 = vpow2.f32 %v3989_v7  ;;  %v3987_v43 = vmul.f32 1.442695, %v3959_v22  ;;  %5495 = vmatpush3.bf16.msra.mxu1 %v4131_v17  ;;  %v7999_v22 = vpack.i.bf16 %v7456_v31, %v7454_v41  ;;  %v8002_v41 = vpack.i.bf16 %v7113_v34, %v7111_v40 }
 0xbc9   :  { %v3943_v0 = vpop.xlane.xlu0 %3942  ;;  %v4013_v42 = vsel %vm911_vm3, %v7642_v29, 0.0  ;;  %5506 = vmatprep.subr.bf16.mxu1 %v7992_v37  ;;  %v8004_v40 = vpack.i.bf16 %v7462_v46, %v7460_v57 }
 0xbca   :  { %v7649_v30 = vpop.eup %5940  ;;  %5950 = vpow2.f32 %v3987_v43  ;;  %v3961_v14 = vsub.f32 %v7580_v2, %v3943_v0  ;;  %4017 = vadd.xlane.f32.xlu1 %v4016_v8  ;;  %4014 = vadd.xlane.f32.xlu0 %v4013_v42  ;;  %v8000_v43 = vpack.i.bf16 %v7101_v20, %v7099_v49  ;;  %v8001_v0 = vpack.i.bf16 %v7468_v32, %v7466_v5 }
 0xbcb   :  { %v4022_v45 = vsel %vm911_vm3, %v7649_v30, 0.0  ;;  %v4178_v7 = vpop.permute.xlu1 %4177  ;;  %v8003_v20 = vpack.i.bf16 %v7095_v51, %v7093_v62  ;;  %v8005_v5 = vpack.i.bf16 %v7107_v35, %v7105_v44  ;;  %v8007_v51 = vpack.i.bf16 %v7119_v50, %v7117_v33 }
 0xbcc   :  { %v7652_v52 = vpop.eup %5942  ;;  %v3991_v53 = vmul.f32 1.442695, %v3961_v14 }
 0xbcd   :  { %v4084_v23 = vpop.permute.xlu0 %4083  ;;  %v4019_v4 = vsel %vm911_vm3, %v7652_v52, 0.0 }
 0xbce   :  { %v7658_v47 = vpop.eup %5944  ;;  %5952 = vpow2.f32 %v3991_v53  ;;  %4023 = vadd.xlane.f32.xlu1 %v4022_v45  ;;  %4020 = vadd.xlane.f32.xlu0 %v4019_v4 }
 0xbcf   :  { %5489 = vmatpush3.bf16.msra.mxu0 %v4084_v23  ;;  %v4028_v2 = vsel %vm911_vm3, %v7658_v47, 0.0  ;;  %v4225_v17 = vpop.permute.xlu1 %4224 }
 0xbd0   :  { %v7660_v61 = vpop.eup %5946  ;;  %5500 = vmatprep.subr.bf16.mxu0 %v7992_v37 }
 0xbd1   :  { %v4025_v9 = vsel %vm911_vm3, %v7660_v61, 0.0  ;;  %v4272_v34 = vpop.permute.xlu0 %4271 }
 0xbd2   :  { %v7667_v48 = vpop.eup %5948  ;;  %4029 = vadd.xlane.f32.xlu1 %v4028_v2  ;;  %4026 = vadd.xlane.f32.xlu0 %v4025_v9 }
 0xbd3   :  { %v4034_v58 = vsel %vm911_vm3, %v7667_v48, 0.0 }
 0xbd4   :  { %v7669_v28 = vpop.eup %5950 }
 0xbd5   :  { %v4031_v19 = vsel %vm911_vm3, %v7669_v28, 0.0 }
 0xbd6   :  { %4035 = vadd.xlane.f32.xlu1 %v4034_v58  ;;  %4032 = vadd.xlane.f32.xlu0 %v4031_v19 }
 0xbd8   :  { %v7675_v13 = vpop.eup %5952 }
 0xbd9   :  { %v4037_v63 = vsel %vm911_vm3, %v7675_v13, 0.0 }
 0xbda   :  { %4038 = vadd.xlane.f32.xlu0 %v4037_v63 }
 0xbf0   :  { %4365 = vrot.lane.b32.xlu0 %v6370_v3, %s6000_s5 }
 0xbf4   :  { %5577 = vrot.lane.b32.xlu0 %v7998_v18, %s6001_s17 }
 0xbf8   :  { %5587 = vrot.lane.b32.xlu0 %v7999_v22, %s6002_s3 }
 0xbfc   :  { %5597 = vrot.lane.b32.xlu0 %v8000_v43, %s6001_s17 }
 0xc00   :  { %v3946_v3 = vpop.xlane.xlu1 %3945  ;;  %5607 = vrot.lane.b32.xlu0 %v8001_v0, %s6002_s3 }
 0xc01   :  { %v3962_v27 = vsub.f32 %v7582_v36, %v3946_v3 }
 0xc03   :  { %v3993_v59 = vmul.f32 1.442695, %v3962_v27 }
 0xc04   :  { %5617 = vrot.lane.b32.xlu0 %v8002_v41, %s6001_s17  ;;  %v7720_v32 = vpop.permute.xlu1 %4318 }
 0xc05   :  { %5954 = vpow2.f32 %v3993_v59 }
 0xc0f   :  { %v7702_v31 = vpop.eup %5954 }
 0xc10   :  { %v4040_v49 = vsel %vm911_vm3, %v7702_v31, 0.0 }
 0xc11   :  { %4041 = vadd.xlane.f32.xlu1 %v4040_v49 }
 0xc18   :  { %v3997_v36 = vpop.xlane.xlu0 %3996 }
 0xc19   :  { %5956 = vrcp.f32 %v3997_v36 }
 0xc22   :  { %4412 = vrot.lane.b32.xlu1 %v6368_v21, %s6000_s5  ;;  %v8006_v21 = vpack.i.bf16 %v7474_v55, %v7472_v54 }
 0xc23   :  { %v5957_v57 = vpop.eup %5956 }
 0xc24   :  { %v4044_v44 = vmul.f32 %v5957_v57, %v7603_v1 }
 0xc26   :  { %5582 = vrot.lane.b32.xlu1 %v8003_v20, %s6001_s17 }
 0xc2a   :  { %5592 = vrot.lane.b32.xlu1 %v8004_v40, %s6002_s3 }
 0xc2e   :  { %5602 = vrot.lane.b32.xlu1 %v8005_v5, %s6001_s17 }
 0xc32   :  { %5612 = vrot.lane.b32.xlu1 %v8006_v21, %s6002_s3 }
 0xc35   :  { %v4000_v62 = vpop.xlane.xlu1 %3999 }
 0xc36   :  { %5958 = vrcp.f32 %v4000_v62  ;;  %5622 = vrot.lane.b32.xlu1 %v8007_v51, %s6001_s17 }
 0xc40   :  { %v5959_v46 = vpop.eup %5958 }
 0xc41   :  { %v4046_v35 = vmul.f32 %v5959_v46, %v7608_v39 }
 0xc43   :  { %v4075_v8 = vpack.c.bf16 %v4046_v35, %v4044_v44 }
 0xc45   :  { %5491 = vmatmul.mubr.msk.bf16.vlgmr.msra.gmra.mrb[112].mxu0 %vm911_vm3, %v4075_v8 }
 0xc46   :  { %5501 = vmatpush3.bf16.msra.mxu0 %v4178_v7  ;;  %5502 = vmatprep.mubr.msk.bf16.mxu0 %vm5989_vm1, %v7992_v37 }
 0xc47   :  { %5512 = vmatprep.subr.bf16.mxu0 %v7992_v37 }
 0xc4b   :  { %v4003_v54 = vpop.xlane.xlu0 %4002 }
 0xc4c   :  { %5960 = vrcp.f32 %v4003_v54 }
 0xc4f   :  { %v4006_v55 = vpop.xlane.xlu1 %4005 }
 0xc50   :  { %5962 = vrcp.f32 %v4006_v55 }
 0xc53   :  { %v4012_v33 = vpop.xlane.xlu1 %4011  ;;  %v4009_v50 = vpop.xlane.xlu0 %4008 }
 0xc54   :  { %5964 = vrcp.f32 %v4012_v33 }
 0xc55   :  { %5966 = vrcp.f32 %v4009_v50 }
 0xc56   :  { %v5961_v39 = vpop.eup %5960 }
 0xc57   :  { %v4018_v1 = vpop.xlane.xlu1 %4017  ;;  %v4015_v42 = vpop.xlane.xlu0 %4014  ;;  %v4048_v53 = vmul.f32 %v5961_v39, %v7618_v16 }
 0xc58   :  { %5968 = vrcp.f32 %v4018_v1 }
 0xc59   :  { %5970 = vrcp.f32 %v4015_v42 }
 0xc5a   :  { %v5963_v14 = vpop.eup %5962 }
 0xc5b   :  { %v4050_v23 = vmul.f32 %v5963_v14, %v7624_v15  ;;  %v4024_v45 = vpop.xlane.xlu1 %4023  ;;  %v4021_v4 = vpop.xlane.xlu0 %4020 }
 0xc5c   :  { %5972 = vrcp.f32 %v4024_v45 }
 0xc5d   :  { %5974 = vrcp.f32 %v4021_v4  ;;  %v4076_v2 = vpack.c.bf16 %v4050_v23, %v4048_v53 }
 0xc5e   :  { %v5965_v9 = vpop.eup %5964 }
 0xc5f   :  { %v5967_v58 = vpop.eup %5966  ;;  %v4054_v19 = vmul.f32 %v5965_v9, %v7629_v10  ;;  %v4030_v63 = vpop.xlane.xlu1 %4029  ;;  %5497 = vmatmul.mubr.msk.bf16.vlgmr.msra.gmra.mrb[128].mxu1 %vm911_vm3, %v4076_v2 }
 0xc60   :  { %v4027_v18 = vpop.xlane.xlu0 %4026  ;;  %v4052_v7 = vmul.f32 %v5967_v58, %v7632_v12  ;;  %5976 = vrcp.f32 %v4030_v63  ;;  %5507 = vmatpush3.bf16.msra.mxu1 %v4225_v17  ;;  %5508 = vmatprep.mubr.msk.bf16.mxu1 %vm5989_vm1, %v7992_v37 }
 0xc61   :  { %5978 = vrcp.f32 %v4027_v18  ;;  %5518 = vmatprep.subr.bf16.mxu1 %v7992_v37  ;;  %v8010_v18 = vpack.i.bf16 %v7125_v24, %v7123_v6  ;;  %v8013_v24 = vld [vmem:[#allocation20_spill] sm:$0xff] }
 0xc62   :  { %v5969_v16 = vpop.eup %5968  ;;  %v4077_v15 = vpack.c.bf16 %v4054_v19, %v4052_v7 }
 0xc63   :  { %v5971_v22 = vpop.eup %5970  ;;  %v4058_v43 = vmul.f32 %v5969_v16, %v7639_v38  ;;  %v4036_v10 = vpop.xlane.xlu1 %4035 }
 0xc64   :  { %v4033_v3 = vpop.xlane.xlu0 %4032  ;;  %v4056_v0 = vmul.f32 %v5971_v22, %v7642_v29  ;;  %5980 = vrcp.f32 %v4036_v10  ;;  %5503 = vmatmul.mubr.msk.bf16.vlgmr.msra.gmra.mrb[116].mxu0 %vm911_vm3, %v4077_v15 }
 0xc65   :  { %5513 = vmatpush3.bf16.msra.mxu0 %v4272_v34  ;;  %5982 = vrcp.f32 %v4033_v3  ;;  %5514 = vmatprep.mubr.msk.bf16.mxu0 %vm5989_vm1, %v7992_v37 }
 0xc66   :  { %v5973_v12 = vpop.eup %5972  ;;  %v4078_v17 = vpack.c.bf16 %v4058_v43, %v4056_v0  ;;  %5524 = vmatprep.subr.bf16.mxu0 %v7992_v37 }
 0xc67   :  { %v5975_v27 = vpop.eup %5974  ;;  %v4062_v59 = vmul.f32 %v5973_v12, %v7649_v30 }
 0xc68   :  { %v4039_v38 = vpop.xlane.xlu0 %4038  ;;  %v4060_v41 = vmul.f32 %v5975_v27, %v7652_v52  ;;  %5509 = vmatmul.mubr.msk.bf16.vlgmr.msra.gmra.mrb[132].mxu1 %vm911_vm3, %v4078_v17  ;;  %v8014_v17 = vld [vmem:[#allocation19_spill] sm:$0xff] }
 0xc69   :  { %5519 = vmatpush3.bf16.msra.mxu1 %v7720_v32  ;;  %5520 = vmatprep.mubr.msk.bf16.mxu1 %vm5989_vm1, %v7992_v37  ;;  %5984 = vrcp.f32 %v4039_v38  ;;  %v8015_v27 = vpack.i.bf16 %v8013_v24, %v8014_v17  ;;  %v8024_v17 = vld [vmem:[#allocation6_spill] sm:$0xff] }
 0xc6a   :  { %v5977_v29 = vpop.eup %5976  ;;  %v4079_v49 = vpack.c.bf16 %v4062_v59, %v4060_v41  ;;  %5530 = vmatprep.subr.bf16.mxu1 %v7992_v37 }
 0xc6b   :  { %v5979_v20 = vpop.eup %5978  ;;  %v4066_v40 = vmul.f32 %v5977_v29, %v7658_v47 }
 0xc6c   :  { %v4366_v34 = vpop.permute.xlu0 %4365  ;;  %v4064_v30 = vmul.f32 %v5979_v20, %v7660_v61  ;;  %5515 = vmatmul.mubr.msk.bf16.vlgmr.msra.gmra.mrb[120].mxu0 %vm911_vm3, %v4079_v49  ;;  %v8017_v49 = vld [vmem:[#allocation21_spill] sm:$0xff] }
 0xc6d   :  { %5525 = vmatpush3.bf16.msra.mxu0 %v4366_v34  ;;  %5526 = vmatprep.mubr.msk.bf16.mxu0 %vm5989_vm1, %v7992_v37 }
 0xc6e   :  { %v5981_v52 = vpop.eup %5980  ;;  %v4080_v5 = vpack.c.bf16 %v4066_v40, %v4064_v30 }
 0xc6f   :  { %v5983_v32 = vpop.eup %5982  ;;  %v4070_v36 = vmul.f32 %v5981_v52, %v7667_v48 }
 0xc70   :  { %v4068_v21 = vmul.f32 %v5983_v32, %v7669_v28  ;;  %5521 = vmatmul.mubr.msk.bf16.vlgmr.msra.gmra.mrb[136].mxu1 %vm911_vm3, %v4080_v5  ;;  %v5578_v40 = vpop.permute.xlu0 %5577 }
 0xc71   :  { %5532 = vmatprep.mubr.msk.bf16.mxu1 %vm5989_vm1, %v7992_v37  ;;  %v5698_v37 = vld [vmem:[%s7966_s6] sm:$0xff]  }
 0xc72   :  { %v4081_v47 = vpack.c.bf16 %v4070_v36, %v4068_v21  ;;  %5536 = vmatprep.subr.bf16.mxu0 %v5698_v37 }
 0xc73   :  { %v5985_v51 = vpop.eup %5984 }
 0xc74   :  { %5527 = vmatmul.mubr.msk.bf16.vlgmr.msra.gmra.mrb[124].mxu0 %vm911_vm3, %v4081_v47  ;;  %v4072_v46 = vmul.f32 %v5985_v51, %v7675_v13  ;;  %v8008_v13 = vpack.i.bf16 %v7480_v56, %v7478_v26  ;;  %v8009_v56 = vpack.i.bf16 %v7486_v60, %v7484_v25  ;;  %v8011_v60 = vld [vmem:[#allocation18_spill] sm:$0xff]  ;;  %v5588_v34 = vpop.permute.xlu0 %5587  ;;  %v5579_v51 = vunpack.i.l.bf16 %v5578_v40 }
 0xc75   :  { %5537 = vmatpush3.bf16.msra.mxu0 %v5698_v37  ;;  %v8012_v43 = vpack.i.bf16 %v7139_v11, %v8011_v60  ;;  %v8016_v11 = vld [vmem:[#allocation22_spill] sm:$0xff]  ;;  %v8019_v37 = vld [vmem:[#allocation3_spill] sm:$0xff] }
 0xc76   :  { %v8018_v20 = vpack.i.bf16 %v8016_v11, %v8017_v49 }
 0xc78   :  { %v5598_v30 = vpop.permute.xlu0 %5597 }
 0xc7c   :  { %v5608_v47 = vpop.permute.xlu0 %5607 }
 0xc7d   :  { %v5610_v60 = vunpack.i.h.bf16 %v5608_v47 }
 0xc9e   :  { %v4042_v61 = vpop.xlane.xlu1 %4041 }
 0xc9f   :  { %5986 = vrcp.f32 %v4042_v61  ;;  %v7809_v61 = vpop.permute.xlu0 %5617 }
 0xca2   :  { %v4413_v62 = vpop.permute.xlu1 %4412 }
 0xca3   :  { %5531 = vmatpush3.bf16.msra.mxu1 %v4413_v62  ;;  %v5580_v62 = vunpack.i.h.bf16 %v5578_v40 }
 0xca9   :  { %v5987_v57 = vpop.eup %5986 }
 0xcaa   :  { %v4074_v48 = vmul.f32 %v5987_v57, %v7702_v31  ;;  %v5699_v31 = vld [vmem:[%s7966_s6 + $0x8] sm:$0xff]   ;;  %v5590_v57 = vunpack.i.h.bf16 %v5588_v34 }
 0xcab   :  { %5538 = vmatprep.subr.bf16.mxu0 %v5699_v31 }
 0xcac   :  { %v4082_v28 = vpack.c.bf16 %v4074_v48, %v4072_v46  ;;  %5539 = vmatpush3.bf16.msra.mxu0 %v5699_v31  ;;  %v5589_v46 = vunpack.i.l.bf16 %v5588_v34  ;;  %v5583_v48 = vpop.permute.xlu1 %5582 }
 0xcae   :  { %5533 = vmatmul.mubr.msk.bf16.vlgmr.msra.gmra.mrb[140].mxu1 %vm911_vm3, %v4082_v28 }
 0xd18   :  { %v4123_v44 = vpop.f32.mrb[112].mxu0 }
 0xd19   :  { %v5492_v35 = vpop.f32.mrb[113].mxu0 }
 0xd1a   :  { %v4126_v8 = vpop.f32.mrb[114].mxu0  ;;  %v8020_v35 = vld [vmem:[#allocation2_spill] sm:$0xff] }
 0xd1b   :  { %v5626_v54 = vpack.i.bf16 %v4126_v8, %v4123_v44  ;;  %v5493_v55 = vpop.f32.mrb[115].mxu0  ;;  %v4652_v44 = vsel %vm489_vm2, %v8019_v37, %v5580_v62  ;;  %v4651_v8 = vsel %vm489_vm2, %v8020_v35, %v5579_v51  ;;  %v8025_v62 = vld [vmem:[#allocation9_spill] sm:$0xff] }
 0xd1c   :  { %v4668_v31 = vsel %vm911_vm3, %v4652_v44, %v5590_v57  ;;  %v8026_v57 = vld [vmem:[#allocation8_spill] sm:$0xff] }
 0xd1d   :  { %5627 = vrot.lane.b32.xlu0 %v5626_v54, %s6003_s20 }
 0xd21   :  { %5632 = vrot.lane.b32.xlu0 %v8008_v13, %s6002_s3  ;;  %v4667_v13 = vsel %vm911_vm3, %v4651_v8, %v5589_v46 }
 0xd32   :  { %v4170_v33 = vpop.f32.mrb[128].mxu1 }
 0xd33   :  { %v5498_v50 = vpop.f32.mrb[129].mxu1 }
 0xd34   :  { %v4173_v1 = vpop.f32.mrb[130].mxu1 }
 0xd35   :  { %v5636_v42 = vpack.i.bf16 %v4173_v1, %v4170_v33  ;;  %v5499_v39 = vpop.f32.mrb[131].mxu1  ;;  %v5593_v1 = vpop.permute.xlu1 %5592 }
 0xd37   :  { %v4217_v14 = vpop.f32.mrb[116].mxu0  ;;  %5637 = vrot.lane.b32.xlu1 %v5636_v42, %s6003_s20 }
 0xd38   :  { %v5504_v53 = vpop.f32.mrb[117].mxu0 }
 0xd39   :  { %v4220_v23 = vpop.f32.mrb[118].mxu0  ;;  %v5603_v39 = vpop.permute.xlu1 %5602 }
 0xd3a   :  { %v5646_v45 = vpack.i.bf16 %v4220_v23, %v4217_v14  ;;  %v5505_v4 = vpop.f32.mrb[119].mxu0  ;;  %v5585_v23 = vunpack.i.h.bf16 %v5583_v48 }
 0xd3b   :  { %v4264_v26 = vpop.f32.mrb[132].mxu1  ;;  %5642 = vrot.lane.b32.xlu1 %v8009_v56, %s6002_s3  ;;  %v5595_v4 = vunpack.i.h.bf16 %v5593_v1  ;;  %v5600_v56 = vunpack.i.h.bf16 %v5598_v30 }
 0xd3c   :  { %5647 = vrot.lane.b32.xlu0 %v5646_v45, %s6003_s20  ;;  %v5510_v2 = vpop.f32.mrb[133].mxu1  ;;  %v5584_v45 = vunpack.i.l.bf16 %v5583_v48 }
 0xd3d   :  { %v4267_v9 = vpop.f32.mrb[134].mxu1  ;;  %v5613_v14 = vpop.permute.xlu1 %5612  ;;  %v5599_v2 = vunpack.i.l.bf16 %v5598_v30  ;;  %v5620_v30 = vunpack.i.h.bf16 %v7809_v61 }
 0xd3e   :  { %v5656_v58 = vpack.i.bf16 %v4267_v9, %v4264_v26  ;;  %v5511_v19 = vpop.f32.mrb[135].mxu1  ;;  %v5594_v26 = vunpack.i.l.bf16 %v5593_v1  ;;  %v5615_v40 = vunpack.i.h.bf16 %v5613_v14  ;;  %v5614_v34 = vunpack.i.l.bf16 %v5613_v14 }
 0xd3f   :  { %v4311_v63 = vpop.f32.mrb[120].mxu0 }
 0xd40   :  { %5652 = vrot.lane.b32.xlu0 %v8010_v18, %s6001_s17  ;;  %5657 = vrot.lane.b32.xlu1 %v5656_v58, %s6003_s20  ;;  %v5516_v7 = vpop.f32.mrb[121].mxu0  ;;  %v8021_v58 = vld [vmem:[#allocation5_spill] sm:$0xff] }
 0xd41   :  { %v4314_v16 = vpop.f32.mrb[122].mxu0  ;;  %v7820_v53 = vpop.permute.xlu1 %5622  ;;  %v4654_v19 = vsel %vm489_vm2, %v8021_v58, %v5585_v23 }
 0xd42   :  { %v5666_v15 = vpack.i.bf16 %v4314_v16, %v4311_v63  ;;  %v5517_v22 = vpop.f32.mrb[123].mxu0  ;;  %v8022_v63 = vld [vmem:[#allocation4_spill] sm:$0xff]  ;;  %v5624_v1 = vunpack.i.l.bf16 %v7820_v53 }
 0xd43   :  { %v4358_v25 = vpop.f32.mrb[136].mxu1  ;;  %v4653_v18 = vsel %vm489_vm2, %v8022_v63, %v5584_v45  ;;  %v8030_v63 = vld [vmem:[#allocation16_spill] sm:$0xff] }
 0xd44   :  { %5662 = vrot.lane.b32.xlu1 %v8012_v43, %s6001_s17  ;;  %5667 = vrot.lane.b32.xlu0 %v5666_v15, %s6003_s20  ;;  %v5522_v10 = vpop.f32.mrb[137].mxu1  ;;  %v4669_v22 = vsel %vm911_vm3, %v4653_v18, %v5594_v26  ;;  %v5609_v43 = vunpack.i.l.bf16 %v5608_v47 }
 0xd45   :  { %v4361_v3 = vpop.f32.mrb[138].mxu1 }
 0xd46   :  { %v5676_v0 = vpack.i.bf16 %v4361_v3, %v4358_v25  ;;  %v5523_v12 = vpop.f32.mrb[139].mxu1  ;;  %v4670_v25 = vsel %vm911_vm3, %v4654_v19, %v5595_v4  ;;  %v8029_v19 = vld [vmem:[#allocation17_spill] sm:$0xff] }
 0xd47   :  { %v4405_v6 = vpop.f32.mrb[124].mxu0 }
 0xd48   :  { %5672 = vrot.lane.b32.xlu0 %v8015_v27, %s6002_s3  ;;  %5677 = vrot.lane.b32.xlu1 %v5676_v0, %s6003_s20  ;;  %v5528_v59 = vpop.f32.mrb[125].mxu0  ;;  %v4655_v27 = vsel %vm489_vm2, %v8024_v17, %v5599_v2 }
 0xd49   :  { %v4408_v38 = vpop.f32.mrb[126].mxu0  ;;  %v4671_v49 = vsel %vm911_vm3, %v4655_v27, %v5609_v43 }
 0xd4a   :  { %v5686_v41 = vpack.i.bf16 %v4408_v38, %v4405_v6  ;;  %v5529_v29 = vpop.f32.mrb[127].mxu0  ;;  %v8023_v6 = vld [vmem:[#allocation7_spill] sm:$0xff]  ;;  %v5605_v38 = vunpack.i.h.bf16 %v5603_v39 }
 0xd4b   :  { %v4656_v24 = vsel %vm489_vm2, %v8023_v6, %v5600_v56 }
 0xd4c   :  { %5682 = vrot.lane.b32.xlu1 %v8018_v20, %s6002_s3  ;;  %5687 = vrot.lane.b32.xlu0 %v5686_v41, %s6003_s20  ;;  %v5604_v41 = vunpack.i.l.bf16 %v5603_v39  ;;  %v4672_v20 = vsel %vm911_vm3, %v4656_v24, %v5610_v60  ;;  %v4658_v51 = vsel %vm489_vm2, %v8025_v62, %v5605_v38 }
 0xd4d   :  { %v4674_v44 = vsel %vm911_vm3, %v4658_v51, %v5615_v40 }
 0xd4e   :  { %v4657_v46 = vsel %vm489_vm2, %v8026_v57, %v5604_v41 }
 0xd4f   :  { %v4673_v37 = vsel %vm911_vm3, %v4657_v46, %v5614_v34  ;;  %v8034_v34 = vld [vmem:[#allocation12_spill] sm:$0xff] }
 0xd81   :  { %v4452_v52 = vpop.f32.mrb[140].mxu1 }
 0xd82   :  { %v5534_v5 = vpop.f32.mrb[141].mxu1 }
 0xd83   :  { %v4455_v32 = vpop.f32.mrb[142].mxu1 }
 0xd84   :  { %v5691_v36 = vpack.i.bf16 %v4455_v32, %v4452_v52  ;;  %v5535_v21 = vpop.f32.mrb[143].mxu1  ;;  %v5619_v32 = vunpack.i.l.bf16 %v7809_v61  ;;  %v8027_v61 = vld [vmem:[#allocation11_spill] sm:$0xff] }
 0xd86   :  { %5692 = vrot.lane.b32.xlu1 %v5691_v36, %s6003_s20 }
 0xd8f   :  { %v5628_v28 = vpop.permute.xlu0 %5627 }
 0xd90   :  { %v5630_v54 = vunpack.i.h.bf16 %v5628_v28  ;;  %v5629_v55 = vunpack.i.l.bf16 %v5628_v28 }
 0xd92   :  { %v4684_v33 = vsel %vm4683_vm4, %v4667_v13, %v5629_v55  ;;  %v4685_v50 = vsel %vm4683_vm4, %v4668_v31, %v5630_v54  ;;  %v4660_v54 = vsel %vm489_vm2, %v8027_v61, %v5620_v30  ;;  %v8028_v31 = vld [vmem:[#allocation10_spill] sm:$0xff] }
 0xd93   :  { %v4700_v42 = vpack.c.bf16 %v4685_v50, %v4684_v33  ;;  %v5633_v7 = vpop.permute.xlu0 %5632  ;;  %v4659_v33 = vsel %vm489_vm2, %v8028_v31, %v5619_v32  ;;  %v5625_v50 = vunpack.i.h.bf16 %v7820_v53 }
 0xd94   :  { %v5635_v35 = vunpack.i.h.bf16 %v5633_v7  ;;  %v5634_v8 = vunpack.i.l.bf16 %v5633_v7 }
 0xd95   :  { %5540 = vmatprep.mubr.msk.bf16.mxu0 %vm48_vm0, %v4700_v42 }
 0xd96   :  { %v4675_v56 = vsel %vm911_vm3, %v4659_v33, %v5634_v8  ;;  %v4676_v2 = vsel %vm911_vm3, %v4660_v54, %v5635_v35 }
 0xda9   :  { %v5638_v9 = vpop.permute.xlu1 %5637 }
 0xdaa   :  { %v5640_v16 = vunpack.i.h.bf16 %v5638_v9  ;;  %v5639_v15 = vunpack.i.l.bf16 %v5638_v9 }
 0xdac   :  { %v4687_v10 = vsel %vm4683_vm4, %v4670_v25, %v5640_v16  ;;  %v4686_v3 = vsel %vm4683_vm4, %v4669_v22, %v5639_v15  ;;  %v8031_v15 = vld [vmem:[#allocation15_spill] sm:$0xff]  ;;  %v8032_v25 = vld [vmem:[#allocation14_spill] sm:$0xff] }
 0xdad   :  { %v4701_v0 = vpack.c.bf16 %v4687_v10, %v4686_v3  ;;  %v7830_v12 = vpop.permute.xlu1 %5642  ;;  %v4662_v22 = vsel %vm489_vm2, %v8031_v15, %v5625_v50  ;;  %v4661_v60 = vsel %vm489_vm2, %v8032_v25, %v5624_v1 }
 0xdae   :  { %v5648_v59 = vpop.permute.xlu0 %5647  ;;  %v5645_v9 = vunpack.i.h.bf16 %v7830_v12  ;;  %v5644_v58 = vunpack.i.l.bf16 %v7830_v12 }
 0xdaf   :  { %v5650_v29 = vunpack.i.h.bf16 %v5648_v59  ;;  %v5649_v11 = vunpack.i.l.bf16 %v5648_v59  ;;  %5541 = vmatmul.mubr.msk.bf16.vlgmr.msra.gmra.mrb[128].mxu0 %vm48_vm0, %v4701_v0 }
 0xdb0   :  { %v4678_v17 = vsel %vm911_vm3, %v4662_v22, %v5645_v9  ;;  %v4677_v27 = vsel %vm911_vm3, %v4661_v60, %v5644_v58 }
 0xdb1   :  { %v4688_v52 = vsel %vm4683_vm4, %v4671_v49, %v5649_v11  ;;  %v4689_v5 = vsel %vm4683_vm4, %v4672_v20, %v5650_v29  ;;  %v8033_v20 = vld [vmem:[#allocation13_spill] sm:$0xff] }
 0xdb2   :  { %v4702_v36 = vpack.c.bf16 %v4689_v5, %v4688_v52  ;;  %v5658_v21 = vpop.permute.xlu1 %5657  ;;  %v5653_v47 = vpop.permute.xlu0 %5652 }
 0xdb3   :  { %v5660_v48 = vunpack.i.h.bf16 %v5658_v21  ;;  %v5659_v28 = vunpack.i.l.bf16 %v5658_v21  ;;  %v5655_v0 = vunpack.i.h.bf16 %v5653_v47  ;;  %v5654_v12 = vunpack.i.l.bf16 %v5653_v47 }
 0xdb4   :  { %5544 = vmatprep.mubr.msk.bf16.mxu0 %vm48_vm0, %v4702_v36 }
 0xdb5   :  { %v4691_v55 = vsel %vm4683_vm4, %v4674_v44, %v5660_v48  ;;  %v4690_v13 = vsel %vm4683_vm4, %v4673_v37, %v5659_v28  ;;  %v4664_v40 = vsel %vm489_vm2, %v8033_v20, %v5655_v0  ;;  %v4663_v30 = vsel %vm489_vm2, %v8034_v34, %v5654_v12 }
 0xdb6   :  { %v4703_v42 = vpack.c.bf16 %v4691_v55, %v4690_v13  ;;  %v5663_v39 = vpop.permute.xlu1 %5662  ;;  %v5668_v14 = vpop.permute.xlu0 %5667  ;;  %v4973_v55 = vld [vmem:[%s7967_s7] ss:$0 sm:$0xff] }
 0xdb7   :  { %v5665_v23 = vunpack.i.h.bf16 %v5663_v39  ;;  %v5664_v45 = vunpack.i.l.bf16 %v5663_v39  ;;  %v5670_v4 = vunpack.i.h.bf16 %v5668_v14  ;;  %v5669_v26 = vunpack.i.l.bf16 %v5668_v14 }
 0xdb8   :  { %5545 = vmatmul.mubr.msk.bf16.gmra.mrb[132].mxu0 %vm48_vm0, %v4703_v42 }
 0xdb9   :  { %v4666_v53 = vsel %vm489_vm2, %v8029_v19, %v5665_v23  ;;  %v4665_v18 = vsel %vm489_vm2, %v8030_v63, %v5664_v45  ;;  %v4692_v7 = vsel %vm4683_vm4, %v4675_v56, %v5669_v26  ;;  %v4693_v16 = vsel %vm4683_vm4, %v4676_v2, %v5670_v4 }
 0xdba   :  { %v4704_v43 = vpack.c.bf16 %v4693_v16, %v4692_v7  ;;  %v5678_v10 = vpop.permute.xlu1 %5677  ;;  %v5673_v3 = vpop.permute.xlu0 %5672 }
 0xdbb   :  { %v5680_v6 = vunpack.i.h.bf16 %v5678_v10  ;;  %v5679_v24 = vunpack.i.l.bf16 %v5678_v10  ;;  %v5675_v59 = vunpack.i.h.bf16 %v5673_v3  ;;  %v5674_v38 = vunpack.i.l.bf16 %v5673_v3 }
 0xdbc   :  { %5548 = vmatprep.mubr.msk.bf16.mxu0 %vm48_vm0, %v4704_v43 }
 0xdbd   :  { %v4695_v41 = vsel %vm4683_vm4, %v4678_v17, %v5680_v6  ;;  %v4694_v29 = vsel %vm4683_vm4, %v4677_v27, %v5679_v24  ;;  %v4679_v32 = vsel %vm911_vm3, %v4663_v30, %v5674_v38  ;;  %v4680_v36 = vsel %vm911_vm3, %v4664_v40, %v5675_v59 }
 0xdbe   :  { %v4705_v11 = vpack.c.bf16 %v4695_v41, %v4694_v29  ;;  %v5688_v49 = vpop.permute.xlu0 %5687  ;;  %v5683_v51 = vpop.permute.xlu1 %5682 }
 0xdbf   :  { %v5690_v52 = vunpack.i.h.bf16 %v5688_v49  ;;  %v5689_v5 = vunpack.i.l.bf16 %v5688_v49  ;;  %v5685_v57 = vunpack.i.h.bf16 %v5683_v51  ;;  %v5684_v46 = vunpack.i.l.bf16 %v5683_v51 }
 0xdc0   :  { %5549 = vmatmul.mubr.msk.bf16.gmra.mrb[136].mxu0 %vm48_vm0, %v4705_v11 }
 0xdc1   :  { %v4696_v21 = vsel %vm4683_vm4, %v4679_v32, %v5689_v5  ;;  %v4697_v47 = vsel %vm4683_vm4, %v4680_v36, %v5690_v52  ;;  %v4682_v44 = vsel %vm911_vm3, %v4666_v53, %v5685_v57  ;;  %v4681_v35 = vsel %vm911_vm3, %v4665_v18, %v5684_v46 }
 0xdc2   :  { %v4706_v62 = vpack.c.bf16 %v4697_v47, %v4696_v21 }
 0xdc4   :  { %5552 = vmatprep.mubr.msk.bf16.mxu0 %vm48_vm0, %v4706_v62 }
 0xdf8   :  { %v5693_v48 = vpop.permute.xlu1 %5692 }
 0xdf9   :  { %v5695_v28 = vunpack.i.h.bf16 %v5693_v48  ;;  %v5694_v37 = vunpack.i.l.bf16 %v5693_v48 }
 0xdfb   :  { %v4699_v8 = vsel %vm4683_vm4, %v4682_v44, %v5695_v28  ;;  %v4698_v61 = vsel %vm4683_vm4, %v4681_v35, %v5694_v37 }
 0xdfc   :  { %v4707_v54 = vpack.c.bf16 %v4699_v8, %v4698_v61 }
 0xdfe   :  { %5553 = vmatmul.mubr.msk.bf16.gmra.mrb[140].mxu0 %vm48_vm0, %v4707_v54 }
 0xe82   :  { %v5542_v13 = vpop.f32.mrb[128].mxu0 }
 0xe83   :  { %v4798_v31 = vadd.f32 %v5542_v13, %v4973_v55  ;;  %v4789_v33 = vpop.f32.mrb[129].mxu0 }
 0xe84   :  { %v4790_v50 = vadd.f32 %v4973_v55, %v4789_v33  ;;  %v5543_v1 = vpop.f32.mrb[130].mxu0 }
 0xe85   :  { %4854 = vst.msk [vmem:[%s7968_s8 + $0x10] sm:$0xff] %vm48_vm0, %v4798_v31  ;;  %v4801_v42 = vadd.f32 %v5543_v1, %v4973_v55  ;;  %v4792_v39 = vpop.f32.mrb[131].mxu0 }
 0xe86   :  { %4852 = vst.msk [vmem:[%s7968_s8] sm:$0xff] %vm48_vm0, %v4790_v50  ;;  %v4793_v14 = vadd.f32 %v4973_v55, %v4792_v39 }
 0xe87   :  { %4855 = vst.msk [vmem:[%s7968_s8 + $0x18] sm:$0xff] %vm48_vm0, %v4801_v42 }
 0xe88   :  { %4853 = vst.msk [vmem:[%s7968_s8 + $0x8] sm:$0xff] %vm48_vm0, %v4793_v14 }
 0xe8b   :  { %v5546_v23 = vpop.f32.mrb[132].mxu0 }
 0xe8c   :  { %v4814_v45 = vadd.f32 %v5546_v23, %v4973_v55  ;;  %v4805_v4 = vpop.f32.mrb[133].mxu0 }
 0xe8d   :  { %v4806_v26 = vadd.f32 %v4973_v55, %v4805_v4  ;;  %v5547_v56 = vpop.f32.mrb[134].mxu0 }
 0xe8e   :  { %4858 = vst.msk [vmem:[%s7968_s8 + $0x30] sm:$0xff] %vm48_vm0, %v4814_v45  ;;  %v4817_v2 = vadd.f32 %v5547_v56, %v4973_v55  ;;  %v4808_v9 = vpop.f32.mrb[135].mxu0 }
 0xe8f   :  { %4856 = vst.msk [vmem:[%s7968_s8 + $0x20] sm:$0xff] %vm48_vm0, %v4806_v26  ;;  %v4809_v58 = vadd.f32 %v4973_v55, %v4808_v9 }
 0xe90   :  { %4859 = vst.msk [vmem:[%s7968_s8 + $0x38] sm:$0xff] %vm48_vm0, %v4817_v2 }
 0xe91   :  { %4857 = vst.msk [vmem:[%s7968_s8 + $0x28] sm:$0xff] %vm48_vm0, %v4809_v58 }
 0xe93   :  { %v5550_v19 = vpop.f32.mrb[136].mxu0 }
 0xe94   :  { %v4830_v53 = vadd.f32 %v5550_v19, %v4973_v55  ;;  %v4821_v63 = vpop.f32.mrb[137].mxu0 }
 0xe95   :  { %v4822_v18 = vadd.f32 %v4973_v55, %v4821_v63  ;;  %v5551_v7 = vpop.f32.mrb[138].mxu0 }
 0xe96   :  { %4862 = vst.msk [vmem:[%s7968_s8 + $0x50] sm:$0xff] %vm48_vm0, %v4830_v53  ;;  %v4833_v16 = vadd.f32 %v5551_v7, %v4973_v55  ;;  %v4824_v15 = vpop.f32.mrb[139].mxu0 }
 0xe97   :  { %4860 = vst.msk [vmem:[%s7968_s8 + $0x40] sm:$0xff] %vm48_vm0, %v4822_v18  ;;  %v4825_v22 = vadd.f32 %v4973_v55, %v4824_v15 }
 0xe98   :  { %4863 = vst.msk [vmem:[%s7968_s8 + $0x58] sm:$0xff] %vm48_vm0, %v4833_v16 }
 0xe99   :  { %4861 = vst.msk [vmem:[%s7968_s8 + $0x48] sm:$0xff] %vm48_vm0, %v4825_v22 }
 0xed1   :  { %v5554_v25 = vpop.f32.mrb[140].mxu0 }
 0xed2   :  { %v4846_v60 = vadd.f32 %v5554_v25, %v4973_v55  ;;  %v4837_v43 = vpop.f32.mrb[141].mxu0 }
 0xed3   :  { %v4838_v10 = vadd.f32 %v4973_v55, %v4837_v43  ;;  %v5555_v3 = vpop.f32.mrb[142].mxu0 }
 0xed4   :  { %4866 = vst.msk [vmem:[%s7968_s8 + $0x70] sm:$0xff] %vm48_vm0, %v4846_v60  ;;  %v4849_v0 = vadd.f32 %v5555_v3, %v4973_v55  ;;  %v4840_v12 = vpop.f32.mrb[143].mxu0 }
 0xed5   :  { %4864 = vst.msk [vmem:[%s7968_s8 + $0x60] sm:$0xff] %vm48_vm0, %v4838_v10  ;;  %v4841_v6 = vadd.f32 %v4973_v55, %v4840_v12 }
 0xed6   :  { %4867 = vst.msk [vmem:[%s7968_s8 + $0x78] sm:$0xff] %vm48_vm0, %v4849_v0 }
 0xed7   :  { %4865 = vst.msk [vmem:[%s7968_s8 + $0x68] sm:$0xff] %vm48_vm0, %v4841_v6 }

</bundles_post_ra>
